<compile_context>
chip_gen: v7x
topology: tpu7x:2x2x1
jax: 0.10.0
libtpu: 0.0.40
codegen_flags: <defaults>
</compile_context>

<pallas_src>
import jax
import jax.numpy as jnp
import numpy as np
from jax import lax
from jax.experimental import pallas as pl
from jax.experimental.pallas import tpu as pltpu

FRAMES = 3                      # "frames" constructor arg (stacked laser scans)
L_IN = 512                      # scan length implied by act_fc1 = Linear(32*128, 512)
L2 = 128                        # length after the two stride-2 convs
C1 = 32                         # conv channels
K1 = FRAMES * 5                 # conv1 im2col contraction size
K1P = ((K1 + 7) // 8) * 8       # padded to a sublane multiple
EXTRA = 3 + 2 + 2 + 3 + 2       # position, goal, speed, other_position, other_speed
NEG_SLOPE = 0.01                # F.leaky_relu default
MAX_TILE_B = 16                 # samples per grid step (auto-shrunk for tiny batches)


def _leaky(v):
    # exact leaky_relu for 0 < slope < 1, only 2 VPU ops
    return jnp.maximum(v, NEG_SLOPE * v)


# --------------------------------- kernel ----------------------------------
def selector_kernel(ce_ref, co_ref, cp_ref, ex_ref,
                    w1_ref, b1_ref, w2_ref, b2_ref,
                    wfc1_ref, bfc1_ref, wfc2_ref, bfc2_ref,
                    wd1a_ref, wd1b_ref, bd1_ref, wd2_ref, bd2_ref,
                    out_ref):
    n = ce_ref.shape[-1]            # lane axis: sample-major, 128 output slots each
    tile_b = n // L2

    # ---- conv1 (k=5, s=2, p=1) as im2col matmuls over even / odd / shifted-odd
    #      output positions (the stride-2 split was done in the wrapper) -------
    w1 = w1_ref[...]                                            # (32, K1P) bf16
    b1 = b1_ref[...]                                            # (32, 1)   f32
    a1e = _leaky(jnp.dot(w1, ce_ref[...], preferred_element_type=jnp.float32) + b1)
    a1o = _leaky(jnp.dot(w1, co_ref[...], preferred_element_type=jnp.float32) + b1)
    a1p = _leaky(jnp.dot(w1, cp_ref[...], preferred_element_type=jnp.float32) + b1)

    # Per-sample boundary masks: odd slot 127 (= conv1 position 255) and the
    # shifted tap's slot 0 (= conv1 position -1) are conv2's zero padding.
    slot = lax.broadcasted_iota(jnp.int32, (1, n), 1) % L2
    a1o = jnp.where(slot == L2 - 1, 0.0, a1o)
    a1p = jnp.where(slot == 0, 0.0, a1p)

    # ---- conv2 (k=3, s=2, p=1) as one fused im2col matmul, K = 3*32 = 96 ------
    taps = jnp.concatenate([a1p, a1e, a1o], axis=0).astype(jnp.bfloat16)   # (96, n)
    a2 = _leaky(jnp.dot(w2_ref[...], taps, preferred_element_type=jnp.float32)
                + b2_ref[...])                                  # (32, n) f32

    # ---- PyTorch's a.view(B, -1): channel-major flatten -> (tile_b, 32*128) ---
    flat = (a2.reshape(C1, tile_b, L2)
              .transpose(1, 0, 2)
              .reshape(tile_b, C1 * L2))

    # ---- act_fc1: one (tile_b,4096)x(4096,512) MXU matmul, bf16 in / f32 acc --
    h1 = jnp.dot(flat.astype(jnp.bfloat16), wfc1_ref[...],
                 preferred_element_type=jnp.float32) + bfc1_ref[...]
    h1 = _leaky(h1)                                             # (tile_b, 512)

    # ---- act_fc2 (bf16 operands, f32 acc) -------------------------------------
    h2 = _leaky(jnp.dot(h1.astype(jnp.bfloat16), wfc2_ref[...],
                        preferred_element_type=jnp.float32)
                + bfc2_ref[...])                                # (tile_b, 128)

    # ---- dqn_fc: Linear(140,64) -> ReLU -> Linear(64,1).  The torch.cat with
    #      the extra features is realised by splitting the weight 128 / 12. -----
    d1 = (jnp.dot(h2, wd1a_ref[...], preferred_element_type=jnp.float32)
          + jnp.dot(ex_ref[...], wd1b_ref[...], preferred_element_type=jnp.float32)
          + bd1_ref[...])
    d1 = jnp.maximum(d1, 0.0)                                   # (tile_b, 64)
    out_ref[...] = (jnp.dot(d1, wd2_ref[...], preferred_element_type=jnp.float32)
                    + bd2_ref[...])                             # (tile_b, 1)


# -------------------------------- wrapper -----------------------------------
def _im2col_even_odd_prev(x):
    """x: (Bp, frames, L_IN) -> three conv1 im2col tensors, each (Bp, K1, 128).

    conv-padded index p of the original conv1 input lives at xp[..., p + 2].
      ce[:, cin*5+k, s] = input at p = 4s     + k   (even outputs t = 2s)
      co[:, cin*5+k, s] = input at p = 4s + 2 + k   (odd  outputs t = 2s+1)
      cp[:, cin*5+k, s] = input at p = 4s - 2 + k   (odd outputs shifted by one slot)
    """
    xp = jnp.pad(x, ((0, 0), (0, 0), (3, 4)))
    span = 4 * (L2 - 1) + 1                                     # 509

    def gather(start):
        cols = jnp.stack(
            [xp[:, :, start + k: start + k + span: 4] for k in range(5)], axis=2)
        return cols.reshape(x.shape[0], K1, L2)                 # (Bp, 15, 128)

    return gather(2), gather(4), gather(0)                      # ce, co, cp


def _tile_batchwise(arr, nb, tile_b):
    """(Bp, R, 128) -> (nb, R, tile_b*128) with lane index = b_local*128 + s."""
    _, r, _ = arr.shape
    return (arr.reshape(nb, tile_b, r, L2)
               .transpose(0, 2, 1, 3)
               .reshape(nb, r, tile_b * L2))


def selector_net_pallas(kparams, x, position, goal, speed, other_position, other_speed):
    B = x.shape[0]
    extras = jnp.concatenate(
        [position, goal, speed, other_position, other_speed], axis=-1
    ).astype(jnp.float32)                                       # (B, 12)

    tile_b = int(min(MAX_TILE_B, ((B + 7) // 8) * 8))           # 8 or 16
    nb = pl.cdiv(B, tile_b)
    Bp = nb * tile_b
    if Bp != B:                                                 # pad batch to a tile multiple
        x = jnp.pad(x, ((0, Bp - B), (0, 0), (0, 0)))
        extras = jnp.pad(extras, ((0, Bp - B), (0, 0)))

    ce, co, cp = _im2col_even_odd_prev(x.astype(jnp.bfloat16))
    pad_k = ((0, 0), (0, K1P - K1), (0, 0))
    ce = _tile_batchwise(jnp.pad(ce, pad_k), nb, tile_b)        # (nb, K1P, tile_b*128) bf16
    co = _tile_batchwise(jnp.pad(co, pad_k), nb, tile_b)
    cp = _tile_batchwise(jnp.pad(cp, pad_k), nb, tile_b)
    ex = extras.reshape(nb, tile_b, EXTRA)

    n = tile_b * L2

    def const_spec(arr):                                        # weights: fetched once
        return pl.BlockSpec(arr.shape, lambda i: (0, 0))

    in_specs = [
        pl.BlockSpec((None, K1P, n), lambda i: (i, 0, 0)),
        pl.BlockSpec((None, K1P, n), lambda i: (i, 0, 0)),
        pl.BlockSpec((None, K1P, n), lambda i: (i, 0, 0)),
        pl.BlockSpec((None, tile_b, EXTRA), lambda i: (i, 0, 0)),
    ] + [const_spec(p) for p in kparams]

    out = pl.pallas_call(
        selector_kernel,
        out_shape=jax.ShapeDtypeStruct((Bp, 1), jnp.float32),
        grid_spec=pltpu.PrefetchScalarGridSpec(
            num_scalar_prefetch=0,
            grid=(nb,),
            in_specs=in_specs,
            out_specs=pl.BlockSpec((tile_b, 1), lambda i: (i, 0)),
        ),
        compiler_params=pltpu.CompilerParams(
            dimension_semantics=("parallel",),
            vmem_limit_bytes=32 * 1024 * 1024,
        ),
    )(ce, co, cp, ex, *kparams)
    return out[:B]


# ------------------- parameter setup (PyTorch-default-like) ------------------
def init_params(key, frames):
    def uni(k, shape, fan_in):
        bound = 1.0 / np.sqrt(fan_in)
        return jax.random.uniform(k, shape, jnp.float32, -bound, bound)

    ks = jax.random.split(key, 12)
    w1 = uni(ks[0], (32, frames, 5), frames * 5)
    b1 = uni(ks[1], (32,), frames * 5)
    w2 = uni(ks[2], (32, 32, 3), 32 * 3)
    b2 = uni(ks[3], (32,), 32 * 3)
    wf1 = uni(ks[4], (512, 128 * 32), 128 * 32)
    bf1 = uni(ks[5], (512,), 128 * 32)
    wf2 = uni(ks[6], (128, 512), 512)
    bf2 = uni(ks[7], (128,), 512)
    wd1 = uni(ks[8], (64, 128 + EXTRA), 128 + EXTRA)
    bd1 = uni(ks[9], (64,), 128 + EXTRA)
    wd2 = uni(ks[10], (1, 64), 64)
    bd2 = uni(ks[11], (1,), 64)
    return (w1, b1, w2, b2, wf1, bf1, wf2, bf2, wd1, bd1, wd2, bd2)


def pack_kernel_params(p):
    (w1, b1, w2, b2, wf1, bf1, wf2, bf2, wd1, bd1, wd2, bd2) = p
    w1f = jnp.pad(w1.reshape(C1, K1), ((0, 0), (0, K1P - K1))).astype(jnp.bfloat16)
    w2f = jnp.transpose(w2, (0, 2, 1)).reshape(C1, 3 * C1).astype(jnp.bfloat16)  # k-major
    wfc1t = wf1.T.astype(jnp.bfloat16)                              # (4096, 512) bf16
    wfc2t = wf2.T.astype(jnp.bfloat16)                              # (512, 128)  bf16
    return (w1f, b1.reshape(C1, 1),
            w2f, b2.reshape(C1, 1),
            wfc1t, bf1.reshape(1, 512),
            wfc2t, bf2.reshape(1, 128),
            wd1[:, :128].T, wd1[:, 128:].T, bd1.reshape(1, 64),
            wd2.T, bd2.reshape(1, 1))


# --------------- pure-JAX f32 reference of the PyTorch forward ---------------
def reference_forward(p, x, position, goal, speed, other_position, other_speed):
    (w1, b1, w2, b2, wf1, bf1, wf2, bf2, wd1, bd1, wd2, bd2) = p
    hp = lax.Precision.HIGHEST
    a = lax.conv_general_dilated(x, w1, (2,), [(1, 1)],
                                 dimension_numbers=('NCH', 'OIH', 'NCH'),
                                 precision=hp) + b1[None, :, None]
    a = _leaky(a)
    a = lax.conv_general_dilated(a, w2, (2,), [(1, 1)],
                                 dimension_numbers=('NCH', 'OIH', 'NCH'),
                                 precision=hp) + b2[None, :, None]
    a = _leaky(a)
    a = a.reshape(a.shape[0], -1)
    a = _leaky(jnp.dot(a, wf1.T, precision=hp) + bf1)
    a = _leaky(jnp.dot(a, wf2.T, precision=hp) + bf2)
    a = jnp.concatenate([a, position, goal, speed, other_position, other_speed], -1)
    a = jnp.maximum(jnp.dot(a, wd1.T, precision=hp) + bd1, 0.0)
    return jnp.dot(a, wd2.T, precision=hp) + bd2


if __name__ == "__main__":
    key = jax.random.PRNGKey(0)
    kp, kx = jax.random.split(key)
    params = init_params(kp, FRAMES)
    kparams = pack_kernel_params(params)

    B = 12                                   # not a multiple of TILE_B -> exercises padding
    ks = jax.random.split(kx, 6)
    x = jax.random.normal(ks[0], (B, FRAMES, L_IN), jnp.float32)
    position = jax.random.normal(ks[1], (B, 3), jnp.float32)
    goal = jax.random.normal(ks[2], (B, 2), jnp.float32)
    speed = jax.random.normal(ks[3], (B, 2), jnp.float32)
    other_position = jax.random.normal(ks[4], (B, 3), jnp.float32)
    other_speed = jax.random.normal(ks[5], (B, 2), jnp.float32)

    fwd = jax.jit(selector_net_pallas)
    out = fwd(kparams, x, position, goal, speed, other_position, other_speed)
    out = jax.block_until_ready(out)

    ref = reference_forward(params, x, position, goal, speed,
                            other_position, other_speed)
    np.testing.assert_allclose(np.asarray(out), np.asarray(ref),
                               rtol=2e-2, atol=2e-2)
    print("KERNEL_OK")
</pallas_src>

<mosaic_0001>
module attributes {stable_mosaic.version = 11 : i64} {
  func.func @selector_kernel(%arg0: i32, %arg1: memref<1x16x2048xbf16, #tpu.memory_space<vmem>>, %arg2: memref<1x16x2048xbf16, #tpu.memory_space<vmem>>, %arg3: memref<1x16x2048xbf16, #tpu.memory_space<vmem>>, %arg4: memref<1x16x12xf32, #tpu.memory_space<vmem>>, %arg5: memref<32x16xbf16, #tpu.memory_space<vmem>>, %arg6: memref<32x1xf32, #tpu.memory_space<vmem>>, %arg7: memref<32x96xbf16, #tpu.memory_space<vmem>>, %arg8: memref<32x1xf32, #tpu.memory_space<vmem>>, %arg9: memref<4096x512xbf16, #tpu.memory_space<vmem>>, %arg10: memref<1x512xf32, #tpu.memory_space<vmem>>, %arg11: memref<512x128xbf16, #tpu.memory_space<vmem>>, %arg12: memref<1x128xf32, #tpu.memory_space<vmem>>, %arg13: memref<128x64xf32, #tpu.memory_space<vmem>>, %arg14: memref<12x64xf32, #tpu.memory_space<vmem>>, %arg15: memref<1x64xf32, #tpu.memory_space<vmem>>, %arg16: memref<64x1xf32, #tpu.memory_space<vmem>>, %arg17: memref<1x1xf32, #tpu.memory_space<vmem>>, %arg18: memref<16x1xf32, #tpu.memory_space<vmem>>) attributes {dimension_semantics = [#tpu.dimension_semantics<parallel>], iteration_bounds = array<i64: 1>, scalar_prefetch = 0 : i64, scratch_operands = 0 : i64, tpu.core_type = #tpu.core_type<tc>, window_params = [{transform_indices = @transform_0, window_bounds = array<i64: 1, 16, 2048>}, {transform_indices = @transform_1, window_bounds = array<i64: 1, 16, 2048>}, {transform_indices = @transform_2, window_bounds = array<i64: 1, 16, 2048>}, {transform_indices = @transform_3, window_bounds = array<i64: 1, 16, 12>}, {pipeline_mode = #tpu.pipeline_mode<synchronous>, transform_indices = @transform_4, window_bounds = array<i64: 32, 16>}, {pipeline_mode = #tpu.pipeline_mode<synchronous>, transform_indices = @transform_5, window_bounds = array<i64: 32, 1>}, {pipeline_mode = #tpu.pipeline_mode<synchronous>, transform_indices = @transform_6, window_bounds = array<i64: 32, 96>}, {pipeline_mode = #tpu.pipeline_mode<synchronous>, transform_indices = @transform_7, window_bounds = array<i64: 32, 1>}, {pipeline_mode = #tpu.pipeline_mode<synchronous>, transform_indices = @transform_8, window_bounds = array<i64: 4096, 512>}, {pipeline_mode = #tpu.pipeline_mode<synchronous>, transform_indices = @transform_9, window_bounds = array<i64: 1, 512>}, {pipeline_mode = #tpu.pipeline_mode<synchronous>, transform_indices = @transform_10, window_bounds = array<i64: 512, 128>}, {pipeline_mode = #tpu.pipeline_mode<synchronous>, transform_indices = @transform_11, window_bounds = array<i64: 1, 128>}, {pipeline_mode = #tpu.pipeline_mode<synchronous>, transform_indices = @transform_12, window_bounds = array<i64: 128, 64>}, {pipeline_mode = #tpu.pipeline_mode<synchronous>, transform_indices = @transform_13, window_bounds = array<i64: 12, 64>}, {pipeline_mode = #tpu.pipeline_mode<synchronous>, transform_indices = @transform_14, window_bounds = array<i64: 1, 64>}, {pipeline_mode = #tpu.pipeline_mode<synchronous>, transform_indices = @transform_15, window_bounds = array<i64: 64, 1>}, {pipeline_mode = #tpu.pipeline_mode<synchronous>, transform_indices = @transform_16, window_bounds = array<i64: 1, 1>}, {transform_indices = @transform_17, window_bounds = array<i64: 16, 1>}]} {
    %c0 = arith.constant 0 : index
    %c0_0 = arith.constant 0 : index
    %0 = vector.load %arg5[%c0, %c0_0] : memref<32x16xbf16, #tpu.memory_space<vmem>>, vector<32x16xbf16>
    %c0_1 = arith.constant 0 : index
    %c0_2 = arith.constant 0 : index
    %1 = vector.load %arg6[%c0_1, %c0_2] : memref<32x1xf32, #tpu.memory_space<vmem>>, vector<32x1xf32>
    %c0_3 = arith.constant 0 : index
    %c0_4 = arith.constant 0 : index
    %c0_5 = arith.constant 0 : index
    %2 = vector.load %arg1[%c0_3, %c0_4, %c0_5] : memref<1x16x2048xbf16, #tpu.memory_space<vmem>>, vector<1x16x2048xbf16>
    %3 = vector.shape_cast %2 : vector<1x16x2048xbf16> to vector<16x2048xbf16>
    %cst = arith.constant dense<0.000000e+00> : vector<32x2048xf32>
    %4 = tpu.matmul %0, %3, %cst {dimension_numbers = #tpu.dot_dimension_numbers<[1], [0], [0], [1], [0, 0, 1, 1], [], []>} : vector<32x16xbf16>, vector<16x2048xbf16>, vector<32x2048xf32> -> vector<32x2048xf32>
    %5 = vector.broadcast %1 : vector<32x1xf32> to vector<32x2048xf32>
    %6 = arith.addf %4, %5 : vector<32x2048xf32>
    %cst_6 = arith.constant 0.00999999977 : f32
    %7 = vector.broadcast %cst_6 : f32 to vector<32x2048xf32>
    %8 = arith.mulf %7, %6 : vector<32x2048xf32>
    %9 = arith.maximumf %6, %8 : vector<32x2048xf32>
    %c0_7 = arith.constant 0 : index
    %c0_8 = arith.constant 0 : index
    %c0_9 = arith.constant 0 : index
    %10 = vector.load %arg2[%c0_7, %c0_8, %c0_9] : memref<1x16x2048xbf16, #tpu.memory_space<vmem>>, vector<1x16x2048xbf16>
    %11 = vector.shape_cast %10 : vector<1x16x2048xbf16> to vector<16x2048xbf16>
    %cst_10 = arith.constant dense<0.000000e+00> : vector<32x2048xf32>
    %12 = tpu.matmul %0, %11, %cst_10 {dimension_numbers = #tpu.dot_dimension_numbers<[1], [0], [0], [1], [0, 0, 1, 1], [], []>} : vector<32x16xbf16>, vector<16x2048xbf16>, vector<32x2048xf32> -> vector<32x2048xf32>
    %13 = vector.broadcast %1 : vector<32x1xf32> to vector<32x2048xf32>
    %14 = arith.addf %12, %13 : vector<32x2048xf32>
    %cst_11 = arith.constant 0.00999999977 : f32
    %15 = vector.broadcast %cst_11 : f32 to vector<32x2048xf32>
    %16 = arith.mulf %15, %14 : vector<32x2048xf32>
    %17 = arith.maximumf %14, %16 : vector<32x2048xf32>
    %c0_12 = arith.constant 0 : index
    %c0_13 = arith.constant 0 : index
    %c0_14 = arith.constant 0 : index
    %18 = vector.load %arg3[%c0_12, %c0_13, %c0_14] : memref<1x16x2048xbf16, #tpu.memory_space<vmem>>, vector<1x16x2048xbf16>
    %19 = vector.shape_cast %18 : vector<1x16x2048xbf16> to vector<16x2048xbf16>
    %cst_15 = arith.constant dense<0.000000e+00> : vector<32x2048xf32>
    %20 = tpu.matmul %0, %19, %cst_15 {dimension_numbers = #tpu.dot_dimension_numbers<[1], [0], [0], [1], [0, 0, 1, 1], [], []>} : vector<32x16xbf16>, vector<16x2048xbf16>, vector<32x2048xf32> -> vector<32x2048xf32>
    %21 = vector.broadcast %1 : vector<32x1xf32> to vector<32x2048xf32>
    %22 = arith.addf %20, %21 : vector<32x2048xf32>
    %cst_16 = arith.constant 0.00999999977 : f32
    %23 = vector.broadcast %cst_16 : f32 to vector<32x2048xf32>
    %24 = arith.mulf %23, %22 : vector<32x2048xf32>
    %25 = arith.maximumf %22, %24 : vector<32x2048xf32>
    %26 = tpu.iota {dimensions = array<i32: 1>} : vector<1x2048xi32>
    %c128_i32 = arith.constant 128 : i32
    %c0_i32 = arith.constant 0 : i32
    %27 = arith.cmpi eq, %c128_i32, %c0_i32 : i32
    %c1_i32 = arith.constant 1 : i32
    %28 = arith.select %27, %c1_i32, %c128_i32 : i32
    %29 = vector.broadcast %28 : i32 to vector<1x2048xi32>
    %30 = arith.remsi %26, %29 : vector<1x2048xi32>
    %c0_i32_17 = arith.constant 0 : i32
    %31 = vector.broadcast %c0_i32_17 : i32 to vector<1x2048xi32>
    %32 = arith.cmpi ne, %30, %31 : vector<1x2048xi32>
    %c0_i32_18 = arith.constant 0 : i32
    %33 = vector.broadcast %c0_i32_18 : i32 to vector<1x2048xi32>
    %34 = arith.cmpi slt, %30, %33 : vector<1x2048xi32>
    %c0_i32_19 = arith.constant 0 : i32
    %35 = arith.cmpi slt, %28, %c0_i32_19 : i32
    %36 = vector.broadcast %35 : i1 to vector<1x2048xi1>
    %37 = vector.broadcast %36 : vector<1x2048xi1> to vector<1x2048xi1>
    %38 = arith.xori %34, %37 : vector<1x2048xi1>
    %39 = arith.andi %38, %32 : vector<1x2048xi1>
    %40 = vector.broadcast %28 : i32 to vector<1x2048xi32>
    %41 = arith.addi %30, %40 : vector<1x2048xi32>
    %42 = arith.select %39, %41, %30 : vector<1x2048xi1>, vector<1x2048xi32>
    %c127_i32 = arith.constant 127 : i32
    %43 = vector.broadcast %c127_i32 : i32 to vector<1x2048xi32>
    %44 = arith.cmpi eq, %42, %43 : vector<1x2048xi32>
    %cst_20 = arith.constant 0.000000e+00 : f32
    %45 = vector.shape_cast %44 : vector<1x2048xi1> to vector<1x2048xi1>
    %46 = vector.broadcast %45 : vector<1x2048xi1> to vector<32x2048xi1>
    %47 = vector.broadcast %cst_20 : f32 to vector<32x2048xf32>
    %48 = arith.select %46, %47, %17 : vector<32x2048xi1>, vector<32x2048xf32>
    %c0_i32_21 = arith.constant 0 : i32
    %49 = vector.broadcast %c0_i32_21 : i32 to vector<1x2048xi32>
    %50 = arith.cmpi eq, %42, %49 : vector<1x2048xi32>
    %cst_22 = arith.constant 0.000000e+00 : f32
    %51 = vector.shape_cast %50 : vector<1x2048xi1> to vector<1x2048xi1>
    %52 = vector.broadcast %51 : vector<1x2048xi1> to vector<32x2048xi1>
    %53 = vector.broadcast %cst_22 : f32 to vector<32x2048xf32>
    %54 = arith.select %52, %53, %25 : vector<32x2048xi1>, vector<32x2048xf32>
    %55 = tpu.concatenate %54, %9, %48 in 0 : vector<32x2048xf32>, vector<32x2048xf32>, vector<32x2048xf32> -> vector<96x2048xf32>
    %56 = arith.truncf %55 : vector<96x2048xf32> to vector<96x2048xbf16>
    %c0_23 = arith.constant 0 : index
    %c0_24 = arith.constant 0 : index
    %57 = vector.load %arg7[%c0_23, %c0_24] : memref<32x96xbf16, #tpu.memory_space<vmem>>, vector<32x96xbf16>
    %cst_25 = arith.constant dense<0.000000e+00> : vector<32x2048xf32>
    %58 = tpu.matmul %57, %56, %cst_25 {dimension_numbers = #tpu.dot_dimension_numbers<[1], [0], [0], [1], [0, 0, 1, 1], [], []>} : vector<32x96xbf16>, vector<96x2048xbf16>, vector<32x2048xf32> -> vector<32x2048xf32>
    %c0_26 = arith.constant 0 : index
    %c0_27 = arith.constant 0 : index
    %59 = vector.load %arg8[%c0_26, %c0_27] : memref<32x1xf32, #tpu.memory_space<vmem>>, vector<32x1xf32>
    %60 = vector.broadcast %59 : vector<32x1xf32> to vector<32x2048xf32>
    %61 = arith.addf %58, %60 : vector<32x2048xf32>
    %cst_28 = arith.constant 0.00999999977 : f32
    %62 = vector.broadcast %cst_28 : f32 to vector<32x2048xf32>
    %63 = arith.mulf %62, %61 : vector<32x2048xf32>
    %64 = arith.maximumf %61, %63 : vector<32x2048xf32>
    %65 = vector.shape_cast %64 : vector<32x2048xf32> to vector<32x16x128xf32>
    %66 = tpu.transpose %65, [1, 0, 2] : vector<32x16x128xf32> -> vector<16x32x128xf32>
    %67 = vector.shape_cast %66 : vector<16x32x128xf32> to vector<16x4096xf32>
    %68 = arith.truncf %67 : vector<16x4096xf32> to vector<16x4096xbf16>
    %c0_29 = arith.constant 0 : index
    %c0_30 = arith.constant 0 : index
    %69 = vector.load %arg9[%c0_29, %c0_30] : memref<4096x512xbf16, #tpu.memory_space<vmem>>, vector<4096x512xbf16>
    %cst_31 = arith.constant dense<0.000000e+00> : vector<16x512xf32>
    %70 = tpu.matmul %68, %69, %cst_31 {dimension_numbers = #tpu.dot_dimension_numbers<[1], [0], [0], [1], [0, 0, 1, 1], [], []>} : vector<16x4096xbf16>, vector<4096x512xbf16>, vector<16x512xf32> -> vector<16x512xf32>
    %c0_32 = arith.constant 0 : index
    %c0_33 = arith.constant 0 : index
    %71 = vector.load %arg10[%c0_32, %c0_33] : memref<1x512xf32, #tpu.memory_space<vmem>>, vector<1x512xf32>
    %72 = vector.broadcast %71 : vector<1x512xf32> to vector<16x512xf32>
    %73 = arith.addf %70, %72 : vector<16x512xf32>
    %cst_34 = arith.constant 0.00999999977 : f32
    %74 = vector.broadcast %cst_34 : f32 to vector<16x512xf32>
    %75 = arith.mulf %74, %73 : vector<16x512xf32>
    %76 = arith.maximumf %73, %75 : vector<16x512xf32>
    %77 = arith.truncf %76 : vector<16x512xf32> to vector<16x512xbf16>
    %c0_35 = arith.constant 0 : index
    %c0_36 = arith.constant 0 : index
    %78 = vector.load %arg11[%c0_35, %c0_36] : memref<512x128xbf16, #tpu.memory_space<vmem>>, vector<512x128xbf16>
    %cst_37 = arith.constant dense<0.000000e+00> : vector<16x128xf32>
    %79 = tpu.matmul %77, %78, %cst_37 {dimension_numbers = #tpu.dot_dimension_numbers<[1], [0], [0], [1], [0, 0, 1, 1], [], []>} : vector<16x512xbf16>, vector<512x128xbf16>, vector<16x128xf32> -> vector<16x128xf32>
    %c0_38 = arith.constant 0 : index
    %c0_39 = arith.constant 0 : index
    %80 = vector.load %arg12[%c0_38, %c0_39] : memref<1x128xf32, #tpu.memory_space<vmem>>, vector<1x128xf32>
    %81 = vector.broadcast %80 : vector<1x128xf32> to vector<16x128xf32>
    %82 = arith.addf %79, %81 : vector<16x128xf32>
    %cst_40 = arith.constant 0.00999999977 : f32
    %83 = vector.broadcast %cst_40 : f32 to vector<16x128xf32>
    %84 = arith.mulf %83, %82 : vector<16x128xf32>
    %85 = arith.maximumf %82, %84 : vector<16x128xf32>
    %c0_41 = arith.constant 0 : index
    %c0_42 = arith.constant 0 : index
    %86 = vector.load %arg13[%c0_41, %c0_42] : memref<128x64xf32, #tpu.memory_space<vmem>>, vector<128x64xf32>
    %cst_43 = arith.constant dense<0.000000e+00> : vector<16x64xf32>
    %87 = tpu.matmul %85, %86, %cst_43 {dimension_numbers = #tpu.dot_dimension_numbers<[1], [0], [0], [1], [0, 0, 1, 1], [], []>} : vector<16x128xf32>, vector<128x64xf32>, vector<16x64xf32> -> vector<16x64xf32>
    %c0_44 = arith.constant 0 : index
    %c0_45 = arith.constant 0 : index
    %c0_46 = arith.constant 0 : index
    %88 = vector.load %arg4[%c0_44, %c0_45, %c0_46] : memref<1x16x12xf32, #tpu.memory_space<vmem>>, vector<1x16x12xf32>
    %89 = vector.shape_cast %88 : vector<1x16x12xf32> to vector<16x12xf32>
    %c0_47 = arith.constant 0 : index
    %c0_48 = arith.constant 0 : index
    %90 = vector.load %arg14[%c0_47, %c0_48] : memref<12x64xf32, #tpu.memory_space<vmem>>, vector<12x64xf32>
    %cst_49 = arith.constant dense<0.000000e+00> : vector<16x64xf32>
    %91 = tpu.matmul %89, %90, %cst_49 {dimension_numbers = #tpu.dot_dimension_numbers<[1], [0], [0], [1], [0, 0, 1, 1], [], []>} : vector<16x12xf32>, vector<12x64xf32>, vector<16x64xf32> -> vector<16x64xf32>
    %92 = arith.addf %87, %91 : vector<16x64xf32>
    %c0_50 = arith.constant 0 : index
    %c0_51 = arith.constant 0 : index
    %93 = vector.load %arg15[%c0_50, %c0_51] : memref<1x64xf32, #tpu.memory_space<vmem>>, vector<1x64xf32>
    %94 = vector.broadcast %93 : vector<1x64xf32> to vector<16x64xf32>
    %95 = arith.addf %92, %94 : vector<16x64xf32>
    %cst_52 = arith.constant 0.000000e+00 : f32
    %96 = vector.broadcast %cst_52 : f32 to vector<16x64xf32>
    %97 = arith.maximumf %95, %96 : vector<16x64xf32>
    %c0_53 = arith.constant 0 : index
    %c0_54 = arith.constant 0 : index
    %98 = vector.load %arg16[%c0_53, %c0_54] : memref<64x1xf32, #tpu.memory_space<vmem>>, vector<64x1xf32>
    %cst_55 = arith.constant dense<0.000000e+00> : vector<16x1xf32>
    %99 = tpu.matmul %97, %98, %cst_55 {dimension_numbers = #tpu.dot_dimension_numbers<[1], [0], [0], [1], [0, 0, 1, 1], [], []>} : vector<16x64xf32>, vector<64x1xf32>, vector<16x1xf32> -> vector<16x1xf32>
    %c0_56 = arith.constant 0 : index
    %c0_57 = arith.constant 0 : index
    %100 = vector.load %arg17[%c0_56, %c0_57] : memref<1x1xf32, #tpu.memory_space<vmem>>, vector<1x1xf32>
    %101 = vector.broadcast %100 : vector<1x1xf32> to vector<16x1xf32>
    %102 = arith.addf %99, %101 : vector<16x1xf32>
    %c0_58 = arith.constant 0 : index
    %c0_59 = arith.constant 0 : index
    %103 = vector.load %arg18[%c0_58, %c0_59] : memref<16x1xf32, #tpu.memory_space<vmem>>, vector<16x1xf32>
    tpu.vector_store %arg18[%c0_58, %c0_59], %102 {strides = array<i32>} : memref<16x1xf32, #tpu.memory_space<vmem>>, vector<16x1xf32>,
    return
  }
  func.func @transform_0(%arg0: i32) -> (i32, i32, i32) {
    %c0_i32 = arith.constant 0 : i32
    %c0_i32_0 = arith.constant 0 : i32
    %c0_i32_1 = arith.constant 0 : i32
    return %arg0, %c0_i32, %c0_i32_0 : i32, i32, i32
  }
  func.func @transform_1(%arg0: i32) -> (i32, i32, i32) {
    %c0_i32 = arith.constant 0 : i32
    %c0_i32_0 = arith.constant 0 : i32
    %c0_i32_1 = arith.constant 0 : i32
    return %arg0, %c0_i32, %c0_i32_0 : i32, i32, i32
  }
  func.func @transform_2(%arg0: i32) -> (i32, i32, i32) {
    %c0_i32 = arith.constant 0 : i32
    %c0_i32_0 = arith.constant 0 : i32
    %c0_i32_1 = arith.constant 0 : i32
    return %arg0, %c0_i32, %c0_i32_0 : i32, i32, i32
  }
  func.func @transform_3(%arg0: i32) -> (i32, i32, i32) {
    %c0_i32 = arith.constant 0 : i32
    %c0_i32_0 = arith.constant 0 : i32
    %c0_i32_1 = arith.constant 0 : i32
    return %arg0, %c0_i32, %c0_i32_0 : i32, i32, i32
  }
  func.func @transform_4(%arg0: i32) -> (i32, i32) {
    %c0_i32 = arith.constant 0 : i32
    %c0_i32_0 = arith.constant 0 : i32
    %c0_i32_1 = arith.constant 0 : i32
    return %c0_i32, %c0_i32_0 : i32, i32
  }
  func.func @transform_5(%arg0: i32) -> (i32, i32) {
    %c0_i32 = arith.constant 0 : i32
    %c0_i32_0 = arith.constant 0 : i32
    %c0_i32_1 = arith.constant 0 : i32
    return %c0_i32, %c0_i32_0 : i32, i32
  }
  func.func @transform_6(%arg0: i32) -> (i32, i32) {
    %c0_i32 = arith.constant 0 : i32
    %c0_i32_0 = arith.constant 0 : i32
    %c0_i32_1 = arith.constant 0 : i32
    return %c0_i32, %c0_i32_0 : i32, i32
  }
  func.func @transform_7(%arg0: i32) -> (i32, i32) {
    %c0_i32 = arith.constant 0 : i32
    %c0_i32_0 = arith.constant 0 : i32
    %c0_i32_1 = arith.constant 0 : i32
    return %c0_i32, %c0_i32_0 : i32, i32
  }
  func.func @transform_8(%arg0: i32) -> (i32, i32) {
    %c0_i32 = arith.constant 0 : i32
    %c0_i32_0 = arith.constant 0 : i32
    %c0_i32_1 = arith.constant 0 : i32
    return %c0_i32, %c0_i32_0 : i32, i32
  }
  func.func @transform_9(%arg0: i32) -> (i32, i32) {
    %c0_i32 = arith.constant 0 : i32
    %c0_i32_0 = arith.constant 0 : i32
    %c0_i32_1 = arith.constant 0 : i32
    return %c0_i32, %c0_i32_0 : i32, i32
  }
  func.func @transform_10(%arg0: i32) -> (i32, i32) {
    %c0_i32 = arith.constant 0 : i32
    %c0_i32_0 = arith.constant 0 : i32
    %c0_i32_1 = arith.constant 0 : i32
    return %c0_i32, %c0_i32_0 : i32, i32
  }
  func.func @transform_11(%arg0: i32) -> (i32, i32) {
    %c0_i32 = arith.constant 0 : i32
    %c0_i32_0 = arith.constant 0 : i32
    %c0_i32_1 = arith.constant 0 : i32
    return %c0_i32, %c0_i32_0 : i32, i32
  }
  func.func @transform_12(%arg0: i32) -> (i32, i32) {
    %c0_i32 = arith.constant 0 : i32
    %c0_i32_0 = arith.constant 0 : i32
    %c0_i32_1 = arith.constant 0 : i32
    return %c0_i32, %c0_i32_0 : i32, i32
  }
  func.func @transform_13(%arg0: i32) -> (i32, i32) {
    %c0_i32 = arith.constant 0 : i32
    %c0_i32_0 = arith.constant 0 : i32
    %c0_i32_1 = arith.constant 0 : i32
    return %c0_i32, %c0_i32_0 : i32, i32
  }
  func.func @transform_14(%arg0: i32) -> (i32, i32) {
    %c0_i32 = arith.constant 0 : i32
    %c0_i32_0 = arith.constant 0 : i32
    %c0_i32_1 = arith.constant 0 : i32
    return %c0_i32, %c0_i32_0 : i32, i32
  }
  func.func @transform_15(%arg0: i32) -> (i32, i32) {
    %c0_i32 = arith.constant 0 : i32
    %c0_i32_0 = arith.constant 0 : i32
    %c0_i32_1 = arith.constant 0 : i32
    return %c0_i32, %c0_i32_0 : i32, i32
  }
  func.func @transform_16(%arg0: i32) -> (i32, i32) {
    %c0_i32 = arith.constant 0 : i32
    %c0_i32_0 = arith.constant 0 : i32
    %c0_i32_1 = arith.constant 0 : i32
    return %c0_i32, %c0_i32_0 : i32, i32
  }
  func.func @transform_17(%arg0: i32) -> (i32, i32) {
    %c0_i32 = arith.constant 0 : i32
    %c0_i32_0 = arith.constant 0 : i32
    return %arg0, %c0_i32 : i32, i32
  }
}

</mosaic_0001>

<bundles_post_ra>
// kernel: selector_net_pallas.1
= control target key start
LH: loop header
LB: loop body
LE: loop exit
PB: predicated region body
PF: predicated region fallthrough
CT: control target
= control target key end

     0   :  { %s21700_s0 = inlined_call_operand.vmem [shape: bf16[1,16,2048], index: 0, kind: input, shape index: {}]   ;;  %s21701_s1 = inlined_call_operand.vmem [shape: bf16[1,16,2048], index: 1, kind: input, shape index: {}]   ;;  %s21702_s2 = inlined_call_operand.vmem [shape: bf16[1,16,2048], index: 2, kind: input, shape index: {}]   ;;  %s21703_s3 = inlined_call_operand.vmem [shape: f32[1,16,12], index: 3, kind: input, shape index: {}]   ;;  %s21704_s4 = inlined_call_operand.vmem [shape: bf16[32,16], index: 4, kind: input, shape index: {}]   ;;  %s21705_s5 = inlined_call_operand.vmem [shape: f32[32,1], index: 5, kind: input, shape index: {}]   ;;  %s21706_s6 = inlined_call_operand.hbm [shape: bf16[32,96], index: 6, kind: input, shape index: {}]   ;;  %s21707_s7 = inlined_call_operand.vmem [shape: f32[32,1], index: 7, kind: input, shape index: {}]   ;;  %s21708_s8 = inlined_call_operand.hbm [shape: bf16[4096,512], index: 8, kind: input, shape index: {}]   ;;  %s21709_s9 = inlined_call_operand.hbm [shape: f32[1,512], index: 9, kind: input, shape index: {}]   ;;  %s21710_s10 = inlined_call_operand.hbm [shape: bf16[512,128], index: 10, kind: input, shape index: {}]   ;;  %s21711_s11 = inlined_call_operand.hbm [shape: f32[1,128], index: 11, kind: input, shape index: {}]   ;;  %s21712_s12 = inlined_call_operand.vmem [shape: f32[128,64], index: 12, kind: input, shape index: {}]   ;;  %s21713_s13 = inlined_call_operand.hbm [shape: f32[12,64], index: 13, kind: input, shape index: {}]   ;;  %s21714_s14 = inlined_call_operand.hbm [shape: f32[1,64], index: 14, kind: input, shape index: {}]   ;;  %s21715_s15 = inlined_call_operand.vmem [shape: f32[64,1], index: 15, kind: input, shape index: {}]   ;;  %s21716_s16 = inlined_call_operand.<no memory space> [shape: f32[1,1], index: 16, kind: input, shape index: {}]   ;;  %s21717_s17 = inlined_call_operand.vmem [shape: f32[16,1], index: 17, kind: output, shape index: {}]  }
   0x1   :  { %21774 = sst [smem:[#allocation65_spill]] %s21700_s0  ;;  %v22_v0 = vstv %s21716_s16 }
   0x2   :  { %21775 = sst [smem:[#allocation66_spill]] %s21701_s1  ;;  %23 = vst [vmem:[#allocation2] sm:$0x1] %v22_v0 }
   0x3   :  { %24 = vsyncpa [#allocation4], 0 }
   0x4   :  { %25 = vsyncpa [#allocation6], 0 }
   0x5   :  { %26 = vsyncpa [#allocation9], 0 }
   0x6   :  { %27 = vsyncpa [#allocation12], 0  ;;  %s18507_s26 = smov [#allocation5]   ;;  %s18345_s0 = scalar_lea.hbm %s21708_s8, 131072 }
   0x7   :  { %s59_s27 = sshll.u32 %s18507_s26, 4  ;;  %p18346_p0 = scmp.ne.s32.totalorder %s21708_s8, %s18345_s0  ;;  %s60_s27 = int_to_ptr.vmem [resolvable:$true] %s59_s27 }
   0x8   :  { %p18349_p1 = scmp.lt.u32.totalorder %s18345_s0, %s21708_s8 }
   0xa   :  { %p18351_p2 = pnand %p18349_p1, %p18346_p0 }
   0xc   :  { %18354 = shalt.err (!%p18351_p2)
}
   0xd   :  { %s18355_s16 = scalar_lea.vmem %s60_s27, 131072  ;;  %p18360_p4 = scmp.lt.s32.totalorder %s60_s27, %s60_s27 }
   0xe   :  { %p18356_p3 = scmp.ne.s32.totalorder %s60_s27, %s18355_s16  ;;  %p18361_p5 = scmp.lt.s32.totalorder %s18355_s16, %s18355_s16 }
  0x10   :  { %p18362_p6 = por %p18361_p5, %p18360_p4 }
  0x12   :  { %p18363_p7 = pnand %p18362_p6, %p18356_p3 }
  0x14   :  { %18366 = shalt.err (!%p18363_p7)
}
  0x15   :  { %s18508_s20 = smov 256   ;;  %s18509_s21 = smov 16  }
  0x16   :  { %65 = dma.hbm_to_vmem [thread:$0]  %s21708_s8, 131072, %s60_s27, [#allocation6], %s18508_s20, %s18508_s20, %s18509_s21  }
  0x17   :  { %s18510_s24 = smov [#allocation8]   ;;  %s18511_s26 = smov [#allocation11]  }
  0x18   :  { %s81_s25 = sshll.u32 %s18510_s24, 4  ;;  %s105_s28 = sshll.u32 %s18511_s26, 4  ;;  %s82_s25 = int_to_ptr.vmem [resolvable:$true] %s81_s25  ;;  %s106_s28 = int_to_ptr.vmem [resolvable:$true] %s105_s28 }
  0x19   :  { %s18367_s30 = scalar_lea.hbm %s21710_s10, 4096 }
  0x1a   :  { %p18368_p8 = scmp.ne.s32.totalorder %s21710_s10, %s18367_s30  ;;  %p18371_p9 = scmp.lt.u32.totalorder %s18367_s30, %s21710_s10 }
  0x1c   :  { %p18373_p10 = pnand %p18371_p9, %p18368_p8 }
  0x1e   :  { %18376 = shalt.err (!%p18373_p10)
}
  0x1f   :  { %s18377_s8 = scalar_lea.vmem %s82_s25, 4096  ;;  %p18382_p12 = scmp.lt.s32.totalorder %s82_s25, %s82_s25 }
  0x20   :  { %p18378_p11 = scmp.ne.s32.totalorder %s82_s25, %s18377_s8  ;;  %p18383_p13 = scmp.lt.s32.totalorder %s18377_s8, %s18377_s8 }
  0x22   :  { %p18384_p0 = por %p18383_p13, %p18382_p12 }
  0x24   :  { %p18385_p1 = pnand %p18384_p0, %p18378_p11 }
  0x26   :  { %18388 = shalt.err (!%p18385_p1)
}
  0x27   :  { %s18512_s27 = smov 64   ;;  %s18513_s20 = smov 4  }
  0x28   :  { %87 = dma.hbm_to_vmem [thread:$0]  %s21710_s10, 4096, %s82_s25, [#allocation9], %s18512_s27, %s18512_s27, %s18513_s20  }
  0x29   :  { %s18389_s26 = scalar_lea.hbm %s21713_s13, 256 }
  0x2a   :  { %p18390_p2 = scmp.ne.s32.totalorder %s21713_s13, %s18389_s26  ;;  %p18393_p3 = scmp.lt.u32.totalorder %s18389_s26, %s21713_s13 }
  0x2c   :  { %p18395_p4 = pnand %p18393_p3, %p18390_p2 }
  0x2e   :  { %18398 = shalt.err (!%p18395_p4)
}
  0x2f   :  { %s18399_s19 = scalar_lea.vmem %s106_s28, 256  ;;  %p18404_p6 = scmp.lt.s32.totalorder %s106_s28, %s106_s28 }
  0x30   :  { %p18400_p5 = scmp.ne.s32.totalorder %s106_s28, %s18399_s19  ;;  %p18405_p7 = scmp.lt.s32.totalorder %s18399_s19, %s18399_s19 }
  0x32   :  { %p18406_p8 = por %p18405_p7, %p18404_p6 }
  0x34   :  { %p18407_p9 = pnand %p18406_p8, %p18400_p5 }
  0x36   :  { %18410 = shalt.err (!%p18407_p9)
}
  0x37   :  { %s18514_s10 = smov 128   ;;  %s18515_s25 = smov 8  }
  0x38   :  { %111 = dma.hbm_to_vmem [thread:$0]  %s21713_s13, 256, %s106_s28, [#allocation12], %s18514_s10, %s18514_s10, %s18515_s25  }
  0x39   :  { %s18516_s8 = smov [#allocation3]   ;;  %s18517_s22 = smov [#allocation7]  }
  0x3a   :  { %s45_s21 = sshll.u32 %s18516_s8, 4  ;;  %s72_s23 = sshll.u32 %s18517_s22, 4  ;;  %s46_s21 = int_to_ptr.vmem [resolvable:$true] %s45_s21  ;;  %s73_s23 = int_to_ptr.vmem [resolvable:$true] %s72_s23 }
  0x3b   :  { %s18411_s29 = scalar_lea.hbm %s21706_s6, 256 }
  0x3c   :  { %p18412_p10 = scmp.ne.s32.totalorder %s21706_s6, %s18411_s29  ;;  %p18415_p11 = scmp.lt.u32.totalorder %s18411_s29, %s21706_s6 }
  0x3e   :  { %p18417_p12 = pnand %p18415_p11, %p18412_p10 }
  0x40   :  { %18420 = shalt.err (!%p18417_p12)
}
  0x41   :  { %s18421_s13 = scalar_lea.vmem %s46_s21, 256  ;;  %p18426_p0 = scmp.lt.s32.totalorder %s46_s21, %s46_s21 }
  0x42   :  { %p18422_p13 = scmp.ne.s32.totalorder %s46_s21, %s18421_s13  ;;  %p18427_p1 = scmp.lt.s32.totalorder %s18421_s13, %s18421_s13 }
  0x44   :  { %p18428_p2 = por %p18427_p1, %p18426_p0 }
  0x46   :  { %p18429_p3 = pnand %p18428_p2, %p18422_p13 }
  0x48   :  { %18432 = shalt.err (!%p18429_p3)
}
  0x49   :  { %51 = dma.hbm_to_vmem [thread:$0]  %s21706_s6, 256, %s46_s21, [#allocation4], %s18512_s27, %s18512_s27, %s18513_s20  }
  0x4a   :  { %s18433_s16 = scalar_lea.hbm %s21709_s9, 64 }
  0x4b   :  { %p18434_p4 = scmp.ne.s32.totalorder %s21709_s9, %s18433_s16  ;;  %p18437_p5 = scmp.lt.u32.totalorder %s18433_s16, %s21709_s9 }
  0x4d   :  { %p18439_p6 = pnand %p18437_p5, %p18434_p4 }
  0x4f   :  { %18442 = shalt.err (!%p18439_p6)
}
  0x50   :  { %s18443_s29 = scalar_lea.vmem %s73_s23, 64  ;;  %p18448_p8 = scmp.lt.s32.totalorder %s73_s23, %s73_s23 }
  0x51   :  { %p18444_p7 = scmp.ne.s32.totalorder %s73_s23, %s18443_s29  ;;  %p18449_p9 = scmp.lt.s32.totalorder %s18443_s29, %s18443_s29 }
  0x53   :  { %p18450_p10 = por %p18449_p9, %p18448_p8 }
  0x55   :  { %p18451_p11 = pnand %p18450_p10, %p18444_p7 }
  0x57   :  { %18454 = shalt.err (!%p18451_p11)
}
  0x58   :  { %75 = dma.hbm_to_vmem [thread:$0]  %s21709_s9, 64, %s73_s23, [#allocation6]  }
  0x59   :  { %s18518_s20 = smov [#allocation10]   ;;  %s18519_s0 = smov [#allocation13]  }
  0x5a   :  { %s94_s21 = sshll.u32 %s18518_s20, 4  ;;  %s118_s30 = sshll.u32 %s18519_s0, 4  ;;  %s95_s21 = int_to_ptr.vmem [resolvable:$true] %s94_s21  ;;  %s119_s30 = int_to_ptr.vmem [resolvable:$true] %s118_s30 }
  0x5b   :  { %s18455_s13 = scalar_lea.hbm %s21711_s11, 16 }
  0x5c   :  { %p18456_p12 = scmp.ne.s32.totalorder %s21711_s11, %s18455_s13  ;;  %p18459_p13 = scmp.lt.u32.totalorder %s18455_s13, %s21711_s11 }
  0x5e   :  { %p18461_p0 = pnand %p18459_p13, %p18456_p12 }
  0x60   :  { %18464 = shalt.err (!%p18461_p0)
}
  0x61   :  { %s18465_s9 = scalar_lea.vmem %s95_s21, 16  ;;  %s18469_s23 = scalar_lea.vmem %s95_s21, 32 }
  0x62   :  { %p18466_p1 = scmp.ne.s32.totalorder %s95_s21, %s18465_s9  ;;  %p18470_p2 = scmp.lt.s32.totalorder %s95_s21, %s95_s21 }
  0x63   :  { %p18471_p3 = scmp.lt.s32.totalorder %s18469_s23, %s18465_s9 }
  0x65   :  { %p18472_p4 = por %p18471_p3, %p18470_p2 }
  0x67   :  { %p18473_p5 = pnand %p18472_p4, %p18466_p1 }
  0x69   :  { %18476 = shalt.err (!%p18473_p5)
}
  0x6a   :  { %97 = dma.hbm_to_vmem [thread:$0]  %s21711_s11, 16, %s95_s21, [#allocation9]  }
  0x6b   :  { %s18477_s26 = scalar_lea.hbm %s21714_s14, 16 }
  0x6c   :  { %p18478_p6 = scmp.ne.s32.totalorder %s21714_s14, %s18477_s26  ;;  %p18481_p7 = scmp.lt.u32.totalorder %s18477_s26, %s21714_s14 }
  0x6e   :  { %p18483_p8 = pnand %p18481_p7, %p18478_p6 }
  0x70   :  { %18486 = shalt.err (!%p18483_p8)
}
  0x71   :  { %s18487_s0 = scalar_lea.vmem %s119_s30, 16  ;;  %s18491_s18 = scalar_lea.vmem %s119_s30, 32 }
  0x72   :  { %p18488_p9 = scmp.ne.s32.totalorder %s119_s30, %s18487_s0  ;;  %p18492_p10 = scmp.lt.s32.totalorder %s119_s30, %s119_s30 }
  0x73   :  { %p18493_p11 = scmp.lt.s32.totalorder %s18491_s18, %s18487_s0 }
  0x75   :  { %p18494_p12 = por %p18493_p11, %p18492_p10 }
  0x77   :  { %p18495_p13 = pnand %p18494_p12, %p18488_p9 }
  0x79   :  { %18498 = shalt.err (!%p18495_p13)
}
  0x7a   :  { %121 = dma.hbm_to_vmem [thread:$0]  %s21714_s14, 16, %s119_s30, [#allocation12]  }
  0x7b   :  { %18499 = dma.done.wait [#allocation4], 256  }
  0x7c   :  { %18500 = vsyncadd [#allocation4], 4294967040 }
  0x7d   :  { %18501 = dma.done.wait [#allocation6], 131136  }
  0x7e   :  { %18502 = vsyncadd [#allocation6], 4294836160 }
  0x7f   :  { %18503 = dma.done.wait [#allocation9], 4112  }
  0x80   :  { %18504 = vsyncadd [#allocation9], 4294963184 }
  0x81   :  { %18505 = dma.done.wait [#allocation12], 272  }
  0x82   :  { %18506 = vsyncadd [#allocation12], 4294967024  ;;  %v21721_v1 = vmov 0   ;;  %s21776_s14 = sld [smem:[#allocation65_spill]]  ;;  %v18732_v12 = vld [vmem:[%s21704_s4] sm:$0xff]   ;;  %vm282_vm0 = vcmask 130048  }
  0x83   :  { %321 = vmatprep.mubr.bf16.mxu1 %v21721_v1  ;;  %427 = vmatprep.mubr.bf16.mxu0 %v21721_v1  ;;  %v152_v25 = vld [vmem:[%s21705_s5] sm:$0xff]  ;;  %v18764_v26 = vld [vmem:[%s21704_s4 + $0x8] sm:$0xff]   ;;  %v154_v27 = vld [vmem:[%s21705_s5 + $0x10] sm:$0xff]  ;;  %s21777_s18 = sld [smem:[#allocation66_spill]]  ;;  %vm2704_vm13 = vcmask 785408  }
  0x84   :  { %16768 = vset.pattern.permute.xlu0 %v21721_v1  ;;  %16769 = vset.pattern.permute.xlu1 %v21721_v1  ;;  %v153_v28 = vld [vmem:[%s21705_s5 + $0x8] sm:$0xff]  ;;  %v155_v29 = vld [vmem:[%s21705_s5 + $0x18] sm:$0xff]  ;;  %v1489_v0 = vld [vmem:[%s21702_s2] sm:$0xff] }
  0x85   :  { %174 = vperm.xlu0 %16768, %v152_v25   ;;  %184 = vperm.xlu1 %16769, %v154_v27  }
  0x88   :  { %v156_v2 = vld [vmem:[%s21776_s14] sm:$0xff]  ;;  %v158_v4 = vld [vmem:[%s21776_s14 + $0x10] sm:$0xff]  ;;  %v157_v10 = vld [vmem:[%s21776_s14 + $0x8] sm:$0xff] }
  0x89   :  { %v164_v3 = vld [vmem:[%s21776_s14 + $0x40] sm:$0xff]  ;;  %v166_v6 = vld [vmem:[%s21776_s14 + $0x50] sm:$0xff]  ;;  %v165_v11 = vld [vmem:[%s21776_s14 + $0x48] sm:$0xff]  ;;  %179 = vperm.xlu0 %16768, %v153_v28   ;;  %189 = vperm.xlu1 %16769, %v155_v29  }
  0x8a   :  { %v14773_v5 = vcombine.high %v156_v2, %v164_v3  ;;  %v14772_v7 = vcombine.low %v156_v2, %v164_v3  ;;  %v14777_v8 = vcombine.high %v158_v4, %v166_v6  ;;  %v14776_v9 = vcombine.low %v158_v4, %v166_v6  ;;  %v160_v15 = vld [vmem:[%s21776_s14 + $0x20] sm:$0xff]  ;;  %v159_v17 = vld [vmem:[%s21776_s14 + $0x18] sm:$0xff]  ;;  %v162_v20 = vld [vmem:[%s21776_s14 + $0x30] sm:$0xff] }
  0x8b   :  { %v14775_v13 = vcombine.high %v157_v10, %v165_v11  ;;  %v14774_v14 = vcombine.low %v157_v10, %v165_v11  ;;  %v168_v16 = vld [vmem:[%s21776_s14 + $0x60] sm:$0xff]  ;;  %v167_v19 = vld [vmem:[%s21776_s14 + $0x58] sm:$0xff]  ;;  %v170_v21 = vld [vmem:[%s21776_s14 + $0x70] sm:$0xff] }
  0x8c   :  { %289 = vmatprep.subr.bf16.mxu1 %v14773_v5  ;;  %395 = vmatprep.subr.bf16.mxu0 %v14777_v8  ;;  %v14781_v18 = vcombine.high %v160_v15, %v168_v16  ;;  %v14780_v22 = vcombine.low %v160_v15, %v168_v16  ;;  %v14779_v23 = vcombine.high %v159_v17, %v167_v19  ;;  %v161_v30 = vld [vmem:[%s21776_s14 + $0x28] sm:$0xff]  ;;  %v841_v32 = vld [vmem:[%s21777_s18] sm:$0xff]  ;;  %v163_v38 = vld [vmem:[%s21776_s14 + $0x38] sm:$0xff] }
  0x8d   :  { %290 = vmatpush1.bf16.msra.mxu1 %v14772_v7  ;;  %396 = vmatpush1.bf16.msra.mxu0 %v14776_v9  ;;  %v14785_v24 = vcombine.high %v162_v20, %v170_v21  ;;  %v169_v31 = vld [vmem:[%s21776_s14 + $0x68] sm:$0xff]  ;;  %v849_v33 = vld [vmem:[%s21777_s18 + $0x40] sm:$0xff]  ;;  %v14778_v34 = vcombine.low %v159_v17, %v167_v19  ;;  %v14784_v35 = vcombine.low %v162_v20, %v170_v21  ;;  %v171_v39 = vld [vmem:[%s21776_s14 + $0x78] sm:$0xff] }
  0x8e   :  { %342 = vmatprep.subr.bf16.mxu1 %v14775_v13  ;;  %501 = vmatprep.subr.bf16.mxu0 %v14781_v18  ;;  %v14783_v36 = vcombine.high %v161_v30, %v169_v31  ;;  %v14805_v37 = vcombine.high %v841_v32, %v849_v33  ;;  %v843_v40 = vld [vmem:[%s21777_s18 + $0x10] sm:$0xff]  ;;  %v14782_v42 = vcombine.low %v161_v30, %v169_v31  ;;  %v842_v46 = vld [vmem:[%s21777_s18 + $0x8] sm:$0xff]  ;;  %v845_v48 = vld [vmem:[%s21777_s18 + $0x20] sm:$0xff] }
  0x8f   :  { %v851_v41 = vld [vmem:[%s21777_s18 + $0x50] sm:$0xff]  ;;  %v14804_v43 = vcombine.low %v841_v32, %v849_v33  ;;  %v14787_v44 = vcombine.high %v163_v38, %v171_v39  ;;  %v850_v47 = vld [vmem:[%s21777_s18 + $0x48] sm:$0xff]  ;;  %v853_v49 = vld [vmem:[%s21777_s18 + $0x60] sm:$0xff]  ;;  %v14786_v50 = vcombine.low %v163_v38, %v171_v39 }
  0x90   :  { %14788 = vmatmul.mubr.msk.bf16.vlgmr.msra.gmra.mrb[0].mxu1 %vm282_vm0, %v18732_v12  ;;  %14792 = vmatmul.mubr.msk.bf16.vlgmr.msra.gmra.mrb[0].mxu0 %vm282_vm0, %v18732_v12  ;;  %v14809_v45 = vcombine.high %v843_v40, %v851_v41  ;;  %v14808_v51 = vcombine.low %v843_v40, %v851_v41  ;;  %v14807_v52 = vcombine.high %v842_v46, %v850_v47  ;;  %v844_v54 = vld [vmem:[%s21777_s18 + $0x18] sm:$0xff]  ;;  %v847_v56 = vld [vmem:[%s21777_s18 + $0x30] sm:$0xff]  ;;  %v846_v62 = vld [vmem:[%s21777_s18 + $0x28] sm:$0xff] }
  0x91   :  { %343 = vmatpush1.bf16.msra.mxu1 %v14774_v14  ;;  %331 = vmatprep.mubr.bf16.mxu1 %v21721_v1  ;;  %v14813_v53 = vcombine.high %v845_v48, %v853_v49  ;;  %v852_v55 = vld [vmem:[%s21777_s18 + $0x58] sm:$0xff]  ;;  %v855_v57 = vld [vmem:[%s21777_s18 + $0x70] sm:$0xff]  ;;  %v14806_v58 = vcombine.low %v842_v46, %v850_v47  ;;  %v14812_v59 = vcombine.low %v845_v48, %v853_v49  ;;  %v854_v63 = vld [vmem:[%s21777_s18 + $0x68] sm:$0xff] }
  0x92   :  { %437 = vmatprep.mubr.bf16.mxu0 %v21721_v1  ;;  %502 = vmatpush1.bf16.msra.mxu0 %v14780_v22  ;;  %v14811_v60 = vcombine.high %v844_v54, %v852_v55  ;;  %v14817_v61 = vcombine.high %v847_v56, %v855_v57  ;;  %v1497_v2 = vld [vmem:[%s21702_s2 + $0x40] sm:$0xff]  ;;  %v14810_v3 = vcombine.low %v844_v54, %v852_v55  ;;  %v848_v7 = vld [vmem:[%s21777_s18 + $0x38] sm:$0xff]  ;;  %v1491_v9 = vld [vmem:[%s21702_s2 + $0x10] sm:$0xff] }
  0x93   :  { %448 = vmatprep.subr.bf16.mxu1 %v14779_v23  ;;  %607 = vmatprep.subr.bf16.mxu0 %v14785_v24  ;;  %v14816_v4 = vcombine.low %v847_v56, %v855_v57  ;;  %v14815_v5 = vcombine.high %v846_v62, %v854_v63  ;;  %v14837_v6 = vcombine.high %v1489_v0, %v1497_v2  ;;  %v856_v8 = vld [vmem:[%s21777_s18 + $0x78] sm:$0xff]  ;;  %v1499_v10 = vld [vmem:[%s21702_s2 + $0x50] sm:$0xff]  ;;  %v2670_v16 = vld [vmem:[%s21707_s7] sm:$0xff] }
  0x94   :  { %v14814_v11 = vcombine.low %v846_v62, %v854_v63  ;;  %v14836_v13 = vcombine.low %v1489_v0, %v1497_v2  ;;  %v14819_v14 = vcombine.high %v848_v7, %v856_v8  ;;  %v14841_v15 = vcombine.high %v1491_v9, %v1499_v10  ;;  %2676 = vperm.xlu0 %16768, %v2670_v16   ;;  %v2671_v17 = vld [vmem:[%s21707_s7 + $0x8] sm:$0xff]  ;;  %v2672_v18 = vld [vmem:[%s21707_s7 + $0x10] sm:$0xff]  ;;  %v1493_v21 = vld [vmem:[%s21702_s2 + $0x20] sm:$0xff] }
  0x95   :  { %2681 = vperm.xlu1 %16769, %v2671_v17   ;;  %v1490_v19 = vld [vmem:[%s21702_s2 + $0x8] sm:$0xff]  ;;  %v1501_v22 = vld [vmem:[%s21702_s2 + $0x60] sm:$0xff]  ;;  %v2673_v23 = vld [vmem:[%s21707_s7 + $0x18] sm:$0xff]  ;;  %v14818_v24 = vcombine.low %v848_v7, %v856_v8  ;;  %v14840_v25 = vcombine.low %v1491_v9, %v1499_v10 }
  0x96   :  { %v1498_v20 = vld [vmem:[%s21702_s2 + $0x48] sm:$0xff]  ;;  %v14845_v28 = vcombine.high %v1493_v21, %v1501_v22  ;;  %v1500_v29 = vld [vmem:[%s21702_s2 + $0x58] sm:$0xff]  ;;  %v1495_v30 = vld [vmem:[%s21702_s2 + $0x30] sm:$0xff]  ;;  %v14844_v32 = vcombine.low %v1493_v21, %v1501_v22 }
  0x97   :  { %v14839_v27 = vcombine.high %v1490_v19, %v1498_v20  ;;  %v14838_v31 = vcombine.low %v1490_v19, %v1498_v20  ;;  %v1502_v38 = vld [vmem:[%s21702_s2 + $0x68] sm:$0xff] }
  0x98   :  { %14789 = vmatmul.mubr.msk.bf16.gmra.mrb[4].mxu1 %vm282_vm0, %v18764_v26  ;;  %14793 = vmatmul.mubr.msk.bf16.gmra.mrb[4].mxu0 %vm282_vm0, %v18764_v26 }
  0x99   :  { %374 = vmatprep.mubr.bf16.mxu1 %v21721_v1  ;;  %533 = vmatprep.mubr.bf16.mxu0 %v21721_v1 }
  0x9a   :  { %2686 = vperm.xlu0 %16768, %v2672_v18   ;;  %2691 = vperm.xlu1 %16769, %v2673_v23  }
  0xa0   :  { %14790 = vmatmul.mubr.msk.bf16.vlgmr.msra.gmra.mrb[8].mxu1 %vm282_vm0, %v18732_v12  ;;  %14796 = vmatmul.mubr.msk.bf16.vlgmr.msra.gmra.mrb[8].mxu0 %vm282_vm0, %v18732_v12 }
  0xa1   :  { %449 = vmatpush1.bf16.msra.mxu1 %v14778_v34  ;;  %384 = vmatprep.mubr.bf16.mxu1 %v21721_v1  ;;  %v18342_v34 = vld [vmem:[%s21704_s4] sm:$0xff]  }
  0xa2   :  { %543 = vmatprep.mubr.bf16.mxu0 %v21721_v1  ;;  %608 = vmatpush1.bf16.msra.mxu0 %v14784_v35 }
  0xa3   :  { %554 = vmatprep.subr.bf16.mxu1 %v14783_v36  ;;  %937 = vmatprep.subr.bf16.mxu0 %v14805_v37  ;;  %v18343_v36 = vld [vmem:[%s21704_s4 + $0x8] sm:$0xff]  }
  0xa4   :  { %v1494_v37 = vld [vmem:[%s21702_s2 + $0x28] sm:$0xff] }
  0xa5   :  { %v14847_v41 = vcombine.high %v1494_v37, %v1502_v38 }
  0xa8   :  { %14791 = vmatmul.mubr.msk.bf16.gmra.mrb[12].mxu1 %vm282_vm0, %v18764_v26  ;;  %14797 = vmatmul.mubr.msk.bf16.gmra.mrb[12].mxu0 %vm282_vm0, %v18764_v26 }
  0xa9   :  { %480 = vmatprep.mubr.bf16.mxu1 %v21721_v1  ;;  %639 = vmatprep.mubr.bf16.mxu0 %v21721_v1 }
  0xb0   :  { %14794 = vmatmul.mubr.msk.bf16.vlgmr.msra.gmra.mrb[16].mxu1 %vm282_vm0, %v18732_v12  ;;  %14800 = vmatmul.mubr.msk.bf16.vlgmr.msra.gmra.mrb[16].mxu0 %vm282_vm0, %v18732_v12 }
  0xb1   :  { %555 = vmatpush1.bf16.msra.mxu1 %v14782_v42  ;;  %490 = vmatprep.mubr.bf16.mxu1 %v21721_v1  ;;  %v1496_v42 = vld [vmem:[%s21702_s2 + $0x38] sm:$0xff] }
  0xb2   :  { %649 = vmatprep.mubr.bf16.mxu0 %v21721_v1  ;;  %938 = vmatpush1.bf16.msra.mxu0 %v14804_v43  ;;  %v1504_v43 = vld [vmem:[%s21702_s2 + $0x78] sm:$0xff] }
  0xb3   :  { %660 = vmatprep.subr.bf16.mxu1 %v14787_v44  ;;  %1043 = vmatprep.subr.bf16.mxu0 %v14809_v45  ;;  %v14846_v44 = vcombine.low %v1494_v37, %v1502_v38  ;;  %v14851_v45 = vcombine.high %v1496_v42, %v1504_v43  ;;  %v14850_v46 = vcombine.low %v1496_v42, %v1504_v43 }
  0xb8   :  { %14795 = vmatmul.mubr.msk.bf16.gmra.mrb[20].mxu1 %vm282_vm0, %v18764_v26  ;;  %14801 = vmatmul.mubr.msk.bf16.gmra.mrb[20].mxu0 %vm282_vm0, %v18764_v26 }
  0xb9   :  { %586 = vmatprep.mubr.bf16.mxu1 %v21721_v1  ;;  %969 = vmatprep.mubr.bf16.mxu0 %v21721_v1 }
  0xc0   :  { %14798 = vmatmul.mubr.msk.bf16.vlgmr.msra.gmra.mrb[24].mxu1 %vm282_vm0, %v18732_v12  ;;  %14820 = vmatmul.mubr.msk.bf16.vlgmr.msra.gmra.mrb[24].mxu0 %vm282_vm0, %v18732_v12 }
  0xc1   :  { %661 = vmatpush1.bf16.msra.mxu1 %v14786_v50  ;;  %596 = vmatprep.mubr.bf16.mxu1 %v21721_v1 }
  0xc2   :  { %979 = vmatprep.mubr.bf16.mxu0 %v21721_v1  ;;  %1044 = vmatpush1.bf16.msra.mxu0 %v14808_v51 }
  0xc3   :  { %990 = vmatprep.subr.bf16.mxu1 %v14807_v52  ;;  %1149 = vmatprep.subr.bf16.mxu0 %v14813_v53 }
  0xc8   :  { %14799 = vmatmul.mubr.msk.bf16.gmra.mrb[28].mxu1 %vm282_vm0, %v18764_v26  ;;  %14821 = vmatmul.mubr.msk.bf16.gmra.mrb[28].mxu0 %vm282_vm0, %v18764_v26 }
  0xc9   :  { %692 = vmatprep.mubr.bf16.mxu1 %v21721_v1  ;;  %1075 = vmatprep.mubr.bf16.mxu0 %v21721_v1 }
  0xd0   :  { %14802 = vmatmul.mubr.msk.bf16.vlgmr.msra.gmra.mrb[32].mxu1 %vm282_vm0, %v18732_v12  ;;  %14824 = vmatmul.mubr.msk.bf16.vlgmr.msra.gmra.mrb[32].mxu0 %vm282_vm0, %v18732_v12 }
  0xd1   :  { %991 = vmatpush1.bf16.msra.mxu1 %v14806_v58  ;;  %702 = vmatprep.mubr.bf16.mxu1 %v21721_v1 }
  0xd2   :  { %1085 = vmatprep.mubr.bf16.mxu0 %v21721_v1  ;;  %1150 = vmatpush1.bf16.msra.mxu0 %v14812_v59 }
  0xd3   :  { %1096 = vmatprep.subr.bf16.mxu1 %v14811_v60  ;;  %1255 = vmatprep.subr.bf16.mxu0 %v14817_v61 }
  0xd8   :  { %14803 = vmatmul.mubr.msk.bf16.gmra.mrb[36].mxu1 %vm282_vm0, %v18764_v26  ;;  %14825 = vmatmul.mubr.msk.bf16.gmra.mrb[36].mxu0 %vm282_vm0, %v18764_v26 }
  0xd9   :  { %1022 = vmatprep.mubr.bf16.mxu1 %v21721_v1  ;;  %1181 = vmatprep.mubr.bf16.mxu0 %v21721_v1 }
  0xe0   :  { %14822 = vmatmul.mubr.msk.bf16.vlgmr.msra.gmra.mrb[40].mxu1 %vm282_vm0, %v18732_v12  ;;  %14828 = vmatmul.mubr.msk.bf16.vlgmr.msra.gmra.mrb[40].mxu0 %vm282_vm0, %v18732_v12 }
  0xe1   :  { %1097 = vmatpush1.bf16.msra.mxu1 %v14810_v3  ;;  %1032 = vmatprep.mubr.bf16.mxu1 %v21721_v1 }
  0xe2   :  { %1191 = vmatprep.mubr.bf16.mxu0 %v21721_v1  ;;  %1256 = vmatpush1.bf16.msra.mxu0 %v14816_v4 }
  0xe3   :  { %1202 = vmatprep.subr.bf16.mxu1 %v14815_v5  ;;  %1585 = vmatprep.subr.bf16.mxu0 %v14837_v6 }
  0xe8   :  { %14823 = vmatmul.mubr.msk.bf16.gmra.mrb[44].mxu1 %vm282_vm0, %v18764_v26  ;;  %14829 = vmatmul.mubr.msk.bf16.gmra.mrb[44].mxu0 %vm282_vm0, %v18764_v26 }
  0xe9   :  { %1128 = vmatprep.mubr.bf16.mxu1 %v21721_v1  ;;  %1287 = vmatprep.mubr.bf16.mxu0 %v21721_v1 }
  0xf0   :  { %14826 = vmatmul.mubr.msk.bf16.vlgmr.msra.gmra.mrb[48].mxu1 %vm282_vm0, %v18732_v12  ;;  %14832 = vmatmul.mubr.msk.bf16.vlgmr.msra.gmra.mrb[48].mxu0 %vm282_vm0, %v18732_v12 }
  0xf1   :  { %1203 = vmatpush1.bf16.msra.mxu1 %v14814_v11  ;;  %1138 = vmatprep.mubr.bf16.mxu1 %v21721_v1 }
  0xf2   :  { %1297 = vmatprep.mubr.bf16.mxu0 %v21721_v1  ;;  %1586 = vmatpush1.bf16.msra.mxu0 %v14836_v13 }
  0xf3   :  { %1308 = vmatprep.subr.bf16.mxu1 %v14819_v14  ;;  %1691 = vmatprep.subr.bf16.mxu0 %v14841_v15 }
  0xf8   :  { %14827 = vmatmul.mubr.msk.bf16.gmra.mrb[52].mxu1 %vm282_vm0, %v18764_v26  ;;  %14833 = vmatmul.mubr.msk.bf16.gmra.mrb[52].mxu0 %vm282_vm0, %v18764_v26 }
  0xf9   :  { %1234 = vmatprep.mubr.bf16.mxu1 %v21721_v1  ;;  %1617 = vmatprep.mubr.bf16.mxu0 %v21721_v1 }
 0x100   :  { %14830 = vmatmul.mubr.msk.bf16.vlgmr.msra.gmra.mrb[56].mxu1 %vm282_vm0, %v18732_v12  ;;  %14852 = vmatmul.mubr.msk.bf16.vlgmr.msra.gmra.mrb[56].mxu0 %vm282_vm0, %v18732_v12  ;;  %v1492_v12 = vld [vmem:[%s21702_s2 + $0x18] sm:$0xff] }
 0x101   :  { %1309 = vmatpush1.bf16.msra.mxu1 %v14818_v24  ;;  %1244 = vmatprep.mubr.bf16.mxu1 %v21721_v1  ;;  %v14843_v33 = vcombine.high %v1492_v12, %v1500_v29  ;;  %v14842_v39 = vcombine.low %v1492_v12, %v1500_v29 }
 0x102   :  { %1627 = vmatprep.mubr.bf16.mxu0 %v21721_v1  ;;  %1692 = vmatpush1.bf16.msra.mxu0 %v14840_v25 }
 0x103   :  { %1638 = vmatprep.subr.bf16.mxu1 %v14839_v27  ;;  %1797 = vmatprep.subr.bf16.mxu0 %v14845_v28 }
 0x104   :  { %v19023_v47 = vpop.permute.xlu0 %174  ;;  %v19025_v48 = vpop.permute.xlu1 %184 }
 0x108   :  { %14831 = vmatmul.mubr.msk.bf16.gmra.mrb[60].mxu1 %vm282_vm0, %v18764_v26  ;;  %14853 = vmatmul.mubr.msk.bf16.gmra.mrb[60].mxu0 %vm282_vm0, %v18764_v26  ;;  %v1503_v26 = vld [vmem:[%s21702_s2 + $0x70] sm:$0xff]  ;;  %v19027_v50 = vpop.permute.xlu0 %179  ;;  %v19037_v15 = vpop.permute.xlu1 %189 }
 0x109   :  { %1340 = vmatprep.mubr.bf16.mxu1 %v21721_v1  ;;  %1723 = vmatprep.mubr.bf16.mxu0 %v21721_v1  ;;  %v14849_v35 = vcombine.high %v1495_v30, %v1503_v26  ;;  %v14848_v40 = vcombine.low %v1495_v30, %v1503_v26 }
 0x110   :  { %14834 = vmatmul.mubr.msk.bf16.vlgmr.msra.gmra.mrb[64].mxu1 %vm282_vm0, %v18342_v34  ;;  %14856 = vmatmul.mubr.msk.bf16.vlgmr.msra.gmra.mrb[64].mxu0 %vm282_vm0, %v18342_v34 }
 0x111   :  { %1639 = vmatpush1.bf16.msra.mxu1 %v14838_v31  ;;  %1350 = vmatprep.mubr.bf16.mxu1 %v21721_v1 }
 0x112   :  { %1733 = vmatprep.mubr.bf16.mxu0 %v21721_v1  ;;  %1798 = vmatpush1.bf16.msra.mxu0 %v14844_v32 }
 0x113   :  { %1744 = vmatprep.subr.bf16.mxu1 %v14843_v33  ;;  %1903 = vmatprep.subr.bf16.mxu0 %v14849_v35 }
 0x118   :  { %14835 = vmatmul.mubr.msk.bf16.gmra.mrb[68].mxu1 %vm282_vm0, %v18343_v36  ;;  %14857 = vmatmul.mubr.msk.bf16.gmra.mrb[68].mxu0 %vm282_vm0, %v18343_v36 }
 0x119   :  { %1670 = vmatprep.mubr.bf16.mxu1 %v21721_v1  ;;  %1829 = vmatprep.mubr.bf16.mxu0 %v21721_v1 }
 0x120   :  { %14854 = vmatmul.mubr.msk.bf16.vlgmr.msra.gmra.mrb[72].mxu1 %vm282_vm0, %v18342_v34  ;;  %14860 = vmatmul.mubr.msk.bf16.vlgmr.msra.gmra.mrb[72].mxu0 %vm282_vm0, %v18342_v34 }
 0x121   :  { %1680 = vmatprep.mubr.bf16.mxu1 %v21721_v1  ;;  %1839 = vmatprep.mubr.bf16.mxu0 %v21721_v1 }
 0x122   :  { %1745 = vmatpush1.bf16.msra.mxu1 %v14842_v39  ;;  %1904 = vmatpush1.bf16.msra.mxu0 %v14848_v40 }
 0x123   :  { %1850 = vmatprep.subr.bf16.mxu1 %v14847_v41 }
 0x128   :  { %14855 = vmatmul.mubr.msk.bf16.gmra.mrb[76].mxu1 %vm282_vm0, %v18343_v36  ;;  %14861 = vmatmul.mubr.msk.bf16.gmra.mrb[76].mxu0 %vm282_vm0, %v18343_v36 }
 0x129   :  { %1776 = vmatprep.mubr.bf16.mxu1 %v21721_v1  ;;  %1935 = vmatprep.mubr.bf16.mxu0 %v21721_v1 }
 0x130   :  { %14858 = vmatmul.mubr.msk.bf16.vlgmr.msra.gmra.mrb[80].mxu1 %vm282_vm0, %v18342_v34  ;;  %14864 = vmatmul.mubr.msk.bf16.vlgmr.msra.gmra.mrb[80].mxu0 %vm282_vm0, %v18342_v34 }
 0x131   :  { %1786 = vmatprep.mubr.bf16.mxu1 %v21721_v1  ;;  %1945 = vmatprep.mubr.bf16.mxu0 %v21721_v1 }
 0x132   :  { %1851 = vmatpush1.bf16.msra.mxu1 %v14846_v44 }
 0x133   :  { %1956 = vmatprep.subr.bf16.mxu1 %v14851_v45 }
 0x138   :  { %14859 = vmatmul.mubr.msk.bf16.gmra.mrb[84].mxu1 %vm282_vm0, %v18343_v36  ;;  %14865 = vmatmul.mubr.msk.bf16.gmra.mrb[84].mxu0 %vm282_vm0, %v18343_v36 }
 0x139   :  { %1882 = vmatprep.mubr.bf16.mxu1 %v21721_v1  ;;  %2743 = vmatprep.mubr.bf16.mxu0 %v21721_v1 }
 0x140   :  { %14862 = vmatmul.mubr.msk.bf16.vlgmr.msra.gmra.mrb[88].mxu1 %vm282_vm0, %v18342_v34 }
 0x141   :  { %1892 = vmatprep.mubr.bf16.mxu1 %v21721_v1  ;;  %1957 = vmatpush1.bf16.msra.mxu1 %v14850_v46 }
 0x148   :  { %14863 = vmatmul.mubr.msk.bf16.gmra.mrb[92].mxu1 %vm282_vm0, %v18343_v36 }
 0x149   :  { %1988 = vmatprep.mubr.bf16.mxu1 %v21721_v1 }
 0x150   :  { %14866 = vmatmul.mubr.msk.bf16.vlgmr.msra.gmra.mrb[96].mxu1 %vm282_vm0, %v18342_v34 }
 0x151   :  { %1998 = vmatprep.mubr.bf16.mxu1 %v21721_v1 }
 0x158   :  { %14867 = vmatmul.mubr.msk.bf16.gmra.mrb[100].mxu1 %vm282_vm0, %v18343_v36 }
 0x159   :  { %2796 = vmatprep.mubr.bf16.mxu1 %v21721_v1 }
 0x163   :  { %v323_v49 = vpop.f32.mrb[0].mxu1  ;;  %v429_v53 = vpop.f32.mrb[0].mxu0 }
 0x164   :  { %v324_v51 = vadd.f32 %v323_v49, %v19023_v47  ;;  %v325_v52 = vpop.f32.mrb[1].mxu1  ;;  %v430_v55 = vadd.f32 %v429_v53, %v19023_v47  ;;  %v431_v56 = vpop.f32.mrb[1].mxu0 }
 0x165   :  { %v327_v54 = vpop.f32.mrb[2].mxu1  ;;  %v326_v58 = vadd.f32 %v325_v52, %v19023_v47  ;;  %v432_v61 = vadd.f32 %v431_v56, %v19023_v47  ;;  %v433_v62 = vpop.f32.mrb[2].mxu0 }
 0x166   :  { %v713_v57 = vmul.f32 0.01, %v324_v51  ;;  %v328_v59 = vadd.f32 %v327_v54, %v19027_v50  ;;  %v329_v60 = vpop.f32.mrb[3].mxu1  ;;  %v717_v0 = vmul.f32 0.01, %v430_v55  ;;  %v434_v2 = vadd.f32 %v433_v62, %v19027_v50  ;;  %v435_v3 = vpop.f32.mrb[3].mxu0 }
 0x167   :  { %v330_v63 = vadd.f32 %v329_v60, %v19027_v50  ;;  %v436_v5 = vadd.f32 %v435_v3, %v19027_v50  ;;  %v714_v9 = vmul.f32 0.01, %v326_v58  ;;  %v718_v11 = vmul.f32 0.01, %v432_v61 }
 0x168   :  { %v729_v4 = vmul.f32 0.01, %v328_v59  ;;  %v781_v6 = vmax.f32 %v430_v55, %v717_v0  ;;  %v733_v7 = vmul.f32 0.01, %v434_v2  ;;  %v777_v8 = vmax.f32 %v324_v51, %v713_v57 }
 0x169   :  { %v730_v13 = vmul.f32 0.01, %v330_v63  ;;  %v734_v20 = vmul.f32 0.01, %v436_v5  ;;  %v782_v37 = vmax.f32 %v432_v61, %v718_v11  ;;  %v778_v39 = vmax.f32 %v326_v58, %v714_v9 }
 0x16a   :  { %v793_v10 = vmax.f32 %v328_v59, %v729_v4  ;;  %v797_v16 = vmax.f32 %v434_v2, %v733_v7 }
 0x16b   :  { %v333_v14 = vpop.f32.mrb[4].mxu1  ;;  %v439_v21 = vpop.f32.mrb[4].mxu0  ;;  %v794_v26 = vmax.f32 %v330_v63, %v730_v13  ;;  %v798_v38 = vmax.f32 %v436_v5, %v734_v20 }
 0x16c   :  { %v19039_v17 = vpack.c.bf16 %v793_v10, %v777_v8  ;;  %v334_v18 = vadd.f32 %v333_v14, %v19025_v48  ;;  %v335_v19 = vpop.f32.mrb[5].mxu1  ;;  %v19043_v24 = vpack.c.bf16 %v797_v16, %v781_v6  ;;  %v440_v25 = vadd.f32 %v439_v21, %v19025_v48  ;;  %v441_v27 = vpop.f32.mrb[5].mxu0 }
 0x16d   :  { %v336_v22 = vadd.f32 %v335_v19, %v19025_v48  ;;  %v337_v23 = vpop.f32.mrb[6].mxu1  ;;  %v443_v30 = vpop.f32.mrb[6].mxu0  ;;  %v19049_v51 = vpack.c.bf16 %v794_v26, %v778_v39  ;;  %v19054_v57 = vpack.c.bf16 %v798_v38, %v782_v37  ;;  %v19064_v14 = vadd.f32 %v441_v27, %v19025_v48 }
 0x16e   :  { %21778 = vst [vmem:[#allocation18_spill] sm:$0xff] %v19043_v24  ;;  %v745_v28 = vmul.f32 0.01, %v334_v18  ;;  %v338_v12 = vadd.f32 %v337_v23, %v19037_v15  ;;  %v339_v29 = vpop.f32.mrb[7].mxu1  ;;  %v749_v32 = vmul.f32 0.01, %v440_v25  ;;  %v444_v33 = vadd.f32 %v443_v30, %v19037_v15 }
 0x16f   :  { %v340_v31 = vadd.f32 %v339_v29, %v19037_v15  ;;  %v445_v34 = vpop.f32.mrb[7].mxu0  ;;  %v746_v35 = vmul.f32 0.01, %v336_v22  ;;  %21779 = vst [vmem:[#allocation19_spill] sm:$0xff] %v19054_v57 }
 0x170   :  { %v761_v36 = vmul.f32 0.01, %v338_v12  ;;  %v813_v41 = vmax.f32 %v440_v25, %v749_v32  ;;  %v765_v42 = vmul.f32 0.01, %v444_v33  ;;  %v809_v43 = vmax.f32 %v334_v18, %v745_v28 }
 0x171   :  { %v762_v40 = vmul.f32 0.01, %v340_v31  ;;  %v810_v52 = vmax.f32 %v336_v22, %v746_v35  ;;  %v19070_v23 = vadd.f32 %v445_v34, %v19037_v15  ;;  %v750_v32 = vmul.f32 0.01, %v19064_v14 }
 0x172   :  { %v825_v44 = vmax.f32 %v338_v12, %v761_v36  ;;  %v829_v49 = vmax.f32 %v444_v33, %v765_v42 }
 0x173   :  { %v826_v45 = vmax.f32 %v340_v31, %v762_v40  ;;  %v376_v46 = vpop.f32.mrb[8].mxu1  ;;  %v535_v56 = vpop.f32.mrb[8].mxu0  ;;  %v766_v39 = vmul.f32 0.01, %v19070_v23 }
 0x174   :  { %v19051_v53 = vpack.c.bf16 %v825_v44, %v809_v43  ;;  %v377_v54 = vadd.f32 %v376_v46, %v19023_v47  ;;  %v378_v55 = vpop.f32.mrb[9].mxu1  ;;  %v19056_v59 = vpack.c.bf16 %v829_v49, %v813_v41  ;;  %v536_v60 = vadd.f32 %v535_v56, %v19023_v47  ;;  %v537_v61 = vpop.f32.mrb[9].mxu0 }
 0x175   :  { %v380_v58 = vpop.f32.mrb[10].mxu1  ;;  %v539_v2 = vpop.f32.mrb[10].mxu0  ;;  %v19060_v3 = vpack.c.bf16 %v826_v45, %v810_v52  ;;  %v19076_v29 = vadd.f32 %v378_v55, %v19023_v47  ;;  %v19081_v33 = vadd.f32 %v537_v61, %v19023_v47  ;;  %v814_v52 = vmax.f32 %v19064_v14, %v750_v32 }
 0x176   :  { %21780 = vst [vmem:[#allocation20_spill] sm:$0xff] %v19056_v59  ;;  %v715_v62 = vmul.f32 0.01, %v377_v54  ;;  %v381_v63 = vadd.f32 %v380_v58, %v19027_v50  ;;  %v382_v0 = vpop.f32.mrb[11].mxu1  ;;  %v721_v4 = vmul.f32 0.01, %v536_v60  ;;  %v540_v5 = vadd.f32 %v539_v2, %v19027_v50 }
 0x177   :  { %v541_v6 = vpop.f32.mrb[11].mxu0  ;;  %v383_v37 = vadd.f32 %v382_v0, %v19027_v50  ;;  %v716_v43 = vmul.f32 0.01, %v19076_v29 }
 0x178   :  { %v731_v7 = vmul.f32 0.01, %v381_v63  ;;  %v785_v8 = vmax.f32 %v536_v60, %v721_v4  ;;  %v737_v9 = vmul.f32 0.01, %v540_v5  ;;  %v779_v10 = vmax.f32 %v377_v54, %v715_v62 }
 0x179   :  { %v19087_v40 = vadd.f32 %v541_v6, %v19027_v50  ;;  %v19095_v54 = vmul.f32 0.01, %v19081_v33  ;;  %v732_v56 = vmul.f32 0.01, %v383_v37 }
 0x17a   :  { %v795_v11 = vmax.f32 %v381_v63, %v731_v7  ;;  %v801_v16 = vmax.f32 %v540_v5, %v737_v9 }
 0x17b   :  { %v386_v13 = vpop.f32.mrb[12].mxu1  ;;  %v545_v21 = vpop.f32.mrb[12].mxu0  ;;  %v19107_v4 = vmul.f32 0.01, %v19087_v40 }
 0x17c   :  { %v19066_v18 = vpack.c.bf16 %v795_v11, %v779_v10  ;;  %v387_v19 = vadd.f32 %v386_v13, %v19025_v48  ;;  %v388_v20 = vpop.f32.mrb[13].mxu1  ;;  %v19072_v25 = vpack.c.bf16 %v801_v16, %v785_v8  ;;  %v546_v28 = vadd.f32 %v545_v21, %v19025_v48  ;;  %v547_v12 = vpop.f32.mrb[13].mxu0 }
 0x17d   :  { %v390_v22 = vpop.f32.mrb[14].mxu1  ;;  %v549_v31 = vpop.f32.mrb[14].mxu0  ;;  %v19091_v46 = vadd.f32 %v388_v20, %v19025_v48  ;;  %v19101_v62 = vadd.f32 %v547_v12, %v19025_v48  ;;  %v830_v11 = vmax.f32 %v19070_v23, %v766_v39 }
 0x17e   :  { %21781 = vst [vmem:[#allocation21_spill] sm:$0xff] %v19066_v18  ;;  %21782 = vst [vmem:[#allocation22_spill] sm:$0xff] %v19072_v25  ;;  %v747_v27 = vmul.f32 0.01, %v387_v19  ;;  %v391_v30 = vadd.f32 %v390_v22, %v19037_v15  ;;  %v392_v26 = vpop.f32.mrb[15].mxu1  ;;  %v550_v35 = vadd.f32 %v549_v31, %v19037_v15  ;;  %v551_v36 = vpop.f32.mrb[15].mxu0  ;;  %v780_v31 = vmax.f32 %v19076_v29, %v716_v43 }
 0x17f   :  { %v753_v34 = vmul.f32 0.01, %v546_v28  ;;  %v19104_v0 = vadd.f32 %v392_v26, %v19037_v15  ;;  %v19117_v13 = vadd.f32 %v551_v36, %v19037_v15  ;;  %v748_v16 = vmul.f32 0.01, %v19091_v46 }
 0x180   :  { %v763_v38 = vmul.f32 0.01, %v391_v30  ;;  %v769_v42 = vmul.f32 0.01, %v550_v35  ;;  %v811_v44 = vmax.f32 %v387_v19, %v747_v27  ;;  %v754_v27 = vmul.f32 0.01, %v19101_v62 }
 0x181   :  { %v817_v41 = vmax.f32 %v546_v28, %v753_v34  ;;  %v796_v28 = vmax.f32 %v383_v37, %v732_v56  ;;  %v764_v23 = vmul.f32 0.01, %v19104_v0  ;;  %v19132_v37 = vpack.c.bf16 %v830_v11, %v814_v52 }
 0x182   :  { %v827_v45 = vmax.f32 %v391_v30, %v763_v38  ;;  %v833_v55 = vmax.f32 %v550_v35, %v769_v42  ;;  %v770_v35 = vmul.f32 0.01, %v19117_v13 }
 0x183   :  { %v482_v49 = vpop.f32.mrb[16].mxu1  ;;  %v641_v63 = vpop.f32.mrb[16].mxu0  ;;  %21785 = vst [vmem:[#allocation25_spill] sm:$0xff] %v19132_v37  ;;  %v19139_v29 = vpack.c.bf16 %v796_v28, %v780_v31 }
 0x184   :  { %v19097_v58 = vpack.c.bf16 %v827_v45, %v811_v44  ;;  %v483_v60 = vadd.f32 %v482_v49, %v19023_v47  ;;  %v484_v61 = vpop.f32.mrb[17].mxu1  ;;  %v19109_v5 = vpack.c.bf16 %v833_v55, %v817_v41  ;;  %v642_v6 = vadd.f32 %v641_v63, %v19023_v47  ;;  %v19112_v7 = vpop.f32.mrb[17].mxu0 }
 0x185   :  { %v486_v2 = vpop.f32.mrb[18].mxu1  ;;  %v645_v14 = vpop.f32.mrb[18].mxu0  ;;  %v485_v36 = vadd.f32 %v484_v61, %v19023_v47  ;;  %21787 = vst [vmem:[#allocation27_spill] sm:$0xff] %v19139_v29  ;;  %v21720_v61 = vlaneseq }
 0x186   :  { %21783 = vst [vmem:[#allocation23_spill] sm:$0xff] %v19097_v58  ;;  %21784 = vst [vmem:[#allocation24_spill] sm:$0xff] %v19109_v5  ;;  %v719_v8 = vmul.f32 0.01, %v483_v60  ;;  %v487_v9 = vadd.f32 %v486_v2, %v19027_v50  ;;  %v488_v10 = vpop.f32.mrb[19].mxu1  ;;  %v646_v21 = vadd.f32 %v645_v14, %v19027_v50  ;;  %v19124_v22 = vpop.f32.mrb[19].mxu0 }
 0x187   :  { %v19121_v19 = vadd.f32 %v488_v10, %v19027_v50  ;;  %v725_v20 = vmul.f32 0.01, %v642_v6  ;;  %v828_v10 = vmax.f32 %v19104_v0, %v764_v23  ;;  %v720_v11 = vmul.f32 0.01, %v485_v36 }
 0x188   :  { %v735_v12 = vmul.f32 0.01, %v487_v9  ;;  %v741_v26 = vmul.f32 0.01, %v646_v21  ;;  %v783_v32 = vmax.f32 %v483_v60, %v719_v8  ;;  %v802_v8 = vmax.f32 %v19087_v40, %v19107_v4 }
 0x189   :  { %v789_v30 = vmax.f32 %v642_v6, %v725_v20  ;;  %v736_v38 = vmul.f32 0.01, %v19121_v19  ;;  %v786_v6 = vmax.f32 %v19081_v33, %v19095_v54  ;;  %v19162_v0 = vand.u32 127, %v21720_v61 }
 0x18a   :  { %v799_v34 = vmax.f32 %v487_v9, %v735_v12  ;;  %v805_v41 = vmax.f32 %v646_v21, %v741_v26  ;;  %v818_v12 = vmax.f32 %v19101_v62, %v754_v27  ;;  %v812_v26 = vmax.f32 %v19091_v46, %v748_v16 }
 0x18b   :  { %v492_v39 = vpop.f32.mrb[20].mxu1  ;;  %v651_v49 = vpop.f32.mrb[20].mxu0  ;;  %v800_v33 = vmax.f32 %v19121_v19, %v736_v38  ;;  %v784_v23 = vmax.f32 %v485_v36, %v720_v11  ;;  %v19189_v11 = vadd.s32 640, %v19162_v0  ;;  %vm16399_vm2 = vcmp.ne.s32.totalorder %v19162_v0, 0 }
 0x18c   :  { %v19134_v42 = vpack.c.bf16 %v799_v34, %v783_v32  ;;  %v493_v44 = vadd.f32 %v492_v39, %v19025_v48  ;;  %v19137_v45 = vpop.f32.mrb[21].mxu1  ;;  %v19141_v55 = vpack.c.bf16 %v805_v41, %v789_v30  ;;  %v652_v56 = vadd.f32 %v651_v49, %v19025_v48  ;;  %v19144_v60 = vpop.f32.mrb[21].mxu0  ;;  %vm19487_vm4 = vmpackc.low %vm16399_vm2, %vm16399_vm2 }
 0x18d   :  { %v496_v43 = vpop.f32.mrb[22].mxu1  ;;  %v655_v9 = vpop.f32.mrb[22].mxu0  ;;  %v834_v30 = vmax.f32 %v19117_v13, %v770_v35  ;;  %v19164_v39 = vpack.c.bf16 %v828_v10, %v812_v26  ;;  %v19166_v41 = vpack.c.bf16 %v802_v8, %v786_v6  ;;  %v19186_v10 = vadd.s32 128, %v19162_v0 }
 0x18e   :  { %21786 = vst [vmem:[#allocation26_spill] sm:$0xff] %v19134_v42  ;;  %21788 = vst [vmem:[#allocation28_spill] sm:$0xff] %v19141_v55  ;;  %v751_v63 = vmul.f32 0.01, %v493_v44  ;;  %v497_v52 = vadd.f32 %v496_v43, %v19037_v15  ;;  %v19147_v2 = vpop.f32.mrb[23].mxu1  ;;  %v656_v20 = vadd.f32 %v655_v9, %v19037_v15  ;;  %v19155_v21 = vpop.f32.mrb[23].mxu0 }
 0x18f   :  { %v757_v14 = vmul.f32 0.01, %v652_v56  ;;  %21789 = vst [vmem:[#allocation29_spill] sm:$0xff] %v19164_v39  ;;  %21790 = vst [vmem:[#allocation30_spill] sm:$0xff] %v19166_v41  ;;  %v19173_v19 = vpack.c.bf16 %v834_v30, %v818_v12  ;;  %v19193_v26 = vadd.s32 512, %v19162_v0  ;;  %vm16401_vm6 = vcmp.ne.s32.totalorder %v19162_v0, 127 }
 0x190   :  { %v767_v28 = vmul.f32 0.01, %v497_v52  ;;  %v773_v40 = vmul.f32 0.01, %v656_v20  ;;  %v815_v4 = vmax.f32 %v493_v44, %v751_v63  ;;  %v19178_v44 = vpack.c.bf16 %v800_v33, %v784_v23  ;;  %vm19588_vm12 = vmpackc.low %vm16401_vm6, %vm16401_vm6 }
 0x191   :  { %v821_v54 = vmax.f32 %v652_v56, %v757_v14  ;;  %21792 = vst [vmem:[#allocation32_spill] sm:$0xff] %v19173_v19 }
 0x192   :  { %v831_v31 = vmax.f32 %v497_v52, %v767_v28  ;;  %v837_v34 = vmax.f32 %v656_v20, %v773_v40  ;;  %21794 = vst [vmem:[#allocation34_spill] sm:$0xff] %v19178_v44 }
 0x193   :  { %v588_v32 = vpop.f32.mrb[24].mxu1  ;;  %v971_v16 = vpop.f32.mrb[24].mxu0 }
 0x194   :  { %v19168_v62 = vpack.c.bf16 %v831_v31, %v815_v4  ;;  %v589_v46 = vadd.f32 %v588_v32, %v19023_v47  ;;  %v19171_v13 = vpop.f32.mrb[25].mxu1  ;;  %v19175_v35 = vpack.c.bf16 %v837_v34, %v821_v54  ;;  %v972_v36 = vadd.f32 %v971_v16, %v19023_v47  ;;  %v973_v38 = vpop.f32.mrb[25].mxu0 }
 0x195   :  { %v592_v27 = vpop.f32.mrb[26].mxu1  ;;  %v974_v63 = vadd.f32 %v973_v38, %v19023_v47  ;;  %v975_v52 = vpop.f32.mrb[26].mxu0 }
 0x196   :  { %21791 = vst [vmem:[#allocation31_spill] sm:$0xff] %v19168_v62  ;;  %21793 = vst [vmem:[#allocation33_spill] sm:$0xff] %v19175_v35  ;;  %v723_v49 = vmul.f32 0.01, %v589_v46  ;;  %v593_v43 = vadd.f32 %v592_v27, %v19027_v50  ;;  %v19181_v56 = vpop.f32.mrb[27].mxu1  ;;  %v976_v8 = vadd.f32 %v975_v52, %v19027_v50  ;;  %v977_v9 = vpop.f32.mrb[27].mxu0 }
 0x197   :  { %v1361_v6 = vmul.f32 0.01, %v972_v36  ;;  %v1362_v20 = vmul.f32 0.01, %v974_v63  ;;  %v978_v28 = vadd.f32 %v977_v9, %v19027_v50  ;;  %v19280_v62 = vadd.f32 %v19181_v56, %v19027_v50 }
 0x198   :  { %v739_v14 = vmul.f32 0.01, %v593_v43  ;;  %v1377_v30 = vmul.f32 0.01, %v976_v8  ;;  %v787_v33 = vmax.f32 %v589_v46, %v723_v49  ;;  %v19204_v46 = vadd.f32 %v19112_v7, %v19023_v47 }
 0x199   :  { %v1425_v12 = vmax.f32 %v972_v36, %v1361_v6  ;;  %v1426_v40 = vmax.f32 %v974_v63, %v1362_v20  ;;  %v1378_v4 = vmul.f32 0.01, %v978_v28  ;;  %v19218_v7 = vadd.f32 %v19124_v22, %v19027_v50 }
 0x19a   :  { %v803_v54 = vmax.f32 %v593_v43, %v739_v14  ;;  %v1441_v23 = vmax.f32 %v976_v8, %v1377_v30 }
 0x19b   :  { %v598_v31 = vpop.f32.mrb[28].mxu1  ;;  %v1442_v38 = vmax.f32 %v978_v28, %v1378_v4  ;;  %v981_v36 = vpop.f32.mrb[28].mxu0  ;;  %v19233_v52 = vmul.f32 0.01, %v19218_v7 }
 0x19c   :  { %v19196_v34 = vpack.c.bf16 %v803_v54, %v787_v33  ;;  %v599_v16 = vadd.f32 %v598_v31, %v19025_v48  ;;  %v19199_v27 = vpop.f32.mrb[29].mxu1  ;;  %v19206_v49 = vpack.c.bf16 %v1441_v23, %v1425_v12  ;;  %v982_v43 = vadd.f32 %v981_v36, %v19025_v48  ;;  %v983_v63 = vpop.f32.mrb[29].mxu0 }
 0x19d   :  { %v602_v6 = vpop.f32.mrb[30].mxu1  ;;  %v19213_v28 = vpack.c.bf16 %v1442_v38, %v1426_v40  ;;  %v984_v30 = vadd.f32 %v983_v63, %v19025_v48  ;;  %v985_v33 = vpop.f32.mrb[30].mxu0  ;;  %v19222_v31 = vadd.s32 384, %v19162_v0  ;;  %v19226_v23 = vadd.f32 %v19137_v45, %v19025_v48 }
 0x19e   :  { %21795 = vst [vmem:[#allocation35_spill] sm:$0xff] %v19196_v34  ;;  %21796 = vst [vmem:[#allocation36_spill] sm:$0xff] %v19206_v49  ;;  %v755_v9 = vmul.f32 0.01, %v599_v16  ;;  %v603_v14 = vadd.f32 %v602_v6, %v19037_v15  ;;  %v19211_v20 = vpop.f32.mrb[31].mxu1  ;;  %v986_v54 = vadd.f32 %v985_v33, %v19037_v15  ;;  %v987_v4 = vpop.f32.mrb[31].mxu0  ;;  %v19237_v45 = vadd.f32 %v19144_v60, %v19025_v48 }
 0x19f   :  { %v1393_v12 = vmul.f32 0.01, %v982_v43  ;;  %v1394_v38 = vmul.f32 0.01, %v984_v30  ;;  %v988_v36 = vadd.f32 %v987_v4, %v19037_v15  ;;  %v19230_v6 = vmul.f32 0.01, %v19204_v46 }
 0x1a0   :  { %v771_v40 = vmul.f32 0.01, %v603_v14  ;;  %v1409_v63 = vmul.f32 0.01, %v986_v54  ;;  %v819_v61 = vmax.f32 %v599_v16, %v755_v9  ;;  %v19240_v4 = vadd.s32 256, %v19162_v0 }
 0x1a1   :  { %v1457_v22 = vmax.f32 %v982_v43, %v1393_v12  ;;  %v1458_v33 = vmax.f32 %v984_v30, %v1394_v38  ;;  %v1410_v8 = vmul.f32 0.01, %v988_v36  ;;  %v19243_v35 = vmul.f32 0.01, %v19226_v23 }
 0x1a2   :  { %v835_v1 = vmax.f32 %v603_v14, %v771_v40  ;;  %v1473_v34 = vmax.f32 %v986_v54, %v1409_v63  ;;  %v19252_v12 = vadd.f32 %v19147_v2, %v19037_v15  ;;  %v19265_v2 = vmul.f32 0.01, %v19237_v45 }
 0x1a3   :  { %v694_v32 = vpop.f32.mrb[32].mxu1  ;;  %v1474_v14 = vmax.f32 %v988_v36, %v1410_v8  ;;  %v1077_v30 = vpop.f32.mrb[32].mxu0 }
 0x1a4   :  { %v19245_v43 = vpack.c.bf16 %v835_v1, %v819_v61  ;;  %v695_v16 = vadd.f32 %v694_v32, %v19023_v47  ;;  %v19248_v9 = vpop.f32.mrb[33].mxu1  ;;  %v19254_v54 = vpack.c.bf16 %v1473_v34, %v1457_v22  ;;  %v1078_v40 = vadd.f32 %v1077_v30, %v19023_v47  ;;  %v1079_v38 = vpop.f32.mrb[33].mxu0 }
 0x1a5   :  { %v698_v60 = vpop.f32.mrb[34].mxu1  ;;  %v1080_v8 = vadd.f32 %v1079_v38, %v19023_v47  ;;  %v1081_v36 = vpop.f32.mrb[34].mxu0  ;;  %v19269_v34 = vadd.f32 %v19155_v21, %v19037_v15  ;;  %v768_v55 = vmul.f32 0.01, %v19252_v12 }
 0x1a6   :  { %21797 = vst [vmem:[#allocation37_spill] sm:$0xff] %v19245_v43  ;;  %21798 = vst [vmem:[#allocation38_spill] sm:$0xff] %v19254_v54  ;;  %v727_v1 = vmul.f32 0.01, %v695_v16  ;;  %v699_v61 = vadd.f32 %v698_v60, %v19027_v50  ;;  %v19259_v32 = vpop.f32.mrb[35].mxu1  ;;  %v19261_v43 = vpack.c.bf16 %v1474_v14, %v1458_v33  ;;  %v1082_v30 = vadd.f32 %v1081_v36, %v19027_v50  ;;  %v1083_v63 = vpop.f32.mrb[35].mxu0 }
 0x1a7   :  { %v1365_v22 = vmul.f32 0.01, %v1078_v40  ;;  %v19274_v60 = vadd.f32 %v19171_v13, %v19023_v47  ;;  %v1366_v14 = vmul.f32 0.01, %v1080_v8  ;;  %v1084_v38 = vadd.f32 %v1083_v63, %v19027_v50 }
 0x1a8   :  { %21799 = vst [vmem:[#allocation39_spill] sm:$0xff] %v19261_v43  ;;  %v743_v33 = vmul.f32 0.01, %v699_v61  ;;  %v1381_v42 = vmul.f32 0.01, %v1082_v30  ;;  %v791_v44 = vmax.f32 %v695_v16, %v727_v1  ;;  %v816_v13 = vmax.f32 %v19226_v23, %v19243_v35 }
 0x1a9   :  { %v1429_v21 = vmax.f32 %v1078_v40, %v1365_v22  ;;  %v1430_v36 = vmax.f32 %v1080_v8, %v1366_v14  ;;  %v1382_v19 = vmul.f32 0.01, %v1084_v38  ;;  %v19285_v25 = vmul.f32 0.01, %v19269_v34 }
 0x1aa   :  { %v807_v5 = vmax.f32 %v699_v61, %v743_v33  ;;  %v1445_v63 = vmax.f32 %v1082_v30, %v1381_v42  ;;  %v19289_v39 = vmul.f32 0.01, %v19274_v60  ;;  %v832_v35 = vmax.f32 %v19252_v12, %v768_v55 }
 0x1ab   :  { %v704_v41 = vpop.f32.mrb[36].mxu1  ;;  %v1446_v1 = vmax.f32 %v1084_v38, %v1382_v19  ;;  %v1087_v61 = vpop.f32.mrb[36].mxu0  ;;  %v19298_v23 = vmul.f32 0.01, %v19280_v62  ;;  %v19311_v55 = vadd.f32 %v19199_v27, %v19025_v48 }
 0x1ac   :  { %v19291_v56 = vpack.c.bf16 %v807_v5, %v791_v44  ;;  %v705_v16 = vadd.f32 %v704_v41, %v19025_v48  ;;  %v19294_v40 = vpop.f32.mrb[37].mxu1  ;;  %v19300_v42 = vpack.c.bf16 %v1445_v63, %v1429_v21  ;;  %v1088_v22 = vadd.f32 %v1087_v61, %v19025_v48  ;;  %v1089_v30 = vpop.f32.mrb[37].mxu0 }
 0x1ad   :  { %v708_v8 = vpop.f32.mrb[38].mxu1  ;;  %v19306_v41 = vpack.c.bf16 %v1446_v1, %v1430_v36  ;;  %v1090_v19 = vadd.f32 %v1089_v30, %v19025_v48  ;;  %v1091_v14 = vpop.f32.mrb[38].mxu0  ;;  %v19315_v63 = vadd.s32 1152, %v19162_v0  ;;  %v19319_v61 = vadd.f32 %v19211_v20, %v19037_v15 }
 0x1ae   :  { %21800 = vst [vmem:[#allocation40_spill] sm:$0xff] %v19291_v56  ;;  %21801 = vst [vmem:[#allocation41_spill] sm:$0xff] %v19300_v42  ;;  %v759_v33 = vmul.f32 0.01, %v705_v16  ;;  %v709_v5 = vadd.f32 %v708_v8, %v19037_v15  ;;  %v19304_v44 = vpop.f32.mrb[39].mxu1  ;;  %v1092_v38 = vadd.f32 %v1091_v14, %v19037_v15  ;;  %v1093_v21 = vpop.f32.mrb[39].mxu0  ;;  %v19324_v30 = vadd.f32 %v19248_v9, %v19023_v47 }
 0x1af   :  { %21802 = vst [vmem:[#allocation42_spill] sm:$0xff] %v19306_v41  ;;  %v1397_v12 = vmul.f32 0.01, %v1088_v22  ;;  %v1398_v1 = vmul.f32 0.01, %v1090_v19  ;;  %v1094_v8 = vadd.f32 %v1093_v21, %v19037_v15  ;;  %v19326_v41 = vpack.c.bf16 %v832_v35, %v816_v13 }
 0x1b0   :  { %v775_v36 = vmul.f32 0.01, %v709_v5  ;;  %v823_v27 = vmax.f32 %v705_v16, %v759_v33  ;;  %v1413_v56 = vmul.f32 0.01, %v1092_v38  ;;  %v19329_v29 = vmul.f32 0.01, %v19311_v55 }
 0x1b1   :  { %v1461_v58 = vmax.f32 %v1088_v22, %v1397_v12  ;;  %v1462_v42 = vmax.f32 %v1090_v19, %v1398_v1  ;;  %v1414_v18 = vmul.f32 0.01, %v1094_v8  ;;  %21803 = vst [vmem:[#allocation43_spill] sm:$0xff] %v19326_v41  ;;  %v790_v20 = vmax.f32 %v19204_v46, %v19230_v6 }
 0x1b2   :  { %v839_v14 = vmax.f32 %v709_v5, %v775_v36  ;;  %v1477_v21 = vmax.f32 %v1092_v38, %v1413_v56  ;;  %v19334_v37 = vmul.f32 0.01, %v19319_v61  ;;  %v19340_v13 = vmul.f32 0.01, %v19324_v30 }
 0x1b3   :  { %v1024_v59 = vpop.f32.mrb[40].mxu1  ;;  %v1478_v33 = vmax.f32 %v1094_v8, %v1414_v18  ;;  %v1183_v5 = vpop.f32.mrb[40].mxu0 }
 0x1b4   :  { %v19336_v9 = vpack.c.bf16 %v839_v14, %v823_v27  ;;  %v1025_v16 = vadd.f32 %v1024_v59, %v19023_v47  ;;  %v1026_v22 = vpop.f32.mrb[41].mxu1  ;;  %v19343_v12 = vpack.c.bf16 %v1477_v21, %v1461_v58  ;;  %v1184_v46 = vadd.f32 %v1183_v5, %v19023_v47  ;;  %v1185_v6 = vpop.f32.mrb[41].mxu0 }
 0x1b5   :  { %v1027_v35 = vadd.f32 %v1026_v22, %v19023_v47  ;;  %v1028_v19 = vpop.f32.mrb[42].mxu1  ;;  %v19347_v1 = vpack.c.bf16 %v1478_v33, %v1462_v42  ;;  %v1186_v59 = vadd.f32 %v1185_v6, %v19023_v47  ;;  %v1187_v18 = vpop.f32.mrb[42].mxu0  ;;  %v806_v21 = vmax.f32 %v19218_v7, %v19233_v52 }
 0x1b6   :  { %21804 = vst [vmem:[#allocation44_spill] sm:$0xff] %v19336_v9  ;;  %21805 = vst [vmem:[#allocation45_spill] sm:$0xff] %v19343_v12  ;;  %v1363_v56 = vmul.f32 0.01, %v1025_v16  ;;  %v1029_v38 = vadd.f32 %v1028_v19, %v19027_v50  ;;  %v1030_v36 = vpop.f32.mrb[43].mxu1  ;;  %v1188_v22 = vadd.f32 %v1187_v18, %v19027_v50  ;;  %v1189_v58 = vpop.f32.mrb[43].mxu0 }
 0x1b7   :  { %21806 = vst [vmem:[#allocation46_spill] sm:$0xff] %v19347_v1  ;;  %v1364_v8 = vmul.f32 0.01, %v1027_v35  ;;  %v1031_v27 = vadd.f32 %v1030_v36, %v19027_v50  ;;  %v1369_v14 = vmul.f32 0.01, %v1184_v46  ;;  %v1190_v19 = vadd.f32 %v1189_v58, %v19027_v50 }
 0x1b8   :  { %v1379_v5 = vmul.f32 0.01, %v1029_v38  ;;  %v1370_v9 = vmul.f32 0.01, %v1186_v59  ;;  %v1385_v33 = vmul.f32 0.01, %v1188_v22  ;;  %v1427_v12 = vmax.f32 %v1025_v16, %v1363_v56 }
 0x1b9   :  { %v1380_v41 = vmul.f32 0.01, %v1031_v27  ;;  %v1433_v42 = vmax.f32 %v1184_v46, %v1369_v14  ;;  %v1386_v24 = vmul.f32 0.01, %v1190_v19  ;;  %v19357_v36 = vadd.f32 %v19259_v32, %v19027_v50 }
 0x1ba   :  { %v1443_v6 = vmax.f32 %v1029_v38, %v1379_v5  ;;  %v1434_v1 = vmax.f32 %v1186_v59, %v1370_v9  ;;  %v1428_v18 = vmax.f32 %v1027_v35, %v1364_v8  ;;  %v1449_v43 = vmax.f32 %v1188_v22, %v1385_v33 }
 0x1bb   :  { %v1444_v57 = vmax.f32 %v1031_v27, %v1380_v41  ;;  %v1034_v54 = vpop.f32.mrb[44].mxu1  ;;  %v1450_v49 = vmax.f32 %v1190_v19, %v1386_v24  ;;  %v1193_v46 = vpop.f32.mrb[44].mxu0  ;;  %v19362_v14 = vpack.c.bf16 %v806_v21, %v790_v20  ;;  %v822_v21 = vmax.f32 %v19237_v45, %v19265_v2 }
 0x1bc   :  { %v19359_v52 = vpack.c.bf16 %v1443_v6, %v1427_v12  ;;  %v1035_v7 = vadd.f32 %v1034_v54, %v19025_v48  ;;  %v1036_v58 = vpop.f32.mrb[45].mxu1  ;;  %v19367_v32 = vpack.c.bf16 %v1449_v43, %v1433_v42  ;;  %v1194_v41 = vadd.f32 %v1193_v46, %v19025_v48  ;;  %v1195_v35 = vpop.f32.mrb[45].mxu0 }
 0x1bd   :  { %21807 = vst [vmem:[#allocation47_spill] sm:$0xff] %v19362_v14  ;;  %v19364_v16 = vpack.c.bf16 %v1444_v57, %v1428_v18  ;;  %v1037_v9 = vadd.f32 %v1036_v58, %v19025_v48  ;;  %v1038_v56 = vpop.f32.mrb[46].mxu1  ;;  %v19371_v54 = vpack.c.bf16 %v1450_v49, %v1434_v1  ;;  %v1196_v24 = vadd.f32 %v1195_v35, %v19025_v48  ;;  %v1197_v20 = vpop.f32.mrb[46].mxu0 }
 0x1be   :  { %21808 = vst [vmem:[#allocation48_spill] sm:$0xff] %v19367_v32  ;;  %v1395_v38 = vmul.f32 0.01, %v1035_v7  ;;  %v1039_v12 = vadd.f32 %v1038_v56, %v19037_v15  ;;  %v1040_v59 = vpop.f32.mrb[47].mxu1  ;;  %v1401_v27 = vmul.f32 0.01, %v1194_v41  ;;  %v1198_v22 = vadd.f32 %v1197_v20, %v19037_v15 }
 0x1bf   :  { %21809 = vst [vmem:[#allocation49_spill] sm:$0xff] %v19371_v54  ;;  %v1396_v8 = vmul.f32 0.01, %v1037_v9  ;;  %v1041_v57 = vadd.f32 %v1040_v59, %v19037_v15  ;;  %v1199_v43 = vpop.f32.mrb[47].mxu0  ;;  %v1402_v19 = vmul.f32 0.01, %v1196_v24  ;;  %v838_v49 = vmax.f32 %v19269_v34, %v19285_v25 }
 0x1c0   :  { %v1411_v5 = vmul.f32 0.01, %v1039_v12  ;;  %v1200_v42 = vadd.f32 %v1199_v43, %v19037_v15  ;;  %v1465_v33 = vmax.f32 %v1194_v41, %v1401_v27  ;;  %v1417_v6 = vmul.f32 0.01, %v1198_v22 }
 0x1c1   :  { %v1412_v1 = vmul.f32 0.01, %v1041_v57  ;;  %v1459_v18 = vmax.f32 %v1035_v7, %v1395_v38  ;;  %v1466_v46 = vmax.f32 %v1196_v24, %v1402_v19  ;;  %v19382_v35 = vmul.f32 0.01, %v19357_v36 }
 0x1c2   :  { %v1475_v58 = vmax.f32 %v1039_v12, %v1411_v5  ;;  %v1418_v56 = vmul.f32 0.01, %v1200_v42  ;;  %v1460_v59 = vmax.f32 %v1037_v9, %v1396_v8  ;;  %v1481_v2 = vmax.f32 %v1198_v22, %v1417_v6 }
 0x1c3   :  { %v1476_v20 = vmax.f32 %v1041_v57, %v1412_v1  ;;  %v1130_v45 = vpop.f32.mrb[48].mxu1  ;;  %v1289_v34 = vpop.f32.mrb[48].mxu0  ;;  %v19388_v41 = vadd.s32 1024, %v19162_v0 }
 0x1c4   :  { %v19384_v14 = vpack.c.bf16 %v1475_v58, %v1459_v18  ;;  %v1131_v43 = vadd.f32 %v1130_v45, %v19023_v47  ;;  %v1132_v32 = vpop.f32.mrb[49].mxu1  ;;  %v1482_v25 = vmax.f32 %v1200_v42, %v1418_v56  ;;  %v19393_v24 = vpack.c.bf16 %v1481_v2, %v1465_v33  ;;  %v1291_v8 = vpop.f32.mrb[49].mxu0 }
 0x1c5   :  { %v19390_v7 = vpack.c.bf16 %v1476_v20, %v1460_v59  ;;  %v1133_v38 = vadd.f32 %v1132_v32, %v19023_v47  ;;  %v1134_v12 = vpop.f32.mrb[50].mxu1  ;;  %v1290_v9 = vadd.f32 %v1289_v34, %v19023_v47  ;;  %v1292_v19 = vadd.f32 %v1291_v8, %v19023_v47  ;;  %v1293_v42 = vpop.f32.mrb[50].mxu0 }
 0x1c6   :  { %21810 = vst [vmem:[#allocation50_spill] sm:$0xff] %v19384_v14  ;;  %21812 = vst [vmem:[#allocation52_spill] sm:$0xff] %v19393_v24  ;;  %v1367_v57 = vmul.f32 0.01, %v1131_v43  ;;  %v1135_v27 = vadd.f32 %v1134_v12, %v19027_v50  ;;  %v1136_v22 = vpop.f32.mrb[51].mxu1  ;;  %v19397_v5 = vpack.c.bf16 %v1482_v25, %v1466_v46  ;;  %v1294_v32 = vadd.f32 %v1293_v42, %v19027_v50  ;;  %v1295_v33 = vpop.f32.mrb[51].mxu0 }
 0x1c7   :  { %21811 = vst [vmem:[#allocation51_spill] sm:$0xff] %v19390_v7  ;;  %v1368_v1 = vmul.f32 0.01, %v1133_v38  ;;  %v1137_v6 = vadd.f32 %v1136_v22, %v19027_v50  ;;  %v1373_v18 = vmul.f32 0.01, %v1290_v9  ;;  %v804_v58 = vmax.f32 %v19280_v62, %v19298_v23 }
 0x1c8   :  { %21813 = vst [vmem:[#allocation53_spill] sm:$0xff] %v19397_v5  ;;  %v1383_v56 = vmul.f32 0.01, %v1135_v27  ;;  %v1374_v59 = vmul.f32 0.01, %v1292_v19  ;;  %v1296_v20 = vadd.f32 %v1295_v33, %v19027_v50  ;;  %v788_v46 = vmax.f32 %v19274_v60, %v19289_v39 }
 0x1c9   :  { %v1384_v45 = vmul.f32 0.01, %v1137_v6  ;;  %v1437_v2 = vmax.f32 %v1290_v9, %v1373_v18  ;;  %v1389_v25 = vmul.f32 0.01, %v1294_v32  ;;  %v1431_v34 = vmax.f32 %v1131_v43, %v1367_v57 }
 0x1ca   :  { %v1447_v12 = vmax.f32 %v1135_v27, %v1383_v56  ;;  %v1438_v8 = vmax.f32 %v1292_v19, %v1374_v59  ;;  %v1390_v22 = vmul.f32 0.01, %v1296_v20  ;;  %v1432_v24 = vmax.f32 %v1133_v38, %v1368_v1 }
 0x1cb   :  { %v1448_v42 = vmax.f32 %v1137_v6, %v1384_v45  ;;  %v1140_v5 = vpop.f32.mrb[52].mxu1  ;;  %v1453_v54 = vmax.f32 %v1294_v32, %v1389_v25  ;;  %v19407_v14 = vpack.c.bf16 %v838_v49, %v822_v21  ;;  %v1299_v39 = vpop.f32.mrb[52].mxu0  ;;  %v19412_v60 = vpack.c.bf16 %v804_v58, %v788_v46 }
 0x1cc   :  { %v19409_v62 = vpack.c.bf16 %v1447_v12, %v1431_v34  ;;  %v1141_v23 = vadd.f32 %v1140_v5, %v19025_v48  ;;  %v1142_v33 = vpop.f32.mrb[53].mxu1  ;;  %v1454_v7 = vmax.f32 %v1296_v20, %v1390_v22  ;;  %v1300_v27 = vadd.f32 %v1299_v39, %v19025_v48  ;;  %v1301_v21 = vpop.f32.mrb[53].mxu0 }
 0x1cd   :  { %v19414_v9 = vpack.c.bf16 %v1448_v42, %v1432_v24  ;;  %v1143_v43 = vadd.f32 %v1142_v33, %v19025_v48  ;;  %v1144_v57 = vpop.f32.mrb[54].mxu1  ;;  %v19417_v38 = vpack.c.bf16 %v1453_v54, %v1437_v2  ;;  %v1302_v6 = vadd.f32 %v1301_v21, %v19025_v48  ;;  %v1303_v18 = vpop.f32.mrb[54].mxu0 }
 0x1ce   :  { %v1399_v49 = vmul.f32 0.01, %v1141_v23  ;;  %v1145_v19 = vadd.f32 %v1144_v57, %v19037_v15  ;;  %v1146_v1 = vpop.f32.mrb[55].mxu1  ;;  %v19421_v5 = vpack.c.bf16 %v1454_v7, %v1438_v8  ;;  %v1405_v58 = vmul.f32 0.01, %v1300_v27  ;;  %v1305_v54 = vpop.f32.mrb[55].mxu0 }
 0x1cf   :  { %v1400_v32 = vmul.f32 0.01, %v1143_v43  ;;  %v1147_v24 = vadd.f32 %v1146_v1, %v19037_v15  ;;  %v1304_v56 = vadd.f32 %v1303_v18, %v19037_v15  ;;  %v836_v59 = vmax.f32 %v19319_v61, %v19334_v37 }
 0x1d0   :  { %v1415_v20 = vmul.f32 0.01, %v1145_v19  ;;  %v1406_v46 = vmul.f32 0.01, %v1302_v6  ;;  %v1306_v45 = vadd.f32 %v1305_v54, %v19037_v15  ;;  %v820_v7 = vmax.f32 %v19311_v55, %v19329_v29 }
 0x1d1   :  { %v1416_v2 = vmul.f32 0.01, %v1147_v24  ;;  %v1469_v25 = vmax.f32 %v1300_v27, %v1405_v58  ;;  %v1421_v34 = vmul.f32 0.01, %v1304_v56  ;;  %v21814_v12 = vand.u32 127, %v19186_v10 }
 0x1d2   :  { %v1463_v22 = vmax.f32 %v1141_v23, %v1399_v49  ;;  %v1479_v42 = vmax.f32 %v1145_v19, %v1415_v20  ;;  %v1470_v33 = vmax.f32 %v1302_v6, %v1406_v46  ;;  %v1422_v37 = vmul.f32 0.01, %v1306_v45 }
 0x1d3   :  { %vm19433_vm1 = vcmp.ne.s32.totalorder %v21814_v12, 0  ;;  %v19439_v61 = vadd.f32 %v19294_v40, %v19025_v48  ;;  %v1464_v39 = vmax.f32 %v1143_v43, %v1400_v32  ;;  %v1480_v57 = vmax.f32 %v1147_v24, %v1416_v2  ;;  %v1236_v29 = vpop.f32.mrb[56].mxu1  ;;  %v1619_v23 = vpop.f32.mrb[56].mxu0 }
 0x1d4   :  { %v1485_v55 = vmax.f32 %v1304_v56, %v1421_v34  ;;  %v19442_v27 = vpack.c.bf16 %v1479_v42, %v1463_v22  ;;  %v1237_v21 = vadd.f32 %v1236_v29, %v19023_v47  ;;  %v1238_v1 = vpop.f32.mrb[57].mxu1  ;;  %v1486_v18 = vmax.f32 %v1306_v45, %v1422_v37  ;;  %v1621_v24 = vpop.f32.mrb[57].mxu0  ;;  %vm14872_vm3 = vmpackc.low %vm19433_vm1, %vm19433_vm1 }
 0x1d5   :  { %v19445_v49 = vpack.c.bf16 %v836_v59, %v820_v7  ;;  %v19447_v19 = vpack.c.bf16 %v1480_v57, %v1464_v39  ;;  %v1239_v40 = vadd.f32 %v1238_v1, %v19023_v47  ;;  %v1240_v6 = vpop.f32.mrb[58].mxu1  ;;  %v1620_v32 = vadd.f32 %v1619_v23, %v19023_v47  ;;  %v1623_v59 = vpop.f32.mrb[58].mxu0 }
 0x1d6   :  { %v19450_v43 = vpack.c.bf16 %v1485_v55, %v1469_v25  ;;  %v1371_v58 = vmul.f32 0.01, %v1237_v21  ;;  %v1241_v56 = vadd.f32 %v1240_v6, %v19027_v50  ;;  %v1242_v54 = vpop.f32.mrb[59].mxu1  ;;  %v19454_v20 = vpack.c.bf16 %v1486_v18, %v1470_v33  ;;  %v1625_v25 = vpop.f32.mrb[59].mxu0 }
 0x1d7   :  { %21817 = vst [vmem:[#allocation54_spill] sm:$0xff] %v19445_v49  ;;  %v1622_v46 = vadd.f32 %v1621_v24, %v19023_v47  ;;  %v1372_v45 = vmul.f32 0.01, %v1239_v40  ;;  %v1243_v7 = vadd.f32 %v1242_v54, %v19027_v50  ;;  %v2009_v2 = vmul.f32 0.01, %v1620_v32 }
 0x1d8   :  { %21818 = vst [vmem:[#allocation55_spill] sm:$0xff] %v19450_v43  ;;  %21819 = vst [vmem:[#allocation56_spill] sm:$0xff] %v19454_v20  ;;  %v1624_v34 = vadd.f32 %v1623_v59, %v19027_v50  ;;  %v19461_v12 = vadd.f32 %v19304_v44, %v19037_v15  ;;  %v1387_v22 = vmul.f32 0.01, %v1241_v56  ;;  %v1626_v37 = vadd.f32 %v1625_v25, %v19027_v50 }
 0x1d9   :  { %v2010_v42 = vmul.f32 0.01, %v1622_v46  ;;  %v808_v33 = vmax.f32 %v19357_v36, %v19382_v35  ;;  %v1388_v39 = vmul.f32 0.01, %v1243_v7  ;;  %v2073_v57 = vmax.f32 %v1620_v32, %v2009_v2 }
 0x1da   :  { %v2025_v29 = vmul.f32 0.01, %v1624_v34  ;;  %v1435_v55 = vmax.f32 %v1237_v21, %v1371_v58  ;;  %v1451_v1 = vmax.f32 %v1241_v56, %v1387_v22  ;;  %v2026_v23 = vmul.f32 0.01, %v1626_v37 }
 0x1db   :  { %v2074_v18 = vmax.f32 %v1622_v46, %v2010_v42  ;;  %v19467_v6 = vmul.f32 0.01, %v19439_v61  ;;  %v1436_v24 = vmax.f32 %v1239_v40, %v1372_v45  ;;  %v1452_v44 = vmax.f32 %v1243_v7, %v1388_v39  ;;  %v1246_v59 = vpop.f32.mrb[60].mxu1  ;;  %v1629_v32 = vpop.f32.mrb[60].mxu0 }
 0x1dc   :  { %v2089_v54 = vmax.f32 %v1624_v34, %v2025_v29  ;;  %v19470_v43 = vmul.f32 0.01, %v19461_v12  ;;  %v19472_v25 = vpack.c.bf16 %v1451_v1, %v1435_v55  ;;  %v2090_v36 = vmax.f32 %v1626_v37, %v2026_v23  ;;  %v1248_v21 = vpop.f32.mrb[61].mxu1  ;;  %v1631_v45 = vpop.f32.mrb[61].mxu0 }
 0x1dd   :  { %v1247_v35 = vadd.f32 %v1246_v59, %v19025_v48  ;;  %v19478_v58 = vpack.c.bf16 %v1452_v44, %v1436_v24  ;;  %v1630_v56 = vadd.f32 %v1629_v32, %v19025_v48  ;;  %v1249_v46 = vadd.f32 %v1248_v21, %v19025_v48  ;;  %v1250_v7 = vpop.f32.mrb[62].mxu1  ;;  %v1633_v37 = vpop.f32.mrb[62].mxu0 }
 0x1de   :  { %21820 = vst [vmem:[#allocation57_spill] sm:$0xff] %v19472_v25  ;;  %v14878_v40 = vpack.c.bf16 %v2089_v54, %v2073_v57  ;;  %v14873_v2 = vpack.c.bf16 %v2090_v36, %v2074_v18  ;;  %v1632_v22 = vadd.f32 %v1631_v45, %v19025_v48  ;;  %v1251_v42 = vadd.f32 %v1250_v7, %v19037_v15  ;;  %v1252_v39 = vpop.f32.mrb[63].mxu1  ;;  %v1635_v23 = vpop.f32.mrb[63].mxu0 }
 0x1df   :  { %21821 = vst [vmem:[#allocation58_spill] sm:$0xff] %v19478_v58  ;;  %v1403_v34 = vmul.f32 0.01, %v1247_v35  ;;  %v2041_v57 = vmul.f32 0.01, %v1630_v56  ;;  %v1634_v1 = vadd.f32 %v1633_v37, %v19037_v15  ;;  %v1253_v18 = vadd.f32 %v1252_v39, %v19037_v15 }
 0x1e0   :  { %v1404_v55 = vmul.f32 0.01, %v1249_v46  ;;  %v2042_v24 = vmul.f32 0.01, %v1632_v22  ;;  %v1419_v44 = vmul.f32 0.01, %v1251_v42  ;;  %v1636_v54 = vadd.f32 %v1635_v23, %v19037_v15  ;;  %14874 = vmatprep.subr.msk.bf16.mxu0 %vm14872_vm3, %v14873_v2 }
 0x1e1   :  { %v792_v59 = vmax.f32 %v19324_v30, %v19340_v13  ;;  %v2105_v36 = vmax.f32 %v1630_v56, %v2041_v57  ;;  %v2057_v32 = vmul.f32 0.01, %v1634_v1  ;;  %v1420_v21 = vmul.f32 0.01, %v1253_v18  ;;  %14879 = vmatpush1.bf16.msk.msra.mxu0 %vm19487_vm4, %v14878_v40 }
 0x1e2   :  { %v1467_v45 = vmax.f32 %v1247_v35, %v1403_v34  ;;  %v2106_v7 = vmax.f32 %v1632_v22, %v2042_v24  ;;  %v1483_v37 = vmax.f32 %v1251_v42, %v1419_v44  ;;  %v2058_v39 = vmul.f32 0.01, %v1636_v54 }
 0x1e3   :  { %v1468_v23 = vmax.f32 %v1249_v46, %v1404_v55  ;;  %v2121_v25 = vmax.f32 %v1634_v1, %v2057_v32  ;;  %v1484_v58 = vmax.f32 %v1253_v18, %v1420_v21  ;;  %v1342_v20 = vpop.f32.mrb[64].mxu1  ;;  %v19503_v49 = vpack.c.bf16 %v808_v33, %v792_v59  ;;  %v1725_v40 = vpop.f32.mrb[64].mxu0 }
 0x1e4   :  { %v840_v2 = vmax.f32 %v19461_v12, %v19470_v43  ;;  %v19507_v30 = vpack.c.bf16 %v1483_v37, %v1467_v45  ;;  %v2122_v13 = vmax.f32 %v1636_v54, %v2058_v39  ;;  %v1343_v56 = vadd.f32 %v1342_v20, %v19023_v47  ;;  %v1344_v57 = vpop.f32.mrb[65].mxu1  ;;  %v1727_v12 = vpop.f32.mrb[65].mxu0 }
 0x1e5   :  { %21824 = vst [vmem:[#allocation59_spill] sm:$0xff] %v19503_v49  ;;  %v21825_v35 = vand.u32 127, %v19186_v10  ;;  %v14888_v46 = vpack.c.bf16 %v2121_v25, %v2105_v36  ;;  %v19516_v22 = vpack.c.bf16 %v1484_v58, %v1468_v23  ;;  %v1345_v33 = vadd.f32 %v1344_v57, %v19023_v47  ;;  %v1346_v42 = vpop.f32.mrb[66].mxu1  ;;  %v1729_v24 = vpop.f32.mrb[66].mxu0 }
 0x1e6   :  { %v1726_v43 = vadd.f32 %v1725_v40, %v19023_v47  ;;  %v14883_v55 = vpack.c.bf16 %v2122_v13, %v2106_v7  ;;  %v1375_v1 = vmul.f32 0.01, %v1343_v56  ;;  %v1347_v20 = vadd.f32 %v1346_v42, %v19027_v50  ;;  %v1348_v18 = vpop.f32.mrb[67].mxu1  ;;  %v1731_v59 = vpop.f32.mrb[67].mxu0 }
 0x1e7   :  { %vm19512_vm5 = vcmp.ne.s32.totalorder %v21825_v35, 127  ;;  %v1728_v10 = vadd.f32 %v1727_v12, %v19023_v47  ;;  %v1376_v44 = vmul.f32 0.01, %v1345_v33  ;;  %v1349_v25 = vadd.f32 %v1348_v18, %v19027_v50 }
 0x1e8   :  { %v2013_v58 = vmul.f32 0.01, %v1726_v43  ;;  %v1730_v54 = vadd.f32 %v1729_v24, %v19027_v50  ;;  %v1391_v36 = vmul.f32 0.01, %v1347_v20  ;;  %14884 = vmatprep.subr.msk.bf16.mxu0 %vm14872_vm3, %v14883_v55  ;;  %v1732_v21 = vadd.f32 %v1731_v59, %v19027_v50  ;;  %vm14892_vm11 = vmpackc.low %vm19512_vm5, %vm19512_vm5 }
 0x1e9   :  { %v2014_v32 = vmul.f32 0.01, %v1728_v10  ;;  %v824_v45 = vmax.f32 %v19439_v61, %v19467_v6  ;;  %v1392_v7 = vmul.f32 0.01, %v1349_v25  ;;  %14889 = vmatpush1.bf16.msk.msra.mxu0 %vm19487_vm4, %v14888_v46  ;;  %v1439_v23 = vmax.f32 %v1343_v56, %v1375_v1 }
 0x1ea   :  { %v2077_v37 = vmax.f32 %v1726_v43, %v2013_v58  ;;  %v2029_v39 = vmul.f32 0.01, %v1730_v54  ;;  %v1455_v13 = vmax.f32 %v1347_v20, %v1391_v36  ;;  %2715 = vmatprep.subr.bf16.mxu0 %v19049_v51  ;;  %v2030_v8 = vmul.f32 0.01, %v1732_v21 }
 0x1eb   :  { %v2078_v57 = vmax.f32 %v1728_v10, %v2014_v32  ;;  %v1440_v40 = vmax.f32 %v1345_v33, %v1376_v44  ;;  %v1456_v35 = vmax.f32 %v1349_v25, %v1392_v7  ;;  %v1352_v42 = vpop.f32.mrb[68].mxu1  ;;  %v21828_v55 = vand.u32 127, %v19189_v11  ;;  %v1735_v43 = vpop.f32.mrb[68].mxu0 }
 0x1ec   :  { %v2093_v12 = vmax.f32 %v1730_v54, %v2029_v39  ;;  %v19542_v6 = vpack.c.bf16 %v840_v2, %v824_v45  ;;  %v19544_v29 = vpack.c.bf16 %v1455_v13, %v1439_v23  ;;  %v1353_v56 = vadd.f32 %v1352_v42, %v19025_v48  ;;  %v1354_v46 = vpop.f32.mrb[69].mxu1  ;;  %v1737_v25 = vpop.f32.mrb[69].mxu0 }
 0x1ed   :  { %vm19538_vm7 = vcmp.ne.s32.totalorder %v21828_v55, 0  ;;  %v2094_v51 = vmax.f32 %v1732_v21, %v2030_v8  ;;  %v21833_v33 = vand.u32 127, %v19193_v26  ;;  %v19554_v18 = vpack.c.bf16 %v1456_v35, %v1440_v40  ;;  %2716 = vmatpush1.bf16.msra.mxu0 %v19039_v17  ;;  %v1356_v10 = vpop.f32.mrb[70].mxu1  ;;  %v1739_v45 = vpop.f32.mrb[70].mxu0 }
 0x1ee   :  { %21831 = vst [vmem:[#allocation60_spill] sm:$0xff] %v19542_v6  ;;  %21832 = vst [vmem:[#allocation61_spill] sm:$0xff] %v19544_v29  ;;  %v1355_v2 = vadd.f32 %v1354_v46, %v19025_v48  ;;  %v19558_v24 = vpack.c.bf16 %v2093_v12, %v2077_v37  ;;  %v1736_v44 = vadd.f32 %v1735_v43, %v19025_v48  ;;  %v21837_v58 = vand.u32 127, %v19222_v31  ;;  %v1358_v32 = vpop.f32.mrb[71].mxu1  ;;  %v21877_v37 = vld [vmem:[#allocation42_spill] sm:$0xff] }
 0x1ef   :  { %vm19549_vm8 = vcmp.ne.s32.totalorder %v21833_v33, 0  ;;  %21836 = vst [vmem:[#allocation62_spill] sm:$0xff] %v19554_v18  ;;  %v1407_v59 = vmul.f32 0.01, %v1353_v56  ;;  %v1357_v36 = vadd.f32 %v1356_v10, %v19037_v15  ;;  %2717 = vmatprep.subr.bf16.mxu0 %v19060_v3  ;;  %v19569_v21 = vpack.c.bf16 %v2094_v51, %v2078_v57  ;;  %v1741_v3 = vpop.f32.mrb[71].mxu0  ;;  %vm14956_vm14 = vmpackc.low %vm19538_vm7, %vm19538_vm7  ;;  %v21893_v29 = vld [vmem:[#allocation50_spill] sm:$0xff] }
 0x1f0   :  { %vm19563_vm9 = vcmp.ne.s32.totalorder %v21837_v58, 0  ;;  %v1738_v17 = vadd.f32 %v1737_v25, %v19025_v48  ;;  %v21840_v7 = vand.u32 127, %v19240_v4  ;;  %v1408_v39 = vmul.f32 0.01, %v1355_v2  ;;  %vm14961_vm15 = vmpackc.low %vm19549_vm8, %vm19549_vm8 }
 0x1f1   :  { %v1359_v23 = vadd.f32 %v1358_v32, %v19037_v15  ;;  %v2045_v13 = vmul.f32 0.01, %v1736_v44  ;;  %v1740_v8 = vadd.f32 %v1739_v45, %v19037_v15  ;;  %v1423_v57 = vmul.f32 0.01, %v1357_v36  ;;  %2718 = vmatpush1.bf16.msra.mxu0 %v19051_v53  ;;  %vm14914_vm0 = vmpackc.low %vm19563_vm9, %vm19563_vm9 }
 0x1f2   :  { %vm19574_vm10 = vcmp.ne.s32.totalorder %v21840_v7, 0  ;;  %v2046_v40 = vmul.f32 0.01, %v1738_v17  ;;  %v1742_v35 = vadd.f32 %v1741_v3, %v19037_v15  ;;  %v1471_v51 = vmax.f32 %v1353_v56, %v1407_v59  ;;  %14894 = vmatprep.subr.msk.bf16.mxu0 %vm14892_vm11, %v19213_v28 }
 0x1f3   :  { %v1424_v42 = vmul.f32 0.01, %v1359_v23  ;;  %v2109_v12 = vmax.f32 %v1736_v44, %v2045_v13  ;;  %v2061_v55 = vmul.f32 0.01, %v1740_v8  ;;  %v1487_v43 = vmax.f32 %v1357_v36, %v1423_v57  ;;  %v1672_v58 = vpop.f32.mrb[72].mxu1  ;;  %v1831_v59 = vpop.f32.mrb[72].mxu0  ;;  %vm14919_vm1 = vmpackc.low %vm19574_vm10, %vm19574_vm10 }
 0x1f4   :  { %v2110_v33 = vmax.f32 %v1738_v17, %v2046_v40  ;;  %v2062_v53 = vmul.f32 0.01, %v1742_v35  ;;  %v1472_v10 = vmax.f32 %v1355_v2, %v1408_v39  ;;  %v1673_v56 = vadd.f32 %v1672_v58, %v19023_v47  ;;  %v1674_v36 = vpop.f32.mrb[73].mxu1 }
 0x1f5   :  { %v1488_v44 = vmax.f32 %v1359_v23, %v1424_v42  ;;  %v2125_v25 = vmax.f32 %v1740_v8, %v2061_v55  ;;  %v19599_v45 = vpack.c.bf16 %v1487_v43, %v1471_v51  ;;  %v19603_v17 = vadd.s32 896, %v19162_v0  ;;  %v1833_v23 = vpop.f32.mrb[73].mxu0  ;;  %v21847_v8 = vld [vmem:[#allocation36_spill] sm:$0xff]  ;;  %v1676_v3 = vpop.f32.mrb[74].mxu1  ;;  %v21848_v51 = vld [vmem:[#allocation39_spill] sm:$0xff]  ;;  %v19622_v43 = vld [vmem:[#allocation3] sm:$0xff]  }
 0x1f6   :  { %v2126_v7 = vmax.f32 %v1742_v35, %v2062_v53  ;;  %v1832_v2 = vadd.f32 %v1831_v59, %v19023_v47  ;;  %v1675_v39 = vadd.f32 %v1674_v36, %v19023_v47  ;;  %14899 = vmatpush1.bf16.msk.msra.mxu0 %vm19588_vm12, %v21847_v8  ;;  %v2011_v40 = vmul.f32 0.01, %v1673_v56  ;;  %v1835_v55 = vpop.f32.mrb[74].mxu0  ;;  %v21849_v8 = vld [vmem:[#allocation38_spill] sm:$0xff] }
 0x1f7   :  { %21845 = vst [vmem:[#allocation63_spill] sm:$0xff] %v19599_v45  ;;  %v19605_v13 = vpack.c.bf16 %v1488_v44, %v1472_v10  ;;  %v19607_v28 = vpack.c.bf16 %v2125_v25, %v2109_v12  ;;  %v1834_v35 = vadd.f32 %v1833_v23, %v19023_v47  ;;  %v1677_v42 = vadd.f32 %v1676_v3, %v19027_v50  ;;  %v1678_v12 = vpop.f32.mrb[75].mxu1  ;;  %v1837_v25 = vpop.f32.mrb[75].mxu0 }
 0x1f8   :  { %v14967_v57 = vpack.c.bf16 %v2126_v7, %v2110_v33  ;;  %14904 = vmatprep.subr.msk.bf16.mxu0 %vm14892_vm11, %v21848_v51  ;;  %v2017_v33 = vmul.f32 0.01, %v1832_v2  ;;  %v2012_v53 = vmul.f32 0.01, %v1675_v39  ;;  %v1836_v10 = vadd.f32 %v1835_v55, %v19027_v50 }
 0x1f9   :  { %21846 = vst [vmem:[#allocation64_spill] sm:$0xff] %v19605_v13  ;;  %v1679_v44 = vadd.f32 %v1678_v12, %v19027_v50  ;;  %v2018_v34 = vmul.f32 0.01, %v1834_v35  ;;  %v2027_v58 = vmul.f32 0.01, %v1677_v42  ;;  %v1838_v7 = vadd.f32 %v1837_v25, %v19027_v50 }
 0x1fa   :  { %v2081_v59 = vmax.f32 %v1832_v2, %v2017_v33  ;;  %v2033_v36 = vmul.f32 0.01, %v1836_v10  ;;  %14909 = vmatpush1.bf16.msk.msra.mxu0 %vm19588_vm12, %v21849_v8  ;;  %v2075_v3 = vmax.f32 %v1673_v56, %v2011_v40  ;;  %v19649_v2 = vadd.s32 768, %v19162_v0 }
 0x1fb   :  { %v2028_v23 = vmul.f32 0.01, %v1679_v44  ;;  %v2091_v55 = vmax.f32 %v1677_v42, %v2027_v58  ;;  %v2034_v51 = vmul.f32 0.01, %v1838_v7  ;;  %14958 = vmatprep.subr.msk.bf16.mxu0 %vm14956_vm14, %v19569_v21  ;;  %v2076_v12 = vmax.f32 %v1675_v39, %v2012_v53  ;;  %v1682_v25 = vpop.f32.mrb[76].mxu1  ;;  %v1841_v20 = vpop.f32.mrb[76].mxu0 }
 0x1fc   :  { %v2097_v46 = vmax.f32 %v1836_v10, %v2033_v36  ;;  %v21850_v8 = vand.u32 127, %v19189_v11  ;;  %v2082_v42 = vmax.f32 %v1834_v35, %v2018_v34  ;;  %v1683_v21 = vadd.f32 %v1682_v25, %v19025_v48  ;;  %v1684_v39 = vpop.f32.mrb[77].mxu1 }
 0x1fd   :  { %v2092_v33 = vmax.f32 %v1679_v44, %v2028_v23  ;;  %v14920_v58 = vpack.c.bf16 %v2091_v55, %v2075_v3  ;;  %v2098_v32 = vmax.f32 %v1838_v7, %v2034_v51  ;;  %14910 = vmatmul.mubr.msk.bf16.vlgmr.msra.gmra.mrb[88].mxu0 %vm2704_vm13, %v19622_v43  ;;  %v21853_v53 = vand.u32 127, %v19193_v26  ;;  %v1843_v7 = vpop.f32.mrb[77].mxu0  ;;  %v1686_v26 = vpop.f32.mrb[78].mxu1 }
 0x1fe   :  { %vm19653_vm2 = vcmp.ne.s32.totalorder %v21850_v8, 127  ;;  %v19667_v10 = vpack.c.bf16 %v2097_v46, %v2081_v59  ;;  %v1842_v35 = vadd.f32 %v1841_v20, %v19025_v48  ;;  %v1685_v34 = vadd.f32 %v1684_v39, %v19025_v48  ;;  %14963 = vmatpush1.bf16.msk.msra.mxu0 %vm14961_vm15, %v19558_v24  ;;  %v1845_v51 = vpop.f32.mrb[78].mxu0  ;;  %v19693_v24 = vld [vmem:[#allocation3 + $0x8] sm:$0xff]  }
 0x1ff   :  { %vm19663_vm3 = vcmp.ne.s32.totalorder %v21853_v53, 127  ;;  %v14915_v44 = vpack.c.bf16 %v2092_v33, %v2076_v12  ;;  %v21856_v36 = vand.u32 127, %v19222_v31  ;;  %v19683_v59 = vpack.c.bf16 %v2098_v32, %v2082_v42  ;;  %v1688_v12 = vpop.f32.mrb[79].mxu1  ;;  %14968 = vmatprep.subr.msk.bf16.mxu0 %vm14956_vm14, %v14967_v57  ;;  %v1847_v39 = vpop.f32.mrb[79].mxu0  ;;  %vm14976_vm11 = vmpackc.low %vm19653_vm2, %vm19653_vm2 }
 0x200   :  { %v2043_v20 = vmul.f32 0.01, %v1683_v21  ;;  %v1844_v3 = vadd.f32 %v1843_v7, %v19025_v48  ;;  %v1687_v55 = vadd.f32 %v1686_v26, %v19037_v15  ;;  %v21859_v31 = vmov 0   ;;  %vm14981_vm12 = vmpackc.low %vm19663_vm3, %vm19663_vm3 }
 0x201   :  { %vm19679_vm4 = vcmp.ne.s32.totalorder %v21856_v36, 127  ;;  %2753 = vmatprep.mubr.bf16.mxu0 %v21859_v31  ;;  %v21860_v32 = vand.u32 127, %v19240_v4  ;;  %v2049_v33 = vmul.f32 0.01, %v1842_v35  ;;  %v2044_v25 = vmul.f32 0.01, %v1685_v34  ;;  %14916 = vmatprep.subr.msk.bf16.mxu1 %vm14914_vm0, %v14915_v44 }
 0x202   :  { %v1846_v8 = vadd.f32 %v1845_v51, %v19037_v15  ;;  %v1689_v42 = vadd.f32 %v1688_v12, %v19037_v15  ;;  %v2050_v61 = vmul.f32 0.01, %v1844_v3  ;;  %v2059_v57 = vmul.f32 0.01, %v1687_v55  ;;  %14921 = vmatpush1.bf16.msk.msra.mxu1 %vm14919_vm1, %v14920_v58  ;;  %14973 = vmatpush1.bf16.msk.msra.mxu0 %vm14961_vm15, %v19607_v28  ;;  %v21863_v51 = vld [vmem:[#allocation19_spill] sm:$0xff]  ;;  %vm14934_vm14 = vmpackc.low %vm19679_vm4, %vm19679_vm4 }
 0x203   :  { %vm19697_vm5 = vcmp.ne.s32.totalorder %v21860_v32, 127  ;;  %v1848_v4 = vadd.f32 %v1847_v39, %v19037_v15  ;;  %v2107_v44 = vmax.f32 %v1683_v21, %v2043_v20  ;;  %2821 = vmatprep.subr.bf16.mxu0 %v21863_v51  ;;  %v21723_v12 = vand.u32 127, %v19649_v2  ;;  %v1778_v45 = vpop.f32.mrb[80].mxu1 }
 0x204   :  { %v2065_v53 = vmul.f32 0.01, %v1846_v8  ;;  %v2060_v7 = vmul.f32 0.01, %v1689_v42  ;;  %v2123_v26 = vmax.f32 %v1687_v55, %v2059_v57  ;;  %v2113_v32 = vmax.f32 %v1842_v35, %v2049_v33  ;;  %v1937_v55 = vpop.f32.mrb[80].mxu0  ;;  %v1780_v35 = vpop.f32.mrb[81].mxu1  ;;  %vm14939_vm9 = vmpackc.low %vm19697_vm5, %vm19697_vm5 }
 0x205   :  { %v2066_v36 = vmul.f32 0.01, %v1848_v4  ;;  %v2108_v39 = vmax.f32 %v1685_v34, %v2044_v25  ;;  %v21864_v13 = vand.u32 127, %v19315_v63  ;;  %v2114_v1 = vmax.f32 %v1844_v3, %v2050_v61  ;;  %14911 = vmatmul.mubr.msk.bf16.gmra.mrb[92].mxu0 %vm2704_vm13, %v19693_v24  ;;  %v1782_v61 = vpop.f32.mrb[82].mxu1 }
 0x206   :  { %v2129_v40 = vmax.f32 %v1846_v8, %v2065_v53  ;;  %v2124_v58 = vmax.f32 %v1689_v42, %v2060_v7  ;;  %v14930_v28 = vpack.c.bf16 %v2123_v26, %v2107_v44  ;;  %v1779_v20 = vadd.f32 %v1778_v45, %v19023_v47  ;;  %v1939_v42 = vpop.f32.mrb[81].mxu0  ;;  %v21870_v45 = vld [vmem:[#allocation18_spill] sm:$0xff]  ;;  %v1784_v51 = vpop.f32.mrb[83].mxu1  ;;  %2849 = vmatprep.mubr.bf16.mxu0 %v21859_v31 }
 0x207   :  { %vm19724_vm6 = vcmp.ne.s32.totalorder %v21864_v13, 0  ;;  %v2130_v21 = vmax.f32 %v1848_v4, %v2066_v36  ;;  %v21867_v34 = vand.u32 127, %v19388_v41  ;;  %v1938_v3 = vadd.f32 %v1937_v55, %v19023_v47  ;;  %2822 = vmatpush1.bf16.msra.mxu0 %v21870_v45  ;;  %v1941_v26 = vpop.f32.mrb[82].mxu0  ;;  %v21874_v36 = vld [vmem:[#allocation25_spill] sm:$0xff]  ;;  %v21876_v45 = vld [vmem:[#allocation27_spill] sm:$0xff] }
 0x208   :  { %v19737_v13 = vpack.c.bf16 %v2129_v40, %v2113_v32  ;;  %v14925_v25 = vpack.c.bf16 %v2124_v58, %v2108_v39  ;;  %v1781_v8 = vadd.f32 %v1780_v35, %v19023_v47  ;;  %v21871_v57 = vand.u32 127, %v19603_v17  ;;  %2823 = vmatprep.subr.bf16.mxu0 %v21874_v36  ;;  %vm15040_vm15 = vmpackc.low %vm19724_vm6, %vm19724_vm6 }
 0x209   :  { %vm19733_vm7 = vcmp.ne.s32.totalorder %v21867_v34, 0  ;;  %v19748_v53 = vpack.c.bf16 %v2130_v21, %v2114_v1  ;;  %v2015_v7 = vmul.f32 0.01, %v1779_v20  ;;  %v1940_v40 = vadd.f32 %v1939_v42, %v19023_v47  ;;  %v1943_v21 = vpop.f32.mrb[83].mxu0  ;;  %v21875_v42 = vld [vmem:[#allocation20_spill] sm:$0xff] }
 0x20a   :  { %vm19744_vm8 = vcmp.ne.s32.totalorder %v21871_v57, 0  ;;  %v1783_v44 = vadd.f32 %v1782_v61, %v19027_v50  ;;  %v2021_v32 = vmul.f32 0.01, %v1938_v3  ;;  %v2016_v39 = vmul.f32 0.01, %v1781_v8  ;;  %14926 = vmatprep.subr.msk.bf16.mxu1 %vm14914_vm0, %v14925_v25  ;;  %vm15045_vm0 = vmpackc.low %vm19733_vm7, %vm19733_vm7 }
 0x20b   :  { %v1942_v58 = vadd.f32 %v1941_v26, %v19027_v50  ;;  %v1785_v1 = vadd.f32 %v1784_v51, %v19027_v50  ;;  %v2022_v55 = vmul.f32 0.01, %v1940_v40  ;;  %v1944_v34 = vadd.f32 %v1943_v21, %v19027_v50  ;;  %14931 = vmatpush1.bf16.msk.msra.mxu1 %vm14919_vm1, %v14930_v28  ;;  %2824 = vmatpush1.bf16.msra.mxu0 %v21875_v42  ;;  %v1947_v18 = vpop.f32.mrb[84].mxu0  ;;  %vm14998_vm1 = vmpackc.low %vm19744_vm8, %vm19744_vm8 }
 0x20c   :  { %v2031_v35 = vmul.f32 0.01, %v1783_v44  ;;  %2768 = vmatprep.subr.bf16.mxu1 %v21876_v45  ;;  %v2079_v61 = vmax.f32 %v1779_v20, %v2015_v7  ;;  %14978 = vmatprep.subr.msk.bf16.mxu0 %vm14976_vm11, %v21877_v37  ;;  %vm19789_vm10 = vcmp.ne.s32.totalorder %v21723_v12, 0  ;;  %v2085_v36 = vmax.f32 %v1938_v3, %v2021_v32  ;;  %v1788_v20 = vpop.f32.mrb[84].mxu1  ;;  %v21880_v37 = vld [vmem:[#allocation21_spill] sm:$0xff]  ;;  %v1949_v32 = vpop.f32.mrb[85].mxu0 }
 0x20d   :  { %v2037_v54 = vmul.f32 0.01, %v1942_v58  ;;  %v2032_v25 = vmul.f32 0.01, %v1785_v1  ;;  %v2038_v26 = vmul.f32 0.01, %v1944_v34  ;;  %v2080_v51 = vmax.f32 %v1781_v8, %v2016_v39  ;;  %vm15003_vm2 = vmpackc.low %vm19789_vm10, %vm19789_vm10 }
 0x20e   :  { %v2095_v57 = vmax.f32 %v1783_v44, %v2031_v35  ;;  %v2086_v7 = vmax.f32 %v1940_v40, %v2022_v55  ;;  %v1789_v45 = vadd.f32 %v1788_v20, %v19025_v48  ;;  %v1790_v6 = vpop.f32.mrb[85].mxu1  ;;  %v1948_v3 = vadd.f32 %v1947_v18, %v19025_v48  ;;  %v21881_v39 = vld [vmem:[#allocation41_spill] sm:$0xff]  ;;  %v21884_v20 = vld [vmem:[#allocation23_spill] sm:$0xff] }
 0x20f   :  { %v2101_v21 = vmax.f32 %v1942_v58, %v2037_v54  ;;  %v2096_v42 = vmax.f32 %v1785_v1, %v2032_v25  ;;  %v2102_v35 = vmax.f32 %v1944_v34, %v2038_v26  ;;  %2769 = vmatpush1.bf16.msra.mxu1 %v21880_v37  ;;  %v1791_v8 = vadd.f32 %v1790_v6, %v19025_v48  ;;  %v1792_v40 = vpop.f32.mrb[86].mxu1  ;;  %v1951_v54 = vpop.f32.mrb[86].mxu0  ;;  %v21882_v18 = vld [vmem:[#allocation29_spill] sm:$0xff]  ;;  %v21883_v6 = vld [vmem:[#allocation46_spill] sm:$0xff] }
 0x210   :  { %v19793_v44 = vpack.c.bf16 %v2095_v57, %v2079_v61  ;;  %14983 = vmatpush1.bf16.msk.msra.mxu0 %vm14981_vm12, %v21881_v39  ;;  %v2047_v1 = vmul.f32 0.01, %v1789_v45  ;;  %v1950_v55 = vadd.f32 %v1949_v32, %v19025_v48  ;;  %v1793_v34 = vadd.f32 %v1792_v40, %v19037_v15  ;;  %2770 = vmatprep.subr.bf16.mxu1 %v21882_v18  ;;  %v1794_v25 = vpop.f32.mrb[87].mxu1  ;;  %v21885_v37 = vld [vmem:[#allocation45_spill] sm:$0xff] }
 0x211   :  { %v19797_v49 = vpack.c.bf16 %v2101_v21, %v2085_v36  ;;  %v19799_v12 = vpack.c.bf16 %v2096_v42, %v2080_v51  ;;  %v19809_v58 = vpack.c.bf16 %v2102_v35, %v2086_v7  ;;  %14988 = vmatprep.subr.msk.bf16.mxu0 %vm14976_vm11, %v21883_v6  ;;  %v2053_v61 = vmul.f32 0.01, %v1948_v3  ;;  %v1953_v51 = vpop.f32.mrb[87].mxu0 }
 0x212   :  { %v2048_v57 = vmul.f32 0.01, %v1791_v8  ;;  %v1952_v26 = vadd.f32 %v1951_v54, %v19037_v15  ;;  %v1795_v36 = vadd.f32 %v1794_v25, %v19037_v15  ;;  %v2054_v21 = vmul.f32 0.01, %v1950_v55 }
 0x213   :  { %v2063_v56 = vmul.f32 0.01, %v1793_v34  ;;  %v1954_v42 = vadd.f32 %v1953_v51, %v19037_v15  ;;  %2771 = vmatpush1.bf16.msra.mxu1 %v21884_v20  ;;  %v2111_v32 = vmax.f32 %v1789_v45, %v2047_v1  ;;  %v2117_v39 = vmax.f32 %v1948_v3, %v2053_v61  ;;  %v21920_v3 = vld [vmem:[#allocation31_spill] sm:$0xff] }
 0x214   :  { %v2069_v7 = vmul.f32 0.01, %v1952_v26  ;;  %v2064_v35 = vmul.f32 0.01, %v1795_v36  ;;  %14993 = vmatpush1.bf16.msk.msra.mxu0 %vm14981_vm12, %v21885_v37  ;;  %14936 = vmatprep.subr.msk.bf16.mxu1 %vm14934_vm14, %v19364_v16  ;;  %v2112_v11 = vmax.f32 %v1791_v8, %v2048_v57  ;;  %v2118_v18 = vmax.f32 %v1950_v55, %v2054_v21  ;;  %v1884_v16 = vpop.f32.mrb[88].mxu1 }
 0x215   :  { %v2127_v40 = vmax.f32 %v1793_v34, %v2063_v56  ;;  %v2070_v54 = vmul.f32 0.01, %v1954_v42  ;;  %15042 = vmatprep.subr.msk.bf16.mxu0 %vm15040_vm15, %v19683_v59  ;;  %v1885_v37 = vadd.f32 %v1884_v16, %v19023_v47  ;;  %v1886_v45 = vpop.f32.mrb[89].mxu1  ;;  %v21886_v59 = vand.u32 127, %v19315_v63 }
 0x216   :  { %v2133_v6 = vmax.f32 %v1952_v26, %v2069_v7  ;;  %v2128_v25 = vmax.f32 %v1795_v36, %v2064_v35  ;;  %v1887_v55 = vadd.f32 %v1886_v45, %v19023_v47  ;;  %v1888_v34 = vpop.f32.mrb[90].mxu1  ;;  %v21890_v36 = vand.u32 127, %v19388_v41  ;;  %v21894_v7 = vld [vmem:[#allocation30_spill] sm:$0xff]  ;;  %v21896_v45 = vld [vmem:[#allocation32_spill] sm:$0xff] }
 0x217   :  { %v15014_v51 = vpack.c.bf16 %v2127_v40, %v2111_v32  ;;  %v2134_v20 = vmax.f32 %v1954_v42, %v2070_v54  ;;  %14994 = vmatmul.mubr.msk.bf16.vlgmr.msra.gmra.mrb[96].mxu0 %vm2704_vm13, %v19622_v43  ;;  %14941 = vmatpush1.bf16.msk.msra.mxu1 %vm14939_vm9, %v19359_v52  ;;  %vm19865_vm3 = vcmp.ne.s32.totalorder %v21886_v59, 127  ;;  %v21889_v52 = vld [vmem:[#allocation51_spill] sm:$0xff]  ;;  %v2019_v61 = vmul.f32 0.01, %v1885_v37 }
 0x218   :  { %v19869_v8 = vpack.c.bf16 %v2133_v6, %v2117_v39  ;;  %v15009_v1 = vpack.c.bf16 %v2128_v25, %v2112_v11  ;;  %15047 = vmatpush1.bf16.msk.msra.mxu0 %vm15045_vm0, %v19667_v10  ;;  %14946 = vmatprep.subr.msk.bf16.mxu1 %vm14934_vm14, %v21889_v52  ;;  %v1889_v57 = vadd.f32 %v1888_v34, %v19027_v50  ;;  %v1890_v10 = vpop.f32.mrb[91].mxu1  ;;  %v2020_v26 = vmul.f32 0.01, %v1887_v55  ;;  %vm15060_vm4 = vmpackc.low %vm19865_vm3, %vm19865_vm3  ;;  %v21895_v6 = vld [vmem:[#allocation22_spill] sm:$0xff] }
 0x219   :  { %v19884_v63 = vpack.c.bf16 %v2134_v20, %v2118_v18  ;;  %15052 = vmatprep.subr.msk.bf16.mxu0 %vm15040_vm15, %v19748_v53  ;;  %2859 = vmatprep.mubr.bf16.mxu0 %v21859_v31  ;;  %v1891_v23 = vadd.f32 %v1890_v10, %v19027_v50  ;;  %vm19900_vm11 = vcmp.ne.s32.totalorder %v21890_v36, 127  ;;  %v19923_v41 = vadd.s32 1664, %v19162_v0  ;;  %v21898_v10 = vld [vmem:[#allocation34_spill] sm:$0xff] }
 0x21a   :  { %v2035_v56 = vmul.f32 0.01, %v1889_v57  ;;  %v2083_v46 = vmax.f32 %v1885_v37, %v2019_v61  ;;  %vm15065_vm5 = vmpackc.low %vm19900_vm11, %vm19900_vm11  ;;  %v2084_v33 = vmax.f32 %v1887_v55, %v2020_v26  ;;  %v19932_v32 = vadd.s32 1536, %v19162_v0 }
 0x21b   :  { %14951 = vmatpush1.bf16.msk.msra.mxu1 %vm14939_vm9, %v21893_v29  ;;  %v2036_v53 = vmul.f32 0.01, %v1891_v23  ;;  %v1894_v35 = vpop.f32.mrb[92].mxu1  ;;  %v19946_v54 = vadd.s32 1408, %v19162_v0  ;;  %v2249_v16 = vand.u32 127, %v19923_v41  ;;  %v21900_v28 = vand.u32 127, %v19603_v17 }
 0x21c   :  { %15057 = vmatpush1.bf16.msk.msra.mxu0 %vm15045_vm0, %v19737_v13  ;;  %15000 = vmatprep.subr.msk.bf16.mxu1 %vm14998_vm1, %v19799_v12  ;;  %v2099_v42 = vmax.f32 %v1889_v57, %v2035_v56  ;;  %v1895_v39 = vadd.f32 %v1894_v35, %v19025_v48  ;;  %v1896_v40 = vpop.f32.mrb[93].mxu1  ;;  %v2242_v4 = vand.u32 127, %v19932_v32  ;;  %v21897_v57 = vld [vmem:[#allocation24_spill] sm:$0xff]  ;;  %v21899_v56 = vld [vmem:[#allocation49_spill] sm:$0xff]  ;;  %v21908_v35 = vld [vmem:[#allocation26_spill] sm:$0xff] }
 0x21d   :  { %2927 = vmatprep.subr.bf16.mxu0 %v21894_v7  ;;  %v2100_v13 = vmax.f32 %v1891_v23, %v2036_v53  ;;  %v1897_v18 = vadd.f32 %v1896_v40, %v19025_v48  ;;  %v1898_v25 = vpop.f32.mrb[94].mxu1  ;;  %v2235_v52 = vand.u32 127, %v19946_v54  ;;  %vm19984_vm6 = vcmp.ne.s32.totalorder %v21900_v28, 127  ;;  %v21913_v54 = vld [vmem:[#allocation48_spill] sm:$0xff]  ;;  %v21937_v32 = vld [vmem:[#allocation57_spill] sm:$0xff] }
 0x21e   :  { %14952 = vmatmul.mubr.msk.bf16.vlgmr.msra.gmra.mrb[104].mxu1 %vm2704_vm13, %v19622_v43  ;;  %v19934_v12 = vpack.c.bf16 %v2099_v42, %v2083_v46  ;;  %v2051_v20 = vmul.f32 0.01, %v1895_v39  ;;  %v1899_v37 = vadd.f32 %v1898_v25, %v19037_v15  ;;  %v1900_v59 = vpop.f32.mrb[95].mxu1  ;;  %vm19990_vm7 = vcmp.ne.s32.totalorder %v2249_v16, 0  ;;  %vm15018_vm10 = vmpackc.low %vm19984_vm6, %vm19984_vm6  ;;  %v16774_v25 = vld [vmem:[#allocation5] ss:$16 sps:$4 sm:$0xff]  }
 0x21f   :  { %14995 = vmatmul.mubr.msk.bf16.gmra.mrb[100].mxu0 %vm2704_vm13, %v19693_v24  ;;  %15005 = vmatpush1.bf16.msk.msra.mxu1 %vm15003_vm2, %v19793_v44  ;;  %v19948_v11 = vpack.c.bf16 %v2100_v13, %v2084_v33  ;;  %v19959_v44 = vadd.s32 1280, %v19162_v0  ;;  %v2052_v55 = vmul.f32 0.01, %v1897_v18  ;;  %v1901_v34 = vadd.f32 %v1900_v59, %v19037_v15  ;;  %vm15124_vm0 = vmpackc.low %vm19990_vm7, %vm19990_vm7  ;;  %v16782_v59 = vld [vmem:[#allocation5 + $0x24] ss:$16 sps:$4 sm:$0xff]  }
 0x220   :  { %2928 = vmatpush1.bf16.msra.mxu0 %v21895_v6  ;;  %15010 = vmatprep.subr.msk.bf16.mxu1 %vm14998_vm1, %v15009_v1  ;;  %v2067_v1 = vmul.f32 0.01, %v1899_v37  ;;  %v2115_v23 = vmax.f32 %v1895_v39, %v2051_v20  ;;  %v21905_v42 = vand.u32 127, %v19649_v2  ;;  %vm20004_vm12 = vcmp.ne.s32.totalorder %v2242_v4, 0  ;;  %v21914_v6 = vld [vmem:[#allocation43_spill] sm:$0xff]  ;;  %v21940_v39 = vld [vmem:[#allocation60_spill] sm:$0xff] }
 0x221   :  { %2929 = vmatprep.subr.bf16.mxu0 %v21896_v45  ;;  %2806 = vmatprep.mubr.bf16.mxu1 %v21859_v31  ;;  %v2068_v61 = vmul.f32 0.01, %v1901_v34  ;;  %v2228_v26 = vand.u32 127, %v19959_v44  ;;  %v2116_v29 = vmax.f32 %v1897_v18, %v2052_v55  ;;  %vm20008_vm14 = vcmp.ne.s32.totalorder %v2235_v52, 0  ;;  %v21933_v44 = vld [vmem:[#allocation56_spill] sm:$0xff] }
 0x222   :  { %2955 = vmatprep.mubr.bf16.mxu0 %v21859_v31  ;;  %v2131_v36 = vmax.f32 %v1899_v37, %v2067_v1  ;;  %vm19996_vm8 = vcmp.ne.s32.totalorder %v21905_v42, 127  ;;  %vm20039_vm15 = vcmp.ne.s32.totalorder %v2249_v16, 127  ;;  %vm20072_vm3 = vcmp.ne.s32.totalorder %v2242_v4, 127  ;;  %vm15082_vm11 = vmpackc.low %vm20008_vm14, %vm20008_vm14 }
 0x223   :  { %15015 = vmatpush1.bf16.msk.msra.mxu1 %vm15003_vm2, %v15014_v51  ;;  %v2132_v53 = vmax.f32 %v1901_v34, %v2068_v61  ;;  %v1990_v41 = vpop.f32.mrb[96].mxu1  ;;  %vm20025_vm9 = vcmp.ne.s32.totalorder %v2228_v26, 0  ;;  %vm15023_vm1 = vmpackc.low %vm19996_vm8, %vm19996_vm8 }
 0x224   :  { %2930 = vmatpush1.bf16.msra.mxu0 %v21897_v57  ;;  %2874 = vmatprep.subr.bf16.mxu1 %v21898_v10  ;;  %v20000_v17 = vpack.c.bf16 %v2131_v36, %v2115_v23  ;;  %v1991_v33 = vadd.f32 %v1990_v41, %v19023_v47  ;;  %v1992_v13 = vpop.f32.mrb[97].mxu1  ;;  %v21921_v57 = vld [vmem:[#allocation52_spill] sm:$0xff]  ;;  %vm15129_vm2 = vmpackc.low %vm20004_vm12, %vm20004_vm12  ;;  %vm20176_vm12 = vcmp.ne.s32.totalorder %v2228_v26, 127  ;;  %v21934_v26 = vld [vmem:[#allocation37_spill] sm:$0xff] }
 0x225   :  { %15062 = vmatprep.subr.msk.bf16.mxu0 %vm15060_vm4, %v21899_v56  ;;  %v20013_v2 = vpack.c.bf16 %v2132_v53, %v2116_v29  ;;  %v1993_v40 = vadd.f32 %v1992_v13, %v19023_v47  ;;  %v1994_v18 = vpop.f32.mrb[98].mxu1  ;;  %v21917_v47 = vld [vmem:[#allocation53_spill] sm:$0xff]  ;;  %vm15144_vm6 = vmpackc.low %vm20039_vm15, %vm20039_vm15 }
 0x226   :  { %14953 = vmatmul.mubr.msk.bf16.gmra.mrb[108].mxu1 %vm2704_vm13, %v19693_v24  ;;  %v2023_v20 = vmul.f32 0.01, %v1991_v33  ;;  %v1995_v37 = vadd.f32 %v1994_v18, %v19027_v50  ;;  %v1996_v45 = vpop.f32.mrb[99].mxu1  ;;  %vm15149_vm7 = vmpackc.low %vm20072_vm3, %vm20072_vm3  ;;  %v21944_v18 = vld [vmem:[#allocation64_spill] sm:$0xff]  ;;  %v16792_v36 = vld [vmem:[#allocation5 + $0x60] ss:$16 sps:$4 sm:$0xff]  }
 0x227   :  { %2875 = vmatpush1.bf16.msra.mxu1 %v21908_v35  ;;  %2902 = vmatprep.mubr.bf16.mxu1 %v21859_v31  ;;  %v2024_v55 = vmul.f32 0.01, %v1993_v40  ;;  %v1997_v34 = vadd.f32 %v1996_v45, %v19027_v50  ;;  %vm15107_vm14 = vmpackc.low %vm20176_vm12, %vm20176_vm12  ;;  %v18344_v35 = vld [vmem:[#allocation3] sm:$0xff]  }
 0x228   :  { %15067 = vmatpush1.bf16.msk.msra.mxu0 %vm15065_vm5, %v21913_v54  ;;  %2876 = vmatprep.subr.bf16.mxu1 %v21914_v6  ;;  %v2039_v1 = vmul.f32 0.01, %v1995_v37  ;;  %v2087_v50 = vmax.f32 %v1991_v33, %v2023_v20  ;;  %v21927_v33 = vld [vmem:[#allocation28_spill] sm:$0xff]  ;;  %v21943_v54 = vld [vmem:[#allocation61_spill] sm:$0xff]  ;;  %v21945_v6 = vld [vmem:[#allocation63_spill] sm:$0xff] }
 0x229   :  { %15072 = vmatprep.subr.msk.bf16.mxu0 %vm15060_vm4, %v21917_v47  ;;  %v2040_v61 = vmul.f32 0.01, %v1997_v34  ;;  %v2088_v21 = vmax.f32 %v1993_v40, %v2024_v55  ;;  %vm20087_vm4 = vcmp.ne.s32.totalorder %v2235_v52, 127  ;;  %v21942_v40 = vld [vmem:[#allocation62_spill] sm:$0xff]  ;;  %v16776_v20 = vld [vmem:[#allocation5 + $0x4] ss:$16 sps:$4 sm:$0xff]  }
 0x22a   :  { %v2103_v16 = vmax.f32 %v1995_v37, %v2039_v1  ;;  %vm15102_vm8 = vmpackc.low %vm20087_vm4, %vm20087_vm4  ;;  %v16777_v37 = vld [vmem:[#allocation5 + $0x8] ss:$16 sps:$4 sm:$0xff]   ;;  %v16779_v47 = vld [vmem:[#allocation5 + $0xc] ss:$16 sps:$4 sm:$0xff]  }
 0x22b   :  { %2877 = vmatpush1.bf16.msra.mxu1 %v21920_v3  ;;  %v2104_v10 = vmax.f32 %v1997_v34, %v2040_v61  ;;  %v2000_v23 = vpop.f32.mrb[100].mxu1  ;;  %v16780_v45 = vld [vmem:[#allocation5 + $0x20] ss:$16 sps:$4 sm:$0xff]   ;;  %v16783_v55 = vld [vmem:[#allocation5 + $0x28] ss:$16 sps:$4 sm:$0xff]  }
 0x22c   :  { %15077 = vmatpush1.bf16.msk.msra.mxu0 %vm15065_vm5, %v21921_v57  ;;  %15020 = vmatprep.subr.msk.bf16.mxu1 %vm15018_vm10, %v19414_v9  ;;  %v20076_v9 = vpack.c.bf16 %v2103_v16, %v2087_v50  ;;  %v2001_v56 = vadd.f32 %v2000_v23, %v19025_v48  ;;  %v2002_v28 = vpop.f32.mrb[101].mxu1  ;;  %vm15087_vm5 = vmpackc.low %vm20025_vm9, %vm20025_vm9  ;;  %v16785_v34 = vld [vmem:[#allocation5 + $0x2c] ss:$16 sps:$4 sm:$0xff]   ;;  %v16786_v61 = vld [vmem:[#allocation5 + $0x40] ss:$16 sps:$4 sm:$0xff]  }
 0x22d   :  { %15126 = vmatprep.subr.msk.bf16.mxu0 %vm15124_vm0, %v19809_v58  ;;  %v20091_v4 = vpack.c.bf16 %v2104_v10, %v2088_v21  ;;  %v2003_v29 = vadd.f32 %v2002_v28, %v19025_v48  ;;  %v2004_v53 = vpop.f32.mrb[102].mxu1  ;;  %v16788_v57 = vld [vmem:[#allocation5 + $0x44] ss:$16 sps:$4 sm:$0xff]   ;;  %v16789_v50 = vld [vmem:[#allocation5 + $0x48] ss:$16 sps:$4 sm:$0xff]   ;;  %v20261_v58 = vpop.permute.xlu0 %2676 }
 0x22e   :  { %v2055_v52 = vmul.f32 0.01, %v2001_v56  ;;  %v2005_v48 = vadd.f32 %v2004_v53, %v19037_v15  ;;  %v16791_v16 = vld [vmem:[#allocation5 + $0x4c] ss:$16 sps:$4 sm:$0xff]   ;;  %v16795_v28 = vld [vmem:[#allocation5 + $0x68] ss:$16 sps:$4 sm:$0xff]  }
 0x22f   :  { %15078 = vmatmul.mubr.msk.bf16.vlgmr.msra.gmra.mrb[104].mxu0 %vm2704_vm13, %v19622_v43  ;;  %15025 = vmatpush1.bf16.msk.msra.mxu1 %vm15023_vm1, %v19409_v62  ;;  %v20107_v62 = vadd.s32 1920, %v19162_v0  ;;  %v2056_v51 = vmul.f32 0.01, %v2003_v29  ;;  %v16803_v53 = vld [vmem:[#allocation5 + $0x8c] ss:$16 sps:$4 sm:$0xff]  }
 0x230   :  { %15131 = vmatpush1.bf16.msk.msra.mxu0 %vm15129_vm2, %v19797_v49  ;;  %15030 = vmatprep.subr.msk.bf16.mxu1 %vm15018_vm10, %v19447_v19  ;;  %v2006_v49 = vpop.f32.mrb[103].mxu1  ;;  %v20121_v19 = vadd.s32 1792, %v19162_v0  ;;  %v2071_v42 = vmul.f32 0.01, %v2005_v48 }
 0x231   :  { %15136 = vmatprep.subr.msk.bf16.mxu0 %vm15124_vm0, %v19884_v63  ;;  %2965 = vmatprep.mubr.bf16.mxu0 %v21859_v31  ;;  %v2007_v41 = vadd.f32 %v2006_v49, %v19037_v15  ;;  %v2119_v15 = vmax.f32 %v2001_v56, %v2055_v52  ;;  %v16798_v52 = vld [vmem:[#allocation5 + $0x80] ss:$16 sps:$4 sm:$0xff]  }
 0x232   :  { %v2135_v0 = vmax.f32 %v2005_v48, %v2071_v42  ;;  %v2256_v13 = vand.u32 127, %v20121_v19  ;;  %v16801_v48 = vld [vmem:[#allocation5 + $0x88] ss:$16 sps:$4 sm:$0xff]   ;;  %v20268_v19 = vpop.permute.xlu0 %2686 }
 0x233   :  { %15035 = vmatpush1.bf16.msk.msra.mxu1 %vm15023_vm1, %v19442_v27  ;;  %v2072_v63 = vmul.f32 0.01, %v2007_v41  ;;  %v21926_v27 = vld [vmem:[#allocation47_spill] sm:$0xff] }
 0x234   :  { %15141 = vmatpush1.bf16.msk.msra.mxu0 %vm15129_vm2, %v19869_v8  ;;  %15084 = vmatprep.subr.msk.bf16.mxu1 %vm15082_vm11, %v19948_v11  ;;  %v2120_v8 = vmax.f32 %v2003_v29, %v2056_v51  ;;  %v15182_v7 = vpack.c.bf16 %v2135_v0, %v2119_v15  ;;  %vm16427_vm15 = vcmp.ne.s32.totalorder %v2256_v13, 0  ;;  %vm16429_vm3 = vcmp.ne.s32.totalorder %v2256_v13, 127  ;;  %v16800_v29 = vld [vmem:[#allocation5 + $0x84] ss:$16 sps:$4 sm:$0xff]   ;;  %v16809_v0 = vld [vmem:[#allocation5 + $0xac] ss:$16 sps:$4 sm:$0xff]  }
 0x235   :  { %3033 = vmatprep.subr.bf16.mxu0 %v21926_v27  ;;  %v2136_v46 = vmax.f32 %v2007_v41, %v2072_v63  ;;  %vm15171_vm0 = vmpackc.low %vm16427_vm15, %vm16427_vm15  ;;  %v16806_v15 = vld [vmem:[#allocation5 + $0xa4] ss:$16 sps:$4 sm:$0xff]   ;;  %v16804_v27 = vld [vmem:[#allocation5 + $0xa0] ss:$16 sps:$4 sm:$0xff]  }
 0x236   :  { %15036 = vmatmul.mubr.msk.bf16.vlgmr.msra.gmra.mrb[112].mxu1 %vm2704_vm13, %v19622_v43  ;;  %vm15191_vm4 = vmpackc.low %vm16429_vm3, %vm16429_vm3  ;;  %v16815_v13 = vld [vmem:[#allocation5 + $0xcc] ss:$16 sps:$4 sm:$0xff]  }
 0x237   :  { %15079 = vmatmul.mubr.msk.bf16.gmra.mrb[108].mxu0 %vm2704_vm13, %v19693_v24  ;;  %15089 = vmatpush1.bf16.msk.msra.mxu1 %vm15087_vm5, %v19934_v12  ;;  %v15177_v11 = vpack.c.bf16 %v2136_v46, %v2120_v8  ;;  %v21931_v12 = vld [vmem:[#allocation35_spill] sm:$0xff]  ;;  %v16807_v8 = vld [vmem:[#allocation5 + $0xa8] ss:$16 sps:$4 sm:$0xff]   ;;  %v18521_v46 = vmov 1983009808  }
 0x238   :  { %3034 = vmatpush1.bf16.msra.mxu0 %v21927_v33  ;;  %15094 = vmatprep.subr.msk.bf16.mxu1 %vm15082_vm11, %v20013_v2  ;;  %v21941_v2 = vld [vmem:[#allocation44_spill] sm:$0xff]  ;;  %vm18523_vm11 = vmmov 1  }
 0x239   :  { %3035 = vmatprep.subr.bf16.mxu0 %v19407_v14  ;;  %2912 = vmatprep.mubr.bf16.mxu1 %v21859_v31  ;;  %v21930_v14 = vld [vmem:[#allocation33_spill] sm:$0xff] }
 0x23a   :  { %3061 = vmatprep.mubr.bf16.mxu0 %v21859_v31 }
 0x23b   :  { %15099 = vmatpush1.bf16.msk.msra.mxu1 %vm15087_vm5, %v20000_v17  ;;  %v21935_v17 = vld [vmem:[#allocation55_spill] sm:$0xff] }
 0x23c   :  { %3036 = vmatpush1.bf16.msra.mxu0 %v21930_v14  ;;  %2980 = vmatprep.subr.bf16.mxu1 %v19412_v60  ;;  %v21932_v60 = vld [vmem:[#allocation54_spill] sm:$0xff] }
 0x23d   :  { %15146 = vmatprep.subr.msk.bf16.mxu0 %vm15144_vm6, %v19421_v5  ;;  %v2263_v5 = vand.u32 127, %v20107_v62  ;;  %v20263_v62 = vpop.permute.xlu1 %2681 }
 0x23e   :  { %15037 = vmatmul.mubr.msk.bf16.gmra.mrb[116].mxu1 %vm2704_vm13, %v19693_v24 }
 0x23f   :  { %2981 = vmatpush1.bf16.msra.mxu1 %v21931_v12  ;;  %3008 = vmatprep.mubr.bf16.mxu1 %v21859_v31  ;;  %vm16426_vm9 = vcmp.ne.s32.totalorder %v2263_v5, 0  ;;  %vm16428_vm1 = vcmp.ne.s32.totalorder %v2263_v5, 127 }
 0x240   :  { %15151 = vmatpush1.bf16.msk.msra.mxu0 %vm15149_vm7, %v19417_v38  ;;  %2982 = vmatprep.subr.bf16.mxu1 %v21932_v60  ;;  %v21936_v38 = vld [vmem:[#allocation58_spill] sm:$0xff]  ;;  %vm15166_vm10 = vmpackc.low %vm16426_vm9, %vm16426_vm9 }
 0x241   :  { %15156 = vmatprep.subr.msk.bf16.mxu0 %vm15144_vm6, %v21933_v44  ;;  %vm15186_vm2 = vmpackc.low %vm16428_vm1, %vm16428_vm1  ;;  %v20278_v12 = vpop.permute.xlu1 %2691  ;;  %vm14490_vm6 = vcmask 97280  }
 0x243   :  { %2983 = vmatpush1.bf16.msra.mxu1 %v21934_v26 }
 0x244   :  { %15161 = vmatpush1.bf16.msk.msra.mxu0 %vm15149_vm7, %v21935_v17  ;;  %15104 = vmatprep.subr.msk.bf16.mxu1 %vm15102_vm8, %v21936_v38  ;;  %v16812_v38 = vld [vmem:[#allocation5 + $0xc4] ss:$16 sps:$4 sm:$0xff]   ;;  %vm14677_vm7 = vcmask 523264  }
 0x245   :  { %12725 = vmatprep.subr.bf16.mxu0 %v16776_v20  ;;  %v16818_v20 = vld [vmem:[#allocation5 + $0xe4] ss:$16 sps:$4 sm:$0xff]  }
 0x247   :  { %15162 = vmatmul.mubr.msk.bf16.vlgmr.msra.gmra.mrb[112].mxu0 %vm2704_vm13, %v18344_v35  ;;  %15109 = vmatpush1.bf16.msk.msra.mxu1 %vm15107_vm14, %v21937_v32 }
 0x248   :  { %15114 = vmatprep.subr.msk.bf16.mxu1 %vm15102_vm8, %v19516_v22  ;;  %3071 = vmatprep.mubr.bf16.mxu0 %v21859_v31  ;;  %v21938_v22 = vld [vmem:[#allocation59_spill] sm:$0xff]  ;;  %vm14759_vm8 = vcmask 7168  }
 0x249   :  { %12726 = vmatpush1.bf16.msra.mxu0 %v16774_v25 }
 0x24a   :  { %12727 = vmatprep.subr.bf16.mxu0 %v16782_v59  ;;  %v16821_v59 = vld [vmem:[#allocation5 + $0xec] ss:$16 sps:$4 sm:$0xff]  }
 0x24b   :  { %15119 = vmatpush1.bf16.msk.msra.mxu1 %vm15107_vm14, %v19507_v30  ;;  %v21939_v30 = vld [vmem:[#allocation40_spill] sm:$0xff] }
 0x24c   :  { %15168 = vmatprep.subr.msk.bf16.mxu1 %vm15166_vm10, %v20091_v4  ;;  %v16797_v4 = vld [vmem:[#allocation5 + $0x6c] ss:$16 sps:$4 sm:$0xff]  }
 0x24d   :  { %12728 = vmatpush1.bf16.msra.mxu0 %v16780_v45  ;;  %v16816_v45 = vld [vmem:[#allocation5 + $0xe0] ss:$16 sps:$4 sm:$0xff]  }
 0x24e   :  { %15120 = vmatmul.mubr.msk.bf16.vlgmr.msra.gmra.mrb[120].mxu1 %vm2704_vm13, %v18344_v35  ;;  %12729 = vmatprep.subr.bf16.mxu0 %v16788_v57 }
 0x24f   :  { %15163 = vmatmul.mubr.msk.bf16.gmra.mrb[116].mxu0 %vm2704_vm13, %v19693_v24  ;;  %15173 = vmatpush1.bf16.msk.msra.mxu1 %vm15171_vm0, %v20076_v9  ;;  %v16794_v9 = vld [vmem:[#allocation5 + $0x64] ss:$16 sps:$4 sm:$0xff]  }
 0x250   :  { %15178 = vmatprep.subr.msk.bf16.mxu1 %vm15166_vm10, %v15177_v11  ;;  %3018 = vmatprep.mubr.bf16.mxu1 %v21859_v31  ;;  %v18522_v11 = vmov 1934713408  }
 0x251   :  { %12730 = vmatpush1.bf16.msra.mxu0 %v16786_v61  ;;  %v3330_v33 = vunpack.c.l.s4 %v18522_v11 }
 0x252   :  { %12731 = vmatprep.subr.bf16.mxu0 %v16794_v9 }
 0x253   :  { %15183 = vmatpush1.bf16.msk.msra.mxu1 %vm15171_vm0, %v15182_v7  ;;  %v3266_v7 = vunpack.c.l.s4 %v18521_v46 }
 0x254   :  { %3086 = vmatprep.subr.bf16.mxu1 %v21938_v22 }
 0x255   :  { %12732 = vmatpush1.bf16.msra.mxu0 %v16792_v36 }
 0x256   :  { %15121 = vmatmul.mubr.msk.bf16.gmra.mrb[124].mxu1 %vm2704_vm13, %v19693_v24  ;;  %12733 = vmatprep.subr.bf16.mxu0 %v16800_v29 }
 0x257   :  { %3087 = vmatpush1.bf16.msra.mxu1 %v21939_v30  ;;  %3114 = vmatprep.mubr.bf16.mxu1 %v21859_v31 }
 0x258   :  { %3088 = vmatprep.subr.bf16.mxu1 %v21940_v39  ;;  %v16810_v39 = vld [vmem:[#allocation5 + $0xc0] ss:$16 sps:$4 sm:$0xff]  }
 0x259   :  { %12734 = vmatpush1.bf16.msra.mxu0 %v16798_v52  ;;  %v16824_v52 = vld [vmem:[#allocation5 + $0x104] ss:$16 sps:$4 sm:$0xff]  }
 0x25a   :  { %12735 = vmatprep.subr.bf16.mxu0 %v16806_v15 }
 0x25b   :  { %3089 = vmatpush1.bf16.msra.mxu1 %v21941_v2  ;;  %v16813_v2 = vld [vmem:[#allocation5 + $0xc8] ss:$16 sps:$4 sm:$0xff]  }
 0x25c   :  { %15188 = vmatprep.subr.msk.bf16.mxu1 %vm15186_vm2, %v21942_v40  ;;  %v3267_v40 = vunpack.c.0.s8 %v3266_v7 }
 0x25d   :  { %12736 = vmatpush1.bf16.msra.mxu0 %v16804_v27  ;;  %v16825_v27 = vld [vmem:[#allocation5 + $0x108] ss:$16 sps:$4 sm:$0xff]  }
 0x25e   :  { %12737 = vmatprep.subr.bf16.mxu0 %v16812_v38 }
 0x25f   :  { %15193 = vmatpush1.bf16.msk.msra.mxu1 %vm15191_vm4, %v21943_v54  ;;  %v3331_v54 = vunpack.c.0.s8 %v3330_v33 }
 0x260   :  { %15198 = vmatprep.subr.msk.bf16.mxu1 %vm15186_vm2, %v21944_v18 }
 0x261   :  { %12738 = vmatpush1.bf16.msra.mxu0 %v16810_v39 }
 0x262   :  { %12739 = vmatprep.subr.bf16.mxu0 %v16818_v20 }
 0x263   :  { %15203 = vmatpush1.bf16.msk.msra.mxu1 %vm15191_vm4, %v21945_v6 }
 0x264   :  { %13413 = vmatprep.subr.bf16.mxu1 %v16779_v47 }
 0x265   :  { %12740 = vmatpush1.bf16.msra.mxu0 %v16816_v45 }
 0x266   :  { %15204 = vmatmul.mubr.msk.bf16.vlgmr.msra.gmra.mrb[128].mxu1 %vm2704_vm13, %v18344_v35  ;;  %v21946_v35 = vlaneseq  ;;  %12741 = vmatprep.subr.bf16.mxu0 %v16824_v52 }
 0x267   :  { %3124 = vmatprep.mubr.bf16.mxu1 %v21859_v31  ;;  %13414 = vmatpush1.bf16.msra.mxu1 %v16777_v37 }
 0x268   :  { %13415 = vmatprep.subr.bf16.mxu1 %v16785_v34  ;;  %v20283_v32 = vshrl.u32 %v21946_v35, 7 }
 0x26a   :  { %21947 = vst [vmem:[#allocation36_spill] sm:$0xff] %v20283_v32 }
 0x26b   :  { %13416 = vmatpush1.bf16.msra.mxu1 %v16783_v55 }
 0x26c   :  { %13417 = vmatprep.subr.bf16.mxu1 %v16791_v16  ;;  %v20294_v16 = vsub.s32 %v3331_v54, %v20283_v32  ;;  %v16828_v54 = vld [vmem:[#allocation5 + $0x120] ss:$16 sps:$4 sm:$0xff]  }
 0x26e   :  { %15205 = vmatmul.mubr.msk.bf16.gmra.mrb[132].mxu1 %vm2704_vm13, %v19693_v24  ;;  %vm14497_vm13 = vcmask 1043456  }
 0x26f   :  { %13418 = vmatpush1.bf16.msra.mxu1 %v16789_v50  ;;  %v20291_v50 = vsub.s32 %v3267_v40, %v20283_v32  ;;  %vm21604_vm5 = vmpackc.low %vm14497_vm13, %vm18523_vm11 }
 0x270   :  { %13419 = vmatprep.subr.bf16.mxu1 %v16797_v4 }
 0x273   :  { %13420 = vmatpush1.bf16.msra.mxu1 %v16795_v28 }
 0x274   :  { %13421 = vmatprep.subr.bf16.mxu1 %v16803_v53 }
 0x277   :  { %13422 = vmatpush1.bf16.msra.mxu1 %v16801_v48  ;;  %v16827_v48 = vld [vmem:[#allocation5 + $0x10c] ss:$16 sps:$4 sm:$0xff]  }
 0x278   :  { %13423 = vmatprep.subr.bf16.mxu1 %v16809_v0 }
 0x27b   :  { %13424 = vmatpush1.bf16.msra.mxu1 %v16807_v8 }
 0x27c   :  { %13425 = vmatprep.subr.bf16.mxu1 %v16815_v13 }
 0x27f   :  { %13426 = vmatpush1.bf16.msra.mxu1 %v16813_v2 }
 0x280   :  { %13427 = vmatprep.subr.bf16.mxu1 %v16821_v59 }
 0x2d0   :  { %v2745_v31 = vpop.f32.mrb[88].mxu0 }
 0x2d1   :  { %v2747_v1 = vpop.f32.mrb[89].mxu0  ;;  %v20266_v49 = vadd.f32 %v2745_v31, %v20261_v58 }
 0x2d2   :  { %v2749_v3 = vpop.f32.mrb[90].mxu0  ;;  %v2748_v51 = vadd.f32 %v2747_v1, %v20261_v58  ;;  %v16819_v1 = vld [vmem:[#allocation5 + $0xe8] ss:$16 sps:$4 sm:$0xff]  }
 0x2d3   :  { %v2751_v24 = vpop.f32.mrb[91].mxu0  ;;  %v2750_v41 = vadd.f32 %v2749_v3, %v20263_v62  ;;  %v3135_v43 = vmul.f32 0.01, %v20266_v49  ;;  %13428 = vmatpush1.bf16.msra.mxu1 %v16819_v1 }
 0x2d4   :  { %v20273_v42 = vadd.f32 %v2751_v24, %v20263_v62  ;;  %v3136_v60 = vmul.f32 0.01, %v2748_v51  ;;  %13429 = vmatprep.subr.bf16.mxu1 %v16827_v48 }
 0x2d5   :  { %v3151_v44 = vmul.f32 0.01, %v2750_v41 }
 0x2d6   :  { %v3152_v5 = vmul.f32 0.01, %v20273_v42 }
 0x2d7   :  { %v20301_v36 = vmax.f32 %v2750_v41, %v3151_v44  ;;  %13430 = vmatpush1.bf16.msra.mxu1 %v16825_v27  ;;  %v16839_v27 = vld [vmem:[#allocation5 + $0x14c] ss:$16 sps:$4 sm:$0xff]  }
 0x2d8   :  { %v2755_v21 = vpop.f32.mrb[92].mxu0 }
 0x2d9   :  { %v2757_v10 = vpop.f32.mrb[93].mxu0  ;;  %v2756_v63 = vadd.f32 %v2755_v21, %v20268_v19 }
 0x2da   :  { %v2759_v23 = vpop.f32.mrb[94].mxu0  ;;  %v2758_v14 = vadd.f32 %v2757_v10, %v20268_v19  ;;  %v20297_v10 = vmax.f32 %v20266_v49, %v3135_v43 }
 0x2db   :  { %v2761_v56 = vpop.f32.mrb[95].mxu0  ;;  %v3167_v26 = vmul.f32 0.01, %v2756_v63  ;;  %v2760_v17 = vadd.f32 %v2759_v23, %v20278_v12  ;;  %v20299_v23 = vmax.f32 %v2748_v51, %v3136_v60 }
 0x2dc   :  { %v2762_v22 = vadd.f32 %v2761_v56, %v20278_v12  ;;  %v3168_v18 = vmul.f32 0.01, %v2758_v14  ;;  %v20304_v56 = vmax.f32 %v20273_v42, %v3152_v5 }
 0x2dd   :  { %v3183_v55 = vmul.f32 0.01, %v2760_v17  ;;  %v20306_v28 = vmax.f32 %v2756_v63, %v3167_v26  ;;  %v16822_v63 = vld [vmem:[#allocation5 + $0x100] ss:$16 sps:$4 sm:$0xff]  }
 0x2de   :  { %v3184_v3 = vmul.f32 0.01, %v2762_v22  ;;  %v20308_v4 = vmax.f32 %v2758_v14, %v3168_v18  ;;  %12742 = vmatpush1.bf16.msra.mxu0 %v16822_v63  ;;  %v16836_v63 = vld [vmem:[#allocation5 + $0x144] ss:$16 sps:$4 sm:$0xff]  }
 0x2df   :  { %v20310_v29 = vmax.f32 %v2760_v17, %v3183_v55 }
 0x2e0   :  { %v20312_v49 = vmax.f32 %v2762_v22, %v3184_v3 }
 0x2ea   :  { %v2851_v30 = vpop.f32.mrb[96].mxu0 }
 0x2eb   :  { %v2852_v6 = vadd.f32 %v2851_v30, %v20261_v58  ;;  %v2853_v25 = vpop.f32.mrb[97].mxu0 }
 0x2ec   :  { %v2854_v37 = vadd.f32 %v2853_v25, %v20261_v58  ;;  %v2855_v47 = vpop.f32.mrb[98].mxu0 }
 0x2ed   :  { %v2856_v34 = vadd.f32 %v2855_v47, %v20263_v62  ;;  %v2857_v31 = vpop.f32.mrb[99].mxu0  ;;  %v3139_v24 = vmul.f32 0.01, %v2852_v6 }
 0x2ee   :  { %v3140_v61 = vmul.f32 0.01, %v2854_v37  ;;  %v2858_v57 = vadd.f32 %v2857_v31, %v20263_v62  ;;  %v16833_v31 = vld [vmem:[#allocation5 + $0x12c] ss:$16 sps:$4 sm:$0xff]  }
 0x2ef   :  { %v3155_v21 = vmul.f32 0.01, %v2856_v34  ;;  %v20314_v51 = vmax.f32 %v2852_v6, %v3139_v24  ;;  %13431 = vmatprep.subr.bf16.mxu1 %v16833_v31 }
 0x2f0   :  { %v3156_v9 = vmul.f32 0.01, %v2858_v57  ;;  %v20316_v41 = vmax.f32 %v2854_v37, %v3140_v61  ;;  %v16830_v37 = vld [vmem:[#allocation5 + $0x124] ss:$16 sps:$4 sm:$0xff]  }
 0x2f1   :  { %v2798_v53 = vpop.f32.mrb[104].mxu1  ;;  %v20319_v8 = vmax.f32 %v2856_v34, %v3155_v21  ;;  %v16831_v34 = vld [vmem:[#allocation5 + $0x128] ss:$16 sps:$4 sm:$0xff]   ;;  %12743 = vmatprep.subr.bf16.mxu0 %v16830_v37 }
 0x2f2   :  { %v2799_v15 = vadd.f32 %v2798_v53, %v20261_v58  ;;  %v2861_v42 = vpop.f32.mrb[100].mxu0  ;;  %v2800_v0 = vpop.f32.mrb[105].mxu1  ;;  %v20323_v43 = vmax.f32 %v2858_v57, %v3156_v9  ;;  %12744 = vmatpush1.bf16.msra.mxu0 %v16828_v54  ;;  %13432 = vmatpush1.bf16.msra.mxu1 %v16831_v34  ;;  %v16842_v54 = vld [vmem:[#allocation5 + $0x164] ss:$16 sps:$4 sm:$0xff]  }
 0x2f3   :  { %v2862_v46 = vadd.f32 %v2861_v42, %v20268_v19  ;;  %v2801_v7 = vadd.f32 %v2800_v0, %v20261_v58  ;;  %v2863_v11 = vpop.f32.mrb[101].mxu0  ;;  %v2802_v33 = vpop.f32.mrb[106].mxu1  ;;  %12745 = vmatprep.subr.bf16.mxu0 %v16836_v63  ;;  %13433 = vmatprep.subr.bf16.mxu1 %v16839_v27  ;;  %v16851_v63 = vld [vmem:[#allocation5 + $0x18c] ss:$16 sps:$4 sm:$0xff]  }
 0x2f4   :  { %v3137_v14 = vmul.f32 0.01, %v2799_v15  ;;  %v2864_v60 = vadd.f32 %v2863_v11, %v20268_v19  ;;  %v2803_v44 = vadd.f32 %v2802_v33, %v20263_v62  ;;  %v2865_v5 = vpop.f32.mrb[102].mxu0  ;;  %v2804_v26 = vpop.f32.mrb[107].mxu1 }
 0x2f5   :  { %v3171_v17 = vmul.f32 0.01, %v2862_v46  ;;  %v3138_v38 = vmul.f32 0.01, %v2801_v7  ;;  %v2866_v13 = vadd.f32 %v2865_v5, %v20278_v12  ;;  %v2805_v35 = vadd.f32 %v2804_v26, %v20263_v62  ;;  %v2867_v22 = vpop.f32.mrb[103].mxu0 }
 0x2f6   :  { %v3201_v30 = vmax.f32 %v2799_v15, %v3137_v14  ;;  %v3172_v39 = vmul.f32 0.01, %v2864_v60  ;;  %v3153_v2 = vmul.f32 0.01, %v2803_v44  ;;  %v2868_v40 = vadd.f32 %v2867_v22, %v20278_v12  ;;  %v16834_v14 = vld [vmem:[#allocation5 + $0x140] ss:$16 sps:$4 sm:$0xff]  }
 0x2f7   :  { %v20330_v18 = vmax.f32 %v2862_v46, %v3171_v17  ;;  %v3202_v6 = vmax.f32 %v2801_v7, %v3138_v38  ;;  %v3187_v25 = vmul.f32 0.01, %v2866_v13  ;;  %v3154_v20 = vmul.f32 0.01, %v2805_v35  ;;  %v16837_v26 = vld [vmem:[#allocation5 + $0x148] ss:$16 sps:$4 sm:$0xff]   ;;  %12746 = vmatpush1.bf16.msra.mxu0 %v16834_v14 }
 0x2f8   :  { %v3263_v47 = vcombine.low %v20297_v10, %v3201_v30  ;;  %v3264_v45 = vcombine.high %v20297_v10, %v3201_v30  ;;  %v20334_v59 = vmax.f32 %v2864_v60, %v3172_v39  ;;  %v3217_v55 = vmax.f32 %v2803_v44, %v3153_v2  ;;  %13434 = vmatpush1.bf16.msra.mxu1 %v16837_v26 }
 0x2f9   :  { %v3279_v1 = vcombine.low %v20299_v23, %v3202_v6  ;;  %v3280_v3 = vcombine.high %v20299_v23, %v3202_v6  ;;  %v20338_v24 = vmax.f32 %v2866_v13, %v3187_v25  ;;  %v3218_v61 = vmax.f32 %v2805_v35, %v3154_v20  ;;  %v2808_v57 = vpop.f32.mrb[108].mxu1  ;;  %v16845_v6 = vld [vmem:[#allocation5 + $0x16c] ss:$16 sps:$4 sm:$0xff]   ;;  %12747 = vmatprep.subr.bf16.mxu0 %v16842_v54 }
 0x2fa   :  { %v3271_v21 = vrot.slane %v3263_v47, %v20291_v50  ;;  %v3278_v9 = vrot.slane %v3264_v45, %v20291_v50  ;;  %v3535_v10 = vcombine.low %v20301_v36, %v3217_v55  ;;  %v3536_v53 = vcombine.high %v20301_v36, %v3217_v55  ;;  %v20344_v52 = vpop.f32.mrb[109].mxu1  ;;  %v16843_v45 = vld [vmem:[#allocation5 + $0x168] ss:$16 sps:$4 sm:$0xff]   ;;  %13435 = vmatprep.subr.bf16.mxu1 %v16845_v6 }
 0x2fb   :  { %v3287_v48 = vrot.slane %v3279_v1, %v20291_v50  ;;  %v3294_v23 = vrot.slane %v3280_v3, %v20291_v50  ;;  %v3551_v15 = vcombine.low %v20304_v56, %v3218_v61  ;;  %v3552_v42 = vcombine.high %v20304_v56, %v3218_v61  ;;  %v20350_v0 = vpop.f32.mrb[110].mxu1 }
 0x2fc   :  { %v3543_v46 = vrot.slane %v3535_v10, %v20291_v50  ;;  %v3550_v36 = vrot.slane %v3536_v53, %v20291_v50  ;;  %v3188_v7 = vmul.f32 0.01, %v2868_v40  ;;  %v20355_v11 = vadd.f32 %v2808_v57, %v20268_v19  ;;  %v20357_v33 = vpop.f32.mrb[111].mxu1  ;;  %13436 = vmatpush1.bf16.msra.mxu1 %v16843_v45  ;;  %v16866_v45 = vld [vmem:[#allocation5 + $0x1e4] ss:$16 sps:$4 sm:$0xff]  }
 0x2fd   :  { %v3327_v60 = vcombine.low %v3271_v21, %v3287_v48  ;;  %v3328_v44 = vcombine.high %v3271_v21, %v3287_v48  ;;  %v3343_v56 = vcombine.low %v3278_v9, %v3294_v23  ;;  %v3344_v5 = vcombine.high %v3278_v9, %v3294_v23  ;;  %13437 = vmatprep.subr.bf16.mxu1 %v16851_v63 }
 0x2fe   :  { %v3559_v17 = vrot.slane %v3551_v15, %v20291_v50  ;;  %v3566_v38 = vrot.slane %v3552_v42, %v20291_v50  ;;  %v20361_v13 = vmax.f32 %v2868_v40, %v3188_v7  ;;  %v3169_v35 = vmul.f32 0.01, %v20355_v11  ;;  %v16840_v40 = vld [vmem:[#allocation5 + $0x160] ss:$16 sps:$4 sm:$0xff]   ;;  %v16848_v42 = vld [vmem:[#allocation5 + $0x184] ss:$16 sps:$4 sm:$0xff]  }
 0x2ff   :  { %v3335_v22 = vrot.slane %v3327_v60, %v20294_v16  ;;  %v3342_v30 = vrot.slane %v3328_v44, %v20294_v16  ;;  %v3351_v39 = vrot.slane %v3343_v56, %v20294_v16  ;;  %v3358_v2 = vrot.slane %v3344_v5, %v20294_v16  ;;  %12748 = vmatpush1.bf16.msra.mxu0 %v16840_v40  ;;  %v16846_v60 = vld [vmem:[#allocation5 + $0x180] ss:$16 sps:$4 sm:$0xff]   ;;  %v16849_v44 = vld [vmem:[#allocation5 + $0x188] ss:$16 sps:$4 sm:$0xff]  }
 0x300   :  { %v3599_v25 = vcombine.low %v3543_v46, %v3559_v17  ;;  %v3600_v20 = vcombine.high %v3543_v46, %v3559_v17  ;;  %v3615_v37 = vcombine.low %v3550_v36, %v3566_v38  ;;  %v3616_v47 = vcombine.high %v3550_v36, %v3566_v38  ;;  %12749 = vmatprep.subr.bf16.mxu0 %v16848_v42 }
 0x301   :  { %v15206_v55 = vcombine.low %v3335_v22, %v3342_v30  ;;  %v15208_v34 = vcombine.high %v3335_v22, %v3342_v30  ;;  %v15210_v31 = vcombine.low %v3351_v39, %v3358_v2  ;;  %v15212_v1 = vcombine.high %v3351_v39, %v3358_v2  ;;  %13438 = vmatpush1.bf16.msra.mxu1 %v16849_v44  ;;  %v16863_v44 = vld [vmem:[#allocation5 + $0x1cc] ss:$16 sps:$4 sm:$0xff]  }
 0x302   :  { %v3607_v3 = vrot.slane %v3599_v25, %v20294_v16  ;;  %v3614_v61 = vrot.slane %v3600_v20, %v20294_v16  ;;  %v3623_v57 = vrot.slane %v3615_v37, %v20294_v16  ;;  %v3630_v21 = vrot.slane %v3616_v47, %v20294_v16  ;;  %v2957_v9 = vpop.f32.mrb[104].mxu0  ;;  %v16854_v37 = vld [vmem:[#allocation5 + $0x1a4] ss:$16 sps:$4 sm:$0xff]   ;;  %v16857_v47 = vld [vmem:[#allocation5 + $0x1ac] ss:$16 sps:$4 sm:$0xff]  }
 0x303   :  { %v20373_v10 = vrot.slane %v15206_v55, %v20291_v50  ;;  %v20376_v53 = vrot.slane %v15208_v34, %v20291_v50  ;;  %v20379_v48 = vrot.slane %v15210_v31, %v20291_v50  ;;  %v20382_v23 = vrot.slane %v15212_v1, %v20291_v50  ;;  %v2959_v15 = vpop.f32.mrb[105].mxu0  ;;  %12750 = vmatpush1.bf16.msra.mxu0 %v16846_v60 }
 0x304   :  { %v15214_v27 = vcombine.low %v3607_v3, %v3614_v61  ;;  %v15216_v46 = vcombine.high %v3607_v3, %v3614_v61  ;;  %v15218_v36 = vcombine.low %v3623_v57, %v3630_v21  ;;  %v15220_v7 = vcombine.high %v3623_v57, %v3630_v21  ;;  %v2961_v14 = vpop.f32.mrb[106].mxu0  ;;  %12751 = vmatprep.subr.bf16.mxu0 %v16854_v37 }
 0x305   :  { %v20392_v38 = vpop.f32.mrb[107].mxu0  ;;  %v3233_v54 = vmax.f32 %v20355_v11, %v3169_v35  ;;  %v2811_v6 = vadd.f32 %v20344_v52, %v20268_v19  ;;  %v2813_v25 = vadd.f32 %v20350_v0, %v20278_v12  ;;  %v2815_v20 = vadd.f32 %v20357_v33, %v20278_v12  ;;  %v16852_v0 = vld [vmem:[#allocation5 + $0x1a0] ss:$16 sps:$4 sm:$0xff]   ;;  %v16855_v35 = vld [vmem:[#allocation5 + $0x1a8] ss:$16 sps:$4 sm:$0xff]   ;;  %13439 = vmatprep.subr.bf16.mxu1 %v16857_v47 }
 0x306   :  { %v20395_v22 = vrot.slane %v15214_v27, %v20291_v50  ;;  %v20398_v30 = vrot.slane %v15216_v46, %v20291_v50  ;;  %v20401_v39 = vrot.slane %v15218_v36, %v20291_v50  ;;  %v20404_v2 = vrot.slane %v15220_v7, %v20291_v50  ;;  %13440 = vmatpush1.bf16.msra.mxu1 %v16855_v35  ;;  %v16864_v11 = vld [vmem:[#allocation5 + $0x1e0] ss:$16 sps:$4 sm:$0xff]  }
 0x307   :  { %v3807_v33 = vcombine.low %v20306_v28, %v3233_v54  ;;  %v3808_v55 = vcombine.high %v20306_v28, %v3233_v54  ;;  %v3170_v34 = vmul.f32 0.01, %v2811_v6  ;;  %v3185_v31 = vmul.f32 0.01, %v2813_v25  ;;  %12752 = vmatpush1.bf16.msra.mxu0 %v16852_v0  ;;  %v16858_v0 = vld [vmem:[#allocation5 + $0x1c0] ss:$16 sps:$4 sm:$0xff]   ;;  %13441 = vmatprep.subr.bf16.mxu1 %v16863_v44 }
 0x308   :  { %21948 = vst [vmem:[#allocation39_spill] sm:$0xff] %v20395_v22  ;;  %21949 = vst [vmem:[#allocation38_spill] sm:$0xff] %v20398_v30  ;;  %v3186_v3 = vmul.f32 0.01, %v2815_v20  ;;  %v2958_v61 = vadd.f32 %v2957_v9, %v20261_v58  ;;  %v2960_v57 = vadd.f32 %v2959_v15, %v20261_v58  ;;  %v2962_v21 = vadd.f32 %v2961_v14, %v20263_v62  ;;  %v16860_v9 = vld [vmem:[#allocation5 + $0x1c4] ss:$16 sps:$4 sm:$0xff]  }
 0x309   :  { %21950 = vst [vmem:[#allocation19_spill] sm:$0xff] %v20401_v39  ;;  %21951 = vst [vmem:[#allocation18_spill] sm:$0xff] %v20404_v2  ;;  %v20423_v1 = vpop.f32.mrb[112].mxu1  ;;  %v3815_v27 = vrot.slane %v3807_v33, %v20291_v50  ;;  %v3822_v28 = vrot.slane %v3808_v55, %v20291_v50  ;;  %v3234_v46 = vmax.f32 %v2811_v6, %v3170_v34  ;;  %12753 = vmatprep.subr.bf16.mxu0 %v16860_v9 }
 0x30a   :  { %v20428_v42 = vpop.f32.mrb[108].mxu0  ;;  %v20430_v63 = vpop.f32.mrb[113].mxu1  ;;  %v3249_v36 = vmax.f32 %v2813_v25, %v3185_v31  ;;  %v3250_v15 = vmax.f32 %v2815_v20, %v3186_v3  ;;  %v3143_v54 = vmul.f32 0.01, %v2958_v61  ;;  %v3144_v14 = vmul.f32 0.01, %v2960_v57 }
 0x30b   :  { %v20434_v7 = vpop.f32.mrb[109].mxu0  ;;  %v20436_v60 = vpop.f32.mrb[114].mxu1  ;;  %v3159_v37 = vmul.f32 0.01, %v2962_v21  ;;  %v3823_v47 = vcombine.low %v20308_v4, %v3234_v46  ;;  %v3824_v33 = vcombine.high %v20308_v4, %v3234_v46  ;;  %v16861_v31 = vld [vmem:[#allocation5 + $0x1c8] ss:$16 sps:$4 sm:$0xff]   ;;  %12754 = vmatpush1.bf16.msra.mxu0 %v16858_v0  ;;  %v20464_v44 = vadd.f32 %v20392_v38, %v20263_v62 }
 0x30c   :  { %v4079_v55 = vcombine.low %v20310_v29, %v3249_v36  ;;  %v4080_v6 = vcombine.high %v20310_v29, %v3249_v36  ;;  %v20442_v25 = vpop.f32.mrb[110].mxu0  ;;  %v20444_v34 = vpop.f32.mrb[115].mxu1  ;;  %v4095_v20 = vcombine.low %v20312_v49, %v3250_v15  ;;  %v4096_v3 = vcombine.high %v20312_v49, %v3250_v15  ;;  %13442 = vmatpush1.bf16.msra.mxu1 %v16861_v31  ;;  %v16867_v15 = vld [vmem:[#allocation5 + $0x1e8] ss:$16 sps:$4 sm:$0xff]  }
 0x30d   :  { %v20448_v35 = vmax.f32 %v2958_v61, %v3143_v54  ;;  %v20450_v52 = vmax.f32 %v2960_v57, %v3144_v14  ;;  %v20452_v4 = vpop.f32.mrb[111].mxu0  ;;  %v3831_v29 = vrot.slane %v3823_v47, %v20291_v50  ;;  %v3838_v46 = vrot.slane %v3824_v33, %v20291_v50  ;;  %v16869_v54 = vld [vmem:[#allocation5 + $0x1ec] ss:$16 sps:$4 sm:$0xff]   ;;  %12755 = vmatprep.subr.bf16.mxu0 %v16866_v45 }
 0x30e   :  { %v4087_v36 = vrot.slane %v4079_v55, %v20291_v50  ;;  %v4094_v9 = vrot.slane %v4080_v6, %v20291_v50  ;;  %v4103_v49 = vrot.slane %v4095_v20, %v20291_v50  ;;  %v4110_v61 = vrot.slane %v4096_v3, %v20291_v50  ;;  %13443 = vmatprep.subr.bf16.mxu1 %v16869_v54 }
 0x30f   :  { %v20460_v57 = vmax.f32 %v2962_v21, %v3159_v37  ;;  %v3871_v14 = vcombine.low %v3815_v27, %v3831_v29  ;;  %v3872_v47 = vcombine.high %v3815_v27, %v3831_v29  ;;  %v3887_v33 = vcombine.low %v3822_v28, %v3838_v46  ;;  %12756 = vmatpush1.bf16.msra.mxu0 %v16864_v11 }
 0x310   :  { %v3888_v55 = vcombine.high %v3822_v28, %v3838_v46  ;;  %v4143_v0 = vcombine.low %v4087_v36, %v4103_v49  ;;  %v4144_v20 = vcombine.high %v4087_v36, %v4103_v49  ;;  %v4159_v40 = vcombine.low %v4094_v9, %v4110_v61  ;;  %13444 = vmatpush1.bf16.msra.mxu1 %v16867_v15 }
 0x311   :  { %v20466_v6 = vpop.f32.mrb[116].mxu1  ;;  %v4160_v3 = vcombine.high %v4094_v9, %v4110_v61  ;;  %v3879_v38 = vrot.slane %v3871_v14, %v20294_v16  ;;  %v3886_v37 = vrot.slane %v3872_v47, %v20294_v16  ;;  %v3895_v31 = vrot.slane %v3887_v33, %v20294_v16 }
 0x312   :  { %v20468_v21 = vpop.f32.mrb[117].mxu1  ;;  %v3902_v27 = vrot.slane %v3888_v55, %v20294_v16  ;;  %v4151_v45 = vrot.slane %v4143_v0, %v20294_v16  ;;  %v4158_v28 = vrot.slane %v4144_v20, %v20294_v16  ;;  %v4167_v46 = vrot.slane %v4159_v40, %v20294_v16 }
 0x313   :  { %v20474_v29 = vpop.f32.mrb[118].mxu1  ;;  %v4174_v36 = vrot.slane %v4160_v3, %v20294_v16  ;;  %v15222_v49 = vcombine.low %v3879_v38, %v3886_v37  ;;  %v15224_v61 = vcombine.high %v3879_v38, %v3886_v37 }
 0x314   :  { %v20480_v9 = vpop.f32.mrb[119].mxu1  ;;  %v15226_v54 = vcombine.low %v3895_v31, %v3902_v27  ;;  %v15228_v14 = vcombine.high %v3895_v31, %v3902_v27  ;;  %v15230_v47 = vcombine.low %v4151_v45, %v4158_v28  ;;  %v15232_v33 = vcombine.high %v4151_v45, %v4158_v28 }
 0x315   :  { %v15234_v55 = vcombine.low %v4167_v46, %v4174_v36  ;;  %v15236_v17 = vcombine.high %v4167_v46, %v4174_v36  ;;  %v20483_v11 = vrot.slane %v15222_v49, %v20291_v50  ;;  %v20486_v0 = vrot.slane %v15224_v61, %v20291_v50 }
 0x316   :  { %v20489_v40 = vrot.slane %v15226_v54, %v20291_v50  ;;  %v20492_v20 = vrot.slane %v15228_v14, %v20291_v50  ;;  %v20495_v15 = vrot.slane %v15230_v47, %v20291_v50  ;;  %v20498_v3 = vrot.slane %v15232_v33, %v20291_v50 }
 0x317   :  { %21952 = vst [vmem:[#allocation25_spill] sm:$0xff] %v20483_v11  ;;  %21953 = vst [vmem:[#allocation20_spill] sm:$0xff] %v20486_v0  ;;  %v20501_v38 = vrot.slane %v15234_v55, %v20291_v50  ;;  %v20504_v37 = vrot.slane %v15236_v17, %v20291_v50  ;;  %v3160_v54 = vmul.f32 0.01, %v20464_v44  ;;  %v2905_v14 = vadd.f32 %v20423_v1, %v20261_v58 }
 0x318   :  { %21954 = vst [vmem:[#allocation27_spill] sm:$0xff] %v20489_v40  ;;  %21955 = vst [vmem:[#allocation42_spill] sm:$0xff] %v20492_v20  ;;  %v2968_v47 = vadd.f32 %v20428_v42, %v20268_v19  ;;  %v2907_v33 = vadd.f32 %v20430_v63, %v20261_v58  ;;  %v2970_v17 = vadd.f32 %v20434_v7, %v20268_v19  ;;  %v16872_v42 = vld [vmem:[#allocation5 + $0x204] ss:$16 sps:$4 sm:$0xff]  }
 0x319   :  { %21956 = vst [vmem:[#allocation21_spill] sm:$0xff] %v20495_v15  ;;  %21957 = vst [vmem:[#allocation41_spill] sm:$0xff] %v20498_v3  ;;  %v2909_v49 = vadd.f32 %v20436_v60, %v20263_v62  ;;  %v2972_v36 = vadd.f32 %v20442_v25, %v20278_v12  ;;  %v2911_v1 = vadd.f32 %v20444_v34, %v20263_v62  ;;  %v3141_v63 = vmul.f32 0.01, %v2905_v14  ;;  %v16875_v3 = vld [vmem:[#allocation5 + $0x20c] ss:$16 sps:$4 sm:$0xff]  }
 0x31a   :  { %21958 = vst [vmem:[#allocation29_spill] sm:$0xff] %v20501_v38  ;;  %21959 = vst [vmem:[#allocation46_spill] sm:$0xff] %v20504_v37  ;;  %v20522_v61 = vpop.f32.mrb[112].mxu0  ;;  %v20544_v28 = vmax.f32 %v20464_v44, %v3160_v54  ;;  %v3175_v45 = vmul.f32 0.01, %v2968_v47  ;;  %v2974_v60 = vadd.f32 %v20452_v4, %v20278_v12  ;;  %12768 = vmatprep.subr.bf16.mxu0 %v16872_v42  ;;  %13456 = vmatprep.subr.bf16.mxu1 %v16875_v3 }
 0x31b   :  { %v20531_v55 = vpop.f32.mrb[113].mxu0  ;;  %v3142_v27 = vmul.f32 0.01, %v2907_v33  ;;  %v3176_v31 = vmul.f32 0.01, %v2970_v17  ;;  %v3205_v25 = vmax.f32 %v2905_v14, %v3141_v63 }
 0x31c   :  { %v20541_v46 = vpop.f32.mrb[114].mxu0  ;;  %v3157_v7 = vmul.f32 0.01, %v2909_v49  ;;  %v3191_v26 = vmul.f32 0.01, %v2972_v36  ;;  %v20548_v5 = vmax.f32 %v2968_v47, %v3175_v45 }
 0x31d   :  { %v3206_v34 = vmax.f32 %v2907_v33, %v3142_v27  ;;  %v3158_v56 = vmul.f32 0.01, %v2911_v1  ;;  %v20550_v32 = vpop.f32.mrb[115].mxu0  ;;  %v20552_v37 = vmax.f32 %v2970_v17, %v3176_v31  ;;  %v3192_v38 = vmul.f32 0.01, %v2974_v60 }
 0x31e   :  { %v3221_v44 = vmax.f32 %v2909_v49, %v3157_v7  ;;  %v20554_v54 = vmax.f32 %v2972_v36, %v3191_v26  ;;  %v3295_v15 = vcombine.low %v20314_v51, %v3205_v25  ;;  %v3296_v20 = vcombine.high %v20314_v51, %v3205_v25 }
 0x31f   :  { %v3311_v4 = vcombine.low %v20316_v41, %v3206_v34  ;;  %v3312_v45 = vcombine.high %v20316_v41, %v3206_v34  ;;  %v3222_v17 = vmax.f32 %v2911_v1, %v3158_v56  ;;  %v20564_v49 = vmax.f32 %v2974_v60, %v3192_v38 }
 0x320   :  { %v3567_v27 = vcombine.low %v20319_v8, %v3221_v44  ;;  %v3568_v31 = vcombine.high %v20319_v8, %v3221_v44  ;;  %v3303_v51 = vrot.slane %v3295_v15, %v20291_v50  ;;  %v3310_v47 = vrot.slane %v3296_v20, %v20291_v50 }
 0x321   :  { %v20560_v14 = vpop.f32.mrb[120].mxu1  ;;  %v3319_v41 = vrot.slane %v3311_v4, %v20291_v50  ;;  %v3326_v33 = vrot.slane %v3312_v45, %v20291_v50  ;;  %v3583_v38 = vcombine.low %v20323_v43, %v3222_v17  ;;  %v3584_v3 = vcombine.high %v20323_v43, %v3222_v17 }
 0x322   :  { %v20566_v26 = vpop.f32.mrb[116].mxu0  ;;  %v20568_v36 = vpop.f32.mrb[121].mxu1  ;;  %v3575_v8 = vrot.slane %v3567_v27, %v20291_v50  ;;  %v3582_v56 = vrot.slane %v3568_v31, %v20291_v50  ;;  %v2915_v45 = vadd.f32 %v20466_v6, %v20268_v19  ;;  %v2917_v43 = vadd.f32 %v20468_v21, %v20268_v19 }
 0x323   :  { %v20574_v42 = vpop.f32.mrb[117].mxu0  ;;  %v20576_v63 = vpop.f32.mrb[122].mxu1  ;;  %v3359_v20 = vcombine.low %v3303_v51, %v3319_v41  ;;  %v3360_v7 = vcombine.high %v3303_v51, %v3319_v41  ;;  %v3375_v60 = vcombine.low %v3310_v47, %v3326_v33  ;;  %v3376_v25 = vcombine.high %v3310_v47, %v3326_v33 }
 0x324   :  { %v20582_v1 = vpop.f32.mrb[118].mxu0  ;;  %v20584_v15 = vpop.f32.mrb[123].mxu1  ;;  %v3591_v44 = vrot.slane %v3583_v38, %v20291_v50  ;;  %v3598_v4 = vrot.slane %v3584_v3, %v20291_v50 }
 0x325   :  { %v20586_v34 = vpop.f32.mrb[119].mxu0  ;;  %v3367_v27 = vrot.slane %v3359_v20, %v20294_v16  ;;  %v3374_v31 = vrot.slane %v3360_v7, %v20294_v16  ;;  %v3383_v17 = vrot.slane %v3375_v60, %v20294_v16  ;;  %v3390_v51 = vrot.slane %v3376_v25, %v20294_v16 }
 0x326   :  { %v3631_v47 = vcombine.low %v3575_v8, %v3591_v44  ;;  %v3632_v41 = vcombine.high %v3575_v8, %v3591_v44  ;;  %v3647_v33 = vcombine.low %v3582_v56, %v3598_v4  ;;  %v3648_v38 = vcombine.high %v3582_v56, %v3598_v4 }
 0x327   :  { %v15207_v40 = vcombine.low %v3367_v27, %v3374_v31  ;;  %v15209_v3 = vcombine.high %v3367_v27, %v3374_v31  ;;  %v15211_v0 = vcombine.low %v3383_v17, %v3390_v51  ;;  %v15213_v11 = vcombine.high %v3383_v17, %v3390_v51 }
 0x328   :  { %v3639_v21 = vrot.slane %v3631_v47, %v20294_v16  ;;  %v3646_v20 = vrot.slane %v3632_v41, %v20294_v16  ;;  %v3655_v7 = vrot.slane %v3647_v33, %v20294_v16  ;;  %v3662_v60 = vrot.slane %v3648_v38, %v20294_v16 }
 0x329   :  { %v20598_v6 = vpop.f32.mrb[124].mxu1  ;;  %v20607_v8 = vrot.slane %v15207_v40, %v20291_v50  ;;  %v20610_v56 = vrot.slane %v15209_v3, %v20291_v50  ;;  %v20613_v25 = vrot.slane %v15211_v0, %v20291_v50  ;;  %v20616_v44 = vrot.slane %v15213_v11, %v20291_v50 }
 0x32a   :  { %v20604_v2 = vpop.f32.mrb[125].mxu1  ;;  %v15215_v27 = vcombine.low %v3639_v21, %v3646_v20  ;;  %v15217_v31 = vcombine.high %v3639_v21, %v3646_v20  ;;  %v15219_v17 = vcombine.low %v3655_v7, %v3662_v60  ;;  %v15221_v51 = vcombine.high %v3655_v7, %v3662_v60 }
 0x32b   :  { %v20618_v4 = vpop.f32.mrb[126].mxu1  ;;  %v3173_v20 = vmul.f32 0.01, %v2915_v45  ;;  %v3174_v7 = vmul.f32 0.01, %v2917_v43  ;;  %v2919_v60 = vadd.f32 %v20474_v29, %v20278_v12  ;;  %v2921_v11 = vadd.f32 %v20480_v9, %v20278_v12 }
 0x32c   :  { %v20620_v47 = vpop.f32.mrb[127].mxu1  ;;  %v20631_v33 = vrot.slane %v15215_v27, %v20291_v50  ;;  %v20634_v38 = vrot.slane %v15217_v31, %v20291_v50  ;;  %v20637_v3 = vrot.slane %v15219_v17, %v20291_v50  ;;  %v20640_v21 = vrot.slane %v15221_v51, %v20291_v50 }
 0x32d   :  { %v3237_v0 = vmax.f32 %v2915_v45, %v3173_v20  ;;  %v3238_v41 = vmax.f32 %v2917_v43, %v3174_v7  ;;  %v3189_v40 = vmul.f32 0.01, %v2919_v60  ;;  %v3190_v39 = vmul.f32 0.01, %v2921_v11 }
 0x32e   :  { %21960 = vst [vmem:[#allocation23_spill] sm:$0xff] %v20631_v33  ;;  %21961 = vst [vmem:[#allocation45_spill] sm:$0xff] %v20634_v38  ;;  %v20656_v29 = vadd.f32 %v20522_v61, %v20261_v58  ;;  %v20660_v9 = vadd.f32 %v20531_v55, %v20261_v58  ;;  %v20664_v31 = vadd.f32 %v20541_v46, %v20263_v62 }
 0x32f   :  { %21962 = vst [vmem:[#allocation51_spill] sm:$0xff] %v20637_v3  ;;  %21963 = vst [vmem:[#allocation50_spill] sm:$0xff] %v20640_v21  ;;  %v20668_v17 = vadd.f32 %v20550_v32, %v20263_v62  ;;  %v3839_v45 = vcombine.low %v20330_v18, %v3237_v0  ;;  %v3840_v43 = vcombine.high %v20330_v18, %v3237_v0 }
 0x330   :  { %v3855_v20 = vcombine.low %v20334_v59, %v3238_v41  ;;  %v3856_v61 = vcombine.high %v20334_v59, %v3238_v41  ;;  %v3253_v7 = vmax.f32 %v2919_v60, %v3189_v40  ;;  %v3254_v51 = vmax.f32 %v2921_v11, %v3190_v39 }
 0x331   :  { %v3147_v55 = vmul.f32 0.01, %v20656_v29  ;;  %v3148_v27 = vmul.f32 0.01, %v20660_v9  ;;  %v3847_v46 = vrot.slane %v3839_v45, %v20291_v50  ;;  %v3854_v21 = vrot.slane %v3840_v43, %v20291_v50 }
 0x332   :  { %v3863_v32 = vrot.slane %v3855_v20, %v20291_v50  ;;  %v3870_v3 = vrot.slane %v3856_v61, %v20291_v50  ;;  %v4111_v18 = vcombine.low %v20338_v24, %v3253_v7  ;;  %v4112_v0 = vcombine.high %v20338_v24, %v3253_v7 }
 0x333   :  { %v4127_v59 = vcombine.low %v20361_v13, %v3254_v51  ;;  %v4128_v39 = vcombine.high %v20361_v13, %v3254_v51 }
 0x334   :  { %v3903_v40 = vcombine.low %v3847_v46, %v3863_v32  ;;  %v3904_v41 = vcombine.high %v3847_v46, %v3863_v32  ;;  %v3919_v11 = vcombine.low %v3854_v21, %v3870_v3  ;;  %v3920_v60 = vcombine.high %v3854_v21, %v3870_v3 }
 0x335   :  { %v4119_v45 = vrot.slane %v4111_v18, %v20291_v50  ;;  %v4126_v43 = vrot.slane %v4112_v0, %v20291_v50  ;;  %v4135_v20 = vrot.slane %v4127_v59, %v20291_v50  ;;  %v4142_v61 = vrot.slane %v4128_v39, %v20291_v50 }
 0x336   :  { %v3911_v38 = vrot.slane %v3903_v40, %v20294_v16  ;;  %v3918_v24 = vrot.slane %v3904_v41, %v20294_v16  ;;  %v3927_v7 = vrot.slane %v3919_v11, %v20294_v16  ;;  %v3934_v13 = vrot.slane %v3920_v60, %v20294_v16 }
 0x337   :  { %v4175_v46 = vcombine.low %v4119_v45, %v4135_v20  ;;  %v4176_v3 = vcombine.high %v4119_v45, %v4135_v20  ;;  %v4191_v21 = vcombine.low %v4126_v43, %v4142_v61  ;;  %v4192_v32 = vcombine.high %v4126_v43, %v4142_v61 }
 0x338   :  { %v15223_v0 = vcombine.low %v3911_v38, %v3918_v24  ;;  %v15225_v59 = vcombine.high %v3911_v38, %v3918_v24  ;;  %v15227_v33 = vcombine.low %v3927_v7, %v3934_v13  ;;  %v15229_v39 = vcombine.high %v3927_v7, %v3934_v13 }
 0x339   :  { %v20692_v51 = vpop.f32.mrb[128].mxu1  ;;  %v4183_v40 = vrot.slane %v4175_v46, %v20294_v16  ;;  %v4190_v41 = vrot.slane %v4176_v3, %v20294_v16  ;;  %v4199_v11 = vrot.slane %v4191_v21, %v20294_v16  ;;  %v4206_v60 = vrot.slane %v4192_v32, %v20294_v16 }
 0x33a   :  { %v20694_v18 = vpop.f32.mrb[129].mxu1  ;;  %v20705_v45 = vrot.slane %v15223_v0, %v20291_v50  ;;  %v20708_v43 = vrot.slane %v15225_v59, %v20291_v50  ;;  %v20711_v38 = vrot.slane %v15227_v33, %v20291_v50  ;;  %v20714_v20 = vrot.slane %v15229_v39, %v20291_v50 }
 0x33b   :  { %v20696_v30 = vpop.f32.mrb[130].mxu1  ;;  %v15231_v61 = vcombine.low %v4183_v40, %v4190_v41  ;;  %v15233_v24 = vcombine.high %v4183_v40, %v4190_v41  ;;  %v15235_v7 = vcombine.low %v4199_v11, %v4206_v60  ;;  %v15237_v13 = vcombine.high %v4199_v11, %v4206_v60 }
 0x33c   :  { %v20702_v22 = vpop.f32.mrb[131].mxu1  ;;  %21964 = vst [vmem:[#allocation30_spill] sm:$0xff] %v20705_v45  ;;  %21965 = vst [vmem:[#allocation22_spill] sm:$0xff] %v20708_v43  ;;  %v20737_v40 = vmax.f32 %v20656_v29, %v3147_v55  ;;  %v20740_v41 = vmax.f32 %v20660_v9, %v3148_v27  ;;  %v3163_v11 = vmul.f32 0.01, %v20664_v31  ;;  %v3076_v29 = vadd.f32 %v20574_v42, %v20268_v19 }
 0x33d   :  { %21966 = vst [vmem:[#allocation32_spill] sm:$0xff] %v20711_v38  ;;  %21967 = vst [vmem:[#allocation24_spill] sm:$0xff] %v20714_v20  ;;  %v20725_v32 = vrot.slane %v15231_v61, %v20291_v50  ;;  %v20728_v0 = vrot.slane %v15233_v24, %v20291_v50  ;;  %v20731_v59 = vrot.slane %v15235_v7, %v20291_v50  ;;  %v3164_v60 = vmul.f32 0.01, %v20668_v17 }
 0x33e   :  { %v20734_v39 = vrot.slane %v15237_v13, %v20291_v50  ;;  %v20757_v9 = vmax.f32 %v20664_v31, %v3163_v11  ;;  %v3011_v24 = vadd.f32 %v20560_v14, %v20261_v58  ;;  %v3074_v7 = vadd.f32 %v20566_v26, %v20268_v19 }
 0x33f   :  { %21968 = vst [vmem:[#allocation34_spill] sm:$0xff] %v20725_v32  ;;  %21969 = vst [vmem:[#allocation49_spill] sm:$0xff] %v20728_v0  ;;  %v20760_v55 = vmax.f32 %v20668_v17, %v3164_v60  ;;  %v3013_v13 = vadd.f32 %v20568_v36, %v20261_v58  ;;  %v3015_v31 = vadd.f32 %v20576_v63, %v20263_v62  ;;  %v3180_v3 = vmul.f32 0.01, %v3076_v29 }
 0x340   :  { %21970 = vst [vmem:[#allocation26_spill] sm:$0xff] %v20731_v59  ;;  %21971 = vst [vmem:[#allocation48_spill] sm:$0xff] %v20734_v39  ;;  %v3078_v17 = vadd.f32 %v20582_v1, %v20278_v12  ;;  %v3145_v14 = vmul.f32 0.01, %v3011_v24  ;;  %v3179_v60 = vmul.f32 0.01, %v3074_v7  ;;  %v3017_v26 = vadd.f32 %v20584_v15, %v20263_v62 }
 0x341   :  { %v20744_v61 = vpop.f32.mrb[132].mxu1  ;;  %v3080_v21 = vadd.f32 %v20586_v34, %v20278_v12  ;;  %v3146_v36 = vmul.f32 0.01, %v3013_v13  ;;  %v3161_v46 = vmul.f32 0.01, %v3015_v31  ;;  %v20784_v42 = vadd.f32 %v20598_v6, %v20268_v19 }
 0x342   :  { %v20754_v27 = vpop.f32.mrb[133].mxu1  ;;  %v3209_v63 = vmax.f32 %v3011_v24, %v3145_v14  ;;  %v20786_v39 = vmax.f32 %v3074_v7, %v3179_v60  ;;  %v3195_v1 = vmul.f32 0.01, %v3078_v17  ;;  %v3162_v59 = vmul.f32 0.01, %v3017_v26 }
 0x343   :  { %v20766_v33 = vpop.f32.mrb[134].mxu1  ;;  %v3210_v0 = vmax.f32 %v3013_v13, %v3146_v36  ;;  %v20788_v32 = vmax.f32 %v3076_v29, %v3180_v3  ;;  %v3225_v20 = vmax.f32 %v3015_v31, %v3161_v46  ;;  %v3196_v15 = vmul.f32 0.01, %v3080_v21 }
 0x344   :  { %v20776_v11 = vpop.f32.mrb[135].mxu1  ;;  %v3399_v38 = vcombine.low %v20448_v35, %v3209_v63  ;;  %v3400_v34 = vcombine.high %v20448_v35, %v3209_v63  ;;  %v20792_v43 = vmax.f32 %v3078_v17, %v3195_v1  ;;  %v3226_v45 = vmax.f32 %v3017_v26, %v3162_v59 }
 0x345   :  { %v3415_v6 = vcombine.low %v20450_v52, %v3210_v0  ;;  %v3416_v24 = vcombine.high %v20450_v52, %v3210_v0  ;;  %v3671_v7 = vcombine.low %v20460_v57, %v3225_v20  ;;  %v3672_v14 = vcombine.high %v20460_v57, %v3225_v20 }
 0x346   :  { %v3407_v3 = vrot.slane %v3399_v38, %v20291_v50  ;;  %v3414_v46 = vrot.slane %v3400_v34, %v20291_v50  ;;  %v3687_v13 = vcombine.low %v20544_v28, %v3226_v45  ;;  %v3688_v29 = vcombine.high %v20544_v28, %v3226_v45 }
 0x347   :  { %v3423_v35 = vrot.slane %v3415_v6, %v20291_v50  ;;  %v3430_v59 = vrot.slane %v3416_v24, %v20291_v50  ;;  %v3679_v31 = vrot.slane %v3671_v7, %v20291_v50  ;;  %v3686_v52 = vrot.slane %v3672_v14, %v20291_v50 }
 0x348   :  { %v3695_v0 = vrot.slane %v3687_v13, %v20291_v50  ;;  %v3702_v57 = vrot.slane %v3688_v29, %v20291_v50  ;;  %v20808_v20 = vmax.f32 %v3080_v21, %v3196_v15  ;;  %v3177_v38 = vmul.f32 0.01, %v20784_v42 }
 0x349   :  { %v3463_v17 = vcombine.low %v3407_v3, %v3423_v35  ;;  %v3464_v60 = vcombine.high %v3407_v3, %v3423_v35  ;;  %v3479_v26 = vcombine.low %v3414_v46, %v3430_v59  ;;  %v3480_v28 = vcombine.high %v3414_v46, %v3430_v59 }
 0x34a   :  { %v3735_v45 = vcombine.low %v3679_v31, %v3695_v0  ;;  %v3736_v36 = vcombine.high %v3679_v31, %v3695_v0  ;;  %v3751_v63 = vcombine.low %v3686_v52, %v3702_v57  ;;  %v3752_v1 = vcombine.high %v3686_v52, %v3702_v57 }
 0x34b   :  { %v3471_v34 = vrot.slane %v3463_v17, %v20294_v16  ;;  %v3478_v6 = vrot.slane %v3464_v60, %v20294_v16  ;;  %v3487_v24 = vrot.slane %v3479_v26, %v20294_v16  ;;  %v3494_v7 = vrot.slane %v3480_v28, %v20294_v16 }
 0x34c   :  { %v3743_v21 = vrot.slane %v3735_v45, %v20294_v16  ;;  %v3750_v15 = vrot.slane %v3736_v36, %v20294_v16  ;;  %v3759_v14 = vrot.slane %v3751_v63, %v20294_v16  ;;  %v3766_v3 = vrot.slane %v3752_v1, %v20294_v16 }
 0x34d   :  { %v15238_v46 = vcombine.low %v3471_v34, %v3478_v6  ;;  %v15240_v13 = vcombine.high %v3471_v34, %v3478_v6  ;;  %v15242_v29 = vcombine.low %v3487_v24, %v3494_v7  ;;  %v15244_v35 = vcombine.high %v3487_v24, %v3494_v7 }
 0x34e   :  { %v15246_v59 = vcombine.low %v3743_v21, %v3750_v15  ;;  %v15248_v31 = vcombine.high %v3743_v21, %v3750_v15  ;;  %v15250_v52 = vcombine.low %v3759_v14, %v3766_v3  ;;  %v15252_v0 = vcombine.high %v3759_v14, %v3766_v3 }
 0x34f   :  { %v20820_v57 = vrot.slane %v15238_v46, %v20291_v50  ;;  %v20823_v17 = vrot.slane %v15240_v13, %v20291_v50  ;;  %v20826_v60 = vrot.slane %v15242_v29, %v20291_v50  ;;  %v20829_v26 = vrot.slane %v15244_v35, %v20291_v50 }
 0x350   :  { %v20832_v28 = vrot.slane %v15246_v59, %v20291_v50  ;;  %v20835_v45 = vrot.slane %v15248_v31, %v20291_v50  ;;  %v20838_v36 = vrot.slane %v15250_v52, %v20291_v50  ;;  %v20841_v63 = vrot.slane %v15252_v0, %v20291_v50 }
 0x351   :  { %v4959_v1 = vcombine.low %v20820_v57, %v20823_v17  ;;  %v4960_v34 = vcombine.high %v20820_v57, %v20823_v17  ;;  %v4991_v6 = vcombine.low %v20826_v60, %v20829_v26  ;;  %v3241_v3 = vmax.f32 %v20784_v42, %v3177_v38 }
 0x352   :  { %v3023_v46 = vadd.f32 %v20604_v2, %v20268_v19  ;;  %v3025_v13 = vadd.f32 %v20618_v4, %v20278_v12  ;;  %v3027_v29 = vadd.f32 %v20620_v47, %v20278_v12  ;;  %v3117_v35 = vadd.f32 %v20692_v51, %v20261_v58 }
 0x353   :  { %v3119_v59 = vadd.f32 %v20694_v18, %v20261_v58  ;;  %v20872_v31 = vadd.f32 %v20696_v30, %v20263_v62  ;;  %v20876_v42 = vadd.f32 %v20702_v22, %v20263_v62  ;;  %v3943_v2 = vcombine.low %v20548_v5, %v3241_v3 }
 0x354   :  { %v3944_v4 = vcombine.high %v20548_v5, %v3241_v3  ;;  %v3178_v38 = vmul.f32 0.01, %v3023_v46  ;;  %v3193_v47 = vmul.f32 0.01, %v3025_v13  ;;  %v3194_v52 = vmul.f32 0.01, %v3027_v29 }
 0x355   :  { %v3149_v0 = vmul.f32 0.01, %v3117_v35  ;;  %v3150_v51 = vmul.f32 0.01, %v3119_v59  ;;  %v20882_v58 = vadd.f32 %v20744_v61, %v20268_v19  ;;  %v3951_v30 = vrot.slane %v3943_v2, %v20291_v50 }
 0x356   :  { %v3958_v18 = vrot.slane %v3944_v4, %v20291_v50  ;;  %v3242_v14 = vmax.f32 %v3023_v46, %v3178_v38  ;;  %v3257_v62 = vmax.f32 %v3025_v13, %v3193_v47  ;;  %v3258_v22 = vmax.f32 %v3027_v29, %v3194_v52 }
 0x357   :  { %v3213_v15 = vmax.f32 %v3117_v35, %v3149_v0  ;;  %v20886_v21 = vmax.f32 %v3119_v59, %v3150_v51  ;;  %v3165_v5 = vmul.f32 0.01, %v20872_v31 }
 0x358   :  { %v3959_v3 = vcombine.low %v20552_v37, %v3242_v14  ;;  %v3960_v7 = vcombine.high %v20552_v37, %v3242_v14  ;;  %v4215_v24 = vcombine.low %v20554_v54, %v3257_v62  ;;  %v4216_v61 = vcombine.high %v20554_v54, %v3257_v62 }
 0x359   :  { %v4231_v2 = vcombine.low %v20564_v49, %v3258_v22  ;;  %v4232_v4 = vcombine.high %v20564_v49, %v3258_v22  ;;  %v3431_v46 = vcombine.low %v20737_v40, %v3213_v15  ;;  %v3432_v13 = vcombine.high %v20737_v40, %v3213_v15 }
 0x35a   :  { %v3967_v29 = vrot.slane %v3959_v3, %v20291_v50  ;;  %v3974_v35 = vrot.slane %v3960_v7, %v20291_v50  ;;  %v4223_v59 = vrot.slane %v4215_v24, %v20291_v50  ;;  %v4230_v37 = vrot.slane %v4216_v61, %v20291_v50 }
 0x35b   :  { %v4239_v14 = vrot.slane %v4231_v2, %v20291_v50  ;;  %v4246_v54 = vrot.slane %v4232_v4, %v20291_v50  ;;  %v20904_v38 = vrot.slane %v3431_v46, %v20291_v50  ;;  %v20907_v49 = vrot.slane %v3432_v13, %v20291_v50 }
 0x35c   :  { %v4007_v47 = vcombine.low %v3951_v30, %v3967_v29  ;;  %v4008_v40 = vcombine.high %v3951_v30, %v3967_v29  ;;  %v4023_v15 = vcombine.low %v3958_v18, %v3974_v35  ;;  %v4024_v52 = vcombine.high %v3958_v18, %v3974_v35 }
 0x35d   :  { %v4279_v0 = vcombine.low %v4223_v59, %v4239_v14  ;;  %v4280_v7 = vcombine.high %v4223_v59, %v4239_v14  ;;  %v4295_v51 = vcombine.low %v4230_v37, %v4246_v54  ;;  %v4296_v24 = vcombine.high %v4230_v37, %v4246_v54 }
 0x35e   :  { %v4015_v62 = vrot.slane %v4007_v47, %v20294_v16  ;;  %v4022_v22 = vrot.slane %v4008_v40, %v20294_v16  ;;  %v4031_v3 = vrot.slane %v4023_v15, %v20294_v16  ;;  %v4038_v61 = vrot.slane %v4024_v52, %v20294_v16 }
 0x35f   :  { %v4287_v2 = vrot.slane %v4279_v0, %v20294_v16  ;;  %v4294_v4 = vrot.slane %v4280_v7, %v20294_v16  ;;  %v4303_v30 = vrot.slane %v4295_v51, %v20294_v16  ;;  %v4310_v18 = vrot.slane %v4296_v24, %v20294_v16 }
 0x360   :  { %v15254_v46 = vcombine.low %v4015_v62, %v4022_v22  ;;  %v15256_v13 = vcombine.high %v4015_v62, %v4022_v22  ;;  %v15258_v29 = vcombine.low %v4031_v3, %v4038_v61  ;;  %v15260_v35 = vcombine.high %v4031_v3, %v4038_v61 }
 0x361   :  { %v15262_v59 = vcombine.low %v4287_v2, %v4294_v4  ;;  %v15264_v37 = vcombine.high %v4287_v2, %v4294_v4  ;;  %v15266_v14 = vcombine.low %v4303_v30, %v4310_v18  ;;  %v15268_v54 = vcombine.high %v4303_v30, %v4310_v18 }
 0x362   :  { %v20918_v47 = vrot.slane %v15254_v46, %v20291_v50  ;;  %v20921_v40 = vrot.slane %v15256_v13, %v20291_v50  ;;  %v20924_v15 = vrot.slane %v15258_v29, %v20291_v50  ;;  %v20927_v52 = vrot.slane %v15260_v35, %v20291_v50 }
 0x363   :  { %v20930_v0 = vrot.slane %v15262_v59, %v20291_v50  ;;  %v20933_v7 = vrot.slane %v15264_v37, %v20291_v50  ;;  %v20936_v51 = vrot.slane %v15266_v14, %v20291_v50  ;;  %v20939_v24 = vrot.slane %v15268_v54, %v20291_v50 }
 0x364   :  { %v3447_v46 = vcombine.low %v20740_v41, %v20886_v21  ;;  %v3448_v13 = vcombine.high %v20740_v41, %v20886_v21  ;;  %v3229_v29 = vmax.f32 %v20872_v31, %v3165_v5  ;;  %v3166_v35 = vmul.f32 0.01, %v20876_v42 }
 0x365   :  { %v3181_v59 = vmul.f32 0.01, %v20882_v58  ;;  %v3129_v37 = vadd.f32 %v20754_v27, %v20268_v19  ;;  %v3131_v14 = vadd.f32 %v20766_v33, %v20278_v12  ;;  %v20970_v54 = vadd.f32 %v20776_v11, %v20278_v12 }
 0x366   :  { %v3455_v18 = vrot.slane %v3447_v46, %v20291_v50  ;;  %v3462_v41 = vrot.slane %v3448_v13, %v20291_v50  ;;  %v3703_v21 = vcombine.low %v20757_v9, %v3229_v29  ;;  %v3704_v31 = vcombine.high %v20757_v9, %v3229_v29 }
 0x367   :  { %v3230_v5 = vmax.f32 %v20876_v42, %v3166_v35  ;;  %v3245_v30 = vmax.f32 %v20882_v58, %v3181_v59  ;;  %v3182_v19 = vmul.f32 0.01, %v3129_v37  ;;  %v3197_v27 = vmul.f32 0.01, %v3131_v14 }
 0x368   :  { %v3495_v33 = vcombine.low %v20904_v38, %v3455_v18  ;;  %v3496_v4 = vcombine.high %v20904_v38, %v3455_v18  ;;  %v3511_v12 = vcombine.low %v20907_v49, %v3462_v41  ;;  %v3512_v11 = vcombine.high %v20907_v49, %v3462_v41 }
 0x369   :  { %v3711_v46 = vrot.slane %v3703_v21, %v20291_v50  ;;  %v3718_v13 = vrot.slane %v3704_v31, %v20291_v50  ;;  %v3719_v9 = vcombine.low %v20760_v55, %v3230_v5  ;;  %v3720_v42 = vcombine.high %v20760_v55, %v3230_v5 }
 0x36a   :  { %v3503_v58 = vrot.slane %v3495_v33, %v20294_v16  ;;  %v3510_v29 = vrot.slane %v3496_v4, %v20294_v16  ;;  %v3519_v35 = vrot.slane %v3511_v12, %v20294_v16  ;;  %v3526_v38 = vrot.slane %v3512_v11, %v20294_v16 }
 0x36b   :  { %v3727_v18 = vrot.slane %v3719_v9, %v20291_v50  ;;  %v3734_v49 = vrot.slane %v3720_v42, %v20291_v50  ;;  %v3975_v59 = vcombine.low %v20786_v39, %v3245_v30  ;;  %v3976_v41 = vcombine.high %v20786_v39, %v3245_v30 }
 0x36c   :  { %v15239_v21 = vcombine.low %v3503_v58, %v3510_v29  ;;  %v15241_v31 = vcombine.high %v3503_v58, %v3510_v29  ;;  %v15243_v2 = vcombine.low %v3519_v35, %v3526_v38  ;;  %v15245_v55 = vcombine.high %v3519_v35, %v3526_v38 }
 0x36d   :  { %v3767_v5 = vcombine.low %v3711_v46, %v3727_v18  ;;  %v3768_v33 = vcombine.high %v3711_v46, %v3727_v18  ;;  %v3783_v61 = vcombine.low %v3718_v13, %v3734_v49  ;;  %v3784_v4 = vcombine.high %v3718_v13, %v3734_v49 }
 0x36e   :  { %v4910_v12 = vrot.slane %v15239_v21, %v20291_v50  ;;  %v4926_v11 = vrot.slane %v15241_v31, %v20291_v50  ;;  %v20997_v9 = vrot.slane %v15243_v2, %v20291_v50  ;;  %v21000_v42 = vrot.slane %v15245_v55, %v20291_v50 }
 0x36f   :  { %v3775_v39 = vrot.slane %v3767_v5, %v20294_v16  ;;  %v3782_v30 = vrot.slane %v3768_v33, %v20294_v16  ;;  %v3791_v58 = vrot.slane %v3783_v61, %v20294_v16  ;;  %v3798_v46 = vrot.slane %v3784_v4, %v20294_v16 }
 0x370   :  { %v4975_v29 = vcombine.low %v4910_v12, %v4926_v11  ;;  %v4976_v13 = vcombine.high %v4910_v12, %v4926_v11  ;;  %v5007_v35 = vcombine.low %v20997_v9, %v21000_v42  ;;  %v5008_v2 = vcombine.high %v20997_v9, %v21000_v42 }
 0x371   :  { %v15247_v38 = vcombine.low %v3775_v39, %v3782_v30  ;;  %v15249_v18 = vcombine.high %v3775_v39, %v3782_v30  ;;  %v15251_v49 = vcombine.low %v3791_v58, %v3798_v46  ;;  %v15253_v21 = vcombine.high %v3791_v58, %v3798_v46 }
 0x372   :  { %v3983_v31 = vrot.slane %v3975_v59, %v20291_v50  ;;  %v3990_v55 = vrot.slane %v3976_v41, %v20291_v50  ;;  %v3246_v5 = vmax.f32 %v3129_v37, %v3182_v19  ;;  %v3261_v61 = vmax.f32 %v3131_v14, %v3197_v27 }
 0x373   :  { %v21013_v33 = vrot.slane %v15247_v38, %v20291_v50  ;;  %v21016_v4 = vrot.slane %v15249_v18, %v20291_v50  ;;  %v21019_v12 = vrot.slane %v15251_v49, %v20291_v50  ;;  %v21022_v11 = vrot.slane %v15253_v21, %v20291_v50 }
 0x374   :  { %v3991_v39 = vcombine.low %v20788_v32, %v3246_v5  ;;  %v3992_v59 = vcombine.high %v20788_v32, %v3246_v5  ;;  %v4247_v41 = vcombine.low %v20792_v43, %v3261_v61  ;;  %v4248_v37 = vcombine.high %v20792_v43, %v3261_v61 }
 0x375   :  { %v5111_v14 = vcombine.low %v21013_v33, %v21016_v4  ;;  %v5112_v19 = vcombine.high %v21013_v33, %v21016_v4  ;;  %v5143_v27 = vcombine.low %v21019_v12, %v21022_v11  ;;  %v3198_v38 = vmul.f32 0.01, %v20970_v54  ;;  %v16902_v4 = vld [vmem:[#allocation5 + $0x2a4] ss:$16 sps:$4 sm:$0xff]  }
 0x376   :  { %v3999_v58 = vrot.slane %v3991_v39, %v20291_v50  ;;  %v4006_v32 = vrot.slane %v3992_v59, %v20291_v50  ;;  %v4255_v46 = vrot.slane %v4247_v41, %v20291_v50  ;;  %v4262_v43 = vrot.slane %v4248_v37, %v20291_v50 }
 0x377   :  { %v21972_v18 = vcombine.low %v20373_v10, %v20376_v53  ;;  %v21973_v21 = vcombine.high %v20373_v10, %v20376_v53  ;;  %v21974_v61 = vcombine.low %v20607_v8, %v20610_v56  ;;  %v3262_v22 = vmax.f32 %v20970_v54, %v3198_v38 }
 0x378   :  { %v4039_v59 = vcombine.low %v3983_v31, %v3999_v58  ;;  %v4040_v41 = vcombine.high %v3983_v31, %v3999_v58  ;;  %v4055_v37 = vcombine.low %v3990_v55, %v4006_v32  ;;  %v4056_v3 = vcombine.high %v3990_v55, %v4006_v32 }
 0x379   :  { %v4423_v49 = vrot.slane %v21972_v18, %v20294_v16  ;;  %v4430_v5 = vrot.slane %v21973_v21, %v20294_v16  ;;  %v4439_v39 = vrot.slane %v21974_v61, %v20294_v16  ;;  %v21975_v18 = vcombine.high %v20607_v8, %v20610_v56 }
 0x37a   :  { %v4967_v10 = vrot.slane %v4959_v1, %v20294_v16  ;;  %v4974_v53 = vrot.slane %v4960_v34, %v20294_v16  ;;  %v4047_v31 = vrot.slane %v4039_v59, %v20294_v16  ;;  %v4054_v55 = vrot.slane %v4040_v41, %v20294_v16 }
 0x37b   :  { %v4446_v62 = vrot.slane %v21975_v18, %v20294_v16  ;;  %v4063_v54 = vrot.slane %v4055_v37, %v20294_v16  ;;  %v4070_v58 = vrot.slane %v4056_v3, %v20294_v16  ;;  %v4263_v8 = vcombine.low %v20808_v20, %v3262_v22 }
 0x37c   :  { %v4264_v56 = vcombine.high %v20808_v20, %v3262_v22  ;;  %v4983_v32 = vrot.slane %v4975_v29, %v20294_v16  ;;  %v4990_v1 = vrot.slane %v4976_v13, %v20294_v16  ;;  %v15255_v38 = vcombine.low %v4047_v31, %v4054_v55 }
 0x37d   :  { %v15257_v21 = vcombine.high %v4047_v31, %v4054_v55  ;;  %v15259_v57 = vcombine.low %v4063_v54, %v4070_v58  ;;  %v15261_v17 = vcombine.high %v4063_v54, %v4070_v58  ;;  %v4271_v34 = vrot.slane %v4263_v8, %v20291_v50 }
 0x37e   :  { %v4278_v61 = vrot.slane %v4264_v56, %v20291_v50  ;;  %v15270_v59 = vcombine.low %v4423_v49, %v4430_v5  ;;  %v15272_v41 = vcombine.high %v4423_v49, %v4430_v5  ;;  %v21077_v3 = vrot.slane %v15255_v38, %v20291_v50 }
 0x37f   :  { %v21080_v37 = vrot.slane %v15257_v21, %v20291_v50  ;;  %v21083_v20 = vrot.slane %v15259_v57, %v20291_v50  ;;  %v21086_v22 = vrot.slane %v15261_v17, %v20291_v50  ;;  %v4311_v29 = vcombine.low %v4255_v46, %v4271_v34 }
 0x380   :  { %v4312_v13 = vcombine.high %v4255_v46, %v4271_v34  ;;  %v4327_v18 = vcombine.low %v4262_v43, %v4278_v61  ;;  %v4328_v31 = vcombine.high %v4262_v43, %v4278_v61  ;;  %v5447_v56 = vrot.slane %v15270_v59, %v20291_v50 }
 0x381   :  { %v4319_v58 = vrot.slane %v4311_v29, %v20294_v16  ;;  %v5463_v38 = vrot.slane %v15272_v41, %v20291_v50  ;;  %v15274_v21 = vcombine.low %v4439_v39, %v4446_v62  ;;  %v15276_v57 = vcombine.high %v4439_v39, %v4446_v62 }
 0x382   :  { %v4326_v8 = vrot.slane %v4312_v13, %v20294_v16  ;;  %v4335_v46 = vrot.slane %v4327_v18, %v20294_v16  ;;  %v4342_v43 = vrot.slane %v4328_v31, %v20294_v16  ;;  %v15278_v13 = vcombine.low %v4967_v10, %v4974_v53 }
 0x383   :  { %v5479_v54 = vrot.slane %v15274_v21, %v20291_v50  ;;  %v5495_v29 = vrot.slane %v15276_v57, %v20291_v50  ;;  %v5503_v49 = vcombine.low %v5447_v56, %v5463_v38  ;;  %v21977_v21 = vcombine.high %v20379_v48, %v20382_v23 }
 0x384   :  { %v15263_v17 = vcombine.low %v4319_v58, %v4326_v8  ;;  %v15265_v34 = vcombine.high %v4319_v58, %v4326_v8  ;;  %v15267_v61 = vcombine.low %v4335_v46, %v4342_v43  ;;  %v15269_v5 = vcombine.high %v4335_v46, %v4342_v43 }
 0x385   :  { %v5511_v39 = vrot.slane %v5503_v49, %v20294_v16  ;;  %v5535_v41 = vcombine.low %v5479_v54, %v5495_v29  ;;  %v5583_v58 = vrot.slane %v15278_v13, %v20291_v50  ;;  %v15280_v8 = vcombine.high %v4967_v10, %v4974_v53 }
 0x386   :  { %v21105_v18 = vrot.slane %v15263_v17, %v20291_v50  ;;  %v21108_v31 = vrot.slane %v15265_v34, %v20291_v50  ;;  %v21111_v59 = vrot.slane %v15267_v61, %v20291_v50  ;;  %v21114_v62 = vrot.slane %v15269_v5, %v20291_v50 }
 0x387   :  { %v5543_v5 = vrot.slane %v5535_v41, %v20294_v16  ;;  %v5599_v49 = vrot.slane %v15280_v8, %v20291_v50  ;;  %v15282_v17 = vcombine.low %v4983_v32, %v4990_v1  ;;  %v15284_v34 = vcombine.high %v4983_v32, %v4990_v1 }
 0x388   :  { %v5504_v61 = vcombine.high %v5447_v56, %v5463_v38  ;;  %v5536_v10 = vcombine.high %v5479_v54, %v5495_v29  ;;  %v21976_v53 = vcombine.low %v20379_v48, %v20382_v23  ;;  %v4462_v43 = vrot.slane %v21977_v21, %v20294_v16 }
 0x389   :  { %v5567_v46 = vcombine.low %v5511_v39, %v5543_v5  ;;  %v5568_v57 = vcombine.high %v5511_v39, %v5543_v5  ;;  %v5615_v41 = vrot.slane %v15282_v17, %v20291_v50  ;;  %v5631_v8 = vrot.slane %v15284_v34, %v20291_v50 }
 0x38a   :  { %v4455_v13 = vrot.slane %v21976_v53, %v20294_v16  ;;  %v5639_v55 = vcombine.low %v5583_v58, %v5599_v49  ;;  %v5518_v32 = vrot.slane %v5504_v61, %v20294_v16  ;;  %v5550_v1 = vrot.slane %v5536_v10, %v20294_v16 }
 0x38b   :  { %v5640_v54 = vcombine.high %v5583_v58, %v5599_v49  ;;  %v5671_v56 = vcombine.low %v5615_v41, %v5631_v8  ;;  %v5672_v38 = vcombine.high %v5615_v41, %v5631_v8  ;;  %v21978_v29 = vcombine.low %v20613_v25, %v20616_v44 }
 0x38c   :  { %v21979_v23 = vcombine.high %v20613_v25, %v20616_v44  ;;  %v5647_v21 = vrot.slane %v5639_v55, %v20294_v16  ;;  %v5570_v5 = vcombine.high %v5518_v32, %v5550_v1  ;;  %v5569_v34 = vcombine.low %v5518_v32, %v5550_v1 }
 0x38d   :  { %v4471_v48 = vrot.slane %v21978_v29, %v20294_v16  ;;  %v5654_v17 = vrot.slane %v5640_v54, %v20294_v16  ;;  %v5679_v58 = vrot.slane %v5671_v56, %v20294_v16  ;;  %v5686_v49 = vrot.slane %v5672_v38, %v20294_v16  ;;  %v16870_v29 = vld [vmem:[#allocation5 + $0x200] ss:$16 sps:$4 sm:$0xff]  }
 0x38e   :  { %v4478_v39 = vrot.slane %v21979_v23, %v20294_v16  ;;  %v4999_v61 = vrot.slane %v4991_v6, %v20294_v16  ;;  %v21980_v25 = vcombine.high %v20826_v60, %v20829_v26  ;;  %v5015_v55 = vrot.slane %v5007_v35, %v20294_v16  ;;  %v16873_v35 = vld [vmem:[#allocation5 + $0x208] ss:$16 sps:$4 sm:$0xff]  }
 0x38f   :  { %v5022_v10 = vrot.slane %v5008_v2, %v20294_v16  ;;  %v15271_v53 = vcombine.low %v4455_v13, %v4462_v43  ;;  %v15273_v41 = vcombine.high %v4455_v13, %v4462_v43  ;;  %v5703_v8 = vcombine.low %v5647_v21, %v5679_v58  ;;  %v16878_v13 = vld [vmem:[#allocation5 + $0x224] ss:$16 sps:$4 sm:$0xff]  }
 0x390   :  { %v5006_v44 = vrot.slane %v21980_v25, %v20294_v16  ;;  %v5704_v32 = vcombine.high %v5647_v21, %v5679_v58  ;;  %v5706_v6 = vcombine.high %v5654_v17, %v5686_v49  ;;  %v5705_v1 = vcombine.low %v5654_v17, %v5686_v49  ;;  %v16881_v21 = vld [vmem:[#allocation5 + $0x22c] ss:$16 sps:$4 sm:$0xff]  }
 0x391   :  { %v5454_v54 = vrot.slane %v15271_v53, %v20291_v50  ;;  %v5470_v60 = vrot.slane %v15273_v41, %v20291_v50  ;;  %v15275_v26 = vcombine.low %v4471_v48, %v4478_v39  ;;  %v15277_v56 = vcombine.high %v4471_v48, %v4478_v39 }
 0x392   :  { %v6528_v38 = vpack.c.bf16 %v5704_v32, %v5568_v57  ;;  %v6527_v23 = vpack.c.bf16 %v5703_v8, %v5567_v46  ;;  %v6530_v25 = vpack.c.bf16 %v5706_v6, %v5570_v5  ;;  %v21170_v30 = vpack.c.bf16 %v5705_v1, %v5569_v34  ;;  %v16876_v5 = vld [vmem:[#allocation5 + $0x220] ss:$16 sps:$4 sm:$0xff]   ;;  %v16879_v34 = vld [vmem:[#allocation5 + $0x228] ss:$16 sps:$4 sm:$0xff]  }
 0x393   :  { %v5486_v9 = vrot.slane %v15275_v26, %v20291_v50  ;;  %v5502_v42 = vrot.slane %v15277_v56, %v20291_v50  ;;  %v5519_v2 = vcombine.low %v5454_v54, %v5470_v60  ;;  %v15279_v43 = vcombine.low %v4999_v61, %v5006_v44 }
 0x394   :  { %12757 = vmatprep.mubr.bf16.mxu0 %v6528_v38  ;;  %13445 = vmatprep.mubr.bf16.mxu1 %v6528_v38  ;;  %v15281_v17 = vcombine.high %v4999_v61, %v5006_v44  ;;  %v15283_v58 = vcombine.low %v5015_v55, %v5022_v10  ;;  %v15285_v48 = vcombine.high %v5015_v55, %v5022_v10  ;;  %v16884_v61 = vld [vmem:[#allocation5 + $0x244] ss:$16 sps:$4 sm:$0xff]   ;;  %v16887_v44 = vld [vmem:[#allocation5 + $0x24c] ss:$16 sps:$4 sm:$0xff]  }
 0x395   :  { %12758 = vmatmul.mubr.bf16.vlgmr.msra.gmra.mrb[120].mxu0 %v6527_v23  ;;  %13446 = vmatmul.mubr.bf16.vlgmr.msra.gmra.mrb[136].mxu1 %v6527_v23  ;;  %v5527_v46 = vrot.slane %v5519_v2, %v20294_v16  ;;  %v5551_v57 = vcombine.low %v5486_v9, %v5502_v42  ;;  %v5590_v39 = vrot.slane %v15279_v43, %v20291_v50  ;;  %v16885_v23 = vld [vmem:[#allocation5 + $0x248] ss:$16 sps:$4 sm:$0xff]  }
 0x396   :  { %12769 = vmatpush1.bf16.msra.mxu0 %v16870_v29  ;;  %13457 = vmatpush1.bf16.msra.mxu1 %v16873_v35  ;;  %v5606_v49 = vrot.slane %v15281_v17, %v20291_v50  ;;  %v5622_v53 = vrot.slane %v15283_v58, %v20291_v50  ;;  %v5638_v41 = vrot.slane %v15285_v48, %v20291_v50  ;;  %v16882_v35 = vld [vmem:[#allocation5 + $0x240] ss:$16 sps:$4 sm:$0xff]   ;;  %v21982_v48 = vld [vmem:[#allocation38_spill] sm:$0xff] }
 0x397   :  { %12800 = vmatprep.mubr.bf16.mxu0 %v6530_v25  ;;  %13488 = vmatprep.mubr.bf16.mxu1 %v6530_v25  ;;  %v5559_v55 = vrot.slane %v5551_v57, %v20294_v16  ;;  %v5520_v10 = vcombine.high %v5454_v54, %v5470_v60  ;;  %v5552_v8 = vcombine.high %v5486_v9, %v5502_v42  ;;  %v16890_v9 = vld [vmem:[#allocation5 + $0x264] ss:$16 sps:$4 sm:$0xff]   ;;  %v16893_v42 = vld [vmem:[#allocation5 + $0x26c] ss:$16 sps:$4 sm:$0xff]  }
 0x398   :  { %12770 = vmatprep.subr.bf16.mxu0 %v16878_v13  ;;  %13458 = vmatprep.subr.bf16.mxu1 %v16881_v21  ;;  %v5655_v32 = vcombine.low %v5590_v39, %v5606_v49  ;;  %v5687_v6 = vcombine.low %v5622_v53, %v5638_v41  ;;  %v5656_v1 = vcombine.high %v5590_v39, %v5606_v49  ;;  %v21981_v58 = vld [vmem:[#allocation39_spill] sm:$0xff] }
 0x399   :  { %v5572_v26 = vcombine.high %v5527_v46, %v5559_v55  ;;  %v5571_v56 = vcombine.low %v5527_v46, %v5559_v55  ;;  %v5534_v38 = vrot.slane %v5520_v10, %v20294_v16  ;;  %v5566_v29 = vrot.slane %v5552_v8, %v20294_v16  ;;  %v21985_v49 = vld [vmem:[#allocation23_spill] sm:$0xff] }
 0x39a   :  { %12771 = vmatpush1.bf16.msra.mxu0 %v16876_v5  ;;  %13459 = vmatpush1.bf16.msra.mxu1 %v16879_v34  ;;  %v5663_v25 = vrot.slane %v5655_v32, %v20294_v16  ;;  %v5695_v54 = vrot.slane %v5687_v6, %v20294_v16  ;;  %v5670_v60 = vrot.slane %v5656_v1, %v20294_v16  ;;  %v16888_v32 = vld [vmem:[#allocation5 + $0x260] ss:$16 sps:$4 sm:$0xff]   ;;  %v16891_v6 = vld [vmem:[#allocation5 + $0x268] ss:$16 sps:$4 sm:$0xff]  }
 0x39b   :  { %12772 = vmatprep.subr.bf16.mxu0 %v16884_v61  ;;  %13460 = vmatprep.subr.bf16.mxu1 %v16887_v44  ;;  %v5574_v2 = vcombine.high %v5534_v38, %v5566_v29  ;;  %v5688_v43 = vcombine.high %v5622_v53, %v5638_v41  ;;  %v5573_v13 = vcombine.low %v5534_v38, %v5566_v29  ;;  %v21986_v61 = vld [vmem:[#allocation45_spill] sm:$0xff] }
 0x39c   :  { %v5708_v21 = vcombine.high %v5663_v25, %v5695_v54  ;;  %v5707_v17 = vcombine.low %v5663_v25, %v5695_v54  ;;  %v21983_v46 = vcombine.low %v21981_v58, %v21982_v48  ;;  %v21984_v39 = vcombine.high %v21981_v58, %v21982_v48  ;;  %v16896_v54 = vld [vmem:[#allocation5 + $0x284] ss:$16 sps:$4 sm:$0xff]  }
 0x39d   :  { %v5702_v34 = vrot.slane %v5688_v43, %v20294_v16  ;;  %v21987_v44 = vcombine.low %v21985_v49, %v21986_v61  ;;  %v21988_v41 = vcombine.high %v21985_v49, %v21986_v61  ;;  %v21989_v10 = vcombine.low %v20832_v28, %v20835_v45  ;;  %v16899_v43 = vld [vmem:[#allocation5 + $0x28c] ss:$16 sps:$4 sm:$0xff]  }
 0x39e   :  { %v4559_v57 = vrot.slane %v21983_v46, %v20294_v16  ;;  %v4566_v5 = vrot.slane %v21984_v39, %v20294_v16  ;;  %12773 = vmatpush1.bf16.msra.mxu0 %v16882_v35  ;;  %13461 = vmatpush1.bf16.msra.mxu1 %v16885_v23  ;;  %v21206_v1 = vpack.c.bf16 %v5708_v21, %v5572_v26 }
 0x39f   :  { %v4575_v53 = vrot.slane %v21987_v44, %v20294_v16  ;;  %v4582_v55 = vrot.slane %v21988_v41, %v20294_v16  ;;  %v5103_v8 = vrot.slane %v21989_v10, %v20294_v16  ;;  %v21208_v38 = vpack.c.bf16 %v5707_v17, %v5571_v56  ;;  %12774 = vmatprep.subr.bf16.mxu0 %v16890_v9  ;;  %v16897_v17 = vld [vmem:[#allocation5 + $0x288] ss:$16 sps:$4 sm:$0xff]   ;;  %v21991_v41 = vld [vmem:[#allocation19_spill] sm:$0xff] }
 0x3a0   :  { %v21990_v29 = vcombine.high %v20832_v28, %v20835_v45  ;;  %13462 = vmatprep.subr.bf16.mxu1 %v16893_v42  ;;  %v5710_v58 = vcombine.high %v5670_v60, %v5702_v34  ;;  %v5709_v48 = vcombine.low %v5670_v60, %v5702_v34  ;;  %v5119_v35 = vrot.slane %v5111_v14, %v20294_v16  ;;  %v16894_v60 = vld [vmem:[#allocation5 + $0x280] ss:$16 sps:$4 sm:$0xff]  }
 0x3a1   :  { %v5126_v26 = vrot.slane %v5112_v19, %v20294_v16  ;;  %v15286_v56 = vcombine.low %v4559_v57, %v4566_v5  ;;  %v15288_v23 = vcombine.high %v4559_v57, %v4566_v5  ;;  %v15290_v28 = vcombine.low %v4575_v53, %v4582_v55  ;;  %v16905_v19 = vld [vmem:[#allocation5 + $0x2ac] ss:$16 sps:$4 sm:$0xff]  }
 0x3a2   :  { %v5110_v25 = vrot.slane %v21990_v29, %v20294_v16  ;;  %v21222_v45 = vpack.c.bf16 %v5710_v58, %v5574_v2  ;;  %v21224_v9 = vpack.c.bf16 %v5709_v48, %v5573_v13  ;;  %v15292_v42 = vcombine.high %v4575_v53, %v4582_v55  ;;  %12775 = vmatpush1.bf16.msra.mxu0 %v16888_v32  ;;  %v21992_v55 = vld [vmem:[#allocation18_spill] sm:$0xff] }
 0x3a3   :  { %13463 = vmatpush1.bf16.msra.mxu1 %v16891_v6  ;;  %v5719_v14 = vrot.slane %v15286_v56, %v20291_v50  ;;  %v5735_v46 = vrot.slane %v15288_v23, %v20291_v50  ;;  %v5751_v33 = vrot.slane %v15290_v28, %v20291_v50  ;;  %12776 = vmatprep.subr.bf16.mxu0 %v16896_v54  ;;  %v16900_v6 = vld [vmem:[#allocation5 + $0x2a0] ss:$16 sps:$4 sm:$0xff]   ;;  %v16903_v29 = vld [vmem:[#allocation5 + $0x2a8] ss:$16 sps:$4 sm:$0xff]   ;;  %v16911_v58 = vld [vmem:[#allocation5 + $0x2cc] ss:$16 sps:$4 sm:$0xff]  }
 0x3a4   :  { %v15294_v21 = vcombine.low %v5103_v8, %v5110_v25  ;;  %13464 = vmatprep.subr.bf16.mxu1 %v16899_v43  ;;  %v5767_v2 = vrot.slane %v15292_v42, %v20291_v50  ;;  %v15296_v57 = vcombine.high %v5103_v8, %v5110_v25  ;;  %v15298_v5 = vcombine.low %v5119_v35, %v5126_v26  ;;  %v16908_v43 = vld [vmem:[#allocation5 + $0x2c4] ss:$16 sps:$4 sm:$0xff]  }
 0x3a5   :  { %v5775_v39 = vcombine.low %v5719_v14, %v5735_v46  ;;  %v15300_v34 = vcombine.high %v5119_v35, %v5126_v26  ;;  %v5776_v49 = vcombine.high %v5719_v14, %v5735_v46  ;;  %v21993_v10 = vcombine.low %v21991_v41, %v21992_v55 }
 0x3a6   :  { %v5855_v13 = vrot.slane %v15294_v21, %v20291_v50  ;;  %v5807_v61 = vcombine.low %v5751_v33, %v5767_v2  ;;  %v5871_v44 = vrot.slane %v15296_v57, %v20291_v50  ;;  %v5808_v53 = vcombine.high %v5751_v33, %v5767_v2  ;;  %12777 = vmatpush1.bf16.msra.mxu0 %v16894_v60  ;;  %v16906_v33 = vld [vmem:[#allocation5 + $0x2c0] ss:$16 sps:$4 sm:$0xff]  }
 0x3a7   :  { %v21236_v32 = vrot.slane %v21993_v10, %v20294_v16  ;;  %13465 = vmatpush1.bf16.msra.mxu1 %v16897_v17  ;;  %v5783_v8 = vrot.slane %v5775_v39, %v20294_v16  ;;  %v5887_v25 = vrot.slane %v15298_v5, %v20291_v50  ;;  %v5903_v54 = vrot.slane %v15300_v34, %v20291_v50  ;;  %v16917_v39 = vld [vmem:[#allocation5 + $0x2ec] ss:$16 sps:$4 sm:$0xff]  }
 0x3a8   :  { %12778 = vmatprep.subr.bf16.mxu0 %v16902_v4  ;;  %13466 = vmatprep.subr.bf16.mxu1 %v16905_v19  ;;  %v5815_v48 = vrot.slane %v5807_v61, %v20294_v16  ;;  %v5911_v35 = vcombine.low %v5855_v13, %v5871_v44  ;;  %v5790_v26 = vrot.slane %v5776_v49, %v20294_v16  ;;  %v16909_v4 = vld [vmem:[#allocation5 + $0x2c8] ss:$16 sps:$4 sm:$0xff]   ;;  %v21995_v49 = vld [vmem:[#allocation51_spill] sm:$0xff] }
 0x3a9   :  { %v5943_v56 = vcombine.low %v5887_v25, %v5903_v54  ;;  %v5822_v23 = vrot.slane %v5808_v53, %v20294_v16  ;;  %v5912_v28 = vcombine.high %v5855_v13, %v5871_v44  ;;  %v5944_v42 = vcombine.high %v5887_v25, %v5903_v54  ;;  %v16914_v13 = vld [vmem:[#allocation5 + $0x2e4] ss:$16 sps:$4 sm:$0xff]   ;;  %v21996_v61 = vld [vmem:[#allocation50_spill] sm:$0xff] }
 0x3aa   :  { %v5840_v21 = vcombine.high %v5783_v8, %v5815_v48  ;;  %v5919_v60 = vrot.slane %v5911_v35, %v20294_v16  ;;  %v5839_v17 = vcombine.low %v5783_v8, %v5815_v48  ;;  %v21994_v14 = vcombine.high %v21991_v41, %v21992_v55  ;;  %12779 = vmatpush1.bf16.msra.mxu0 %v16900_v6  ;;  %v16912_v35 = vld [vmem:[#allocation5 + $0x2e0] ss:$16 sps:$4 sm:$0xff]  }
 0x3ab   :  { %13467 = vmatpush1.bf16.msra.mxu1 %v16903_v29  ;;  %v5951_v19 = vrot.slane %v5943_v56, %v20294_v16  ;;  %v5842_v2 = vcombine.high %v5790_v26, %v5822_v23  ;;  %v5926_v57 = vrot.slane %v5912_v28, %v20294_v16  ;;  %12780 = vmatprep.subr.bf16.mxu0 %v16908_v43 }
 0x3ac   :  { %v4598_v46 = vrot.slane %v21994_v14, %v20294_v16  ;;  %13468 = vmatprep.subr.bf16.mxu1 %v16911_v58  ;;  %v5958_v5 = vrot.slane %v5944_v42, %v20294_v16  ;;  %v5841_v34 = vcombine.low %v5790_v26, %v5822_v23  ;;  %v21997_v44 = vcombine.low %v21995_v49, %v21996_v61  ;;  %v16915_v26 = vld [vmem:[#allocation5 + $0x2e8] ss:$16 sps:$4 sm:$0xff]  }
 0x3ad   :  { %v5976_v41 = vcombine.high %v5919_v60, %v5951_v19  ;;  %v5975_v55 = vcombine.low %v5919_v60, %v5951_v19  ;;  %v21998_v10 = vcombine.high %v21995_v49, %v21996_v61  ;;  %v21999_v29 = vcombine.low %v20838_v36, %v20841_v63 }
 0x3ae   :  { %v4607_v53 = vrot.slane %v21997_v44, %v20294_v16  ;;  %v5978_v25 = vcombine.high %v5926_v57, %v5958_v5  ;;  %v5977_v54 = vcombine.low %v5926_v57, %v5958_v5  ;;  %v22000_v43 = vcombine.high %v20838_v36, %v20841_v63  ;;  %12781 = vmatpush1.bf16.msra.mxu0 %v16906_v33  ;;  %v16920_v36 = vld [vmem:[#allocation5 + $0x304] ss:$16 sps:$4 sm:$0xff]   ;;  %v16923_v63 = vld [vmem:[#allocation5 + $0x30c] ss:$16 sps:$4 sm:$0xff]  }
 0x3af   :  { %v4614_v6 = vrot.slane %v21998_v10, %v20294_v16  ;;  %v5135_v8 = vrot.slane %v21999_v29, %v20294_v16  ;;  %v5151_v48 = vrot.slane %v5143_v27, %v20294_v16  ;;  %13469 = vmatpush1.bf16.msra.mxu1 %v16909_v4  ;;  %v21272_v56 = vpack.c.bf16 %v5976_v41, %v5840_v21 }
 0x3b0   :  { %v5142_v58 = vrot.slane %v22000_v43, %v20294_v16  ;;  %v21274_v23 = vpack.c.bf16 %v5975_v55, %v5839_v17  ;;  %v22001_v28 = vcombine.high %v21019_v12, %v21022_v11  ;;  %12782 = vmatprep.subr.bf16.mxu0 %v16914_v13  ;;  %13470 = vmatprep.subr.bf16.mxu1 %v16917_v39  ;;  %v16918_v13 = vld [vmem:[#allocation5 + $0x300] ss:$16 sps:$4 sm:$0xff]   ;;  %v16921_v39 = vld [vmem:[#allocation5 + $0x308] ss:$16 sps:$4 sm:$0xff]  }
 0x3b1   :  { %v21280_v60 = vpack.c.bf16 %v5978_v25, %v5842_v2  ;;  %v21282_v27 = vpack.c.bf16 %v5977_v54, %v5841_v34  ;;  %v15287_v14 = vcombine.low %v21236_v32, %v4598_v46  ;;  %v15289_v21 = vcombine.high %v21236_v32, %v4598_v46  ;;  %v16926_v32 = vld [vmem:[#allocation5 + $0x324] ss:$16 sps:$4 sm:$0xff]   ;;  %v16929_v46 = vld [vmem:[#allocation5 + $0x32c] ss:$16 sps:$4 sm:$0xff]  }
 0x3b2   :  { %v5158_v42 = vrot.slane %v22001_v28, %v20294_v16  ;;  %v15291_v33 = vcombine.low %v4607_v53, %v4614_v6  ;;  %v15293_v17 = vcombine.high %v4607_v53, %v4614_v6  ;;  %v15295_v4 = vcombine.low %v5135_v8, %v5142_v58  ;;  %12783 = vmatpush1.bf16.msra.mxu0 %v16912_v35  ;;  %v22002_v25 = vld [vmem:[#allocation25_spill] sm:$0xff]  ;;  %v22003_v54 = vld [vmem:[#allocation20_spill] sm:$0xff] }
 0x3b3   :  { %v5726_v19 = vrot.slane %v15287_v14, %v20291_v50  ;;  %v15297_v57 = vcombine.high %v5135_v8, %v5142_v58  ;;  %13471 = vmatpush1.bf16.msra.mxu1 %v16915_v26  ;;  %v5742_v2 = vrot.slane %v15289_v21, %v20291_v50  ;;  %12784 = vmatprep.subr.bf16.mxu0 %v16920_v36  ;;  %v16927_v35 = vld [vmem:[#allocation5 + $0x328] ss:$16 sps:$4 sm:$0xff]   ;;  %v16932_v36 = vld [vmem:[#allocation5 + $0x344] ss:$16 sps:$4 sm:$0xff]  }
 0x3b4   :  { %v15299_v12 = vcombine.low %v5151_v48, %v5158_v42  ;;  %v15301_v11 = vcombine.high %v5151_v48, %v5158_v42  ;;  %v5758_v5 = vrot.slane %v15291_v33, %v20291_v50  ;;  %v5774_v34 = vrot.slane %v15293_v17, %v20291_v50  ;;  %13472 = vmatprep.subr.bf16.mxu1 %v16923_v63  ;;  %v16924_v48 = vld [vmem:[#allocation5 + $0x320] ss:$16 sps:$4 sm:$0xff]   ;;  %v16935_v63 = vld [vmem:[#allocation5 + $0x34c] ss:$16 sps:$4 sm:$0xff]  }
 0x3b5   :  { %v5862_v49 = vrot.slane %v15295_v4, %v20291_v50  ;;  %v5878_v61 = vrot.slane %v15297_v57, %v20291_v50  ;;  %v5791_v53 = vcombine.low %v5726_v19, %v5742_v2  ;;  %v5792_v10 = vcombine.high %v5726_v19, %v5742_v2 }
 0x3b6   :  { %v5894_v44 = vrot.slane %v15299_v12, %v20291_v50  ;;  %v5823_v41 = vcombine.low %v5758_v5, %v5774_v34  ;;  %v5910_v55 = vrot.slane %v15301_v11, %v20291_v50  ;;  %v5824_v29 = vcombine.high %v5758_v5, %v5774_v34  ;;  %12785 = vmatpush1.bf16.msra.mxu0 %v16918_v13  ;;  %v16930_v5 = vld [vmem:[#allocation5 + $0x340] ss:$16 sps:$4 sm:$0xff]   ;;  %v16933_v34 = vld [vmem:[#allocation5 + $0x348] ss:$16 sps:$4 sm:$0xff]  }
 0x3b7   :  { %v5927_v6 = vcombine.low %v5862_v49, %v5878_v61  ;;  %v5928_v8 = vcombine.high %v5862_v49, %v5878_v61  ;;  %v22004_v43 = vcombine.low %v22002_v25, %v22003_v54  ;;  %13473 = vmatpush1.bf16.msra.mxu1 %v16921_v39  ;;  %v5799_v26 = vrot.slane %v5791_v53, %v20294_v16  ;;  %v22006_v49 = vld [vmem:[#allocation30_spill] sm:$0xff] }
 0x3b8   :  { %v5831_v28 = vrot.slane %v5823_v41, %v20294_v16  ;;  %v5959_v42 = vcombine.low %v5894_v44, %v5910_v55  ;;  %12786 = vmatprep.subr.bf16.mxu0 %v16926_v32  ;;  %13474 = vmatprep.subr.bf16.mxu1 %v16929_v46  ;;  %v5806_v21 = vrot.slane %v5792_v10, %v20294_v16  ;;  %v22007_v61 = vld [vmem:[#allocation22_spill] sm:$0xff] }
 0x3b9   :  { %v4695_v58 = vrot.slane %v22004_v43, %v20294_v16  ;;  %v5935_v14 = vrot.slane %v5927_v6, %v20294_v16  ;;  %v5838_v33 = vrot.slane %v5824_v29, %v20294_v16  ;;  %v5942_v57 = vrot.slane %v5928_v8, %v20294_v16 }
 0x3ba   :  { %v5844_v17 = vcombine.high %v5799_v26, %v5831_v28  ;;  %v5967_v4 = vrot.slane %v5959_v42, %v20294_v16  ;;  %v5843_v19 = vcombine.low %v5799_v26, %v5831_v28  ;;  %v5960_v11 = vcombine.high %v5894_v44, %v5910_v55  ;;  %12787 = vmatpush1.bf16.msra.mxu0 %v16924_v48  ;;  %v16938_v44 = vld [vmem:[#allocation5 + $0x364] ss:$16 sps:$4 sm:$0xff]   ;;  %v16941_v55 = vld [vmem:[#allocation5 + $0x36c] ss:$16 sps:$4 sm:$0xff]  }
 0x3bb   :  { %v5846_v12 = vcombine.high %v5806_v21, %v5838_v33  ;;  %v5845_v13 = vcombine.low %v5806_v21, %v5838_v33  ;;  %v22005_v39 = vcombine.high %v22002_v25, %v22003_v54  ;;  %13475 = vmatpush1.bf16.msra.mxu1 %v16927_v35  ;;  %v22008_v53 = vcombine.low %v22006_v49, %v22007_v61  ;;  %v16936_v33 = vld [vmem:[#allocation5 + $0x360] ss:$16 sps:$4 sm:$0xff]  }
 0x3bc   :  { %v5980_v32 = vcombine.high %v5935_v14, %v5967_v4  ;;  %v5979_v46 = vcombine.low %v5935_v14, %v5967_v4  ;;  %12788 = vmatprep.subr.bf16.mxu0 %v16932_v36  ;;  %13476 = vmatprep.subr.bf16.mxu1 %v16935_v63  ;;  %v5974_v10 = vrot.slane %v5960_v11, %v20294_v16  ;;  %v16947_v11 = vld [vmem:[#allocation5 + $0x38c] ss:$16 sps:$4 sm:$0xff]  }
 0x3bd   :  { %v4702_v2 = vrot.slane %v22005_v39, %v20294_v16  ;;  %v4711_v41 = vrot.slane %v22008_v53, %v20294_v16  ;;  %v22009_v6 = vcombine.high %v22006_v49, %v22007_v61  ;;  %v22010_v8 = vcombine.low %v20918_v47, %v20921_v40  ;;  %v22014_v49 = vld [vmem:[#allocation27_spill] sm:$0xff]  ;;  %v22015_v61 = vld [vmem:[#allocation42_spill] sm:$0xff] }
 0x3be   :  { %v21322_v54 = vpack.c.bf16 %v5980_v32, %v5844_v17  ;;  %v21324_v43 = vpack.c.bf16 %v5979_v46, %v5843_v19  ;;  %v22011_v48 = vcombine.high %v20918_v47, %v20921_v40  ;;  %v22012_v26 = vcombine.low %v21077_v3, %v21080_v37  ;;  %12789 = vmatpush1.bf16.msra.mxu0 %v16930_v5  ;;  %v16939_v17 = vld [vmem:[#allocation5 + $0x368] ss:$16 sps:$4 sm:$0xff]   ;;  %v16944_v19 = vld [vmem:[#allocation5 + $0x384] ss:$16 sps:$4 sm:$0xff]  }
 0x3bf   :  { %v4718_v29 = vrot.slane %v22009_v6, %v20294_v16  ;;  %v5239_v25 = vrot.slane %v22010_v8, %v20294_v16  ;;  %v5982_v42 = vcombine.high %v5942_v57, %v5974_v10  ;;  %v5981_v36 = vcombine.low %v5942_v57, %v5974_v10  ;;  %13477 = vmatpush1.bf16.msra.mxu1 %v16933_v34  ;;  %v16950_v6 = vld [vmem:[#allocation5 + $0x3a4] ss:$16 sps:$4 sm:$0xff]  }
 0x3c0   :  { %v5246_v35 = vrot.slane %v22011_v48, %v20294_v16  ;;  %v5255_v28 = vrot.slane %v22012_v26, %v20294_v16  ;;  %v22013_v63 = vcombine.high %v21077_v3, %v21080_v37  ;;  %v15302_v21 = vcombine.low %v4695_v58, %v4702_v2  ;;  %12790 = vmatprep.subr.bf16.mxu0 %v16938_v44 }
 0x3c1   :  { %v15304_v4 = vcombine.high %v4695_v58, %v4702_v2  ;;  %v15306_v47 = vcombine.low %v4711_v41, %v4718_v29  ;;  %v15308_v40 = vcombine.high %v4711_v41, %v4718_v29  ;;  %13478 = vmatprep.subr.bf16.mxu1 %v16941_v55  ;;  %v21338_v39 = vpack.c.bf16 %v5982_v42, %v5846_v12  ;;  %v16945_v41 = vld [vmem:[#allocation5 + $0x388] ss:$16 sps:$4 sm:$0xff]   ;;  %v16953_v29 = vld [vmem:[#allocation5 + $0x3ac] ss:$16 sps:$4 sm:$0xff]  }
 0x3c2   :  { %v5262_v14 = vrot.slane %v22013_v63, %v20294_v16  ;;  %v21340_v57 = vpack.c.bf16 %v5981_v36, %v5845_v13  ;;  %v5991_v32 = vrot.slane %v15302_v21, %v20291_v50  ;;  %v15310_v34 = vcombine.low %v5239_v25, %v5246_v35  ;;  %12791 = vmatpush1.bf16.msra.mxu0 %v16936_v33  ;;  %v16942_v13 = vld [vmem:[#allocation5 + $0x380] ss:$16 sps:$4 sm:$0xff]  }
 0x3c3   :  { %v6007_v3 = vrot.slane %v15304_v4, %v20291_v50  ;;  %v6023_v37 = vrot.slane %v15306_v47, %v20291_v50  ;;  %v6039_v5 = vrot.slane %v15308_v40, %v20291_v50  ;;  %v15312_v58 = vcombine.high %v5239_v25, %v5246_v35  ;;  %13479 = vmatpush1.bf16.msra.mxu1 %v16939_v17  ;;  %v16948_v33 = vld [vmem:[#allocation5 + $0x3a0] ss:$16 sps:$4 sm:$0xff]   ;;  %v16951_v17 = vld [vmem:[#allocation5 + $0x3a8] ss:$16 sps:$4 sm:$0xff]  }
 0x3c4   :  { %v15314_v2 = vcombine.low %v5255_v28, %v5262_v14  ;;  %v15316_v46 = vcombine.high %v5255_v28, %v5262_v14  ;;  %v22016_v53 = vcombine.low %v22014_v49, %v22015_v61  ;;  %v6127_v10 = vrot.slane %v15310_v34, %v20291_v50  ;;  %12792 = vmatprep.subr.bf16.mxu0 %v16944_v19  ;;  %v16956_v19 = vld [vmem:[#allocation5 + $0x3c4] ss:$16 sps:$4 sm:$0xff]  }
 0x3c5   :  { %v6047_v44 = vcombine.low %v5991_v32, %v6007_v3  ;;  %v6079_v55 = vcombine.low %v6023_v37, %v6039_v5  ;;  %13480 = vmatprep.subr.bf16.mxu1 %v16947_v11  ;;  %v6143_v8 = vrot.slane %v15312_v58, %v20291_v50  ;;  %v6048_v28 = vcombine.high %v5991_v32, %v6007_v3  ;;  %v16959_v11 = vld [vmem:[#allocation5 + $0x3cc] ss:$16 sps:$4 sm:$0xff]  }
 0x3c6   :  { %v21350_v12 = vrot.slane %v22016_v53, %v20294_v16  ;;  %v6159_v25 = vrot.slane %v15314_v2, %v20291_v50  ;;  %v6175_v48 = vrot.slane %v15316_v46, %v20291_v50  ;;  %v6080_v42 = vcombine.high %v6023_v37, %v6039_v5  ;;  %12793 = vmatpush1.bf16.msra.mxu0 %v16942_v13  ;;  %v22018_v46 = vld [vmem:[#allocation32_spill] sm:$0xff] }
 0x3c7   :  { %v6055_v35 = vrot.slane %v6047_v44, %v20294_v16  ;;  %v6087_v26 = vrot.slane %v6079_v55, %v20294_v16  ;;  %v6183_v36 = vcombine.low %v6127_v10, %v6143_v8  ;;  %v6184_v14 = vcombine.high %v6127_v10, %v6143_v8  ;;  %13481 = vmatpush1.bf16.msra.mxu1 %v16945_v41  ;;  %v22019_v53 = vld [vmem:[#allocation24_spill] sm:$0xff] }
 0x3c8   :  { %v6215_v63 = vcombine.low %v6159_v25, %v6175_v48  ;;  %v6216_v21 = vcombine.high %v6159_v25, %v6175_v48  ;;  %v6062_v40 = vrot.slane %v6048_v28, %v20294_v16  ;;  %12794 = vmatprep.subr.bf16.mxu0 %v16950_v6  ;;  %13482 = vmatprep.subr.bf16.mxu1 %v16953_v29  ;;  %v16954_v29 = vld [vmem:[#allocation5 + $0x3c0] ss:$16 sps:$4 sm:$0xff]   ;;  %v16957_v8 = vld [vmem:[#allocation5 + $0x3c8] ss:$16 sps:$4 sm:$0xff]  }
 0x3c9   :  { %v6112_v4 = vcombine.high %v6055_v35, %v6087_v26  ;;  %v6111_v47 = vcombine.low %v6055_v35, %v6087_v26  ;;  %v6191_v34 = vrot.slane %v6183_v36, %v20294_v16  ;;  %v6094_v3 = vrot.slane %v6080_v42, %v20294_v16  ;;  %v16962_v35 = vld [vmem:[#allocation5 + $0x3e4] ss:$16 sps:$4 sm:$0xff]   ;;  %v16965_v26 = vld [vmem:[#allocation5 + $0x3ec] ss:$16 sps:$4 sm:$0xff]  }
 0x3ca   :  { %v6223_v32 = vrot.slane %v6215_v63, %v20294_v16  ;;  %v6198_v37 = vrot.slane %v6184_v14, %v20294_v16  ;;  %v6230_v5 = vrot.slane %v6216_v21, %v20294_v16  ;;  %v22017_v58 = vcombine.high %v22014_v49, %v22015_v61  ;;  %12795 = vmatpush1.bf16.msra.mxu0 %v16948_v33 }
 0x3cb   :  { %v22020_v13 = vcombine.low %v22018_v46, %v22019_v53  ;;  %v6114_v10 = vcombine.high %v6062_v40, %v6094_v3  ;;  %v6113_v6 = vcombine.low %v6062_v40, %v6094_v3  ;;  %13483 = vmatpush1.bf16.msra.mxu1 %v16951_v17  ;;  %v22021_v49 = vcombine.high %v22018_v46, %v22019_v53  ;;  %v16960_v3 = vld [vmem:[#allocation5 + $0x3e0] ss:$16 sps:$4 sm:$0xff]   ;;  %v16971_v46 = vld [vmem:[#allocation5 + $0x40c] ss:$16 sps:$4 sm:$0xff]  }
 0x3cc   :  { %v4734_v2 = vrot.slane %v22017_v58, %v20294_v16  ;;  %v6248_v44 = vcombine.high %v6191_v34, %v6223_v32  ;;  %v6247_v55 = vcombine.low %v6191_v34, %v6223_v32  ;;  %v6250_v25 = vcombine.high %v6198_v37, %v6230_v5  ;;  %12796 = vmatprep.subr.bf16.mxu0 %v16956_v19  ;;  %v16968_v58 = vld [vmem:[#allocation5 + $0x404] ss:$16 sps:$4 sm:$0xff]  }
 0x3cd   :  { %v4743_v41 = vrot.slane %v22020_v13, %v20294_v16  ;;  %v6249_v48 = vcombine.low %v6198_v37, %v6230_v5  ;;  %v4750_v61 = vrot.slane %v22021_v49, %v20294_v16  ;;  %13484 = vmatprep.subr.bf16.mxu1 %v16959_v11  ;;  %v22022_v36 = vcombine.low %v20924_v15, %v20927_v52 }
 0x3ce   :  { %v21376_v28 = vpack.c.bf16 %v6248_v44, %v6112_v4  ;;  %v21378_v42 = vpack.c.bf16 %v6247_v55, %v6111_v47  ;;  %v21384_v14 = vpack.c.bf16 %v6250_v25, %v6114_v10  ;;  %v22023_v33 = vcombine.high %v20924_v15, %v20927_v52  ;;  %12797 = vmatpush1.bf16.msra.mxu0 %v16954_v29  ;;  %v16963_v15 = vld [vmem:[#allocation5 + $0x3e8] ss:$16 sps:$4 sm:$0xff]   ;;  %v22027_v29 = vld [vmem:[#allocation41_spill] sm:$0xff] }
 0x3cf   :  { %v5271_v63 = vrot.slane %v22022_v36, %v20294_v16  ;;  %v21386_v21 = vpack.c.bf16 %v6249_v48, %v6113_v6  ;;  %v22024_v4 = vcombine.low %v21083_v20, %v21086_v22  ;;  %v22025_v40 = vcombine.high %v21083_v20, %v21086_v22  ;;  %13485 = vmatpush1.bf16.msra.mxu1 %v16957_v8  ;;  %v22026_v6 = vld [vmem:[#allocation21_spill] sm:$0xff] }
 0x3d0   :  { %v5278_v17 = vrot.slane %v22023_v33, %v20294_v16  ;;  %v15303_v11 = vcombine.low %v21350_v12, %v4734_v2  ;;  %v15305_v34 = vcombine.high %v21350_v12, %v4734_v2  ;;  %v15307_v32 = vcombine.low %v4743_v41, %v4750_v61  ;;  %12798 = vmatprep.subr.bf16.mxu0 %v16962_v35  ;;  %v16966_v48 = vld [vmem:[#allocation5 + $0x400] ss:$16 sps:$4 sm:$0xff]  }
 0x3d1   :  { %v5287_v47 = vrot.slane %v22024_v4, %v20294_v16  ;;  %v5294_v19 = vrot.slane %v22025_v40, %v20294_v16  ;;  %v15309_v52 = vcombine.high %v4743_v41, %v4750_v61  ;;  %13486 = vmatprep.subr.bf16.mxu1 %v16965_v26  ;;  %v22028_v8 = vcombine.low %v22026_v6, %v22027_v29  ;;  %v16969_v26 = vld [vmem:[#allocation5 + $0x408] ss:$16 sps:$4 sm:$0xff]   ;;  %v16977_v4 = vld [vmem:[#allocation5 + $0x42c] ss:$16 sps:$4 sm:$0xff]  }
 0x3d2   :  { %v15311_v37 = vcombine.low %v5271_v63, %v5278_v17  ;;  %v15313_v5 = vcombine.high %v5271_v63, %v5278_v17  ;;  %v5998_v53 = vrot.slane %v15303_v11, %v20291_v50  ;;  %v6014_v20 = vrot.slane %v15305_v34, %v20291_v50  ;;  %12799 = vmatpush1.bf16.msra.mxu0 %v16960_v3  ;;  %v16974_v17 = vld [vmem:[#allocation5 + $0x424] ss:$16 sps:$4 sm:$0xff]  }
 0x3d3   :  { %v6030_v22 = vrot.slane %v15307_v32, %v20291_v50  ;;  %v6046_v12 = vrot.slane %v15309_v52, %v20291_v50  ;;  %v15315_v44 = vcombine.low %v5287_v47, %v5294_v19  ;;  %v15317_v55 = vcombine.high %v5287_v47, %v5294_v19  ;;  %13487 = vmatpush1.bf16.msra.mxu1 %v16963_v15  ;;  %v16972_v52 = vld [vmem:[#allocation5 + $0x420] ss:$16 sps:$4 sm:$0xff]  }
 0x3d4   :  { %v6134_v2 = vrot.slane %v15311_v37, %v20291_v50  ;;  %v6150_v13 = vrot.slane %v15313_v5, %v20291_v50  ;;  %v6063_v41 = vcombine.low %v5998_v53, %v6014_v20  ;;  %v6064_v10 = vcombine.high %v5998_v53, %v6014_v20  ;;  %12811 = vmatprep.subr.bf16.mxu0 %v16968_v58 }
 0x3d5   :  { %v21412_v25 = vrot.slane %v22028_v8, %v20294_v16  ;;  %v6095_v49 = vcombine.low %v6030_v22, %v6046_v12  ;;  %v6166_v61 = vrot.slane %v15315_v44, %v20291_v50  ;;  %13499 = vmatprep.subr.bf16.mxu1 %v16971_v46  ;;  %v6182_v63 = vrot.slane %v15317_v55, %v20291_v50  ;;  %v16975_v46 = vld [vmem:[#allocation5 + $0x428] ss:$16 sps:$4 sm:$0xff]  }
 0x3d6   :  { %v6199_v35 = vcombine.low %v6134_v2, %v6150_v13  ;;  %v6071_v36 = vrot.slane %v6063_v41, %v20294_v16  ;;  %v6078_v33 = vrot.slane %v6064_v10, %v20294_v16  ;;  %v6096_v19 = vcombine.high %v6030_v22, %v6046_v12  ;;  %12801 = vmatmul.mubr.bf16.vlgmr.msra.gmra.mrb[120].mxu0 %v21170_v30  ;;  %v16983_v12 = vld [vmem:[#allocation5 + $0x44c] ss:$16 sps:$4 sm:$0xff]   ;;  %v22031_v41 = vld [vmem:[#allocation49_spill] sm:$0xff] }
 0x3d7   :  { %v6103_v47 = vrot.slane %v6095_v49, %v20294_v16  ;;  %v6200_v11 = vcombine.high %v6134_v2, %v6150_v13  ;;  %13489 = vmatmul.mubr.bf16.vlgmr.msra.gmra.mrb[136].mxu1 %v21170_v30  ;;  %v6231_v34 = vcombine.low %v6166_v61, %v6182_v63  ;;  %v6232_v32 = vcombine.high %v6166_v61, %v6182_v63  ;;  %v16980_v30 = vld [vmem:[#allocation5 + $0x444] ss:$16 sps:$4 sm:$0xff]   ;;  %v22030_v44 = vld [vmem:[#allocation34_spill] sm:$0xff] }
 0x3d8   :  { %v6207_v40 = vrot.slane %v6199_v35, %v20294_v16  ;;  %v22029_v3 = vcombine.high %v22026_v6, %v22027_v29  ;;  %12812 = vmatpush1.bf16.msra.mxu0 %v16966_v48  ;;  %12843 = vmatprep.mubr.bf16.mxu0 %v21206_v1  ;;  %v6110_v58 = vrot.slane %v6096_v19, %v20294_v16  ;;  %v16978_v48 = vld [vmem:[#allocation5 + $0x440] ss:$16 sps:$4 sm:$0xff]  }
 0x3d9   :  { %v6116_v37 = vcombine.high %v6071_v36, %v6103_v47  ;;  %v6115_v5 = vcombine.low %v6071_v36, %v6103_v47  ;;  %13500 = vmatpush1.bf16.msra.mxu1 %v16969_v26  ;;  %13531 = vmatprep.mubr.bf16.mxu1 %v21206_v1  ;;  %v6239_v53 = vrot.slane %v6231_v34, %v20294_v16  ;;  %v16986_v47 = vld [vmem:[#allocation5 + $0x464] ss:$16 sps:$4 sm:$0xff]   ;;  %v16989_v34 = vld [vmem:[#allocation5 + $0x46c] ss:$16 sps:$4 sm:$0xff]  }
 0x3da   :  { %v4838_v15 = vrot.slane %v22029_v3, %v20294_v16  ;;  %v6214_v20 = vrot.slane %v6200_v11, %v20294_v16  ;;  %v6246_v22 = vrot.slane %v6232_v32, %v20294_v16  ;;  %12813 = vmatprep.subr.bf16.mxu0 %v16974_v17  ;;  %13501 = vmatprep.subr.bf16.mxu1 %v16977_v4  ;;  %v16981_v4 = vld [vmem:[#allocation5 + $0x448] ss:$16 sps:$4 sm:$0xff]  }
 0x3db   :  { %v6118_v2 = vcombine.high %v6078_v33, %v6110_v58  ;;  %v6117_v13 = vcombine.low %v6078_v33, %v6110_v58  ;;  %v22032_v55 = vcombine.low %v22030_v44, %v22031_v41  ;;  %v6252_v6 = vcombine.high %v6207_v40, %v6239_v53 }
 0x3dc   :  { %v6251_v1 = vcombine.low %v6207_v40, %v6239_v53  ;;  %v6254_v29 = vcombine.high %v6214_v20, %v6246_v22  ;;  %v6253_v8 = vcombine.low %v6214_v20, %v6246_v22  ;;  %12814 = vmatpush1.bf16.msra.mxu0 %v16972_v52  ;;  %v22033_v49 = vcombine.high %v22030_v44, %v22031_v41 }
 0x3dd   :  { %v4847_v10 = vrot.slane %v22032_v55, %v20294_v16  ;;  %v22034_v35 = vcombine.low %v20930_v0, %v20933_v7  ;;  %v22035_v36 = vcombine.high %v20930_v0, %v20933_v7  ;;  %v22036_v33 = vcombine.low %v21105_v18, %v21108_v31  ;;  %13502 = vmatpush1.bf16.msra.mxu1 %v16975_v46 }
 0x3de   :  { %v4854_v61 = vrot.slane %v22033_v49, %v20294_v16  ;;  %12815 = vmatprep.subr.bf16.mxu0 %v16980_v30  ;;  %v21452_v40 = vpack.c.bf16 %v6252_v6, %v6116_v37  ;;  %v21454_v19 = vpack.c.bf16 %v6251_v1, %v6115_v5  ;;  %v21456_v11 = vpack.c.bf16 %v6254_v29, %v6118_v2  ;;  %v16984_v30 = vld [vmem:[#allocation5 + $0x460] ss:$16 sps:$4 sm:$0xff]  }
 0x3df   :  { %v5375_v26 = vrot.slane %v22034_v35, %v20294_v16  ;;  %v5382_v63 = vrot.slane %v22035_v36, %v20294_v16  ;;  %v5391_v17 = vrot.slane %v22036_v33, %v20294_v16  ;;  %13503 = vmatprep.subr.bf16.mxu1 %v16983_v12  ;;  %v21458_v32 = vpack.c.bf16 %v6253_v8, %v6117_v13  ;;  %v16995_v13 = vld [vmem:[#allocation5 + $0x48c] ss:$16 sps:$4 sm:$0xff]   ;;  %v22038_v8 = vld [vmem:[#allocation29_spill] sm:$0xff] }
 0x3e0   :  { %v22037_v0 = vcombine.high %v21105_v18, %v21108_v31  ;;  %v15318_v3 = vcombine.low %v21412_v25, %v4838_v15  ;;  %v15320_v52 = vcombine.high %v21412_v25, %v4838_v15  ;;  %v15322_v58 = vcombine.low %v4847_v10, %v4854_v61  ;;  %12816 = vmatpush1.bf16.msra.mxu0 %v16978_v48  ;;  %v16987_v18 = vld [vmem:[#allocation5 + $0x468] ss:$16 sps:$4 sm:$0xff]   ;;  %v16992_v31 = vld [vmem:[#allocation5 + $0x484] ss:$16 sps:$4 sm:$0xff]   ;;  %v16990_v35 = vld [vmem:[#allocation5 + $0x480] ss:$16 sps:$4 sm:$0xff]  }
 0x3e1   :  { %v15324_v37 = vcombine.high %v4847_v10, %v4854_v61  ;;  %v15326_v46 = vcombine.low %v5375_v26, %v5382_v63  ;;  %v15328_v5 = vcombine.high %v5375_v26, %v5382_v63  ;;  %13504 = vmatpush1.bf16.msra.mxu1 %v16981_v4  ;;  %12817 = vmatprep.subr.bf16.mxu0 %v16986_v47  ;;  %v22039_v48 = vld [vmem:[#allocation46_spill] sm:$0xff]  ;;  %v16998_v4 = vld [vmem:[#allocation5 + $0x4a4] ss:$16 sps:$4 sm:$0xff]  }
 0x3e2   :  { %v5398_v7 = vrot.slane %v22037_v0, %v20294_v16  ;;  %v6263_v53 = vrot.slane %v15318_v3, %v20291_v50  ;;  %v6279_v20 = vrot.slane %v15320_v52, %v20291_v50  ;;  %v6295_v2 = vrot.slane %v15322_v58, %v20291_v50  ;;  %13505 = vmatprep.subr.bf16.mxu1 %v16989_v34 }
 0x3e3   :  { %v6311_v25 = vrot.slane %v15324_v37, %v20291_v50  ;;  %v6399_v15 = vrot.slane %v15326_v46, %v20291_v50  ;;  %v6415_v41 = vrot.slane %v15328_v5, %v20291_v50  ;;  %v22040_v49 = vcombine.low %v22038_v8, %v22039_v48 }
 0x3e4   :  { %v15330_v22 = vcombine.low %v5391_v17, %v5398_v7  ;;  %v15332_v12 = vcombine.high %v5391_v17, %v5398_v7  ;;  %v6319_v44 = vcombine.low %v6263_v53, %v6279_v20  ;;  %v6320_v1 = vcombine.high %v6263_v53, %v6279_v20  ;;  %12818 = vmatpush1.bf16.msra.mxu0 %v16984_v30  ;;  %v16993_v17 = vld [vmem:[#allocation5 + $0x488] ss:$16 sps:$4 sm:$0xff]   ;;  %v17001_v7 = vld [vmem:[#allocation5 + $0x4ac] ss:$16 sps:$4 sm:$0xff]   ;;  %v16996_v20 = vld [vmem:[#allocation5 + $0x4a0] ss:$16 sps:$4 sm:$0xff]  }
 0x3e5   :  { %v6351_v6 = vcombine.low %v6295_v2, %v6311_v25  ;;  %v6352_v29 = vcombine.high %v6295_v2, %v6311_v25  ;;  %v21478_v61 = vrot.slane %v22040_v49, %v20294_v16  ;;  %v6455_v36 = vcombine.low %v6399_v15, %v6415_v41  ;;  %13506 = vmatpush1.bf16.msra.mxu1 %v16987_v18  ;;  %v16999_v25 = vld [vmem:[#allocation5 + $0x4a8] ss:$16 sps:$4 sm:$0xff]  }
 0x3e6   :  { %v6431_v55 = vrot.slane %v15330_v22, %v20291_v50  ;;  %v6447_v10 = vrot.slane %v15332_v12, %v20291_v50  ;;  %v6327_v26 = vrot.slane %v6319_v44, %v20294_v16  ;;  %v6456_v33 = vcombine.high %v6399_v15, %v6415_v41  ;;  %12819 = vmatprep.subr.bf16.mxu0 %v16992_v31  ;;  %v17004_v15 = vld [vmem:[#allocation5 + $0x4c4] ss:$16 sps:$4 sm:$0xff]   ;;  %v22043_v44 = vld [vmem:[#allocation48_spill] sm:$0xff] }
 0x3e7   :  { %v6359_v47 = vrot.slane %v6351_v6, %v20294_v16  ;;  %v6334_v34 = vrot.slane %v6320_v1, %v20294_v16  ;;  %v6366_v0 = vrot.slane %v6352_v29, %v20294_v16  ;;  %13507 = vmatprep.subr.bf16.mxu1 %v16995_v13  ;;  %v6463_v3 = vrot.slane %v6455_v36, %v20294_v16  ;;  %v22042_v13 = vld [vmem:[#allocation26_spill] sm:$0xff] }
 0x3e8   :  { %v6487_v63 = vcombine.low %v6431_v55, %v6447_v10  ;;  %v6470_v58 = vrot.slane %v6456_v33, %v20294_v16  ;;  %v6488_v37 = vcombine.high %v6431_v55, %v6447_v10  ;;  %12820 = vmatpush1.bf16.msra.mxu0 %v16990_v35  ;;  %v22041_v31 = vcombine.high %v22038_v8, %v22039_v48  ;;  %v17007_v8 = vld [vmem:[#allocation5 + $0x4cc] ss:$16 sps:$4 sm:$0xff]  }
 0x3e9   :  { %v6384_v46 = vcombine.high %v6327_v26, %v6359_v47  ;;  %v6383_v5 = vcombine.low %v6327_v26, %v6359_v47  ;;  %v6386_v30 = vcombine.high %v6334_v34, %v6366_v0  ;;  %v6385_v53 = vcombine.low %v6334_v34, %v6366_v0  ;;  %13508 = vmatpush1.bf16.msra.mxu1 %v16993_v17  ;;  %v17002_v0 = vld [vmem:[#allocation5 + $0x4c0] ss:$16 sps:$4 sm:$0xff]  }
 0x3ea   :  { %v6495_v52 = vrot.slane %v6487_v63, %v20294_v16  ;;  %v6502_v18 = vrot.slane %v6488_v37, %v20294_v16  ;;  %v4870_v2 = vrot.slane %v22041_v31, %v20294_v16  ;;  %12821 = vmatprep.subr.bf16.mxu0 %v16998_v4  ;;  %v22044_v41 = vcombine.low %v22042_v13, %v22043_v44 }
 0x3eb   :  { %v22045_v10 = vcombine.high %v22042_v13, %v22043_v44  ;;  %v22046_v1 = vcombine.low %v20936_v51, %v20939_v24  ;;  %13509 = vmatprep.subr.bf16.mxu1 %v17001_v7  ;;  %v22047_v36 = vcombine.high %v20936_v51, %v20939_v24  ;;  %v22048_v33 = vcombine.low %v21111_v59, %v21114_v62  ;;  %v17011_v13 = vld [vmem:[#allocation5 + $0x4e8] ss:$16 sps:$4 sm:$0xff]   ;;  %v17016_v44 = vld [vmem:[#allocation5 + $0x504] ss:$16 sps:$4 sm:$0xff]  }
 0x3ec   :  { %v6520_v22 = vcombine.high %v6463_v3, %v6495_v52  ;;  %v6519_v12 = vcombine.low %v6463_v3, %v6495_v52  ;;  %v4879_v55 = vrot.slane %v22044_v41, %v20294_v16  ;;  %v6522_v35 = vcombine.high %v6470_v58, %v6502_v18  ;;  %12822 = vmatpush1.bf16.msra.mxu0 %v16996_v20  ;;  %v17005_v52 = vld [vmem:[#allocation5 + $0x4c8] ss:$16 sps:$4 sm:$0xff]  }
 0x3ed   :  { %v4886_v6 = vrot.slane %v22045_v10, %v20294_v16  ;;  %v5407_v29 = vrot.slane %v22046_v1, %v20294_v16  ;;  %v6521_v26 = vcombine.low %v6470_v58, %v6502_v18  ;;  %v5414_v63 = vrot.slane %v22047_v36, %v20294_v16  ;;  %13510 = vmatpush1.bf16.msra.mxu1 %v16999_v25  ;;  %v17010_v58 = vld [vmem:[#allocation5 + $0x4e4] ss:$16 sps:$4 sm:$0xff]   ;;  %v17008_v18 = vld [vmem:[#allocation5 + $0x4e0] ss:$16 sps:$4 sm:$0xff]  }
 0x3ee   :  { %v21504_v48 = vpack.c.bf16 %v6520_v22, %v6384_v46  ;;  %v21506_v49 = vpack.c.bf16 %v6519_v12, %v6383_v5  ;;  %v5423_v17 = vrot.slane %v22048_v33, %v20294_v16  ;;  %v22049_v4 = vcombine.high %v21111_v59, %v21114_v62  ;;  %12823 = vmatprep.subr.bf16.mxu0 %v17004_v15  ;;  %v17013_v62 = vld [vmem:[#allocation5 + $0x4ec] ss:$16 sps:$4 sm:$0xff]   ;;  %v17014_v33 = vld [vmem:[#allocation5 + $0x500] ss:$16 sps:$4 sm:$0xff]  }
 0x3ef   :  { %v15319_v34 = vcombine.low %v21478_v61, %v4870_v2  ;;  %v21521_v7 = vpack.c.bf16 %v6522_v35, %v6386_v30  ;;  %v21523_v3 = vpack.c.bf16 %v6521_v26, %v6385_v53  ;;  %v15321_v51 = vcombine.high %v21478_v61, %v4870_v2  ;;  %13511 = vmatprep.subr.bf16.mxu1 %v17007_v8 }
 0x3f0   :  { %v5430_v47 = vrot.slane %v22049_v4, %v20294_v16  ;;  %v15323_v24 = vcombine.low %v4879_v55, %v4886_v6  ;;  %v15325_v46 = vcombine.high %v4879_v55, %v4886_v6  ;;  %v15327_v59 = vcombine.low %v5407_v29, %v5414_v63  ;;  %12824 = vmatpush1.bf16.msra.mxu0 %v17002_v0  ;;  %v17019_v6 = vld [vmem:[#allocation5 + $0x50c] ss:$16 sps:$4 sm:$0xff]  }
 0x3f1   :  { %v6270_v37 = vrot.slane %v15319_v34, %v20291_v50  ;;  %v6286_v5 = vrot.slane %v15321_v51, %v20291_v50  ;;  %v15329_v20 = vcombine.high %v5407_v29, %v5414_v63  ;;  %13512 = vmatpush1.bf16.msra.mxu1 %v17005_v52  ;;  %12825 = vmatprep.subr.bf16.mxu0 %v17010_v58 }
 0x3f2   :  { %v6302_v30 = vrot.slane %v15323_v24, %v20291_v50  ;;  %v15331_v53 = vcombine.low %v5423_v17, %v5430_v47  ;;  %v6318_v22 = vrot.slane %v15325_v46, %v20291_v50  ;;  %v6406_v61 = vrot.slane %v15327_v59, %v20291_v50  ;;  %13513 = vmatprep.subr.bf16.mxu1 %v17013_v62  ;;  %v17025_v24 = vld [vmem:[#allocation5 + $0x52c] ss:$16 sps:$4 sm:$0xff]  }
 0x3f3   :  { %v15333_v12 = vcombine.high %v5423_v17, %v5430_v47  ;;  %v6335_v31 = vcombine.low %v6270_v37, %v6286_v5  ;;  %v6422_v2 = vrot.slane %v15329_v20, %v20291_v50  ;;  %v6336_v15 = vcombine.high %v6270_v37, %v6286_v5  ;;  %v17022_v47 = vld [vmem:[#allocation5 + $0x524] ss:$16 sps:$4 sm:$0xff]   ;;  %v17020_v5 = vld [vmem:[#allocation5 + $0x520] ss:$16 sps:$4 sm:$0xff]  }
 0x3f4   :  { %v6438_v25 = vrot.slane %v15331_v53, %v20291_v50  ;;  %v6367_v41 = vcombine.low %v6302_v30, %v6318_v22  ;;  %v6368_v10 = vcombine.high %v6302_v30, %v6318_v22  ;;  %12826 = vmatpush1.bf16.msra.mxu0 %v17008_v18  ;;  %v17023_v53 = vld [vmem:[#allocation5 + $0x528] ss:$16 sps:$4 sm:$0xff]   ;;  %v17028_v22 = vld [vmem:[#allocation5 + $0x544] ss:$16 sps:$4 sm:$0xff]   ;;  %v17031_v18 = vld [vmem:[#allocation5 + $0x54c] ss:$16 sps:$4 sm:$0xff]  }
 0x3f5   :  { %v6454_v55 = vrot.slane %v15333_v12, %v20291_v50  ;;  %v6343_v1 = vrot.slane %v6335_v31, %v20294_v16  ;;  %v6471_v29 = vcombine.low %v6406_v61, %v6422_v2  ;;  %v6472_v8 = vcombine.high %v6406_v61, %v6422_v2  ;;  %13514 = vmatpush1.bf16.msra.mxu1 %v17011_v13  ;;  %v17017_v50 = vld [vmem:[#allocation5 + $0x508] ss:$16 sps:$4 sm:$0xff]   ;;  %v17026_v2 = vld [vmem:[#allocation5 + $0x540] ss:$16 sps:$4 sm:$0xff]   ;;  %v17037_v13 = vld [vmem:[#allocation5 + $0x56c] ss:$16 sps:$4 sm:$0xff]  }
 0x3f6   :  { %v6375_v35 = vrot.slane %v6367_v41, %v20294_v16  ;;  %v6382_v36 = vrot.slane %v6368_v10, %v20294_v16  ;;  %v6350_v4 = vrot.slane %v6336_v15, %v20294_v16  ;;  %12827 = vmatprep.subr.bf16.mxu0 %v17016_v44  ;;  %13515 = vmatprep.subr.bf16.mxu1 %v17019_v6  ;;  %v17034_v15 = vld [vmem:[#allocation5 + $0x564] ss:$16 sps:$4 sm:$0xff]   ;;  %v17032_v44 = vld [vmem:[#allocation5 + $0x560] ss:$16 sps:$4 sm:$0xff]   ;;  %v17035_v41 = vld [vmem:[#allocation5 + $0x568] ss:$16 sps:$4 sm:$0xff]  }
 0x3f7   :  { %v6503_v26 = vcombine.low %v6438_v25, %v6454_v55  ;;  %v6504_v63 = vcombine.high %v6438_v25, %v6454_v55  ;;  %v6479_v17 = vrot.slane %v6471_v29, %v20294_v16  ;;  %v6486_v58 = vrot.slane %v6472_v8, %v20294_v16  ;;  %v17029_v25 = vld [vmem:[#allocation5 + $0x548] ss:$16 sps:$4 sm:$0xff]   ;;  %v17040_v55 = vld [vmem:[#allocation5 + $0x584] ss:$16 sps:$4 sm:$0xff]   ;;  %v17043_v10 = vld [vmem:[#allocation5 + $0x58c] ss:$16 sps:$4 sm:$0xff]  }
 0x3f8   :  { %v6388_v34 = vcombine.high %v6343_v1, %v6375_v35  ;;  %v6387_v51 = vcombine.low %v6343_v1, %v6375_v35  ;;  %v6390_v52 = vcombine.high %v6350_v4, %v6382_v36  ;;  %v6389_v46 = vcombine.low %v6350_v4, %v6382_v36  ;;  %12828 = vmatpush1.bf16.msra.mxu0 %v17014_v33  ;;  %v17038_v6 = vld [vmem:[#allocation5 + $0x580] ss:$16 sps:$4 sm:$0xff]   ;;  %v17041_v1 = vld [vmem:[#allocation5 + $0x588] ss:$16 sps:$4 sm:$0xff]   ;;  %v17046_v29 = vld [vmem:[#allocation5 + $0x5a4] ss:$16 sps:$4 sm:$0xff]  }
 0x3f9   :  { %v6511_v0 = vrot.slane %v6503_v26, %v20294_v16  ;;  %v6518_v37 = vrot.slane %v6504_v63, %v20294_v16  ;;  %13516 = vmatpush1.bf16.msra.mxu1 %v17017_v50  ;;  %12829 = vmatprep.subr.bf16.mxu0 %v17022_v47  ;;  %v17049_v8 = vld [vmem:[#allocation5 + $0x5ac] ss:$16 sps:$4 sm:$0xff]   ;;  %v17044_v35 = vld [vmem:[#allocation5 + $0x5a0] ss:$16 sps:$4 sm:$0xff]   ;;  %v17047_v26 = vld [vmem:[#allocation5 + $0x5a8] ss:$16 sps:$4 sm:$0xff]  }
 0x3fa   :  { %13517 = vmatprep.subr.bf16.mxu1 %v17025_v24  ;;  %v17052_v36 = vld [vmem:[#allocation5 + $0x5c4] ss:$16 sps:$4 sm:$0xff]   ;;  %v17055_v63 = vld [vmem:[#allocation5 + $0x5cc] ss:$16 sps:$4 sm:$0xff]   ;;  %v17050_v33 = vld [vmem:[#allocation5 + $0x5c0] ss:$16 sps:$4 sm:$0xff]  }
 0x3fb   :  { %v6524_v59 = vcombine.high %v6479_v17, %v6511_v0  ;;  %v6523_v62 = vcombine.low %v6479_v17, %v6511_v0  ;;  %v6526_v30 = vcombine.high %v6486_v58, %v6518_v37  ;;  %v6525_v20 = vcombine.low %v6486_v58, %v6518_v37  ;;  %v17053_v17 = vld [vmem:[#allocation5 + $0x5c8] ss:$16 sps:$4 sm:$0xff]   ;;  %v17058_v4 = vld [vmem:[#allocation5 + $0x5e4] ss:$16 sps:$4 sm:$0xff]   ;;  %v17061_v50 = vld [vmem:[#allocation5 + $0x5ec] ss:$16 sps:$4 sm:$0xff]  }
 0x3fc   :  { %12830 = vmatpush1.bf16.msra.mxu0 %v17020_v5  ;;  %v17056_v47 = vld [vmem:[#allocation5 + $0x5e0] ss:$16 sps:$4 sm:$0xff]   ;;  %v17064_v0 = vld [vmem:[#allocation5 + $0x604] ss:$16 sps:$4 sm:$0xff]   ;;  %v17073_v37 = vld [vmem:[#allocation5 + $0x62c] ss:$16 sps:$4 sm:$0xff]  }
 0x3fd   :  { %v21542_v61 = vpack.c.bf16 %v6524_v59, %v6388_v34  ;;  %v21544_v12 = vpack.c.bf16 %v6523_v62, %v6387_v51  ;;  %v21546_v31 = vpack.c.bf16 %v6526_v30, %v6390_v52  ;;  %v21548_v16 = vpack.c.bf16 %v6525_v20, %v6389_v46  ;;  %13518 = vmatpush1.bf16.msra.mxu1 %v17023_v53  ;;  %v17059_v34 = vld [vmem:[#allocation5 + $0x5e8] ss:$16 sps:$4 sm:$0xff]   ;;  %v17067_v51 = vld [vmem:[#allocation5 + $0x60c] ss:$16 sps:$4 sm:$0xff]   ;;  %v17062_v24 = vld [vmem:[#allocation5 + $0x600] ss:$16 sps:$4 sm:$0xff]  }
 0x3fe   :  { %12831 = vmatprep.subr.bf16.mxu0 %v17028_v22  ;;  %13519 = vmatprep.subr.bf16.mxu1 %v17031_v18  ;;  %v17065_v52 = vld [vmem:[#allocation5 + $0x608] ss:$16 sps:$4 sm:$0xff]   ;;  %v17070_v58 = vld [vmem:[#allocation5 + $0x624] ss:$16 sps:$4 sm:$0xff]   ;;  %v17068_v46 = vld [vmem:[#allocation5 + $0x620] ss:$16 sps:$4 sm:$0xff]  }
 0x3ff   :  { %v17071_v59 = vld [vmem:[#allocation5 + $0x628] ss:$16 sps:$4 sm:$0xff]   ;;  %v17076_v62 = vld [vmem:[#allocation5 + $0x644] ss:$16 sps:$4 sm:$0xff]   ;;  %v17079_v5 = vld [vmem:[#allocation5 + $0x64c] ss:$16 sps:$4 sm:$0xff]  }
 0x400   :  { %12832 = vmatpush1.bf16.msra.mxu0 %v17026_v2  ;;  %v17074_v30 = vld [vmem:[#allocation5 + $0x640] ss:$16 sps:$4 sm:$0xff]   ;;  %v17077_v20 = vld [vmem:[#allocation5 + $0x648] ss:$16 sps:$4 sm:$0xff]   ;;  %v17082_v53 = vld [vmem:[#allocation5 + $0x664] ss:$16 sps:$4 sm:$0xff]  }
 0x401   :  { %13520 = vmatpush1.bf16.msra.mxu1 %v17029_v25  ;;  %12833 = vmatprep.subr.bf16.mxu0 %v17034_v15  ;;  %v17080_v22 = vld [vmem:[#allocation5 + $0x660] ss:$16 sps:$4 sm:$0xff]   ;;  %v17083_v18 = vld [vmem:[#allocation5 + $0x668] ss:$16 sps:$4 sm:$0xff]   ;;  %v17088_v2 = vld [vmem:[#allocation5 + $0x684] ss:$16 sps:$4 sm:$0xff]  }
 0x402   :  { %13521 = vmatprep.subr.bf16.mxu1 %v17037_v13  ;;  %v17091_v25 = vld [vmem:[#allocation5 + $0x68c] ss:$16 sps:$4 sm:$0xff]   ;;  %v17089_v15 = vld [vmem:[#allocation5 + $0x688] ss:$16 sps:$4 sm:$0xff]   ;;  %v17094_v13 = vld [vmem:[#allocation5 + $0x6a4] ss:$16 sps:$4 sm:$0xff]  }
 0x404   :  { %12834 = vmatpush1.bf16.msra.mxu0 %v17032_v44  ;;  %v17097_v44 = vld [vmem:[#allocation5 + $0x6ac] ss:$16 sps:$4 sm:$0xff]  }
 0x405   :  { %13522 = vmatpush1.bf16.msra.mxu1 %v17035_v41  ;;  %12835 = vmatprep.subr.bf16.mxu0 %v17040_v55  ;;  %v17092_v41 = vld [vmem:[#allocation5 + $0x6a0] ss:$16 sps:$4 sm:$0xff]   ;;  %v17095_v55 = vld [vmem:[#allocation5 + $0x6a8] ss:$16 sps:$4 sm:$0xff]  }
 0x406   :  { %13523 = vmatprep.subr.bf16.mxu1 %v17043_v10  ;;  %v17100_v10 = vld [vmem:[#allocation5 + $0x6c4] ss:$16 sps:$4 sm:$0xff]  }
 0x408   :  { %12836 = vmatpush1.bf16.msra.mxu0 %v17038_v6  ;;  %v17103_v6 = vld [vmem:[#allocation5 + $0x6cc] ss:$16 sps:$4 sm:$0xff]  }
 0x409   :  { %13524 = vmatpush1.bf16.msra.mxu1 %v17041_v1  ;;  %12837 = vmatprep.subr.bf16.mxu0 %v17046_v29  ;;  %v17098_v1 = vld [vmem:[#allocation5 + $0x6c0] ss:$16 sps:$4 sm:$0xff]   ;;  %v17101_v29 = vld [vmem:[#allocation5 + $0x6c8] ss:$16 sps:$4 sm:$0xff]  }
 0x40a   :  { %13525 = vmatprep.subr.bf16.mxu1 %v17049_v8  ;;  %v17106_v8 = vld [vmem:[#allocation5 + $0x6e4] ss:$16 sps:$4 sm:$0xff]  }
 0x40c   :  { %12838 = vmatpush1.bf16.msra.mxu0 %v17044_v35  ;;  %v17109_v35 = vld [vmem:[#allocation5 + $0x6ec] ss:$16 sps:$4 sm:$0xff]  }
 0x40d   :  { %13526 = vmatpush1.bf16.msra.mxu1 %v17047_v26  ;;  %12839 = vmatprep.subr.bf16.mxu0 %v17052_v36  ;;  %v17104_v26 = vld [vmem:[#allocation5 + $0x6e0] ss:$16 sps:$4 sm:$0xff]   ;;  %v17107_v36 = vld [vmem:[#allocation5 + $0x6e8] ss:$16 sps:$4 sm:$0xff]  }
 0x40e   :  { %13527 = vmatprep.subr.bf16.mxu1 %v17055_v63  ;;  %v17112_v63 = vld [vmem:[#allocation5 + $0x704] ss:$16 sps:$4 sm:$0xff]  }
 0x410   :  { %12840 = vmatpush1.bf16.msra.mxu0 %v17050_v33  ;;  %v17115_v33 = vld [vmem:[#allocation5 + $0x70c] ss:$16 sps:$4 sm:$0xff]  }
 0x411   :  { %13528 = vmatpush1.bf16.msra.mxu1 %v17053_v17  ;;  %12841 = vmatprep.subr.bf16.mxu0 %v17058_v4  ;;  %v17110_v17 = vld [vmem:[#allocation5 + $0x700] ss:$16 sps:$4 sm:$0xff]   ;;  %v17113_v4 = vld [vmem:[#allocation5 + $0x708] ss:$16 sps:$4 sm:$0xff]  }
 0x412   :  { %13529 = vmatprep.subr.bf16.mxu1 %v17061_v50  ;;  %v17118_v50 = vld [vmem:[#allocation5 + $0x724] ss:$16 sps:$4 sm:$0xff]  }
 0x414   :  { %12842 = vmatpush1.bf16.msra.mxu0 %v17056_v47  ;;  %v17121_v47 = vld [vmem:[#allocation5 + $0x72c] ss:$16 sps:$4 sm:$0xff]  }
 0x415   :  { %13530 = vmatpush1.bf16.msra.mxu1 %v17059_v34  ;;  %12854 = vmatprep.subr.bf16.mxu0 %v17064_v0  ;;  %v17116_v34 = vld [vmem:[#allocation5 + $0x720] ss:$16 sps:$4 sm:$0xff]   ;;  %v17119_v0 = vld [vmem:[#allocation5 + $0x728] ss:$16 sps:$4 sm:$0xff]  }
 0x416   :  { %13542 = vmatprep.subr.bf16.mxu1 %v17067_v51  ;;  %v17124_v51 = vld [vmem:[#allocation5 + $0x744] ss:$16 sps:$4 sm:$0xff]  }
 0x417   :  { %12844 = vmatmul.mubr.bf16.vlgmr.msra.gmra.mrb[120].mxu0 %v21208_v38 }
 0x418   :  { %13532 = vmatmul.mubr.bf16.vlgmr.msra.gmra.mrb[136].mxu1 %v21208_v38  ;;  %12855 = vmatpush1.bf16.msra.mxu0 %v17062_v24  ;;  %v17085_v38 = vld [vmem:[#allocation5 + $0x66c] ss:$16 sps:$4 sm:$0xff]  }
 0x419   :  { %12886 = vmatprep.mubr.bf16.mxu0 %v21222_v45  ;;  %13543 = vmatpush1.bf16.msra.mxu1 %v17065_v52  ;;  %v17127_v24 = vld [vmem:[#allocation5 + $0x74c] ss:$16 sps:$4 sm:$0xff]   ;;  %v17122_v52 = vld [vmem:[#allocation5 + $0x740] ss:$16 sps:$4 sm:$0xff]  }
 0x41a   :  { %13574 = vmatprep.mubr.bf16.mxu1 %v21222_v45  ;;  %12856 = vmatprep.subr.bf16.mxu0 %v17070_v58  ;;  %v17086_v45 = vld [vmem:[#allocation5 + $0x680] ss:$16 sps:$4 sm:$0xff]   ;;  %v17125_v58 = vld [vmem:[#allocation5 + $0x748] ss:$16 sps:$4 sm:$0xff]  }
 0x41b   :  { %13544 = vmatprep.subr.bf16.mxu1 %v17073_v37  ;;  %v17130_v37 = vld [vmem:[#allocation5 + $0x764] ss:$16 sps:$4 sm:$0xff]  }
 0x41c   :  { %12857 = vmatpush1.bf16.msra.mxu0 %v17068_v46  ;;  %v17133_v46 = vld [vmem:[#allocation5 + $0x76c] ss:$16 sps:$4 sm:$0xff]  }
 0x41d   :  { %13545 = vmatpush1.bf16.msra.mxu1 %v17071_v59  ;;  %12858 = vmatprep.subr.bf16.mxu0 %v17076_v62  ;;  %v17128_v59 = vld [vmem:[#allocation5 + $0x760] ss:$16 sps:$4 sm:$0xff]   ;;  %v17131_v62 = vld [vmem:[#allocation5 + $0x768] ss:$16 sps:$4 sm:$0xff]  }
 0x41e   :  { %13546 = vmatprep.subr.bf16.mxu1 %v17079_v5  ;;  %v17136_v5 = vld [vmem:[#allocation5 + $0x784] ss:$16 sps:$4 sm:$0xff]  }
 0x420   :  { %12859 = vmatpush1.bf16.msra.mxu0 %v17074_v30  ;;  %v17139_v30 = vld [vmem:[#allocation5 + $0x78c] ss:$16 sps:$4 sm:$0xff]  }
 0x421   :  { %13547 = vmatpush1.bf16.msra.mxu1 %v17077_v20  ;;  %12860 = vmatprep.subr.bf16.mxu0 %v17082_v53  ;;  %v17134_v20 = vld [vmem:[#allocation5 + $0x780] ss:$16 sps:$4 sm:$0xff]   ;;  %v17137_v53 = vld [vmem:[#allocation5 + $0x788] ss:$16 sps:$4 sm:$0xff]  }
 0x422   :  { %13548 = vmatprep.subr.bf16.mxu1 %v17085_v38  ;;  %v17142_v38 = vld [vmem:[#allocation5 + $0x7a4] ss:$16 sps:$4 sm:$0xff]  }
 0x424   :  { %12861 = vmatpush1.bf16.msra.mxu0 %v17080_v22  ;;  %v17145_v22 = vld [vmem:[#allocation5 + $0x7ac] ss:$16 sps:$4 sm:$0xff]  }
 0x425   :  { %13549 = vmatpush1.bf16.msra.mxu1 %v17083_v18  ;;  %12862 = vmatprep.subr.bf16.mxu0 %v17088_v2  ;;  %v17140_v18 = vld [vmem:[#allocation5 + $0x7a0] ss:$16 sps:$4 sm:$0xff]   ;;  %v17143_v2 = vld [vmem:[#allocation5 + $0x7a8] ss:$16 sps:$4 sm:$0xff]  }
 0x426   :  { %13550 = vmatprep.subr.bf16.mxu1 %v17091_v25  ;;  %v17148_v25 = vld [vmem:[#allocation5 + $0x7c4] ss:$16 sps:$4 sm:$0xff]  }
 0x428   :  { %12863 = vmatpush1.bf16.msra.mxu0 %v17086_v45  ;;  %v17151_v45 = vld [vmem:[#allocation5 + $0x7cc] ss:$16 sps:$4 sm:$0xff]  }
 0x429   :  { %13551 = vmatpush1.bf16.msra.mxu1 %v17089_v15  ;;  %12864 = vmatprep.subr.bf16.mxu0 %v17094_v13  ;;  %v17146_v15 = vld [vmem:[#allocation5 + $0x7c0] ss:$16 sps:$4 sm:$0xff]   ;;  %v17149_v13 = vld [vmem:[#allocation5 + $0x7c8] ss:$16 sps:$4 sm:$0xff]  }
 0x42a   :  { %13552 = vmatprep.subr.bf16.mxu1 %v17097_v44  ;;  %v17154_v44 = vld [vmem:[#allocation5 + $0x7e4] ss:$16 sps:$4 sm:$0xff]  }
 0x42c   :  { %12865 = vmatpush1.bf16.msra.mxu0 %v17092_v41  ;;  %v17157_v41 = vld [vmem:[#allocation5 + $0x7ec] ss:$16 sps:$4 sm:$0xff]  }
 0x42d   :  { %13553 = vmatpush1.bf16.msra.mxu1 %v17095_v55  ;;  %12866 = vmatprep.subr.bf16.mxu0 %v17100_v10  ;;  %v17152_v55 = vld [vmem:[#allocation5 + $0x7e0] ss:$16 sps:$4 sm:$0xff]   ;;  %v17155_v10 = vld [vmem:[#allocation5 + $0x7e8] ss:$16 sps:$4 sm:$0xff]  }
 0x42e   :  { %13554 = vmatprep.subr.bf16.mxu1 %v17103_v6  ;;  %v17160_v6 = vld [vmem:[#allocation5 + $0x804] ss:$16 sps:$4 sm:$0xff]  }
 0x430   :  { %12867 = vmatpush1.bf16.msra.mxu0 %v17098_v1  ;;  %v17163_v1 = vld [vmem:[#allocation5 + $0x80c] ss:$16 sps:$4 sm:$0xff]  }
 0x431   :  { %13555 = vmatpush1.bf16.msra.mxu1 %v17101_v29  ;;  %12868 = vmatprep.subr.bf16.mxu0 %v17106_v8  ;;  %v17158_v29 = vld [vmem:[#allocation5 + $0x800] ss:$16 sps:$4 sm:$0xff]   ;;  %v17161_v8 = vld [vmem:[#allocation5 + $0x808] ss:$16 sps:$4 sm:$0xff]  }
 0x432   :  { %13556 = vmatprep.subr.bf16.mxu1 %v17109_v35  ;;  %v17166_v35 = vld [vmem:[#allocation5 + $0x824] ss:$16 sps:$4 sm:$0xff]  }
 0x434   :  { %12869 = vmatpush1.bf16.msra.mxu0 %v17104_v26  ;;  %v17169_v26 = vld [vmem:[#allocation5 + $0x82c] ss:$16 sps:$4 sm:$0xff]  }
 0x435   :  { %13557 = vmatpush1.bf16.msra.mxu1 %v17107_v36  ;;  %12870 = vmatprep.subr.bf16.mxu0 %v17112_v63  ;;  %v17164_v36 = vld [vmem:[#allocation5 + $0x820] ss:$16 sps:$4 sm:$0xff]   ;;  %v17167_v63 = vld [vmem:[#allocation5 + $0x828] ss:$16 sps:$4 sm:$0xff]  }
 0x436   :  { %13558 = vmatprep.subr.bf16.mxu1 %v17115_v33  ;;  %v17172_v33 = vld [vmem:[#allocation5 + $0x844] ss:$16 sps:$4 sm:$0xff]  }
 0x438   :  { %12871 = vmatpush1.bf16.msra.mxu0 %v17110_v17  ;;  %v17175_v17 = vld [vmem:[#allocation5 + $0x84c] ss:$16 sps:$4 sm:$0xff]  }
 0x439   :  { %13559 = vmatpush1.bf16.msra.mxu1 %v17113_v4  ;;  %12872 = vmatprep.subr.bf16.mxu0 %v17118_v50  ;;  %v17170_v4 = vld [vmem:[#allocation5 + $0x840] ss:$16 sps:$4 sm:$0xff]   ;;  %v17173_v50 = vld [vmem:[#allocation5 + $0x848] ss:$16 sps:$4 sm:$0xff]  }
 0x43a   :  { %13560 = vmatprep.subr.bf16.mxu1 %v17121_v47  ;;  %v17178_v47 = vld [vmem:[#allocation5 + $0x864] ss:$16 sps:$4 sm:$0xff]  }
 0x43c   :  { %12873 = vmatpush1.bf16.msra.mxu0 %v17116_v34  ;;  %v17176_v34 = vld [vmem:[#allocation5 + $0x860] ss:$16 sps:$4 sm:$0xff]  }
 0x43d   :  { %13561 = vmatpush1.bf16.msra.mxu1 %v17119_v0  ;;  %12874 = vmatprep.subr.bf16.mxu0 %v17124_v51  ;;  %v17179_v0 = vld [vmem:[#allocation5 + $0x868] ss:$16 sps:$4 sm:$0xff]   ;;  %v17184_v51 = vld [vmem:[#allocation5 + $0x884] ss:$16 sps:$4 sm:$0xff]  }
 0x43e   :  { %13562 = vmatprep.subr.bf16.mxu1 %v17127_v24  ;;  %v17187_v24 = vld [vmem:[#allocation5 + $0x88c] ss:$16 sps:$4 sm:$0xff]  }
 0x440   :  { %12875 = vmatpush1.bf16.msra.mxu0 %v17122_v52  ;;  %v17185_v52 = vld [vmem:[#allocation5 + $0x888] ss:$16 sps:$4 sm:$0xff]  }
 0x441   :  { %13563 = vmatpush1.bf16.msra.mxu1 %v17125_v58  ;;  %12876 = vmatprep.subr.bf16.mxu0 %v17130_v37  ;;  %v17190_v58 = vld [vmem:[#allocation5 + $0x8a4] ss:$16 sps:$4 sm:$0xff]   ;;  %v17193_v37 = vld [vmem:[#allocation5 + $0x8ac] ss:$16 sps:$4 sm:$0xff]  }
 0x442   :  { %13564 = vmatprep.subr.bf16.mxu1 %v17133_v46  ;;  %v17188_v46 = vld [vmem:[#allocation5 + $0x8a0] ss:$16 sps:$4 sm:$0xff]  }
 0x444   :  { %12877 = vmatpush1.bf16.msra.mxu0 %v17128_v59  ;;  %v17191_v59 = vld [vmem:[#allocation5 + $0x8a8] ss:$16 sps:$4 sm:$0xff]  }
 0x445   :  { %13565 = vmatpush1.bf16.msra.mxu1 %v17131_v62  ;;  %12878 = vmatprep.subr.bf16.mxu0 %v17136_v5  ;;  %v17196_v62 = vld [vmem:[#allocation5 + $0x8c4] ss:$16 sps:$4 sm:$0xff]   ;;  %v17199_v5 = vld [vmem:[#allocation5 + $0x8cc] ss:$16 sps:$4 sm:$0xff]  }
 0x446   :  { %13566 = vmatprep.subr.bf16.mxu1 %v17139_v30  ;;  %v17194_v30 = vld [vmem:[#allocation5 + $0x8c0] ss:$16 sps:$4 sm:$0xff]  }
 0x448   :  { %12879 = vmatpush1.bf16.msra.mxu0 %v17134_v20  ;;  %v17197_v20 = vld [vmem:[#allocation5 + $0x8c8] ss:$16 sps:$4 sm:$0xff]  }
 0x449   :  { %13567 = vmatpush1.bf16.msra.mxu1 %v17137_v53  ;;  %12880 = vmatprep.subr.bf16.mxu0 %v17142_v38  ;;  %v17202_v53 = vld [vmem:[#allocation5 + $0x8e4] ss:$16 sps:$4 sm:$0xff]   ;;  %v17205_v38 = vld [vmem:[#allocation5 + $0x8ec] ss:$16 sps:$4 sm:$0xff]  }
 0x44a   :  { %13568 = vmatprep.subr.bf16.mxu1 %v17145_v22  ;;  %v17200_v22 = vld [vmem:[#allocation5 + $0x8e0] ss:$16 sps:$4 sm:$0xff]  }
 0x44c   :  { %12881 = vmatpush1.bf16.msra.mxu0 %v17140_v18  ;;  %v17203_v18 = vld [vmem:[#allocation5 + $0x8e8] ss:$16 sps:$4 sm:$0xff]  }
 0x44d   :  { %13569 = vmatpush1.bf16.msra.mxu1 %v17143_v2  ;;  %12882 = vmatprep.subr.bf16.mxu0 %v17148_v25  ;;  %v17208_v2 = vld [vmem:[#allocation5 + $0x904] ss:$16 sps:$4 sm:$0xff]   ;;  %v17211_v25 = vld [vmem:[#allocation5 + $0x90c] ss:$16 sps:$4 sm:$0xff]  }
 0x44e   :  { %13570 = vmatprep.subr.bf16.mxu1 %v17151_v45  ;;  %v17206_v45 = vld [vmem:[#allocation5 + $0x900] ss:$16 sps:$4 sm:$0xff]  }
 0x450   :  { %12883 = vmatpush1.bf16.msra.mxu0 %v17146_v15  ;;  %v17209_v15 = vld [vmem:[#allocation5 + $0x908] ss:$16 sps:$4 sm:$0xff]  }
 0x451   :  { %13571 = vmatpush1.bf16.msra.mxu1 %v17149_v13  ;;  %12884 = vmatprep.subr.bf16.mxu0 %v17154_v44  ;;  %v17214_v13 = vld [vmem:[#allocation5 + $0x924] ss:$16 sps:$4 sm:$0xff]   ;;  %v17217_v44 = vld [vmem:[#allocation5 + $0x92c] ss:$16 sps:$4 sm:$0xff]  }
 0x452   :  { %13572 = vmatprep.subr.bf16.mxu1 %v17157_v41  ;;  %v17212_v41 = vld [vmem:[#allocation5 + $0x920] ss:$16 sps:$4 sm:$0xff]  }
 0x454   :  { %12885 = vmatpush1.bf16.msra.mxu0 %v17152_v55  ;;  %v17215_v55 = vld [vmem:[#allocation5 + $0x928] ss:$16 sps:$4 sm:$0xff]  }
 0x455   :  { %13573 = vmatpush1.bf16.msra.mxu1 %v17155_v10  ;;  %12897 = vmatprep.subr.bf16.mxu0 %v17160_v6  ;;  %v17220_v10 = vld [vmem:[#allocation5 + $0x944] ss:$16 sps:$4 sm:$0xff]   ;;  %v17223_v6 = vld [vmem:[#allocation5 + $0x94c] ss:$16 sps:$4 sm:$0xff]  }
 0x456   :  { %13585 = vmatprep.subr.bf16.mxu1 %v17163_v1  ;;  %v17218_v1 = vld [vmem:[#allocation5 + $0x940] ss:$16 sps:$4 sm:$0xff]  }
 0x457   :  { %12887 = vmatmul.mubr.bf16.vlgmr.msra.gmra.mrb[120].mxu0 %v21224_v9 }
 0x458   :  { %13575 = vmatmul.mubr.bf16.vlgmr.msra.gmra.mrb[136].mxu1 %v21224_v9  ;;  %12898 = vmatpush1.bf16.msra.mxu0 %v17158_v29  ;;  %v17181_v9 = vld [vmem:[#allocation5 + $0x86c] ss:$16 sps:$4 sm:$0xff]   ;;  %v17221_v29 = vld [vmem:[#allocation5 + $0x948] ss:$16 sps:$4 sm:$0xff]  }
 0x459   :  { %12929 = vmatprep.mubr.bf16.mxu0 %v21272_v56  ;;  %13586 = vmatpush1.bf16.msra.mxu1 %v17161_v8  ;;  %v17226_v8 = vld [vmem:[#allocation5 + $0x964] ss:$16 sps:$4 sm:$0xff]  }
 0x45a   :  { %13617 = vmatprep.mubr.bf16.mxu1 %v21272_v56  ;;  %12899 = vmatprep.subr.bf16.mxu0 %v17166_v35  ;;  %v17182_v56 = vld [vmem:[#allocation5 + $0x880] ss:$16 sps:$4 sm:$0xff]   ;;  %v17229_v35 = vld [vmem:[#allocation5 + $0x96c] ss:$16 sps:$4 sm:$0xff]  }
 0x45b   :  { %13587 = vmatprep.subr.bf16.mxu1 %v17169_v26  ;;  %v17224_v26 = vld [vmem:[#allocation5 + $0x960] ss:$16 sps:$4 sm:$0xff]  }
 0x45c   :  { %12900 = vmatpush1.bf16.msra.mxu0 %v17164_v36  ;;  %v17227_v36 = vld [vmem:[#allocation5 + $0x968] ss:$16 sps:$4 sm:$0xff]  }
 0x45d   :  { %13588 = vmatpush1.bf16.msra.mxu1 %v17167_v63  ;;  %12901 = vmatprep.subr.bf16.mxu0 %v17172_v33  ;;  %v17232_v63 = vld [vmem:[#allocation5 + $0x984] ss:$16 sps:$4 sm:$0xff]   ;;  %v17235_v33 = vld [vmem:[#allocation5 + $0x98c] ss:$16 sps:$4 sm:$0xff]  }
 0x45e   :  { %13589 = vmatprep.subr.bf16.mxu1 %v17175_v17  ;;  %v17230_v17 = vld [vmem:[#allocation5 + $0x980] ss:$16 sps:$4 sm:$0xff]  }
 0x460   :  { %12902 = vmatpush1.bf16.msra.mxu0 %v17170_v4  ;;  %v17233_v4 = vld [vmem:[#allocation5 + $0x988] ss:$16 sps:$4 sm:$0xff]  }
 0x461   :  { %13590 = vmatpush1.bf16.msra.mxu1 %v17173_v50  ;;  %12903 = vmatprep.subr.bf16.mxu0 %v17178_v47  ;;  %v17238_v50 = vld [vmem:[#allocation5 + $0x9a4] ss:$16 sps:$4 sm:$0xff]   ;;  %v17241_v47 = vld [vmem:[#allocation5 + $0x9ac] ss:$16 sps:$4 sm:$0xff]  }
 0x462   :  { %13591 = vmatprep.subr.bf16.mxu1 %v17181_v9  ;;  %v17236_v9 = vld [vmem:[#allocation5 + $0x9a0] ss:$16 sps:$4 sm:$0xff]  }
 0x464   :  { %12904 = vmatpush1.bf16.msra.mxu0 %v17176_v34  ;;  %v17239_v34 = vld [vmem:[#allocation5 + $0x9a8] ss:$16 sps:$4 sm:$0xff]  }
 0x465   :  { %13592 = vmatpush1.bf16.msra.mxu1 %v17179_v0  ;;  %12905 = vmatprep.subr.bf16.mxu0 %v17184_v51  ;;  %v17244_v0 = vld [vmem:[#allocation5 + $0x9c4] ss:$16 sps:$4 sm:$0xff]   ;;  %v17247_v51 = vld [vmem:[#allocation5 + $0x9cc] ss:$16 sps:$4 sm:$0xff]  }
 0x466   :  { %13593 = vmatprep.subr.bf16.mxu1 %v17187_v24  ;;  %v17242_v24 = vld [vmem:[#allocation5 + $0x9c0] ss:$16 sps:$4 sm:$0xff]  }
 0x468   :  { %12906 = vmatpush1.bf16.msra.mxu0 %v17182_v56  ;;  %v17245_v56 = vld [vmem:[#allocation5 + $0x9c8] ss:$16 sps:$4 sm:$0xff]  }
 0x469   :  { %13594 = vmatpush1.bf16.msra.mxu1 %v17185_v52  ;;  %12907 = vmatprep.subr.bf16.mxu0 %v17190_v58  ;;  %v17250_v52 = vld [vmem:[#allocation5 + $0x9e4] ss:$16 sps:$4 sm:$0xff]   ;;  %v17253_v58 = vld [vmem:[#allocation5 + $0x9ec] ss:$16 sps:$4 sm:$0xff]  }
 0x46a   :  { %13595 = vmatprep.subr.bf16.mxu1 %v17193_v37  ;;  %v17248_v37 = vld [vmem:[#allocation5 + $0x9e0] ss:$16 sps:$4 sm:$0xff]  }
 0x46c   :  { %12908 = vmatpush1.bf16.msra.mxu0 %v17188_v46  ;;  %v17251_v46 = vld [vmem:[#allocation5 + $0x9e8] ss:$16 sps:$4 sm:$0xff]  }
 0x46d   :  { %13596 = vmatpush1.bf16.msra.mxu1 %v17191_v59  ;;  %12909 = vmatprep.subr.bf16.mxu0 %v17196_v62  ;;  %v17256_v59 = vld [vmem:[#allocation5 + $0xa04] ss:$16 sps:$4 sm:$0xff]   ;;  %v17259_v62 = vld [vmem:[#allocation5 + $0xa0c] ss:$16 sps:$4 sm:$0xff]  }
 0x46e   :  { %13597 = vmatprep.subr.bf16.mxu1 %v17199_v5  ;;  %v17254_v5 = vld [vmem:[#allocation5 + $0xa00] ss:$16 sps:$4 sm:$0xff]  }
 0x470   :  { %12910 = vmatpush1.bf16.msra.mxu0 %v17194_v30  ;;  %v17257_v30 = vld [vmem:[#allocation5 + $0xa08] ss:$16 sps:$4 sm:$0xff]  }
 0x471   :  { %13598 = vmatpush1.bf16.msra.mxu1 %v17197_v20  ;;  %12911 = vmatprep.subr.bf16.mxu0 %v17202_v53  ;;  %v17262_v20 = vld [vmem:[#allocation5 + $0xa24] ss:$16 sps:$4 sm:$0xff]   ;;  %v17265_v53 = vld [vmem:[#allocation5 + $0xa2c] ss:$16 sps:$4 sm:$0xff]  }
 0x472   :  { %13599 = vmatprep.subr.bf16.mxu1 %v17205_v38  ;;  %v17260_v38 = vld [vmem:[#allocation5 + $0xa20] ss:$16 sps:$4 sm:$0xff]  }
 0x474   :  { %12912 = vmatpush1.bf16.msra.mxu0 %v17200_v22  ;;  %v17263_v22 = vld [vmem:[#allocation5 + $0xa28] ss:$16 sps:$4 sm:$0xff]  }
 0x475   :  { %13600 = vmatpush1.bf16.msra.mxu1 %v17203_v18  ;;  %12913 = vmatprep.subr.bf16.mxu0 %v17208_v2  ;;  %v17268_v18 = vld [vmem:[#allocation5 + $0xa44] ss:$16 sps:$4 sm:$0xff]   ;;  %v17271_v2 = vld [vmem:[#allocation5 + $0xa4c] ss:$16 sps:$4 sm:$0xff]  }
 0x476   :  { %13601 = vmatprep.subr.bf16.mxu1 %v17211_v25  ;;  %v17266_v25 = vld [vmem:[#allocation5 + $0xa40] ss:$16 sps:$4 sm:$0xff]  }
 0x478   :  { %12914 = vmatpush1.bf16.msra.mxu0 %v17206_v45  ;;  %v17269_v45 = vld [vmem:[#allocation5 + $0xa48] ss:$16 sps:$4 sm:$0xff]  }
 0x479   :  { %13602 = vmatpush1.bf16.msra.mxu1 %v17209_v15  ;;  %12915 = vmatprep.subr.bf16.mxu0 %v17214_v13  ;;  %v17274_v15 = vld [vmem:[#allocation5 + $0xa64] ss:$16 sps:$4 sm:$0xff]   ;;  %v17272_v13 = vld [vmem:[#allocation5 + $0xa60] ss:$16 sps:$4 sm:$0xff]  }
 0x47a   :  { %13603 = vmatprep.subr.bf16.mxu1 %v17217_v44  ;;  %v17275_v44 = vld [vmem:[#allocation5 + $0xa68] ss:$16 sps:$4 sm:$0xff]  }
 0x47c   :  { %12916 = vmatpush1.bf16.msra.mxu0 %v17212_v41  ;;  %v17280_v41 = vld [vmem:[#allocation5 + $0xa84] ss:$16 sps:$4 sm:$0xff]  }
 0x47d   :  { %13604 = vmatpush1.bf16.msra.mxu1 %v17215_v55  ;;  %12917 = vmatprep.subr.bf16.mxu0 %v17220_v10  ;;  %v17283_v55 = vld [vmem:[#allocation5 + $0xa8c] ss:$16 sps:$4 sm:$0xff]   ;;  %v17281_v10 = vld [vmem:[#allocation5 + $0xa88] ss:$16 sps:$4 sm:$0xff]  }
 0x47e   :  { %13605 = vmatprep.subr.bf16.mxu1 %v17223_v6  ;;  %v17286_v6 = vld [vmem:[#allocation5 + $0xaa4] ss:$16 sps:$4 sm:$0xff]  }
 0x480   :  { %12918 = vmatpush1.bf16.msra.mxu0 %v17218_v1  ;;  %v17289_v1 = vld [vmem:[#allocation5 + $0xaac] ss:$16 sps:$4 sm:$0xff]  }
 0x481   :  { %13606 = vmatpush1.bf16.msra.mxu1 %v17221_v29  ;;  %12919 = vmatprep.subr.bf16.mxu0 %v17226_v8  ;;  %v17284_v29 = vld [vmem:[#allocation5 + $0xaa0] ss:$16 sps:$4 sm:$0xff]   ;;  %v17287_v8 = vld [vmem:[#allocation5 + $0xaa8] ss:$16 sps:$4 sm:$0xff]  }
 0x482   :  { %13607 = vmatprep.subr.bf16.mxu1 %v17229_v35  ;;  %v17292_v35 = vld [vmem:[#allocation5 + $0xac4] ss:$16 sps:$4 sm:$0xff]  }
 0x484   :  { %12920 = vmatpush1.bf16.msra.mxu0 %v17224_v26  ;;  %v17295_v26 = vld [vmem:[#allocation5 + $0xacc] ss:$16 sps:$4 sm:$0xff]  }
 0x485   :  { %13608 = vmatpush1.bf16.msra.mxu1 %v17227_v36  ;;  %12921 = vmatprep.subr.bf16.mxu0 %v17232_v63  ;;  %v17290_v36 = vld [vmem:[#allocation5 + $0xac0] ss:$16 sps:$4 sm:$0xff]   ;;  %v17293_v63 = vld [vmem:[#allocation5 + $0xac8] ss:$16 sps:$4 sm:$0xff]  }
 0x486   :  { %13609 = vmatprep.subr.bf16.mxu1 %v17235_v33  ;;  %v17298_v33 = vld [vmem:[#allocation5 + $0xae4] ss:$16 sps:$4 sm:$0xff]  }
 0x488   :  { %12922 = vmatpush1.bf16.msra.mxu0 %v17230_v17  ;;  %v17301_v17 = vld [vmem:[#allocation5 + $0xaec] ss:$16 sps:$4 sm:$0xff]  }
 0x489   :  { %13610 = vmatpush1.bf16.msra.mxu1 %v17233_v4  ;;  %12923 = vmatprep.subr.bf16.mxu0 %v17238_v50  ;;  %v17296_v4 = vld [vmem:[#allocation5 + $0xae0] ss:$16 sps:$4 sm:$0xff]   ;;  %v17299_v50 = vld [vmem:[#allocation5 + $0xae8] ss:$16 sps:$4 sm:$0xff]  }
 0x48a   :  { %13611 = vmatprep.subr.bf16.mxu1 %v17241_v47  ;;  %v17304_v47 = vld [vmem:[#allocation5 + $0xb04] ss:$16 sps:$4 sm:$0xff]  }
 0x48c   :  { %12924 = vmatpush1.bf16.msra.mxu0 %v17236_v9  ;;  %v17307_v9 = vld [vmem:[#allocation5 + $0xb0c] ss:$16 sps:$4 sm:$0xff]  }
 0x48d   :  { %13612 = vmatpush1.bf16.msra.mxu1 %v17239_v34  ;;  %12925 = vmatprep.subr.bf16.mxu0 %v17244_v0  ;;  %v17302_v34 = vld [vmem:[#allocation5 + $0xb00] ss:$16 sps:$4 sm:$0xff]   ;;  %v17305_v0 = vld [vmem:[#allocation5 + $0xb08] ss:$16 sps:$4 sm:$0xff]  }
 0x48e   :  { %13613 = vmatprep.subr.bf16.mxu1 %v17247_v51  ;;  %v17310_v51 = vld [vmem:[#allocation5 + $0xb24] ss:$16 sps:$4 sm:$0xff]  }
 0x490   :  { %12926 = vmatpush1.bf16.msra.mxu0 %v17242_v24  ;;  %v17313_v24 = vld [vmem:[#allocation5 + $0xb2c] ss:$16 sps:$4 sm:$0xff]  }
 0x491   :  { %13614 = vmatpush1.bf16.msra.mxu1 %v17245_v56  ;;  %12927 = vmatprep.subr.bf16.mxu0 %v17250_v52  ;;  %v17308_v56 = vld [vmem:[#allocation5 + $0xb20] ss:$16 sps:$4 sm:$0xff]   ;;  %v17311_v52 = vld [vmem:[#allocation5 + $0xb28] ss:$16 sps:$4 sm:$0xff]  }
 0x492   :  { %13615 = vmatprep.subr.bf16.mxu1 %v17253_v58  ;;  %v17316_v58 = vld [vmem:[#allocation5 + $0xb44] ss:$16 sps:$4 sm:$0xff]  }
 0x494   :  { %12928 = vmatpush1.bf16.msra.mxu0 %v17248_v37  ;;  %v17319_v37 = vld [vmem:[#allocation5 + $0xb4c] ss:$16 sps:$4 sm:$0xff]  }
 0x495   :  { %13616 = vmatpush1.bf16.msra.mxu1 %v17251_v46  ;;  %12940 = vmatprep.subr.bf16.mxu0 %v17256_v59  ;;  %v17314_v46 = vld [vmem:[#allocation5 + $0xb40] ss:$16 sps:$4 sm:$0xff]   ;;  %v17317_v59 = vld [vmem:[#allocation5 + $0xb48] ss:$16 sps:$4 sm:$0xff]  }
 0x496   :  { %13628 = vmatprep.subr.bf16.mxu1 %v17259_v62  ;;  %v17322_v62 = vld [vmem:[#allocation5 + $0xb64] ss:$16 sps:$4 sm:$0xff]  }
 0x497   :  { %12930 = vmatmul.mubr.bf16.vlgmr.msra.gmra.mrb[120].mxu0 %v21274_v23 }
 0x498   :  { %13618 = vmatmul.mubr.bf16.vlgmr.msra.gmra.mrb[136].mxu1 %v21274_v23  ;;  %12941 = vmatpush1.bf16.msra.mxu0 %v17254_v5  ;;  %v17277_v23 = vld [vmem:[#allocation5 + $0xa6c] ss:$16 sps:$4 sm:$0xff]  }
 0x499   :  { %12972 = vmatprep.mubr.bf16.mxu0 %v21280_v60  ;;  %13629 = vmatpush1.bf16.msra.mxu1 %v17257_v30  ;;  %v17325_v5 = vld [vmem:[#allocation5 + $0xb6c] ss:$16 sps:$4 sm:$0xff]   ;;  %v17320_v30 = vld [vmem:[#allocation5 + $0xb60] ss:$16 sps:$4 sm:$0xff]  }
 0x49a   :  { %13660 = vmatprep.mubr.bf16.mxu1 %v21280_v60  ;;  %12942 = vmatprep.subr.bf16.mxu0 %v17262_v20  ;;  %v17278_v60 = vld [vmem:[#allocation5 + $0xa80] ss:$16 sps:$4 sm:$0xff]   ;;  %v17323_v20 = vld [vmem:[#allocation5 + $0xb68] ss:$16 sps:$4 sm:$0xff]  }
 0x49b   :  { %13630 = vmatprep.subr.bf16.mxu1 %v17265_v53  ;;  %v17328_v53 = vld [vmem:[#allocation5 + $0xb84] ss:$16 sps:$4 sm:$0xff]  }
 0x49c   :  { %12943 = vmatpush1.bf16.msra.mxu0 %v17260_v38  ;;  %v17331_v38 = vld [vmem:[#allocation5 + $0xb8c] ss:$16 sps:$4 sm:$0xff]  }
 0x49d   :  { %13631 = vmatpush1.bf16.msra.mxu1 %v17263_v22  ;;  %12944 = vmatprep.subr.bf16.mxu0 %v17268_v18  ;;  %v17326_v22 = vld [vmem:[#allocation5 + $0xb80] ss:$16 sps:$4 sm:$0xff]   ;;  %v17329_v18 = vld [vmem:[#allocation5 + $0xb88] ss:$16 sps:$4 sm:$0xff]  }
 0x49e   :  { %13632 = vmatprep.subr.bf16.mxu1 %v17271_v2  ;;  %v17334_v2 = vld [vmem:[#allocation5 + $0xba4] ss:$16 sps:$4 sm:$0xff]  }
 0x4a0   :  { %12945 = vmatpush1.bf16.msra.mxu0 %v17266_v25  ;;  %v17337_v25 = vld [vmem:[#allocation5 + $0xbac] ss:$16 sps:$4 sm:$0xff]  }
 0x4a1   :  { %13633 = vmatpush1.bf16.msra.mxu1 %v17269_v45  ;;  %12946 = vmatprep.subr.bf16.mxu0 %v17274_v15  ;;  %v17332_v45 = vld [vmem:[#allocation5 + $0xba0] ss:$16 sps:$4 sm:$0xff]   ;;  %v17335_v15 = vld [vmem:[#allocation5 + $0xba8] ss:$16 sps:$4 sm:$0xff]  }
 0x4a2   :  { %13634 = vmatprep.subr.bf16.mxu1 %v17277_v23  ;;  %v17340_v23 = vld [vmem:[#allocation5 + $0xbc4] ss:$16 sps:$4 sm:$0xff]  }
 0x4a4   :  { %12947 = vmatpush1.bf16.msra.mxu0 %v17272_v13  ;;  %v17343_v13 = vld [vmem:[#allocation5 + $0xbcc] ss:$16 sps:$4 sm:$0xff]  }
 0x4a5   :  { %13635 = vmatpush1.bf16.msra.mxu1 %v17275_v44  ;;  %12948 = vmatprep.subr.bf16.mxu0 %v17280_v41  ;;  %v17338_v44 = vld [vmem:[#allocation5 + $0xbc0] ss:$16 sps:$4 sm:$0xff]   ;;  %v17341_v41 = vld [vmem:[#allocation5 + $0xbc8] ss:$16 sps:$4 sm:$0xff]  }
 0x4a6   :  { %13636 = vmatprep.subr.bf16.mxu1 %v17283_v55  ;;  %v17346_v55 = vld [vmem:[#allocation5 + $0xbe4] ss:$16 sps:$4 sm:$0xff]  }
 0x4a8   :  { %12949 = vmatpush1.bf16.msra.mxu0 %v17278_v60  ;;  %v17349_v60 = vld [vmem:[#allocation5 + $0xbec] ss:$16 sps:$4 sm:$0xff]  }
 0x4a9   :  { %13637 = vmatpush1.bf16.msra.mxu1 %v17281_v10  ;;  %12950 = vmatprep.subr.bf16.mxu0 %v17286_v6  ;;  %v17344_v10 = vld [vmem:[#allocation5 + $0xbe0] ss:$16 sps:$4 sm:$0xff]   ;;  %v17347_v6 = vld [vmem:[#allocation5 + $0xbe8] ss:$16 sps:$4 sm:$0xff]  }
 0x4aa   :  { %13638 = vmatprep.subr.bf16.mxu1 %v17289_v1  ;;  %v17352_v1 = vld [vmem:[#allocation5 + $0xc04] ss:$16 sps:$4 sm:$0xff]  }
 0x4ac   :  { %12951 = vmatpush1.bf16.msra.mxu0 %v17284_v29  ;;  %v17355_v29 = vld [vmem:[#allocation5 + $0xc0c] ss:$16 sps:$4 sm:$0xff]  }
 0x4ad   :  { %13639 = vmatpush1.bf16.msra.mxu1 %v17287_v8  ;;  %12952 = vmatprep.subr.bf16.mxu0 %v17292_v35  ;;  %v17350_v8 = vld [vmem:[#allocation5 + $0xc00] ss:$16 sps:$4 sm:$0xff]   ;;  %v17353_v35 = vld [vmem:[#allocation5 + $0xc08] ss:$16 sps:$4 sm:$0xff]  }
 0x4ae   :  { %13640 = vmatprep.subr.bf16.mxu1 %v17295_v26  ;;  %v17358_v26 = vld [vmem:[#allocation5 + $0xc24] ss:$16 sps:$4 sm:$0xff]  }
 0x4b0   :  { %12953 = vmatpush1.bf16.msra.mxu0 %v17290_v36  ;;  %v17361_v36 = vld [vmem:[#allocation5 + $0xc2c] ss:$16 sps:$4 sm:$0xff]  }
 0x4b1   :  { %13641 = vmatpush1.bf16.msra.mxu1 %v17293_v63  ;;  %12954 = vmatprep.subr.bf16.mxu0 %v17298_v33  ;;  %v17356_v63 = vld [vmem:[#allocation5 + $0xc20] ss:$16 sps:$4 sm:$0xff]   ;;  %v17359_v33 = vld [vmem:[#allocation5 + $0xc28] ss:$16 sps:$4 sm:$0xff]  }
 0x4b2   :  { %13642 = vmatprep.subr.bf16.mxu1 %v17301_v17  ;;  %v17364_v17 = vld [vmem:[#allocation5 + $0xc44] ss:$16 sps:$4 sm:$0xff]  }
 0x4b4   :  { %12955 = vmatpush1.bf16.msra.mxu0 %v17296_v4  ;;  %v17367_v4 = vld [vmem:[#allocation5 + $0xc4c] ss:$16 sps:$4 sm:$0xff]  }
 0x4b5   :  { %13643 = vmatpush1.bf16.msra.mxu1 %v17299_v50  ;;  %12956 = vmatprep.subr.bf16.mxu0 %v17304_v47  ;;  %v17362_v50 = vld [vmem:[#allocation5 + $0xc40] ss:$16 sps:$4 sm:$0xff]   ;;  %v17365_v47 = vld [vmem:[#allocation5 + $0xc48] ss:$16 sps:$4 sm:$0xff]  }
 0x4b6   :  { %13644 = vmatprep.subr.bf16.mxu1 %v17307_v9  ;;  %v17370_v9 = vld [vmem:[#allocation5 + $0xc64] ss:$16 sps:$4 sm:$0xff]  }
 0x4b8   :  { %12957 = vmatpush1.bf16.msra.mxu0 %v17302_v34  ;;  %v17368_v34 = vld [vmem:[#allocation5 + $0xc60] ss:$16 sps:$4 sm:$0xff]  }
 0x4b9   :  { %13645 = vmatpush1.bf16.msra.mxu1 %v17305_v0  ;;  %12958 = vmatprep.subr.bf16.mxu0 %v17310_v51  ;;  %v17371_v0 = vld [vmem:[#allocation5 + $0xc68] ss:$16 sps:$4 sm:$0xff]   ;;  %v17376_v51 = vld [vmem:[#allocation5 + $0xc84] ss:$16 sps:$4 sm:$0xff]  }
 0x4ba   :  { %13646 = vmatprep.subr.bf16.mxu1 %v17313_v24  ;;  %v17379_v24 = vld [vmem:[#allocation5 + $0xc8c] ss:$16 sps:$4 sm:$0xff]  }
 0x4bc   :  { %12959 = vmatpush1.bf16.msra.mxu0 %v17308_v56  ;;  %v17377_v56 = vld [vmem:[#allocation5 + $0xc88] ss:$16 sps:$4 sm:$0xff]  }
 0x4bd   :  { %13647 = vmatpush1.bf16.msra.mxu1 %v17311_v52  ;;  %12960 = vmatprep.subr.bf16.mxu0 %v17316_v58  ;;  %v17382_v52 = vld [vmem:[#allocation5 + $0xca4] ss:$16 sps:$4 sm:$0xff]   ;;  %v17385_v58 = vld [vmem:[#allocation5 + $0xcac] ss:$16 sps:$4 sm:$0xff]  }
 0x4be   :  { %13648 = vmatprep.subr.bf16.mxu1 %v17319_v37  ;;  %v17380_v37 = vld [vmem:[#allocation5 + $0xca0] ss:$16 sps:$4 sm:$0xff]  }
 0x4c0   :  { %12961 = vmatpush1.bf16.msra.mxu0 %v17314_v46  ;;  %v17383_v46 = vld [vmem:[#allocation5 + $0xca8] ss:$16 sps:$4 sm:$0xff]  }
 0x4c1   :  { %13649 = vmatpush1.bf16.msra.mxu1 %v17317_v59  ;;  %12962 = vmatprep.subr.bf16.mxu0 %v17322_v62  ;;  %v17388_v59 = vld [vmem:[#allocation5 + $0xcc4] ss:$16 sps:$4 sm:$0xff]   ;;  %v17391_v62 = vld [vmem:[#allocation5 + $0xccc] ss:$16 sps:$4 sm:$0xff]  }
 0x4c2   :  { %13650 = vmatprep.subr.bf16.mxu1 %v17325_v5  ;;  %v17386_v5 = vld [vmem:[#allocation5 + $0xcc0] ss:$16 sps:$4 sm:$0xff]  }
 0x4c4   :  { %12963 = vmatpush1.bf16.msra.mxu0 %v17320_v30  ;;  %v17389_v30 = vld [vmem:[#allocation5 + $0xcc8] ss:$16 sps:$4 sm:$0xff]  }
 0x4c5   :  { %13651 = vmatpush1.bf16.msra.mxu1 %v17323_v20  ;;  %12964 = vmatprep.subr.bf16.mxu0 %v17328_v53  ;;  %v17394_v20 = vld [vmem:[#allocation5 + $0xce4] ss:$16 sps:$4 sm:$0xff]   ;;  %v17397_v53 = vld [vmem:[#allocation5 + $0xcec] ss:$16 sps:$4 sm:$0xff]  }
 0x4c6   :  { %13652 = vmatprep.subr.bf16.mxu1 %v17331_v38  ;;  %v17392_v38 = vld [vmem:[#allocation5 + $0xce0] ss:$16 sps:$4 sm:$0xff]  }
 0x4c8   :  { %12965 = vmatpush1.bf16.msra.mxu0 %v17326_v22  ;;  %v17395_v22 = vld [vmem:[#allocation5 + $0xce8] ss:$16 sps:$4 sm:$0xff]  }
 0x4c9   :  { %13653 = vmatpush1.bf16.msra.mxu1 %v17329_v18  ;;  %12966 = vmatprep.subr.bf16.mxu0 %v17334_v2  ;;  %v17400_v18 = vld [vmem:[#allocation5 + $0xd04] ss:$16 sps:$4 sm:$0xff]   ;;  %v17403_v2 = vld [vmem:[#allocation5 + $0xd0c] ss:$16 sps:$4 sm:$0xff]  }
 0x4ca   :  { %13654 = vmatprep.subr.bf16.mxu1 %v17337_v25  ;;  %v17398_v25 = vld [vmem:[#allocation5 + $0xd00] ss:$16 sps:$4 sm:$0xff]  }
 0x4cc   :  { %12967 = vmatpush1.bf16.msra.mxu0 %v17332_v45  ;;  %v17401_v45 = vld [vmem:[#allocation5 + $0xd08] ss:$16 sps:$4 sm:$0xff]  }
 0x4cd   :  { %13655 = vmatpush1.bf16.msra.mxu1 %v17335_v15  ;;  %12968 = vmatprep.subr.bf16.mxu0 %v17340_v23  ;;  %v17406_v15 = vld [vmem:[#allocation5 + $0xd24] ss:$16 sps:$4 sm:$0xff]   ;;  %v17409_v23 = vld [vmem:[#allocation5 + $0xd2c] ss:$16 sps:$4 sm:$0xff]  }
 0x4ce   :  { %13656 = vmatprep.subr.bf16.mxu1 %v17343_v13  ;;  %v17404_v13 = vld [vmem:[#allocation5 + $0xd20] ss:$16 sps:$4 sm:$0xff]  }
 0x4d0   :  { %12969 = vmatpush1.bf16.msra.mxu0 %v17338_v44  ;;  %v17407_v44 = vld [vmem:[#allocation5 + $0xd28] ss:$16 sps:$4 sm:$0xff]  }
 0x4d1   :  { %13657 = vmatpush1.bf16.msra.mxu1 %v17341_v41  ;;  %12970 = vmatprep.subr.bf16.mxu0 %v17346_v55  ;;  %v17412_v41 = vld [vmem:[#allocation5 + $0xd44] ss:$16 sps:$4 sm:$0xff]   ;;  %v17415_v55 = vld [vmem:[#allocation5 + $0xd4c] ss:$16 sps:$4 sm:$0xff]  }
 0x4d2   :  { %13658 = vmatprep.subr.bf16.mxu1 %v17349_v60  ;;  %v17410_v60 = vld [vmem:[#allocation5 + $0xd40] ss:$16 sps:$4 sm:$0xff]  }
 0x4d4   :  { %12971 = vmatpush1.bf16.msra.mxu0 %v17344_v10  ;;  %v17413_v10 = vld [vmem:[#allocation5 + $0xd48] ss:$16 sps:$4 sm:$0xff]  }
 0x4d5   :  { %13659 = vmatpush1.bf16.msra.mxu1 %v17347_v6  ;;  %12983 = vmatprep.subr.bf16.mxu0 %v17352_v1  ;;  %v17418_v6 = vld [vmem:[#allocation5 + $0xd64] ss:$16 sps:$4 sm:$0xff]   ;;  %v17421_v1 = vld [vmem:[#allocation5 + $0xd6c] ss:$16 sps:$4 sm:$0xff]  }
 0x4d6   :  { %13671 = vmatprep.subr.bf16.mxu1 %v17355_v29  ;;  %v17416_v29 = vld [vmem:[#allocation5 + $0xd60] ss:$16 sps:$4 sm:$0xff]  }
 0x4d7   :  { %12973 = vmatmul.mubr.bf16.vlgmr.msra.gmra.mrb[120].mxu0 %v21282_v27 }
 0x4d8   :  { %13661 = vmatmul.mubr.bf16.vlgmr.msra.gmra.mrb[136].mxu1 %v21282_v27  ;;  %12984 = vmatpush1.bf16.msra.mxu0 %v17350_v8  ;;  %v17373_v27 = vld [vmem:[#allocation5 + $0xc6c] ss:$16 sps:$4 sm:$0xff]   ;;  %v17419_v8 = vld [vmem:[#allocation5 + $0xd68] ss:$16 sps:$4 sm:$0xff]  }
 0x4d9   :  { %13015 = vmatprep.mubr.bf16.mxu0 %v21322_v54  ;;  %13672 = vmatpush1.bf16.msra.mxu1 %v17353_v35  ;;  %v17424_v35 = vld [vmem:[#allocation5 + $0xd84] ss:$16 sps:$4 sm:$0xff]  }
 0x4da   :  { %13703 = vmatprep.mubr.bf16.mxu1 %v21322_v54  ;;  %12985 = vmatprep.subr.bf16.mxu0 %v17358_v26  ;;  %v17374_v54 = vld [vmem:[#allocation5 + $0xc80] ss:$16 sps:$4 sm:$0xff]   ;;  %v17427_v26 = vld [vmem:[#allocation5 + $0xd8c] ss:$16 sps:$4 sm:$0xff]  }
 0x4db   :  { %13673 = vmatprep.subr.bf16.mxu1 %v17361_v36  ;;  %v17422_v36 = vld [vmem:[#allocation5 + $0xd80] ss:$16 sps:$4 sm:$0xff]  }
 0x4dc   :  { %12986 = vmatpush1.bf16.msra.mxu0 %v17356_v63  ;;  %v17425_v63 = vld [vmem:[#allocation5 + $0xd88] ss:$16 sps:$4 sm:$0xff]  }
 0x4dd   :  { %13674 = vmatpush1.bf16.msra.mxu1 %v17359_v33  ;;  %12987 = vmatprep.subr.bf16.mxu0 %v17364_v17  ;;  %v17430_v33 = vld [vmem:[#allocation5 + $0xda4] ss:$16 sps:$4 sm:$0xff]   ;;  %v17433_v17 = vld [vmem:[#allocation5 + $0xdac] ss:$16 sps:$4 sm:$0xff]  }
 0x4de   :  { %13675 = vmatprep.subr.bf16.mxu1 %v17367_v4  ;;  %v17428_v4 = vld [vmem:[#allocation5 + $0xda0] ss:$16 sps:$4 sm:$0xff]  }
 0x4e0   :  { %12988 = vmatpush1.bf16.msra.mxu0 %v17362_v50  ;;  %v17431_v50 = vld [vmem:[#allocation5 + $0xda8] ss:$16 sps:$4 sm:$0xff]  }
 0x4e1   :  { %13676 = vmatpush1.bf16.msra.mxu1 %v17365_v47  ;;  %12989 = vmatprep.subr.bf16.mxu0 %v17370_v9  ;;  %v17436_v47 = vld [vmem:[#allocation5 + $0xdc4] ss:$16 sps:$4 sm:$0xff]   ;;  %v17439_v9 = vld [vmem:[#allocation5 + $0xdcc] ss:$16 sps:$4 sm:$0xff]  }
 0x4e2   :  { %13677 = vmatprep.subr.bf16.mxu1 %v17373_v27  ;;  %v17434_v27 = vld [vmem:[#allocation5 + $0xdc0] ss:$16 sps:$4 sm:$0xff]  }
 0x4e4   :  { %12990 = vmatpush1.bf16.msra.mxu0 %v17368_v34  ;;  %v17437_v34 = vld [vmem:[#allocation5 + $0xdc8] ss:$16 sps:$4 sm:$0xff]  }
 0x4e5   :  { %13678 = vmatpush1.bf16.msra.mxu1 %v17371_v0  ;;  %12991 = vmatprep.subr.bf16.mxu0 %v17376_v51  ;;  %v17442_v0 = vld [vmem:[#allocation5 + $0xde4] ss:$16 sps:$4 sm:$0xff]   ;;  %v17445_v51 = vld [vmem:[#allocation5 + $0xdec] ss:$16 sps:$4 sm:$0xff]  }
 0x4e6   :  { %13679 = vmatprep.subr.bf16.mxu1 %v17379_v24  ;;  %v17440_v24 = vld [vmem:[#allocation5 + $0xde0] ss:$16 sps:$4 sm:$0xff]  }
 0x4e8   :  { %12992 = vmatpush1.bf16.msra.mxu0 %v17374_v54  ;;  %v17443_v54 = vld [vmem:[#allocation5 + $0xde8] ss:$16 sps:$4 sm:$0xff]  }
 0x4e9   :  { %13680 = vmatpush1.bf16.msra.mxu1 %v17377_v56  ;;  %12993 = vmatprep.subr.bf16.mxu0 %v17382_v52  ;;  %v17448_v56 = vld [vmem:[#allocation5 + $0xe04] ss:$16 sps:$4 sm:$0xff]   ;;  %v17451_v52 = vld [vmem:[#allocation5 + $0xe0c] ss:$16 sps:$4 sm:$0xff]  }
 0x4ea   :  { %13681 = vmatprep.subr.bf16.mxu1 %v17385_v58  ;;  %v17446_v58 = vld [vmem:[#allocation5 + $0xe00] ss:$16 sps:$4 sm:$0xff]  }
 0x4ec   :  { %12994 = vmatpush1.bf16.msra.mxu0 %v17380_v37  ;;  %v17449_v37 = vld [vmem:[#allocation5 + $0xe08] ss:$16 sps:$4 sm:$0xff]  }
 0x4ed   :  { %13682 = vmatpush1.bf16.msra.mxu1 %v17383_v46  ;;  %12995 = vmatprep.subr.bf16.mxu0 %v17388_v59  ;;  %v17454_v46 = vld [vmem:[#allocation5 + $0xe24] ss:$16 sps:$4 sm:$0xff]   ;;  %v17457_v59 = vld [vmem:[#allocation5 + $0xe2c] ss:$16 sps:$4 sm:$0xff]  }
 0x4ee   :  { %13683 = vmatprep.subr.bf16.mxu1 %v17391_v62  ;;  %v17452_v62 = vld [vmem:[#allocation5 + $0xe20] ss:$16 sps:$4 sm:$0xff]  }
 0x4f0   :  { %12996 = vmatpush1.bf16.msra.mxu0 %v17386_v5  ;;  %v17455_v5 = vld [vmem:[#allocation5 + $0xe28] ss:$16 sps:$4 sm:$0xff]  }
 0x4f1   :  { %13684 = vmatpush1.bf16.msra.mxu1 %v17389_v30  ;;  %12997 = vmatprep.subr.bf16.mxu0 %v17394_v20  ;;  %v17460_v30 = vld [vmem:[#allocation5 + $0xe44] ss:$16 sps:$4 sm:$0xff]   ;;  %v17463_v20 = vld [vmem:[#allocation5 + $0xe4c] ss:$16 sps:$4 sm:$0xff]  }
 0x4f2   :  { %13685 = vmatprep.subr.bf16.mxu1 %v17397_v53  ;;  %v17458_v53 = vld [vmem:[#allocation5 + $0xe40] ss:$16 sps:$4 sm:$0xff]  }
 0x4f4   :  { %12998 = vmatpush1.bf16.msra.mxu0 %v17392_v38  ;;  %v17461_v38 = vld [vmem:[#allocation5 + $0xe48] ss:$16 sps:$4 sm:$0xff]  }
 0x4f5   :  { %13686 = vmatpush1.bf16.msra.mxu1 %v17395_v22  ;;  %12999 = vmatprep.subr.bf16.mxu0 %v17400_v18  ;;  %v17466_v22 = vld [vmem:[#allocation5 + $0xe64] ss:$16 sps:$4 sm:$0xff]   ;;  %v17464_v18 = vld [vmem:[#allocation5 + $0xe60] ss:$16 sps:$4 sm:$0xff]  }
 0x4f6   :  { %13687 = vmatprep.subr.bf16.mxu1 %v17403_v2  ;;  %v17467_v2 = vld [vmem:[#allocation5 + $0xe68] ss:$16 sps:$4 sm:$0xff]  }
 0x4f8   :  { %13000 = vmatpush1.bf16.msra.mxu0 %v17398_v25  ;;  %v17472_v25 = vld [vmem:[#allocation5 + $0xe84] ss:$16 sps:$4 sm:$0xff]  }
 0x4f9   :  { %13688 = vmatpush1.bf16.msra.mxu1 %v17401_v45  ;;  %13001 = vmatprep.subr.bf16.mxu0 %v17406_v15  ;;  %v17475_v45 = vld [vmem:[#allocation5 + $0xe8c] ss:$16 sps:$4 sm:$0xff]   ;;  %v17473_v15 = vld [vmem:[#allocation5 + $0xe88] ss:$16 sps:$4 sm:$0xff]  }
 0x4fa   :  { %13689 = vmatprep.subr.bf16.mxu1 %v17409_v23  ;;  %v17478_v23 = vld [vmem:[#allocation5 + $0xea4] ss:$16 sps:$4 sm:$0xff]  }
 0x4fc   :  { %13002 = vmatpush1.bf16.msra.mxu0 %v17404_v13  ;;  %v17481_v13 = vld [vmem:[#allocation5 + $0xeac] ss:$16 sps:$4 sm:$0xff]  }
 0x4fd   :  { %13690 = vmatpush1.bf16.msra.mxu1 %v17407_v44  ;;  %13003 = vmatprep.subr.bf16.mxu0 %v17412_v41  ;;  %v17476_v44 = vld [vmem:[#allocation5 + $0xea0] ss:$16 sps:$4 sm:$0xff]   ;;  %v17479_v41 = vld [vmem:[#allocation5 + $0xea8] ss:$16 sps:$4 sm:$0xff]  }
 0x4fe   :  { %13691 = vmatprep.subr.bf16.mxu1 %v17415_v55  ;;  %v17484_v55 = vld [vmem:[#allocation5 + $0xec4] ss:$16 sps:$4 sm:$0xff]  }
 0x500   :  { %13004 = vmatpush1.bf16.msra.mxu0 %v17410_v60  ;;  %v17487_v60 = vld [vmem:[#allocation5 + $0xecc] ss:$16 sps:$4 sm:$0xff]  }
 0x501   :  { %13692 = vmatpush1.bf16.msra.mxu1 %v17413_v10  ;;  %13005 = vmatprep.subr.bf16.mxu0 %v17418_v6  ;;  %v17482_v10 = vld [vmem:[#allocation5 + $0xec0] ss:$16 sps:$4 sm:$0xff]   ;;  %v17485_v6 = vld [vmem:[#allocation5 + $0xec8] ss:$16 sps:$4 sm:$0xff]  }
 0x502   :  { %13693 = vmatprep.subr.bf16.mxu1 %v17421_v1  ;;  %v17490_v1 = vld [vmem:[#allocation5 + $0xee4] ss:$16 sps:$4 sm:$0xff]  }
 0x504   :  { %13006 = vmatpush1.bf16.msra.mxu0 %v17416_v29  ;;  %v17493_v29 = vld [vmem:[#allocation5 + $0xeec] ss:$16 sps:$4 sm:$0xff]  }
 0x505   :  { %13694 = vmatpush1.bf16.msra.mxu1 %v17419_v8  ;;  %13007 = vmatprep.subr.bf16.mxu0 %v17424_v35  ;;  %v17488_v8 = vld [vmem:[#allocation5 + $0xee0] ss:$16 sps:$4 sm:$0xff]   ;;  %v17491_v35 = vld [vmem:[#allocation5 + $0xee8] ss:$16 sps:$4 sm:$0xff]  }
 0x506   :  { %13695 = vmatprep.subr.bf16.mxu1 %v17427_v26  ;;  %v17496_v26 = vld [vmem:[#allocation5 + $0xf04] ss:$16 sps:$4 sm:$0xff]  }
 0x508   :  { %13008 = vmatpush1.bf16.msra.mxu0 %v17422_v36  ;;  %v17499_v36 = vld [vmem:[#allocation5 + $0xf0c] ss:$16 sps:$4 sm:$0xff]  }
 0x509   :  { %13696 = vmatpush1.bf16.msra.mxu1 %v17425_v63  ;;  %13009 = vmatprep.subr.bf16.mxu0 %v17430_v33  ;;  %v17494_v63 = vld [vmem:[#allocation5 + $0xf00] ss:$16 sps:$4 sm:$0xff]   ;;  %v17497_v33 = vld [vmem:[#allocation5 + $0xf08] ss:$16 sps:$4 sm:$0xff]  }
 0x50a   :  { %13697 = vmatprep.subr.bf16.mxu1 %v17433_v17  ;;  %v17502_v17 = vld [vmem:[#allocation5 + $0xf24] ss:$16 sps:$4 sm:$0xff]  }
 0x50c   :  { %13010 = vmatpush1.bf16.msra.mxu0 %v17428_v4  ;;  %v17505_v4 = vld [vmem:[#allocation5 + $0xf2c] ss:$16 sps:$4 sm:$0xff]  }
 0x50d   :  { %13698 = vmatpush1.bf16.msra.mxu1 %v17431_v50  ;;  %13011 = vmatprep.subr.bf16.mxu0 %v17436_v47  ;;  %v17500_v50 = vld [vmem:[#allocation5 + $0xf20] ss:$16 sps:$4 sm:$0xff]   ;;  %v17503_v47 = vld [vmem:[#allocation5 + $0xf28] ss:$16 sps:$4 sm:$0xff]  }
 0x50e   :  { %13699 = vmatprep.subr.bf16.mxu1 %v17439_v9  ;;  %v17508_v9 = vld [vmem:[#allocation5 + $0xf44] ss:$16 sps:$4 sm:$0xff]  }
 0x510   :  { %13012 = vmatpush1.bf16.msra.mxu0 %v17434_v27  ;;  %v17511_v27 = vld [vmem:[#allocation5 + $0xf4c] ss:$16 sps:$4 sm:$0xff]  }
 0x511   :  { %13700 = vmatpush1.bf16.msra.mxu1 %v17437_v34  ;;  %13013 = vmatprep.subr.bf16.mxu0 %v17442_v0  ;;  %v17506_v34 = vld [vmem:[#allocation5 + $0xf40] ss:$16 sps:$4 sm:$0xff]   ;;  %v17509_v0 = vld [vmem:[#allocation5 + $0xf48] ss:$16 sps:$4 sm:$0xff]  }
 0x512   :  { %13701 = vmatprep.subr.bf16.mxu1 %v17445_v51  ;;  %v17514_v51 = vld [vmem:[#allocation5 + $0xf64] ss:$16 sps:$4 sm:$0xff]  }
 0x514   :  { %13014 = vmatpush1.bf16.msra.mxu0 %v17440_v24  ;;  %v17517_v24 = vld [vmem:[#allocation5 + $0xf6c] ss:$16 sps:$4 sm:$0xff]  }
 0x515   :  { %13702 = vmatpush1.bf16.msra.mxu1 %v17443_v54  ;;  %13026 = vmatprep.subr.bf16.mxu0 %v17448_v56  ;;  %v17512_v54 = vld [vmem:[#allocation5 + $0xf60] ss:$16 sps:$4 sm:$0xff]   ;;  %v17515_v56 = vld [vmem:[#allocation5 + $0xf68] ss:$16 sps:$4 sm:$0xff]  }
 0x516   :  { %13714 = vmatprep.subr.bf16.mxu1 %v17451_v52  ;;  %v17520_v52 = vld [vmem:[#allocation5 + $0xf84] ss:$16 sps:$4 sm:$0xff]  }
 0x517   :  { %13016 = vmatmul.mubr.bf16.vlgmr.msra.gmra.mrb[120].mxu0 %v21324_v43 }
 0x518   :  { %13704 = vmatmul.mubr.bf16.vlgmr.msra.gmra.mrb[136].mxu1 %v21324_v43  ;;  %13027 = vmatpush1.bf16.msra.mxu0 %v17446_v58  ;;  %v17469_v43 = vld [vmem:[#allocation5 + $0xe6c] ss:$16 sps:$4 sm:$0xff]  }
 0x519   :  { %13058 = vmatprep.mubr.bf16.mxu0 %v21338_v39  ;;  %13715 = vmatpush1.bf16.msra.mxu1 %v17449_v37  ;;  %v17523_v58 = vld [vmem:[#allocation5 + $0xf8c] ss:$16 sps:$4 sm:$0xff]   ;;  %v17518_v37 = vld [vmem:[#allocation5 + $0xf80] ss:$16 sps:$4 sm:$0xff]  }
 0x51a   :  { %13746 = vmatprep.mubr.bf16.mxu1 %v21338_v39  ;;  %13028 = vmatprep.subr.bf16.mxu0 %v17454_v46  ;;  %v17470_v39 = vld [vmem:[#allocation5 + $0xe80] ss:$16 sps:$4 sm:$0xff]   ;;  %v17521_v46 = vld [vmem:[#allocation5 + $0xf88] ss:$16 sps:$4 sm:$0xff]  }
 0x51b   :  { %13716 = vmatprep.subr.bf16.mxu1 %v17457_v59  ;;  %v17526_v59 = vld [vmem:[#allocation5 + $0xfa4] ss:$16 sps:$4 sm:$0xff]  }
 0x51c   :  { %13029 = vmatpush1.bf16.msra.mxu0 %v17452_v62  ;;  %v17529_v62 = vld [vmem:[#allocation5 + $0xfac] ss:$16 sps:$4 sm:$0xff]  }
 0x51d   :  { %13717 = vmatpush1.bf16.msra.mxu1 %v17455_v5  ;;  %13030 = vmatprep.subr.bf16.mxu0 %v17460_v30  ;;  %v17524_v5 = vld [vmem:[#allocation5 + $0xfa0] ss:$16 sps:$4 sm:$0xff]   ;;  %v17527_v30 = vld [vmem:[#allocation5 + $0xfa8] ss:$16 sps:$4 sm:$0xff]  }
 0x51e   :  { %13718 = vmatprep.subr.bf16.mxu1 %v17463_v20  ;;  %v17532_v20 = vld [vmem:[#allocation5 + $0xfc4] ss:$16 sps:$4 sm:$0xff]  }
 0x520   :  { %13031 = vmatpush1.bf16.msra.mxu0 %v17458_v53  ;;  %v17535_v53 = vld [vmem:[#allocation5 + $0xfcc] ss:$16 sps:$4 sm:$0xff]  }
 0x521   :  { %13719 = vmatpush1.bf16.msra.mxu1 %v17461_v38  ;;  %13032 = vmatprep.subr.bf16.mxu0 %v17466_v22  ;;  %v17530_v38 = vld [vmem:[#allocation5 + $0xfc0] ss:$16 sps:$4 sm:$0xff]   ;;  %v17533_v22 = vld [vmem:[#allocation5 + $0xfc8] ss:$16 sps:$4 sm:$0xff]  }
 0x522   :  { %13720 = vmatprep.subr.bf16.mxu1 %v17469_v43  ;;  %v17538_v43 = vld [vmem:[#allocation5 + $0xfe4] ss:$16 sps:$4 sm:$0xff]  }
 0x524   :  { %13033 = vmatpush1.bf16.msra.mxu0 %v17464_v18  ;;  %v17541_v18 = vld [vmem:[#allocation5 + $0xfec] ss:$16 sps:$4 sm:$0xff]  }
 0x525   :  { %13721 = vmatpush1.bf16.msra.mxu1 %v17467_v2  ;;  %13034 = vmatprep.subr.bf16.mxu0 %v17472_v25  ;;  %v17536_v2 = vld [vmem:[#allocation5 + $0xfe0] ss:$16 sps:$4 sm:$0xff]   ;;  %v17539_v25 = vld [vmem:[#allocation5 + $0xfe8] ss:$16 sps:$4 sm:$0xff]  }
 0x526   :  { %13722 = vmatprep.subr.bf16.mxu1 %v17475_v45  ;;  %v17544_v45 = vld [vmem:[#allocation5 + $0x1004] ss:$16 sps:$4 sm:$0xff]  }
 0x528   :  { %13035 = vmatpush1.bf16.msra.mxu0 %v17470_v39  ;;  %v17547_v39 = vld [vmem:[#allocation5 + $0x100c] ss:$16 sps:$4 sm:$0xff]  }
 0x529   :  { %13723 = vmatpush1.bf16.msra.mxu1 %v17473_v15  ;;  %13036 = vmatprep.subr.bf16.mxu0 %v17478_v23  ;;  %v17542_v15 = vld [vmem:[#allocation5 + $0x1000] ss:$16 sps:$4 sm:$0xff]   ;;  %v17545_v23 = vld [vmem:[#allocation5 + $0x1008] ss:$16 sps:$4 sm:$0xff]  }
 0x52a   :  { %13724 = vmatprep.subr.bf16.mxu1 %v17481_v13  ;;  %v17550_v13 = vld [vmem:[#allocation5 + $0x1024] ss:$16 sps:$4 sm:$0xff]  }
 0x52c   :  { %13037 = vmatpush1.bf16.msra.mxu0 %v17476_v44  ;;  %v17553_v44 = vld [vmem:[#allocation5 + $0x102c] ss:$16 sps:$4 sm:$0xff]  }
 0x52d   :  { %13725 = vmatpush1.bf16.msra.mxu1 %v17479_v41  ;;  %13038 = vmatprep.subr.bf16.mxu0 %v17484_v55  ;;  %v17548_v41 = vld [vmem:[#allocation5 + $0x1020] ss:$16 sps:$4 sm:$0xff]   ;;  %v17551_v55 = vld [vmem:[#allocation5 + $0x1028] ss:$16 sps:$4 sm:$0xff]  }
 0x52e   :  { %13726 = vmatprep.subr.bf16.mxu1 %v17487_v60  ;;  %v17556_v60 = vld [vmem:[#allocation5 + $0x1044] ss:$16 sps:$4 sm:$0xff]  }
 0x530   :  { %13039 = vmatpush1.bf16.msra.mxu0 %v17482_v10  ;;  %v17559_v10 = vld [vmem:[#allocation5 + $0x104c] ss:$16 sps:$4 sm:$0xff]  }
 0x531   :  { %13727 = vmatpush1.bf16.msra.mxu1 %v17485_v6  ;;  %13040 = vmatprep.subr.bf16.mxu0 %v17490_v1  ;;  %v17554_v6 = vld [vmem:[#allocation5 + $0x1040] ss:$16 sps:$4 sm:$0xff]   ;;  %v17557_v1 = vld [vmem:[#allocation5 + $0x1048] ss:$16 sps:$4 sm:$0xff]  }
 0x532   :  { %13728 = vmatprep.subr.bf16.mxu1 %v17493_v29  ;;  %v17562_v29 = vld [vmem:[#allocation5 + $0x1064] ss:$16 sps:$4 sm:$0xff]  }
 0x534   :  { %13041 = vmatpush1.bf16.msra.mxu0 %v17488_v8  ;;  %v17560_v8 = vld [vmem:[#allocation5 + $0x1060] ss:$16 sps:$4 sm:$0xff]  }
 0x535   :  { %13729 = vmatpush1.bf16.msra.mxu1 %v17491_v35  ;;  %13042 = vmatprep.subr.bf16.mxu0 %v17496_v26  ;;  %v17563_v35 = vld [vmem:[#allocation5 + $0x1068] ss:$16 sps:$4 sm:$0xff]   ;;  %v17568_v26 = vld [vmem:[#allocation5 + $0x1084] ss:$16 sps:$4 sm:$0xff]  }
 0x536   :  { %13730 = vmatprep.subr.bf16.mxu1 %v17499_v36  ;;  %v17571_v36 = vld [vmem:[#allocation5 + $0x108c] ss:$16 sps:$4 sm:$0xff]  }
 0x538   :  { %13043 = vmatpush1.bf16.msra.mxu0 %v17494_v63  ;;  %v17569_v63 = vld [vmem:[#allocation5 + $0x1088] ss:$16 sps:$4 sm:$0xff]  }
 0x539   :  { %13731 = vmatpush1.bf16.msra.mxu1 %v17497_v33  ;;  %13044 = vmatprep.subr.bf16.mxu0 %v17502_v17  ;;  %v17574_v33 = vld [vmem:[#allocation5 + $0x10a4] ss:$16 sps:$4 sm:$0xff]   ;;  %v17577_v17 = vld [vmem:[#allocation5 + $0x10ac] ss:$16 sps:$4 sm:$0xff]  }
 0x53a   :  { %13732 = vmatprep.subr.bf16.mxu1 %v17505_v4  ;;  %v17572_v4 = vld [vmem:[#allocation5 + $0x10a0] ss:$16 sps:$4 sm:$0xff]  }
 0x53c   :  { %13045 = vmatpush1.bf16.msra.mxu0 %v17500_v50  ;;  %v17575_v50 = vld [vmem:[#allocation5 + $0x10a8] ss:$16 sps:$4 sm:$0xff]  }
 0x53d   :  { %13733 = vmatpush1.bf16.msra.mxu1 %v17503_v47  ;;  %13046 = vmatprep.subr.bf16.mxu0 %v17508_v9  ;;  %v17580_v47 = vld [vmem:[#allocation5 + $0x10c4] ss:$16 sps:$4 sm:$0xff]   ;;  %v17583_v9 = vld [vmem:[#allocation5 + $0x10cc] ss:$16 sps:$4 sm:$0xff]  }
 0x53e   :  { %13734 = vmatprep.subr.bf16.mxu1 %v17511_v27  ;;  %v17578_v27 = vld [vmem:[#allocation5 + $0x10c0] ss:$16 sps:$4 sm:$0xff]  }
 0x540   :  { %13047 = vmatpush1.bf16.msra.mxu0 %v17506_v34  ;;  %v17581_v34 = vld [vmem:[#allocation5 + $0x10c8] ss:$16 sps:$4 sm:$0xff]  }
 0x541   :  { %13735 = vmatpush1.bf16.msra.mxu1 %v17509_v0  ;;  %13048 = vmatprep.subr.bf16.mxu0 %v17514_v51  ;;  %v17586_v0 = vld [vmem:[#allocation5 + $0x10e4] ss:$16 sps:$4 sm:$0xff]   ;;  %v17589_v51 = vld [vmem:[#allocation5 + $0x10ec] ss:$16 sps:$4 sm:$0xff]  }
 0x542   :  { %13736 = vmatprep.subr.bf16.mxu1 %v17517_v24  ;;  %v17584_v24 = vld [vmem:[#allocation5 + $0x10e0] ss:$16 sps:$4 sm:$0xff]  }
 0x544   :  { %13049 = vmatpush1.bf16.msra.mxu0 %v17512_v54  ;;  %v17587_v54 = vld [vmem:[#allocation5 + $0x10e8] ss:$16 sps:$4 sm:$0xff]  }
 0x545   :  { %13737 = vmatpush1.bf16.msra.mxu1 %v17515_v56  ;;  %13050 = vmatprep.subr.bf16.mxu0 %v17520_v52  ;;  %v17592_v56 = vld [vmem:[#allocation5 + $0x1104] ss:$16 sps:$4 sm:$0xff]   ;;  %v17595_v52 = vld [vmem:[#allocation5 + $0x110c] ss:$16 sps:$4 sm:$0xff]  }
 0x546   :  { %13738 = vmatprep.subr.bf16.mxu1 %v17523_v58  ;;  %v17590_v58 = vld [vmem:[#allocation5 + $0x1100] ss:$16 sps:$4 sm:$0xff]  }
 0x548   :  { %13051 = vmatpush1.bf16.msra.mxu0 %v17518_v37  ;;  %v17593_v37 = vld [vmem:[#allocation5 + $0x1108] ss:$16 sps:$4 sm:$0xff]  }
 0x549   :  { %13739 = vmatpush1.bf16.msra.mxu1 %v17521_v46  ;;  %13052 = vmatprep.subr.bf16.mxu0 %v17526_v59  ;;  %v17598_v46 = vld [vmem:[#allocation5 + $0x1124] ss:$16 sps:$4 sm:$0xff]   ;;  %v17601_v59 = vld [vmem:[#allocation5 + $0x112c] ss:$16 sps:$4 sm:$0xff]  }
 0x54a   :  { %13740 = vmatprep.subr.bf16.mxu1 %v17529_v62  ;;  %v17596_v62 = vld [vmem:[#allocation5 + $0x1120] ss:$16 sps:$4 sm:$0xff]  }
 0x54c   :  { %13053 = vmatpush1.bf16.msra.mxu0 %v17524_v5  ;;  %v17599_v5 = vld [vmem:[#allocation5 + $0x1128] ss:$16 sps:$4 sm:$0xff]  }
 0x54d   :  { %13741 = vmatpush1.bf16.msra.mxu1 %v17527_v30  ;;  %13054 = vmatprep.subr.bf16.mxu0 %v17532_v20  ;;  %v17604_v30 = vld [vmem:[#allocation5 + $0x1144] ss:$16 sps:$4 sm:$0xff]   ;;  %v17607_v20 = vld [vmem:[#allocation5 + $0x114c] ss:$16 sps:$4 sm:$0xff]  }
 0x54e   :  { %13742 = vmatprep.subr.bf16.mxu1 %v17535_v53  ;;  %v17602_v53 = vld [vmem:[#allocation5 + $0x1140] ss:$16 sps:$4 sm:$0xff]  }
 0x550   :  { %13055 = vmatpush1.bf16.msra.mxu0 %v17530_v38  ;;  %v17605_v38 = vld [vmem:[#allocation5 + $0x1148] ss:$16 sps:$4 sm:$0xff]  }
 0x551   :  { %13743 = vmatpush1.bf16.msra.mxu1 %v17533_v22  ;;  %13056 = vmatprep.subr.bf16.mxu0 %v17538_v43  ;;  %v17610_v22 = vld [vmem:[#allocation5 + $0x1164] ss:$16 sps:$4 sm:$0xff]   ;;  %v17613_v43 = vld [vmem:[#allocation5 + $0x116c] ss:$16 sps:$4 sm:$0xff]  }
 0x552   :  { %13744 = vmatprep.subr.bf16.mxu1 %v17541_v18  ;;  %v17608_v18 = vld [vmem:[#allocation5 + $0x1160] ss:$16 sps:$4 sm:$0xff]  }
 0x554   :  { %13057 = vmatpush1.bf16.msra.mxu0 %v17536_v2  ;;  %v17611_v2 = vld [vmem:[#allocation5 + $0x1168] ss:$16 sps:$4 sm:$0xff]  }
 0x555   :  { %13745 = vmatpush1.bf16.msra.mxu1 %v17539_v25  ;;  %13069 = vmatprep.subr.bf16.mxu0 %v17544_v45  ;;  %v17616_v25 = vld [vmem:[#allocation5 + $0x1184] ss:$16 sps:$4 sm:$0xff]   ;;  %v17619_v45 = vld [vmem:[#allocation5 + $0x118c] ss:$16 sps:$4 sm:$0xff]  }
 0x556   :  { %13757 = vmatprep.subr.bf16.mxu1 %v17547_v39  ;;  %v17614_v39 = vld [vmem:[#allocation5 + $0x1180] ss:$16 sps:$4 sm:$0xff]  }
 0x557   :  { %13059 = vmatmul.mubr.bf16.vlgmr.msra.gmra.mrb[120].mxu0 %v21340_v57 }
 0x558   :  { %13747 = vmatmul.mubr.bf16.vlgmr.msra.gmra.mrb[136].mxu1 %v21340_v57  ;;  %13070 = vmatpush1.bf16.msra.mxu0 %v17542_v15  ;;  %v17565_v57 = vld [vmem:[#allocation5 + $0x106c] ss:$16 sps:$4 sm:$0xff]   ;;  %v17617_v15 = vld [vmem:[#allocation5 + $0x1188] ss:$16 sps:$4 sm:$0xff]  }
 0x559   :  { %13101 = vmatprep.mubr.bf16.mxu0 %v21376_v28  ;;  %13758 = vmatpush1.bf16.msra.mxu1 %v17545_v23  ;;  %v17622_v23 = vld [vmem:[#allocation5 + $0x11a4] ss:$16 sps:$4 sm:$0xff]  }
 0x55a   :  { %13789 = vmatprep.mubr.bf16.mxu1 %v21376_v28  ;;  %13071 = vmatprep.subr.bf16.mxu0 %v17550_v13  ;;  %v17566_v28 = vld [vmem:[#allocation5 + $0x1080] ss:$16 sps:$4 sm:$0xff]   ;;  %v17625_v13 = vld [vmem:[#allocation5 + $0x11ac] ss:$16 sps:$4 sm:$0xff]  }
 0x55b   :  { %13759 = vmatprep.subr.bf16.mxu1 %v17553_v44  ;;  %v17620_v44 = vld [vmem:[#allocation5 + $0x11a0] ss:$16 sps:$4 sm:$0xff]  }
 0x55c   :  { %13072 = vmatpush1.bf16.msra.mxu0 %v17548_v41  ;;  %v17623_v41 = vld [vmem:[#allocation5 + $0x11a8] ss:$16 sps:$4 sm:$0xff]  }
 0x55d   :  { %13760 = vmatpush1.bf16.msra.mxu1 %v17551_v55  ;;  %13073 = vmatprep.subr.bf16.mxu0 %v17556_v60  ;;  %v17628_v55 = vld [vmem:[#allocation5 + $0x11c4] ss:$16 sps:$4 sm:$0xff]   ;;  %v17631_v60 = vld [vmem:[#allocation5 + $0x11cc] ss:$16 sps:$4 sm:$0xff]  }
 0x55e   :  { %13761 = vmatprep.subr.bf16.mxu1 %v17559_v10  ;;  %v17626_v10 = vld [vmem:[#allocation5 + $0x11c0] ss:$16 sps:$4 sm:$0xff]  }
 0x560   :  { %13074 = vmatpush1.bf16.msra.mxu0 %v17554_v6  ;;  %v17629_v6 = vld [vmem:[#allocation5 + $0x11c8] ss:$16 sps:$4 sm:$0xff]  }
 0x561   :  { %13762 = vmatpush1.bf16.msra.mxu1 %v17557_v1  ;;  %13075 = vmatprep.subr.bf16.mxu0 %v17562_v29  ;;  %v17634_v1 = vld [vmem:[#allocation5 + $0x11e4] ss:$16 sps:$4 sm:$0xff]   ;;  %v17637_v29 = vld [vmem:[#allocation5 + $0x11ec] ss:$16 sps:$4 sm:$0xff]  }
 0x562   :  { %13763 = vmatprep.subr.bf16.mxu1 %v17565_v57  ;;  %v17632_v57 = vld [vmem:[#allocation5 + $0x11e0] ss:$16 sps:$4 sm:$0xff]  }
 0x564   :  { %13076 = vmatpush1.bf16.msra.mxu0 %v17560_v8  ;;  %v17635_v8 = vld [vmem:[#allocation5 + $0x11e8] ss:$16 sps:$4 sm:$0xff]  }
 0x565   :  { %13764 = vmatpush1.bf16.msra.mxu1 %v17563_v35  ;;  %13077 = vmatprep.subr.bf16.mxu0 %v17568_v26  ;;  %v17640_v35 = vld [vmem:[#allocation5 + $0x1204] ss:$16 sps:$4 sm:$0xff]   ;;  %v17643_v26 = vld [vmem:[#allocation5 + $0x120c] ss:$16 sps:$4 sm:$0xff]  }
 0x566   :  { %13765 = vmatprep.subr.bf16.mxu1 %v17571_v36  ;;  %v17638_v36 = vld [vmem:[#allocation5 + $0x1200] ss:$16 sps:$4 sm:$0xff]  }
 0x568   :  { %13078 = vmatpush1.bf16.msra.mxu0 %v17566_v28  ;;  %v17641_v28 = vld [vmem:[#allocation5 + $0x1208] ss:$16 sps:$4 sm:$0xff]  }
 0x569   :  { %13766 = vmatpush1.bf16.msra.mxu1 %v17569_v63  ;;  %13079 = vmatprep.subr.bf16.mxu0 %v17574_v33  ;;  %v17646_v63 = vld [vmem:[#allocation5 + $0x1224] ss:$16 sps:$4 sm:$0xff]   ;;  %v17649_v33 = vld [vmem:[#allocation5 + $0x122c] ss:$16 sps:$4 sm:$0xff]  }
 0x56a   :  { %13767 = vmatprep.subr.bf16.mxu1 %v17577_v17  ;;  %v17644_v17 = vld [vmem:[#allocation5 + $0x1220] ss:$16 sps:$4 sm:$0xff]  }
 0x56c   :  { %13080 = vmatpush1.bf16.msra.mxu0 %v17572_v4  ;;  %v17647_v4 = vld [vmem:[#allocation5 + $0x1228] ss:$16 sps:$4 sm:$0xff]  }
 0x56d   :  { %13768 = vmatpush1.bf16.msra.mxu1 %v17575_v50  ;;  %13081 = vmatprep.subr.bf16.mxu0 %v17580_v47  ;;  %v17652_v50 = vld [vmem:[#allocation5 + $0x1244] ss:$16 sps:$4 sm:$0xff]   ;;  %v17655_v47 = vld [vmem:[#allocation5 + $0x124c] ss:$16 sps:$4 sm:$0xff]  }
 0x56e   :  { %13769 = vmatprep.subr.bf16.mxu1 %v17583_v9  ;;  %v17650_v9 = vld [vmem:[#allocation5 + $0x1240] ss:$16 sps:$4 sm:$0xff]  }
 0x570   :  { %13082 = vmatpush1.bf16.msra.mxu0 %v17578_v27  ;;  %v17653_v27 = vld [vmem:[#allocation5 + $0x1248] ss:$16 sps:$4 sm:$0xff]  }
 0x571   :  { %13770 = vmatpush1.bf16.msra.mxu1 %v17581_v34  ;;  %13083 = vmatprep.subr.bf16.mxu0 %v17586_v0  ;;  %v17658_v34 = vld [vmem:[#allocation5 + $0x1264] ss:$16 sps:$4 sm:$0xff]   ;;  %v17656_v0 = vld [vmem:[#allocation5 + $0x1260] ss:$16 sps:$4 sm:$0xff]  }
 0x572   :  { %13771 = vmatprep.subr.bf16.mxu1 %v17589_v51  ;;  %v17659_v51 = vld [vmem:[#allocation5 + $0x1268] ss:$16 sps:$4 sm:$0xff]  }
 0x574   :  { %13084 = vmatpush1.bf16.msra.mxu0 %v17584_v24  ;;  %v17664_v24 = vld [vmem:[#allocation5 + $0x1284] ss:$16 sps:$4 sm:$0xff]  }
 0x575   :  { %13772 = vmatpush1.bf16.msra.mxu1 %v17587_v54  ;;  %13085 = vmatprep.subr.bf16.mxu0 %v17592_v56  ;;  %v17667_v54 = vld [vmem:[#allocation5 + $0x128c] ss:$16 sps:$4 sm:$0xff]   ;;  %v17665_v56 = vld [vmem:[#allocation5 + $0x1288] ss:$16 sps:$4 sm:$0xff]  }
 0x576   :  { %13773 = vmatprep.subr.bf16.mxu1 %v17595_v52  ;;  %v17670_v52 = vld [vmem:[#allocation5 + $0x12a4] ss:$16 sps:$4 sm:$0xff]  }
 0x578   :  { %13086 = vmatpush1.bf16.msra.mxu0 %v17590_v58  ;;  %v17673_v58 = vld [vmem:[#allocation5 + $0x12ac] ss:$16 sps:$4 sm:$0xff]  }
 0x579   :  { %13774 = vmatpush1.bf16.msra.mxu1 %v17593_v37  ;;  %13087 = vmatprep.subr.bf16.mxu0 %v17598_v46  ;;  %v17668_v37 = vld [vmem:[#allocation5 + $0x12a0] ss:$16 sps:$4 sm:$0xff]   ;;  %v17671_v46 = vld [vmem:[#allocation5 + $0x12a8] ss:$16 sps:$4 sm:$0xff]  }
 0x57a   :  { %13775 = vmatprep.subr.bf16.mxu1 %v17601_v59  ;;  %v17676_v59 = vld [vmem:[#allocation5 + $0x12c4] ss:$16 sps:$4 sm:$0xff]  }
 0x57c   :  { %13088 = vmatpush1.bf16.msra.mxu0 %v17596_v62  ;;  %v17679_v62 = vld [vmem:[#allocation5 + $0x12cc] ss:$16 sps:$4 sm:$0xff]  }
 0x57d   :  { %13776 = vmatpush1.bf16.msra.mxu1 %v17599_v5  ;;  %13089 = vmatprep.subr.bf16.mxu0 %v17604_v30  ;;  %v17674_v5 = vld [vmem:[#allocation5 + $0x12c0] ss:$16 sps:$4 sm:$0xff]   ;;  %v17677_v30 = vld [vmem:[#allocation5 + $0x12c8] ss:$16 sps:$4 sm:$0xff]  }
 0x57e   :  { %13777 = vmatprep.subr.bf16.mxu1 %v17607_v20  ;;  %v17682_v20 = vld [vmem:[#allocation5 + $0x12e4] ss:$16 sps:$4 sm:$0xff]  }
 0x580   :  { %13090 = vmatpush1.bf16.msra.mxu0 %v17602_v53  ;;  %v17685_v53 = vld [vmem:[#allocation5 + $0x12ec] ss:$16 sps:$4 sm:$0xff]  }
 0x581   :  { %13778 = vmatpush1.bf16.msra.mxu1 %v17605_v38  ;;  %13091 = vmatprep.subr.bf16.mxu0 %v17610_v22  ;;  %v17680_v38 = vld [vmem:[#allocation5 + $0x12e0] ss:$16 sps:$4 sm:$0xff]   ;;  %v17683_v22 = vld [vmem:[#allocation5 + $0x12e8] ss:$16 sps:$4 sm:$0xff]  }
 0x582   :  { %13779 = vmatprep.subr.bf16.mxu1 %v17613_v43  ;;  %v17688_v43 = vld [vmem:[#allocation5 + $0x1304] ss:$16 sps:$4 sm:$0xff]  }
 0x584   :  { %13092 = vmatpush1.bf16.msra.mxu0 %v17608_v18  ;;  %v17691_v18 = vld [vmem:[#allocation5 + $0x130c] ss:$16 sps:$4 sm:$0xff]  }
 0x585   :  { %13780 = vmatpush1.bf16.msra.mxu1 %v17611_v2  ;;  %13093 = vmatprep.subr.bf16.mxu0 %v17616_v25  ;;  %v17686_v2 = vld [vmem:[#allocation5 + $0x1300] ss:$16 sps:$4 sm:$0xff]   ;;  %v17689_v25 = vld [vmem:[#allocation5 + $0x1308] ss:$16 sps:$4 sm:$0xff]  }
 0x586   :  { %13781 = vmatprep.subr.bf16.mxu1 %v17619_v45  ;;  %v17694_v45 = vld [vmem:[#allocation5 + $0x1324] ss:$16 sps:$4 sm:$0xff]  }
 0x588   :  { %13094 = vmatpush1.bf16.msra.mxu0 %v17614_v39  ;;  %v17697_v39 = vld [vmem:[#allocation5 + $0x132c] ss:$16 sps:$4 sm:$0xff]  }
 0x589   :  { %13782 = vmatpush1.bf16.msra.mxu1 %v17617_v15  ;;  %13095 = vmatprep.subr.bf16.mxu0 %v17622_v23  ;;  %v17692_v15 = vld [vmem:[#allocation5 + $0x1320] ss:$16 sps:$4 sm:$0xff]   ;;  %v17695_v23 = vld [vmem:[#allocation5 + $0x1328] ss:$16 sps:$4 sm:$0xff]  }
 0x58a   :  { %13783 = vmatprep.subr.bf16.mxu1 %v17625_v13  ;;  %v17700_v13 = vld [vmem:[#allocation5 + $0x1344] ss:$16 sps:$4 sm:$0xff]  }
 0x58c   :  { %13096 = vmatpush1.bf16.msra.mxu0 %v17620_v44  ;;  %v17703_v44 = vld [vmem:[#allocation5 + $0x134c] ss:$16 sps:$4 sm:$0xff]  }
 0x58d   :  { %13784 = vmatpush1.bf16.msra.mxu1 %v17623_v41  ;;  %13097 = vmatprep.subr.bf16.mxu0 %v17628_v55  ;;  %v17698_v41 = vld [vmem:[#allocation5 + $0x1340] ss:$16 sps:$4 sm:$0xff]   ;;  %v17701_v55 = vld [vmem:[#allocation5 + $0x1348] ss:$16 sps:$4 sm:$0xff]  }
 0x58e   :  { %13785 = vmatprep.subr.bf16.mxu1 %v17631_v60  ;;  %v17706_v60 = vld [vmem:[#allocation5 + $0x1364] ss:$16 sps:$4 sm:$0xff]  }
 0x590   :  { %13098 = vmatpush1.bf16.msra.mxu0 %v17626_v10  ;;  %v17709_v10 = vld [vmem:[#allocation5 + $0x136c] ss:$16 sps:$4 sm:$0xff]  }
 0x591   :  { %13786 = vmatpush1.bf16.msra.mxu1 %v17629_v6  ;;  %13099 = vmatprep.subr.bf16.mxu0 %v17634_v1  ;;  %v17704_v6 = vld [vmem:[#allocation5 + $0x1360] ss:$16 sps:$4 sm:$0xff]   ;;  %v17707_v1 = vld [vmem:[#allocation5 + $0x1368] ss:$16 sps:$4 sm:$0xff]  }
 0x592   :  { %13787 = vmatprep.subr.bf16.mxu1 %v17637_v29  ;;  %v17712_v29 = vld [vmem:[#allocation5 + $0x1384] ss:$16 sps:$4 sm:$0xff]  }
 0x594   :  { %13100 = vmatpush1.bf16.msra.mxu0 %v17632_v57  ;;  %v17715_v57 = vld [vmem:[#allocation5 + $0x138c] ss:$16 sps:$4 sm:$0xff]  }
 0x595   :  { %13788 = vmatpush1.bf16.msra.mxu1 %v17635_v8  ;;  %13112 = vmatprep.subr.bf16.mxu0 %v17640_v35  ;;  %v17710_v8 = vld [vmem:[#allocation5 + $0x1380] ss:$16 sps:$4 sm:$0xff]   ;;  %v17713_v35 = vld [vmem:[#allocation5 + $0x1388] ss:$16 sps:$4 sm:$0xff]  }
 0x596   :  { %13800 = vmatprep.subr.bf16.mxu1 %v17643_v26  ;;  %v17718_v26 = vld [vmem:[#allocation5 + $0x13a4] ss:$16 sps:$4 sm:$0xff]  }
 0x597   :  { %13102 = vmatmul.mubr.bf16.vlgmr.msra.gmra.mrb[120].mxu0 %v21378_v42 }
 0x598   :  { %13790 = vmatmul.mubr.bf16.vlgmr.msra.gmra.mrb[136].mxu1 %v21378_v42  ;;  %13113 = vmatpush1.bf16.msra.mxu0 %v17638_v36  ;;  %v17661_v42 = vld [vmem:[#allocation5 + $0x126c] ss:$16 sps:$4 sm:$0xff]  }
 0x599   :  { %13144 = vmatprep.mubr.bf16.mxu0 %v21384_v14  ;;  %13801 = vmatpush1.bf16.msra.mxu1 %v17641_v28  ;;  %v17721_v36 = vld [vmem:[#allocation5 + $0x13ac] ss:$16 sps:$4 sm:$0xff]   ;;  %v17716_v28 = vld [vmem:[#allocation5 + $0x13a0] ss:$16 sps:$4 sm:$0xff]  }
 0x59a   :  { %13832 = vmatprep.mubr.bf16.mxu1 %v21384_v14  ;;  %13114 = vmatprep.subr.bf16.mxu0 %v17646_v63  ;;  %v17662_v14 = vld [vmem:[#allocation5 + $0x1280] ss:$16 sps:$4 sm:$0xff]   ;;  %v17719_v63 = vld [vmem:[#allocation5 + $0x13a8] ss:$16 sps:$4 sm:$0xff]  }
 0x59b   :  { %13802 = vmatprep.subr.bf16.mxu1 %v17649_v33  ;;  %v17724_v33 = vld [vmem:[#allocation5 + $0x13c4] ss:$16 sps:$4 sm:$0xff]  }
 0x59c   :  { %13115 = vmatpush1.bf16.msra.mxu0 %v17644_v17  ;;  %v17727_v17 = vld [vmem:[#allocation5 + $0x13cc] ss:$16 sps:$4 sm:$0xff]  }
 0x59d   :  { %13803 = vmatpush1.bf16.msra.mxu1 %v17647_v4  ;;  %13116 = vmatprep.subr.bf16.mxu0 %v17652_v50  ;;  %v17722_v4 = vld [vmem:[#allocation5 + $0x13c0] ss:$16 sps:$4 sm:$0xff]   ;;  %v17725_v50 = vld [vmem:[#allocation5 + $0x13c8] ss:$16 sps:$4 sm:$0xff]  }
 0x59e   :  { %13804 = vmatprep.subr.bf16.mxu1 %v17655_v47  ;;  %v17730_v47 = vld [vmem:[#allocation5 + $0x13e4] ss:$16 sps:$4 sm:$0xff]  }
 0x5a0   :  { %13117 = vmatpush1.bf16.msra.mxu0 %v17650_v9  ;;  %v17733_v9 = vld [vmem:[#allocation5 + $0x13ec] ss:$16 sps:$4 sm:$0xff]  }
 0x5a1   :  { %13805 = vmatpush1.bf16.msra.mxu1 %v17653_v27  ;;  %13118 = vmatprep.subr.bf16.mxu0 %v17658_v34  ;;  %v17728_v27 = vld [vmem:[#allocation5 + $0x13e0] ss:$16 sps:$4 sm:$0xff]   ;;  %v17731_v34 = vld [vmem:[#allocation5 + $0x13e8] ss:$16 sps:$4 sm:$0xff]  }
 0x5a2   :  { %13806 = vmatprep.subr.bf16.mxu1 %v17661_v42  ;;  %v17736_v42 = vld [vmem:[#allocation5 + $0x1404] ss:$16 sps:$4 sm:$0xff]  }
 0x5a4   :  { %13119 = vmatpush1.bf16.msra.mxu0 %v17656_v0  ;;  %v17739_v0 = vld [vmem:[#allocation5 + $0x140c] ss:$16 sps:$4 sm:$0xff]  }
 0x5a5   :  { %13807 = vmatpush1.bf16.msra.mxu1 %v17659_v51  ;;  %13120 = vmatprep.subr.bf16.mxu0 %v17664_v24  ;;  %v17734_v51 = vld [vmem:[#allocation5 + $0x1400] ss:$16 sps:$4 sm:$0xff]   ;;  %v17737_v24 = vld [vmem:[#allocation5 + $0x1408] ss:$16 sps:$4 sm:$0xff]  }
 0x5a6   :  { %13808 = vmatprep.subr.bf16.mxu1 %v17667_v54  ;;  %v17742_v54 = vld [vmem:[#allocation5 + $0x1424] ss:$16 sps:$4 sm:$0xff]  }
 0x5a8   :  { %13121 = vmatpush1.bf16.msra.mxu0 %v17662_v14  ;;  %v17745_v14 = vld [vmem:[#allocation5 + $0x142c] ss:$16 sps:$4 sm:$0xff]  }
 0x5a9   :  { %13809 = vmatpush1.bf16.msra.mxu1 %v17665_v56  ;;  %13122 = vmatprep.subr.bf16.mxu0 %v17670_v52  ;;  %v17740_v56 = vld [vmem:[#allocation5 + $0x1420] ss:$16 sps:$4 sm:$0xff]   ;;  %v17743_v52 = vld [vmem:[#allocation5 + $0x1428] ss:$16 sps:$4 sm:$0xff]  }
 0x5aa   :  { %13810 = vmatprep.subr.bf16.mxu1 %v17673_v58  ;;  %v17748_v58 = vld [vmem:[#allocation5 + $0x1444] ss:$16 sps:$4 sm:$0xff]  }
 0x5ac   :  { %13123 = vmatpush1.bf16.msra.mxu0 %v17668_v37  ;;  %v17751_v37 = vld [vmem:[#allocation5 + $0x144c] ss:$16 sps:$4 sm:$0xff]  }
 0x5ad   :  { %13811 = vmatpush1.bf16.msra.mxu1 %v17671_v46  ;;  %13124 = vmatprep.subr.bf16.mxu0 %v17676_v59  ;;  %v17746_v46 = vld [vmem:[#allocation5 + $0x1440] ss:$16 sps:$4 sm:$0xff]   ;;  %v17749_v59 = vld [vmem:[#allocation5 + $0x1448] ss:$16 sps:$4 sm:$0xff]  }
 0x5ae   :  { %13812 = vmatprep.subr.bf16.mxu1 %v17679_v62  ;;  %v17754_v62 = vld [vmem:[#allocation5 + $0x1464] ss:$16 sps:$4 sm:$0xff]  }
 0x5b0   :  { %13125 = vmatpush1.bf16.msra.mxu0 %v17674_v5  ;;  %v17752_v5 = vld [vmem:[#allocation5 + $0x1460] ss:$16 sps:$4 sm:$0xff]  }
 0x5b1   :  { %13813 = vmatpush1.bf16.msra.mxu1 %v17677_v30  ;;  %13126 = vmatprep.subr.bf16.mxu0 %v17682_v20  ;;  %v17755_v30 = vld [vmem:[#allocation5 + $0x1468] ss:$16 sps:$4 sm:$0xff]   ;;  %v17760_v20 = vld [vmem:[#allocation5 + $0x1484] ss:$16 sps:$4 sm:$0xff]  }
 0x5b2   :  { %13814 = vmatprep.subr.bf16.mxu1 %v17685_v53  ;;  %v17763_v53 = vld [vmem:[#allocation5 + $0x148c] ss:$16 sps:$4 sm:$0xff]  }
 0x5b4   :  { %13127 = vmatpush1.bf16.msra.mxu0 %v17680_v38  ;;  %v17761_v38 = vld [vmem:[#allocation5 + $0x1488] ss:$16 sps:$4 sm:$0xff]  }
 0x5b5   :  { %13815 = vmatpush1.bf16.msra.mxu1 %v17683_v22  ;;  %13128 = vmatprep.subr.bf16.mxu0 %v17688_v43  ;;  %v17766_v22 = vld [vmem:[#allocation5 + $0x14a4] ss:$16 sps:$4 sm:$0xff]   ;;  %v17769_v43 = vld [vmem:[#allocation5 + $0x14ac] ss:$16 sps:$4 sm:$0xff]  }
 0x5b6   :  { %13816 = vmatprep.subr.bf16.mxu1 %v17691_v18  ;;  %v17764_v18 = vld [vmem:[#allocation5 + $0x14a0] ss:$16 sps:$4 sm:$0xff]  }
 0x5b8   :  { %13129 = vmatpush1.bf16.msra.mxu0 %v17686_v2  ;;  %v17767_v2 = vld [vmem:[#allocation5 + $0x14a8] ss:$16 sps:$4 sm:$0xff]  }
 0x5b9   :  { %13817 = vmatpush1.bf16.msra.mxu1 %v17689_v25  ;;  %13130 = vmatprep.subr.bf16.mxu0 %v17694_v45  ;;  %v17772_v25 = vld [vmem:[#allocation5 + $0x14c4] ss:$16 sps:$4 sm:$0xff]   ;;  %v17775_v45 = vld [vmem:[#allocation5 + $0x14cc] ss:$16 sps:$4 sm:$0xff]  }
 0x5ba   :  { %13818 = vmatprep.subr.bf16.mxu1 %v17697_v39  ;;  %v17770_v39 = vld [vmem:[#allocation5 + $0x14c0] ss:$16 sps:$4 sm:$0xff]  }
 0x5bc   :  { %13131 = vmatpush1.bf16.msra.mxu0 %v17692_v15  ;;  %v17773_v15 = vld [vmem:[#allocation5 + $0x14c8] ss:$16 sps:$4 sm:$0xff]  }
 0x5bd   :  { %13819 = vmatpush1.bf16.msra.mxu1 %v17695_v23  ;;  %13132 = vmatprep.subr.bf16.mxu0 %v17700_v13  ;;  %v17778_v23 = vld [vmem:[#allocation5 + $0x14e4] ss:$16 sps:$4 sm:$0xff]   ;;  %v17781_v13 = vld [vmem:[#allocation5 + $0x14ec] ss:$16 sps:$4 sm:$0xff]  }
 0x5be   :  { %13820 = vmatprep.subr.bf16.mxu1 %v17703_v44  ;;  %v17776_v44 = vld [vmem:[#allocation5 + $0x14e0] ss:$16 sps:$4 sm:$0xff]  }
 0x5c0   :  { %13133 = vmatpush1.bf16.msra.mxu0 %v17698_v41  ;;  %v17779_v41 = vld [vmem:[#allocation5 + $0x14e8] ss:$16 sps:$4 sm:$0xff]  }
 0x5c1   :  { %13821 = vmatpush1.bf16.msra.mxu1 %v17701_v55  ;;  %13134 = vmatprep.subr.bf16.mxu0 %v17706_v60  ;;  %v17784_v55 = vld [vmem:[#allocation5 + $0x1504] ss:$16 sps:$4 sm:$0xff]   ;;  %v17787_v60 = vld [vmem:[#allocation5 + $0x150c] ss:$16 sps:$4 sm:$0xff]  }
 0x5c2   :  { %13822 = vmatprep.subr.bf16.mxu1 %v17709_v10  ;;  %v17782_v10 = vld [vmem:[#allocation5 + $0x1500] ss:$16 sps:$4 sm:$0xff]  }
 0x5c4   :  { %13135 = vmatpush1.bf16.msra.mxu0 %v17704_v6  ;;  %v17785_v6 = vld [vmem:[#allocation5 + $0x1508] ss:$16 sps:$4 sm:$0xff]  }
 0x5c5   :  { %13823 = vmatpush1.bf16.msra.mxu1 %v17707_v1  ;;  %13136 = vmatprep.subr.bf16.mxu0 %v17712_v29  ;;  %v17790_v1 = vld [vmem:[#allocation5 + $0x1524] ss:$16 sps:$4 sm:$0xff]   ;;  %v17793_v29 = vld [vmem:[#allocation5 + $0x152c] ss:$16 sps:$4 sm:$0xff]  }
 0x5c6   :  { %13824 = vmatprep.subr.bf16.mxu1 %v17715_v57  ;;  %v17788_v57 = vld [vmem:[#allocation5 + $0x1520] ss:$16 sps:$4 sm:$0xff]  }
 0x5c8   :  { %13137 = vmatpush1.bf16.msra.mxu0 %v17710_v8  ;;  %v17791_v8 = vld [vmem:[#allocation5 + $0x1528] ss:$16 sps:$4 sm:$0xff]  }
 0x5c9   :  { %13825 = vmatpush1.bf16.msra.mxu1 %v17713_v35  ;;  %13138 = vmatprep.subr.bf16.mxu0 %v17718_v26  ;;  %v17796_v35 = vld [vmem:[#allocation5 + $0x1544] ss:$16 sps:$4 sm:$0xff]   ;;  %v17799_v26 = vld [vmem:[#allocation5 + $0x154c] ss:$16 sps:$4 sm:$0xff]  }
 0x5ca   :  { %13826 = vmatprep.subr.bf16.mxu1 %v17721_v36  ;;  %v17794_v36 = vld [vmem:[#allocation5 + $0x1540] ss:$16 sps:$4 sm:$0xff]  }
 0x5cc   :  { %13139 = vmatpush1.bf16.msra.mxu0 %v17716_v28  ;;  %v17797_v28 = vld [vmem:[#allocation5 + $0x1548] ss:$16 sps:$4 sm:$0xff]  }
 0x5cd   :  { %13827 = vmatpush1.bf16.msra.mxu1 %v17719_v63  ;;  %13140 = vmatprep.subr.bf16.mxu0 %v17724_v33  ;;  %v17802_v63 = vld [vmem:[#allocation5 + $0x1564] ss:$16 sps:$4 sm:$0xff]   ;;  %v17805_v33 = vld [vmem:[#allocation5 + $0x156c] ss:$16 sps:$4 sm:$0xff]  }
 0x5ce   :  { %13828 = vmatprep.subr.bf16.mxu1 %v17727_v17  ;;  %v17800_v17 = vld [vmem:[#allocation5 + $0x1560] ss:$16 sps:$4 sm:$0xff]  }
 0x5d0   :  { %13141 = vmatpush1.bf16.msra.mxu0 %v17722_v4  ;;  %v17803_v4 = vld [vmem:[#allocation5 + $0x1568] ss:$16 sps:$4 sm:$0xff]  }
 0x5d1   :  { %13829 = vmatpush1.bf16.msra.mxu1 %v17725_v50  ;;  %13142 = vmatprep.subr.bf16.mxu0 %v17730_v47  ;;  %v17808_v50 = vld [vmem:[#allocation5 + $0x1584] ss:$16 sps:$4 sm:$0xff]   ;;  %v17811_v47 = vld [vmem:[#allocation5 + $0x158c] ss:$16 sps:$4 sm:$0xff]  }
 0x5d2   :  { %13830 = vmatprep.subr.bf16.mxu1 %v17733_v9  ;;  %v17806_v9 = vld [vmem:[#allocation5 + $0x1580] ss:$16 sps:$4 sm:$0xff]  }
 0x5d4   :  { %13143 = vmatpush1.bf16.msra.mxu0 %v17728_v27  ;;  %v17809_v27 = vld [vmem:[#allocation5 + $0x1588] ss:$16 sps:$4 sm:$0xff]  }
 0x5d5   :  { %13831 = vmatpush1.bf16.msra.mxu1 %v17731_v34  ;;  %13155 = vmatprep.subr.bf16.mxu0 %v17736_v42  ;;  %v17814_v34 = vld [vmem:[#allocation5 + $0x15a4] ss:$16 sps:$4 sm:$0xff]   ;;  %v17817_v42 = vld [vmem:[#allocation5 + $0x15ac] ss:$16 sps:$4 sm:$0xff]  }
 0x5d6   :  { %13843 = vmatprep.subr.bf16.mxu1 %v17739_v0  ;;  %v17812_v0 = vld [vmem:[#allocation5 + $0x15a0] ss:$16 sps:$4 sm:$0xff]  }
 0x5d7   :  { %13145 = vmatmul.mubr.bf16.vlgmr.msra.gmra.mrb[120].mxu0 %v21386_v21 }
 0x5d8   :  { %13833 = vmatmul.mubr.bf16.vlgmr.msra.gmra.mrb[136].mxu1 %v21386_v21  ;;  %13156 = vmatpush1.bf16.msra.mxu0 %v17734_v51  ;;  %v17757_v21 = vld [vmem:[#allocation5 + $0x146c] ss:$16 sps:$4 sm:$0xff]   ;;  %v17815_v51 = vld [vmem:[#allocation5 + $0x15a8] ss:$16 sps:$4 sm:$0xff]  }
 0x5d9   :  { %13187 = vmatprep.mubr.bf16.mxu0 %v21452_v40  ;;  %13844 = vmatpush1.bf16.msra.mxu1 %v17737_v24  ;;  %v17820_v24 = vld [vmem:[#allocation5 + $0x15c4] ss:$16 sps:$4 sm:$0xff]  }
 0x5da   :  { %13875 = vmatprep.mubr.bf16.mxu1 %v21452_v40  ;;  %13157 = vmatprep.subr.bf16.mxu0 %v17742_v54  ;;  %v17758_v40 = vld [vmem:[#allocation5 + $0x1480] ss:$16 sps:$4 sm:$0xff]   ;;  %v17823_v54 = vld [vmem:[#allocation5 + $0x15cc] ss:$16 sps:$4 sm:$0xff]  }
 0x5db   :  { %13845 = vmatprep.subr.bf16.mxu1 %v17745_v14  ;;  %v17818_v14 = vld [vmem:[#allocation5 + $0x15c0] ss:$16 sps:$4 sm:$0xff]  }
 0x5dc   :  { %13158 = vmatpush1.bf16.msra.mxu0 %v17740_v56  ;;  %v17821_v56 = vld [vmem:[#allocation5 + $0x15c8] ss:$16 sps:$4 sm:$0xff]  }
 0x5dd   :  { %13846 = vmatpush1.bf16.msra.mxu1 %v17743_v52  ;;  %13159 = vmatprep.subr.bf16.mxu0 %v17748_v58  ;;  %v17826_v52 = vld [vmem:[#allocation5 + $0x15e4] ss:$16 sps:$4 sm:$0xff]   ;;  %v17829_v58 = vld [vmem:[#allocation5 + $0x15ec] ss:$16 sps:$4 sm:$0xff]  }
 0x5de   :  { %13847 = vmatprep.subr.bf16.mxu1 %v17751_v37  ;;  %v17824_v37 = vld [vmem:[#allocation5 + $0x15e0] ss:$16 sps:$4 sm:$0xff]  }
 0x5e0   :  { %13160 = vmatpush1.bf16.msra.mxu0 %v17746_v46  ;;  %v17827_v46 = vld [vmem:[#allocation5 + $0x15e8] ss:$16 sps:$4 sm:$0xff]  }
 0x5e1   :  { %13848 = vmatpush1.bf16.msra.mxu1 %v17749_v59  ;;  %13161 = vmatprep.subr.bf16.mxu0 %v17754_v62  ;;  %v17832_v59 = vld [vmem:[#allocation5 + $0x1604] ss:$16 sps:$4 sm:$0xff]   ;;  %v17835_v62 = vld [vmem:[#allocation5 + $0x160c] ss:$16 sps:$4 sm:$0xff]  }
 0x5e2   :  { %13849 = vmatprep.subr.bf16.mxu1 %v17757_v21  ;;  %v17830_v21 = vld [vmem:[#allocation5 + $0x1600] ss:$16 sps:$4 sm:$0xff]  }
 0x5e4   :  { %13162 = vmatpush1.bf16.msra.mxu0 %v17752_v5  ;;  %v17833_v5 = vld [vmem:[#allocation5 + $0x1608] ss:$16 sps:$4 sm:$0xff]  }
 0x5e5   :  { %13850 = vmatpush1.bf16.msra.mxu1 %v17755_v30  ;;  %13163 = vmatprep.subr.bf16.mxu0 %v17760_v20  ;;  %v17838_v30 = vld [vmem:[#allocation5 + $0x1624] ss:$16 sps:$4 sm:$0xff]   ;;  %v17841_v20 = vld [vmem:[#allocation5 + $0x162c] ss:$16 sps:$4 sm:$0xff]  }
 0x5e6   :  { %13851 = vmatprep.subr.bf16.mxu1 %v17763_v53  ;;  %v17836_v53 = vld [vmem:[#allocation5 + $0x1620] ss:$16 sps:$4 sm:$0xff]  }
 0x5e8   :  { %13164 = vmatpush1.bf16.msra.mxu0 %v17758_v40  ;;  %v17839_v40 = vld [vmem:[#allocation5 + $0x1628] ss:$16 sps:$4 sm:$0xff]  }
 0x5e9   :  { %13852 = vmatpush1.bf16.msra.mxu1 %v17761_v38  ;;  %13165 = vmatprep.subr.bf16.mxu0 %v17766_v22  ;;  %v17844_v38 = vld [vmem:[#allocation5 + $0x1644] ss:$16 sps:$4 sm:$0xff]   ;;  %v17847_v22 = vld [vmem:[#allocation5 + $0x164c] ss:$16 sps:$4 sm:$0xff]  }
 0x5ea   :  { %13853 = vmatprep.subr.bf16.mxu1 %v17769_v43  ;;  %v17842_v43 = vld [vmem:[#allocation5 + $0x1640] ss:$16 sps:$4 sm:$0xff]  }
 0x5ec   :  { %13166 = vmatpush1.bf16.msra.mxu0 %v17764_v18  ;;  %v17845_v18 = vld [vmem:[#allocation5 + $0x1648] ss:$16 sps:$4 sm:$0xff]  }
 0x5ed   :  { %13854 = vmatpush1.bf16.msra.mxu1 %v17767_v2  ;;  %13167 = vmatprep.subr.bf16.mxu0 %v17772_v25  ;;  %v17850_v2 = vld [vmem:[#allocation5 + $0x1664] ss:$16 sps:$4 sm:$0xff]   ;;  %v17848_v25 = vld [vmem:[#allocation5 + $0x1660] ss:$16 sps:$4 sm:$0xff]  }
 0x5ee   :  { %13855 = vmatprep.subr.bf16.mxu1 %v17775_v45  ;;  %v17851_v45 = vld [vmem:[#allocation5 + $0x1668] ss:$16 sps:$4 sm:$0xff]  }
 0x5f0   :  { %13168 = vmatpush1.bf16.msra.mxu0 %v17770_v39  ;;  %v17856_v39 = vld [vmem:[#allocation5 + $0x1684] ss:$16 sps:$4 sm:$0xff]  }
 0x5f1   :  { %13856 = vmatpush1.bf16.msra.mxu1 %v17773_v15  ;;  %13169 = vmatprep.subr.bf16.mxu0 %v17778_v23  ;;  %v17859_v15 = vld [vmem:[#allocation5 + $0x168c] ss:$16 sps:$4 sm:$0xff]   ;;  %v17857_v23 = vld [vmem:[#allocation5 + $0x1688] ss:$16 sps:$4 sm:$0xff]  }
 0x5f2   :  { %13857 = vmatprep.subr.bf16.mxu1 %v17781_v13  ;;  %v17862_v13 = vld [vmem:[#allocation5 + $0x16a4] ss:$16 sps:$4 sm:$0xff]  }
 0x5f4   :  { %13170 = vmatpush1.bf16.msra.mxu0 %v17776_v44  ;;  %v17865_v44 = vld [vmem:[#allocation5 + $0x16ac] ss:$16 sps:$4 sm:$0xff]  }
 0x5f5   :  { %13858 = vmatpush1.bf16.msra.mxu1 %v17779_v41  ;;  %13171 = vmatprep.subr.bf16.mxu0 %v17784_v55  ;;  %v17860_v41 = vld [vmem:[#allocation5 + $0x16a0] ss:$16 sps:$4 sm:$0xff]   ;;  %v17863_v55 = vld [vmem:[#allocation5 + $0x16a8] ss:$16 sps:$4 sm:$0xff]  }
 0x5f6   :  { %13859 = vmatprep.subr.bf16.mxu1 %v17787_v60  ;;  %v17868_v60 = vld [vmem:[#allocation5 + $0x16c4] ss:$16 sps:$4 sm:$0xff]  }
 0x5f8   :  { %13172 = vmatpush1.bf16.msra.mxu0 %v17782_v10  ;;  %v17871_v10 = vld [vmem:[#allocation5 + $0x16cc] ss:$16 sps:$4 sm:$0xff]  }
 0x5f9   :  { %13860 = vmatpush1.bf16.msra.mxu1 %v17785_v6  ;;  %13173 = vmatprep.subr.bf16.mxu0 %v17790_v1  ;;  %v17866_v6 = vld [vmem:[#allocation5 + $0x16c0] ss:$16 sps:$4 sm:$0xff]   ;;  %v17869_v1 = vld [vmem:[#allocation5 + $0x16c8] ss:$16 sps:$4 sm:$0xff]  }
 0x5fa   :  { %13861 = vmatprep.subr.bf16.mxu1 %v17793_v29  ;;  %v17874_v29 = vld [vmem:[#allocation5 + $0x16e4] ss:$16 sps:$4 sm:$0xff]  }
 0x5fc   :  { %13174 = vmatpush1.bf16.msra.mxu0 %v17788_v57  ;;  %v17877_v57 = vld [vmem:[#allocation5 + $0x16ec] ss:$16 sps:$4 sm:$0xff]  }
 0x5fd   :  { %13862 = vmatpush1.bf16.msra.mxu1 %v17791_v8  ;;  %13175 = vmatprep.subr.bf16.mxu0 %v17796_v35  ;;  %v17872_v8 = vld [vmem:[#allocation5 + $0x16e0] ss:$16 sps:$4 sm:$0xff]   ;;  %v17875_v35 = vld [vmem:[#allocation5 + $0x16e8] ss:$16 sps:$4 sm:$0xff]  }
 0x5fe   :  { %13863 = vmatprep.subr.bf16.mxu1 %v17799_v26  ;;  %v17880_v26 = vld [vmem:[#allocation5 + $0x1704] ss:$16 sps:$4 sm:$0xff]  }
 0x600   :  { %13176 = vmatpush1.bf16.msra.mxu0 %v17794_v36  ;;  %v17883_v36 = vld [vmem:[#allocation5 + $0x170c] ss:$16 sps:$4 sm:$0xff]  }
 0x601   :  { %13864 = vmatpush1.bf16.msra.mxu1 %v17797_v28  ;;  %13177 = vmatprep.subr.bf16.mxu0 %v17802_v63  ;;  %v17878_v28 = vld [vmem:[#allocation5 + $0x1700] ss:$16 sps:$4 sm:$0xff]   ;;  %v17881_v63 = vld [vmem:[#allocation5 + $0x1708] ss:$16 sps:$4 sm:$0xff]  }
 0x602   :  { %13865 = vmatprep.subr.bf16.mxu1 %v17805_v33  ;;  %v17886_v33 = vld [vmem:[#allocation5 + $0x1724] ss:$16 sps:$4 sm:$0xff]  }
 0x604   :  { %13178 = vmatpush1.bf16.msra.mxu0 %v17800_v17  ;;  %v17889_v17 = vld [vmem:[#allocation5 + $0x172c] ss:$16 sps:$4 sm:$0xff]  }
 0x605   :  { %13866 = vmatpush1.bf16.msra.mxu1 %v17803_v4  ;;  %13179 = vmatprep.subr.bf16.mxu0 %v17808_v50  ;;  %v17884_v4 = vld [vmem:[#allocation5 + $0x1720] ss:$16 sps:$4 sm:$0xff]   ;;  %v17887_v50 = vld [vmem:[#allocation5 + $0x1728] ss:$16 sps:$4 sm:$0xff]  }
 0x606   :  { %13867 = vmatprep.subr.bf16.mxu1 %v17811_v47  ;;  %v17892_v47 = vld [vmem:[#allocation5 + $0x1744] ss:$16 sps:$4 sm:$0xff]  }
 0x608   :  { %13180 = vmatpush1.bf16.msra.mxu0 %v17806_v9  ;;  %v17895_v9 = vld [vmem:[#allocation5 + $0x174c] ss:$16 sps:$4 sm:$0xff]  }
 0x609   :  { %13868 = vmatpush1.bf16.msra.mxu1 %v17809_v27  ;;  %13181 = vmatprep.subr.bf16.mxu0 %v17814_v34  ;;  %v17890_v27 = vld [vmem:[#allocation5 + $0x1740] ss:$16 sps:$4 sm:$0xff]   ;;  %v17893_v34 = vld [vmem:[#allocation5 + $0x1748] ss:$16 sps:$4 sm:$0xff]  }
 0x60a   :  { %13869 = vmatprep.subr.bf16.mxu1 %v17817_v42  ;;  %v17898_v42 = vld [vmem:[#allocation5 + $0x1764] ss:$16 sps:$4 sm:$0xff]  }
 0x60c   :  { %13182 = vmatpush1.bf16.msra.mxu0 %v17812_v0  ;;  %v17901_v0 = vld [vmem:[#allocation5 + $0x176c] ss:$16 sps:$4 sm:$0xff]  }
 0x60d   :  { %13870 = vmatpush1.bf16.msra.mxu1 %v17815_v51  ;;  %13183 = vmatprep.subr.bf16.mxu0 %v17820_v24  ;;  %v17896_v51 = vld [vmem:[#allocation5 + $0x1760] ss:$16 sps:$4 sm:$0xff]   ;;  %v17899_v24 = vld [vmem:[#allocation5 + $0x1768] ss:$16 sps:$4 sm:$0xff]  }
 0x60e   :  { %13871 = vmatprep.subr.bf16.mxu1 %v17823_v54  ;;  %v17904_v54 = vld [vmem:[#allocation5 + $0x1784] ss:$16 sps:$4 sm:$0xff]  }
 0x610   :  { %13184 = vmatpush1.bf16.msra.mxu0 %v17818_v14  ;;  %v17907_v14 = vld [vmem:[#allocation5 + $0x178c] ss:$16 sps:$4 sm:$0xff]  }
 0x611   :  { %13872 = vmatpush1.bf16.msra.mxu1 %v17821_v56  ;;  %13185 = vmatprep.subr.bf16.mxu0 %v17826_v52  ;;  %v17902_v56 = vld [vmem:[#allocation5 + $0x1780] ss:$16 sps:$4 sm:$0xff]   ;;  %v17905_v52 = vld [vmem:[#allocation5 + $0x1788] ss:$16 sps:$4 sm:$0xff]  }
 0x612   :  { %13873 = vmatprep.subr.bf16.mxu1 %v17829_v58  ;;  %v17910_v58 = vld [vmem:[#allocation5 + $0x17a4] ss:$16 sps:$4 sm:$0xff]  }
 0x614   :  { %13186 = vmatpush1.bf16.msra.mxu0 %v17824_v37  ;;  %v17913_v37 = vld [vmem:[#allocation5 + $0x17ac] ss:$16 sps:$4 sm:$0xff]  }
 0x615   :  { %13874 = vmatpush1.bf16.msra.mxu1 %v17827_v46  ;;  %13198 = vmatprep.subr.bf16.mxu0 %v17832_v59  ;;  %v17908_v46 = vld [vmem:[#allocation5 + $0x17a0] ss:$16 sps:$4 sm:$0xff]   ;;  %v17911_v59 = vld [vmem:[#allocation5 + $0x17a8] ss:$16 sps:$4 sm:$0xff]  }
 0x616   :  { %13886 = vmatprep.subr.bf16.mxu1 %v17835_v62  ;;  %v17916_v62 = vld [vmem:[#allocation5 + $0x17c4] ss:$16 sps:$4 sm:$0xff]  }
 0x617   :  { %13188 = vmatmul.mubr.bf16.vlgmr.msra.gmra.mrb[120].mxu0 %v21454_v19 }
 0x618   :  { %13876 = vmatmul.mubr.bf16.vlgmr.msra.gmra.mrb[136].mxu1 %v21454_v19  ;;  %13199 = vmatpush1.bf16.msra.mxu0 %v17830_v21  ;;  %v17853_v19 = vld [vmem:[#allocation5 + $0x166c] ss:$16 sps:$4 sm:$0xff]  }
 0x619   :  { %13230 = vmatprep.mubr.bf16.mxu0 %v21456_v11  ;;  %13887 = vmatpush1.bf16.msra.mxu1 %v17833_v5  ;;  %v17919_v21 = vld [vmem:[#allocation5 + $0x17cc] ss:$16 sps:$4 sm:$0xff]   ;;  %v17914_v5 = vld [vmem:[#allocation5 + $0x17c0] ss:$16 sps:$4 sm:$0xff]  }
 0x61a   :  { %13918 = vmatprep.mubr.bf16.mxu1 %v21456_v11  ;;  %13200 = vmatprep.subr.bf16.mxu0 %v17838_v30  ;;  %v17854_v11 = vld [vmem:[#allocation5 + $0x1680] ss:$16 sps:$4 sm:$0xff]   ;;  %v17917_v30 = vld [vmem:[#allocation5 + $0x17c8] ss:$16 sps:$4 sm:$0xff]  }
 0x61b   :  { %13888 = vmatprep.subr.bf16.mxu1 %v17841_v20  ;;  %v17922_v20 = vld [vmem:[#allocation5 + $0x17e4] ss:$16 sps:$4 sm:$0xff]  }
 0x61c   :  { %13201 = vmatpush1.bf16.msra.mxu0 %v17836_v53  ;;  %v17925_v53 = vld [vmem:[#allocation5 + $0x17ec] ss:$16 sps:$4 sm:$0xff]  }
 0x61d   :  { %13889 = vmatpush1.bf16.msra.mxu1 %v17839_v40  ;;  %13202 = vmatprep.subr.bf16.mxu0 %v17844_v38  ;;  %v17920_v40 = vld [vmem:[#allocation5 + $0x17e0] ss:$16 sps:$4 sm:$0xff]   ;;  %v17923_v38 = vld [vmem:[#allocation5 + $0x17e8] ss:$16 sps:$4 sm:$0xff]  }
 0x61e   :  { %13890 = vmatprep.subr.bf16.mxu1 %v17847_v22  ;;  %v17928_v22 = vld [vmem:[#allocation5 + $0x1804] ss:$16 sps:$4 sm:$0xff]  }
 0x620   :  { %13203 = vmatpush1.bf16.msra.mxu0 %v17842_v43  ;;  %v17931_v43 = vld [vmem:[#allocation5 + $0x180c] ss:$16 sps:$4 sm:$0xff]  }
 0x621   :  { %13891 = vmatpush1.bf16.msra.mxu1 %v17845_v18  ;;  %13204 = vmatprep.subr.bf16.mxu0 %v17850_v2  ;;  %v17926_v18 = vld [vmem:[#allocation5 + $0x1800] ss:$16 sps:$4 sm:$0xff]   ;;  %v17929_v2 = vld [vmem:[#allocation5 + $0x1808] ss:$16 sps:$4 sm:$0xff]  }
 0x622   :  { %13892 = vmatprep.subr.bf16.mxu1 %v17853_v19  ;;  %v17934_v19 = vld [vmem:[#allocation5 + $0x1824] ss:$16 sps:$4 sm:$0xff]  }
 0x624   :  { %13205 = vmatpush1.bf16.msra.mxu0 %v17848_v25  ;;  %v17937_v25 = vld [vmem:[#allocation5 + $0x182c] ss:$16 sps:$4 sm:$0xff]  }
 0x625   :  { %13893 = vmatpush1.bf16.msra.mxu1 %v17851_v45  ;;  %13206 = vmatprep.subr.bf16.mxu0 %v17856_v39  ;;  %v17932_v45 = vld [vmem:[#allocation5 + $0x1820] ss:$16 sps:$4 sm:$0xff]   ;;  %v17935_v39 = vld [vmem:[#allocation5 + $0x1828] ss:$16 sps:$4 sm:$0xff]  }
 0x626   :  { %13894 = vmatprep.subr.bf16.mxu1 %v17859_v15  ;;  %v17940_v15 = vld [vmem:[#allocation5 + $0x1844] ss:$16 sps:$4 sm:$0xff]  }
 0x628   :  { %13207 = vmatpush1.bf16.msra.mxu0 %v17854_v11  ;;  %v17943_v11 = vld [vmem:[#allocation5 + $0x184c] ss:$16 sps:$4 sm:$0xff]  }
 0x629   :  { %13895 = vmatpush1.bf16.msra.mxu1 %v17857_v23  ;;  %13208 = vmatprep.subr.bf16.mxu0 %v17862_v13  ;;  %v17938_v23 = vld [vmem:[#allocation5 + $0x1840] ss:$16 sps:$4 sm:$0xff]   ;;  %v17941_v13 = vld [vmem:[#allocation5 + $0x1848] ss:$16 sps:$4 sm:$0xff]  }
 0x62a   :  { %13896 = vmatprep.subr.bf16.mxu1 %v17865_v44  ;;  %v17946_v44 = vld [vmem:[#allocation5 + $0x1864] ss:$16 sps:$4 sm:$0xff]  }
 0x62c   :  { %13209 = vmatpush1.bf16.msra.mxu0 %v17860_v41  ;;  %v17944_v41 = vld [vmem:[#allocation5 + $0x1860] ss:$16 sps:$4 sm:$0xff]  }
 0x62d   :  { %13897 = vmatpush1.bf16.msra.mxu1 %v17863_v55  ;;  %13210 = vmatprep.subr.bf16.mxu0 %v17868_v60  ;;  %v17947_v55 = vld [vmem:[#allocation5 + $0x1868] ss:$16 sps:$4 sm:$0xff]   ;;  %v17952_v60 = vld [vmem:[#allocation5 + $0x1884] ss:$16 sps:$4 sm:$0xff]  }
 0x62e   :  { %13898 = vmatprep.subr.bf16.mxu1 %v17871_v10  ;;  %v17955_v10 = vld [vmem:[#allocation5 + $0x188c] ss:$16 sps:$4 sm:$0xff]  }
 0x630   :  { %13211 = vmatpush1.bf16.msra.mxu0 %v17866_v6  ;;  %v17953_v6 = vld [vmem:[#allocation5 + $0x1888] ss:$16 sps:$4 sm:$0xff]  }
 0x631   :  { %13899 = vmatpush1.bf16.msra.mxu1 %v17869_v1  ;;  %13212 = vmatprep.subr.bf16.mxu0 %v17874_v29  ;;  %v17958_v1 = vld [vmem:[#allocation5 + $0x18a4] ss:$16 sps:$4 sm:$0xff]   ;;  %v17961_v29 = vld [vmem:[#allocation5 + $0x18ac] ss:$16 sps:$4 sm:$0xff]  }
 0x632   :  { %13900 = vmatprep.subr.bf16.mxu1 %v17877_v57  ;;  %v17956_v57 = vld [vmem:[#allocation5 + $0x18a0] ss:$16 sps:$4 sm:$0xff]  }
 0x634   :  { %13213 = vmatpush1.bf16.msra.mxu0 %v17872_v8  ;;  %v17959_v8 = vld [vmem:[#allocation5 + $0x18a8] ss:$16 sps:$4 sm:$0xff]  }
 0x635   :  { %13901 = vmatpush1.bf16.msra.mxu1 %v17875_v35  ;;  %13214 = vmatprep.subr.bf16.mxu0 %v17880_v26  ;;  %v17964_v35 = vld [vmem:[#allocation5 + $0x18c4] ss:$16 sps:$4 sm:$0xff]   ;;  %v17967_v26 = vld [vmem:[#allocation5 + $0x18cc] ss:$16 sps:$4 sm:$0xff]  }
 0x636   :  { %13902 = vmatprep.subr.bf16.mxu1 %v17883_v36  ;;  %v17962_v36 = vld [vmem:[#allocation5 + $0x18c0] ss:$16 sps:$4 sm:$0xff]  }
 0x638   :  { %13215 = vmatpush1.bf16.msra.mxu0 %v17878_v28  ;;  %v17965_v28 = vld [vmem:[#allocation5 + $0x18c8] ss:$16 sps:$4 sm:$0xff]  }
 0x639   :  { %13903 = vmatpush1.bf16.msra.mxu1 %v17881_v63  ;;  %13216 = vmatprep.subr.bf16.mxu0 %v17886_v33  ;;  %v17970_v63 = vld [vmem:[#allocation5 + $0x18e4] ss:$16 sps:$4 sm:$0xff]   ;;  %v17973_v33 = vld [vmem:[#allocation5 + $0x18ec] ss:$16 sps:$4 sm:$0xff]  }
 0x63a   :  { %13904 = vmatprep.subr.bf16.mxu1 %v17889_v17  ;;  %v17968_v17 = vld [vmem:[#allocation5 + $0x18e0] ss:$16 sps:$4 sm:$0xff]  }
 0x63c   :  { %13217 = vmatpush1.bf16.msra.mxu0 %v17884_v4  ;;  %v17971_v4 = vld [vmem:[#allocation5 + $0x18e8] ss:$16 sps:$4 sm:$0xff]  }
 0x63d   :  { %13905 = vmatpush1.bf16.msra.mxu1 %v17887_v50  ;;  %13218 = vmatprep.subr.bf16.mxu0 %v17892_v47  ;;  %v17976_v50 = vld [vmem:[#allocation5 + $0x1904] ss:$16 sps:$4 sm:$0xff]   ;;  %v17979_v47 = vld [vmem:[#allocation5 + $0x190c] ss:$16 sps:$4 sm:$0xff]  }
 0x63e   :  { %13906 = vmatprep.subr.bf16.mxu1 %v17895_v9  ;;  %v17974_v9 = vld [vmem:[#allocation5 + $0x1900] ss:$16 sps:$4 sm:$0xff]  }
 0x640   :  { %13219 = vmatpush1.bf16.msra.mxu0 %v17890_v27  ;;  %v17977_v27 = vld [vmem:[#allocation5 + $0x1908] ss:$16 sps:$4 sm:$0xff]  }
 0x641   :  { %13907 = vmatpush1.bf16.msra.mxu1 %v17893_v34  ;;  %13220 = vmatprep.subr.bf16.mxu0 %v17898_v42  ;;  %v17982_v34 = vld [vmem:[#allocation5 + $0x1924] ss:$16 sps:$4 sm:$0xff]   ;;  %v17985_v42 = vld [vmem:[#allocation5 + $0x192c] ss:$16 sps:$4 sm:$0xff]  }
 0x642   :  { %13908 = vmatprep.subr.bf16.mxu1 %v17901_v0  ;;  %v17980_v0 = vld [vmem:[#allocation5 + $0x1920] ss:$16 sps:$4 sm:$0xff]  }
 0x644   :  { %13221 = vmatpush1.bf16.msra.mxu0 %v17896_v51  ;;  %v17983_v51 = vld [vmem:[#allocation5 + $0x1928] ss:$16 sps:$4 sm:$0xff]  }
 0x645   :  { %13909 = vmatpush1.bf16.msra.mxu1 %v17899_v24  ;;  %13222 = vmatprep.subr.bf16.mxu0 %v17904_v54  ;;  %v17988_v24 = vld [vmem:[#allocation5 + $0x1944] ss:$16 sps:$4 sm:$0xff]   ;;  %v17991_v54 = vld [vmem:[#allocation5 + $0x194c] ss:$16 sps:$4 sm:$0xff]  }
 0x646   :  { %13910 = vmatprep.subr.bf16.mxu1 %v17907_v14  ;;  %v17986_v14 = vld [vmem:[#allocation5 + $0x1940] ss:$16 sps:$4 sm:$0xff]  }
 0x648   :  { %13223 = vmatpush1.bf16.msra.mxu0 %v17902_v56  ;;  %v17989_v56 = vld [vmem:[#allocation5 + $0x1948] ss:$16 sps:$4 sm:$0xff]  }
 0x649   :  { %13911 = vmatpush1.bf16.msra.mxu1 %v17905_v52  ;;  %13224 = vmatprep.subr.bf16.mxu0 %v17910_v58  ;;  %v17994_v52 = vld [vmem:[#allocation5 + $0x1964] ss:$16 sps:$4 sm:$0xff]   ;;  %v17997_v58 = vld [vmem:[#allocation5 + $0x196c] ss:$16 sps:$4 sm:$0xff]  }
 0x64a   :  { %13912 = vmatprep.subr.bf16.mxu1 %v17913_v37  ;;  %v17992_v37 = vld [vmem:[#allocation5 + $0x1960] ss:$16 sps:$4 sm:$0xff]  }
 0x64c   :  { %13225 = vmatpush1.bf16.msra.mxu0 %v17908_v46  ;;  %v17995_v46 = vld [vmem:[#allocation5 + $0x1968] ss:$16 sps:$4 sm:$0xff]  }
 0x64d   :  { %13913 = vmatpush1.bf16.msra.mxu1 %v17911_v59  ;;  %13226 = vmatprep.subr.bf16.mxu0 %v17916_v62  ;;  %v18000_v59 = vld [vmem:[#allocation5 + $0x1984] ss:$16 sps:$4 sm:$0xff]   ;;  %v18003_v62 = vld [vmem:[#allocation5 + $0x198c] ss:$16 sps:$4 sm:$0xff]  }
 0x64e   :  { %13914 = vmatprep.subr.bf16.mxu1 %v17919_v21  ;;  %v17998_v21 = vld [vmem:[#allocation5 + $0x1980] ss:$16 sps:$4 sm:$0xff]  }
 0x650   :  { %13227 = vmatpush1.bf16.msra.mxu0 %v17914_v5  ;;  %v18001_v5 = vld [vmem:[#allocation5 + $0x1988] ss:$16 sps:$4 sm:$0xff]  }
 0x651   :  { %13915 = vmatpush1.bf16.msra.mxu1 %v17917_v30  ;;  %13228 = vmatprep.subr.bf16.mxu0 %v17922_v20  ;;  %v18006_v30 = vld [vmem:[#allocation5 + $0x19a4] ss:$16 sps:$4 sm:$0xff]   ;;  %v18009_v20 = vld [vmem:[#allocation5 + $0x19ac] ss:$16 sps:$4 sm:$0xff]  }
 0x652   :  { %13916 = vmatprep.subr.bf16.mxu1 %v17925_v53  ;;  %v18004_v53 = vld [vmem:[#allocation5 + $0x19a0] ss:$16 sps:$4 sm:$0xff]  }
 0x654   :  { %13229 = vmatpush1.bf16.msra.mxu0 %v17920_v40  ;;  %v18007_v40 = vld [vmem:[#allocation5 + $0x19a8] ss:$16 sps:$4 sm:$0xff]  }
 0x655   :  { %13917 = vmatpush1.bf16.msra.mxu1 %v17923_v38  ;;  %13241 = vmatprep.subr.bf16.mxu0 %v17928_v22  ;;  %v18012_v38 = vld [vmem:[#allocation5 + $0x19c4] ss:$16 sps:$4 sm:$0xff]   ;;  %v18015_v22 = vld [vmem:[#allocation5 + $0x19cc] ss:$16 sps:$4 sm:$0xff]  }
 0x656   :  { %13929 = vmatprep.subr.bf16.mxu1 %v17931_v43  ;;  %v18010_v43 = vld [vmem:[#allocation5 + $0x19c0] ss:$16 sps:$4 sm:$0xff]  }
 0x657   :  { %13231 = vmatmul.mubr.bf16.vlgmr.msra.gmra.mrb[120].mxu0 %v21458_v32 }
 0x658   :  { %13919 = vmatmul.mubr.bf16.vlgmr.msra.gmra.mrb[136].mxu1 %v21458_v32  ;;  %13242 = vmatpush1.bf16.msra.mxu0 %v17926_v18  ;;  %v17949_v32 = vld [vmem:[#allocation5 + $0x186c] ss:$16 sps:$4 sm:$0xff]   ;;  %v18013_v18 = vld [vmem:[#allocation5 + $0x19c8] ss:$16 sps:$4 sm:$0xff]  }
 0x659   :  { %13273 = vmatprep.mubr.bf16.mxu0 %v21504_v48  ;;  %13930 = vmatpush1.bf16.msra.mxu1 %v17929_v2  ;;  %v18018_v2 = vld [vmem:[#allocation5 + $0x19e4] ss:$16 sps:$4 sm:$0xff]  }
 0x65a   :  { %13961 = vmatprep.mubr.bf16.mxu1 %v21504_v48  ;;  %13243 = vmatprep.subr.bf16.mxu0 %v17934_v19  ;;  %v17950_v48 = vld [vmem:[#allocation5 + $0x1880] ss:$16 sps:$4 sm:$0xff]   ;;  %v18021_v19 = vld [vmem:[#allocation5 + $0x19ec] ss:$16 sps:$4 sm:$0xff]  }
 0x65b   :  { %13931 = vmatprep.subr.bf16.mxu1 %v17937_v25  ;;  %v18016_v25 = vld [vmem:[#allocation5 + $0x19e0] ss:$16 sps:$4 sm:$0xff]  }
 0x65c   :  { %13244 = vmatpush1.bf16.msra.mxu0 %v17932_v45  ;;  %v18019_v45 = vld [vmem:[#allocation5 + $0x19e8] ss:$16 sps:$4 sm:$0xff]  }
 0x65d   :  { %13932 = vmatpush1.bf16.msra.mxu1 %v17935_v39  ;;  %13245 = vmatprep.subr.bf16.mxu0 %v17940_v15  ;;  %v18024_v39 = vld [vmem:[#allocation5 + $0x1a04] ss:$16 sps:$4 sm:$0xff]   ;;  %v18027_v15 = vld [vmem:[#allocation5 + $0x1a0c] ss:$16 sps:$4 sm:$0xff]  }
 0x65e   :  { %13933 = vmatprep.subr.bf16.mxu1 %v17943_v11  ;;  %v18022_v11 = vld [vmem:[#allocation5 + $0x1a00] ss:$16 sps:$4 sm:$0xff]  }
 0x660   :  { %13246 = vmatpush1.bf16.msra.mxu0 %v17938_v23  ;;  %v18025_v23 = vld [vmem:[#allocation5 + $0x1a08] ss:$16 sps:$4 sm:$0xff]  }
 0x661   :  { %13934 = vmatpush1.bf16.msra.mxu1 %v17941_v13  ;;  %13247 = vmatprep.subr.bf16.mxu0 %v17946_v44  ;;  %v18030_v13 = vld [vmem:[#allocation5 + $0x1a24] ss:$16 sps:$4 sm:$0xff]   ;;  %v18033_v44 = vld [vmem:[#allocation5 + $0x1a2c] ss:$16 sps:$4 sm:$0xff]  }
 0x662   :  { %13935 = vmatprep.subr.bf16.mxu1 %v17949_v32  ;;  %v18028_v32 = vld [vmem:[#allocation5 + $0x1a20] ss:$16 sps:$4 sm:$0xff]  }
 0x664   :  { %13248 = vmatpush1.bf16.msra.mxu0 %v17944_v41  ;;  %v18031_v41 = vld [vmem:[#allocation5 + $0x1a28] ss:$16 sps:$4 sm:$0xff]  }
 0x665   :  { %13936 = vmatpush1.bf16.msra.mxu1 %v17947_v55  ;;  %13249 = vmatprep.subr.bf16.mxu0 %v17952_v60  ;;  %v18036_v55 = vld [vmem:[#allocation5 + $0x1a44] ss:$16 sps:$4 sm:$0xff]   ;;  %v18039_v60 = vld [vmem:[#allocation5 + $0x1a4c] ss:$16 sps:$4 sm:$0xff]  }
 0x666   :  { %13937 = vmatprep.subr.bf16.mxu1 %v17955_v10  ;;  %v18034_v10 = vld [vmem:[#allocation5 + $0x1a40] ss:$16 sps:$4 sm:$0xff]  }
 0x668   :  { %13250 = vmatpush1.bf16.msra.mxu0 %v17950_v48  ;;  %v18037_v48 = vld [vmem:[#allocation5 + $0x1a48] ss:$16 sps:$4 sm:$0xff]  }
 0x669   :  { %13938 = vmatpush1.bf16.msra.mxu1 %v17953_v6  ;;  %13251 = vmatprep.subr.bf16.mxu0 %v17958_v1  ;;  %v18042_v6 = vld [vmem:[#allocation5 + $0x1a64] ss:$16 sps:$4 sm:$0xff]   ;;  %v18040_v1 = vld [vmem:[#allocation5 + $0x1a60] ss:$16 sps:$4 sm:$0xff]  }
 0x66a   :  { %13939 = vmatprep.subr.bf16.mxu1 %v17961_v29  ;;  %v18043_v29 = vld [vmem:[#allocation5 + $0x1a68] ss:$16 sps:$4 sm:$0xff]  }
 0x66c   :  { %13252 = vmatpush1.bf16.msra.mxu0 %v17956_v57  ;;  %v18048_v57 = vld [vmem:[#allocation5 + $0x1a84] ss:$16 sps:$4 sm:$0xff]  }
 0x66d   :  { %13940 = vmatpush1.bf16.msra.mxu1 %v17959_v8  ;;  %13253 = vmatprep.subr.bf16.mxu0 %v17964_v35  ;;  %v18051_v8 = vld [vmem:[#allocation5 + $0x1a8c] ss:$16 sps:$4 sm:$0xff]   ;;  %v18049_v35 = vld [vmem:[#allocation5 + $0x1a88] ss:$16 sps:$4 sm:$0xff]  }
 0x66e   :  { %13941 = vmatprep.subr.bf16.mxu1 %v17967_v26  ;;  %v18054_v26 = vld [vmem:[#allocation5 + $0x1aa4] ss:$16 sps:$4 sm:$0xff]  }
 0x670   :  { %13254 = vmatpush1.bf16.msra.mxu0 %v17962_v36  ;;  %v18057_v36 = vld [vmem:[#allocation5 + $0x1aac] ss:$16 sps:$4 sm:$0xff]  }
 0x671   :  { %13942 = vmatpush1.bf16.msra.mxu1 %v17965_v28  ;;  %13255 = vmatprep.subr.bf16.mxu0 %v17970_v63  ;;  %v18052_v28 = vld [vmem:[#allocation5 + $0x1aa0] ss:$16 sps:$4 sm:$0xff]   ;;  %v18055_v63 = vld [vmem:[#allocation5 + $0x1aa8] ss:$16 sps:$4 sm:$0xff]  }
 0x672   :  { %13943 = vmatprep.subr.bf16.mxu1 %v17973_v33  ;;  %v18060_v33 = vld [vmem:[#allocation5 + $0x1ac4] ss:$16 sps:$4 sm:$0xff]  }
 0x674   :  { %13256 = vmatpush1.bf16.msra.mxu0 %v17968_v17  ;;  %v18063_v17 = vld [vmem:[#allocation5 + $0x1acc] ss:$16 sps:$4 sm:$0xff]  }
 0x675   :  { %13944 = vmatpush1.bf16.msra.mxu1 %v17971_v4  ;;  %13257 = vmatprep.subr.bf16.mxu0 %v17976_v50  ;;  %v18058_v4 = vld [vmem:[#allocation5 + $0x1ac0] ss:$16 sps:$4 sm:$0xff]   ;;  %v18061_v50 = vld [vmem:[#allocation5 + $0x1ac8] ss:$16 sps:$4 sm:$0xff]  }
 0x676   :  { %13945 = vmatprep.subr.bf16.mxu1 %v17979_v47  ;;  %v18066_v47 = vld [vmem:[#allocation5 + $0x1ae4] ss:$16 sps:$4 sm:$0xff]  }
 0x678   :  { %13258 = vmatpush1.bf16.msra.mxu0 %v17974_v9  ;;  %v18069_v9 = vld [vmem:[#allocation5 + $0x1aec] ss:$16 sps:$4 sm:$0xff]  }
 0x679   :  { %13946 = vmatpush1.bf16.msra.mxu1 %v17977_v27  ;;  %13259 = vmatprep.subr.bf16.mxu0 %v17982_v34  ;;  %v18064_v27 = vld [vmem:[#allocation5 + $0x1ae0] ss:$16 sps:$4 sm:$0xff]   ;;  %v18067_v34 = vld [vmem:[#allocation5 + $0x1ae8] ss:$16 sps:$4 sm:$0xff]  }
 0x67a   :  { %13947 = vmatprep.subr.bf16.mxu1 %v17985_v42  ;;  %v18072_v42 = vld [vmem:[#allocation5 + $0x1b04] ss:$16 sps:$4 sm:$0xff]  }
 0x67c   :  { %13260 = vmatpush1.bf16.msra.mxu0 %v17980_v0  ;;  %v18075_v0 = vld [vmem:[#allocation5 + $0x1b0c] ss:$16 sps:$4 sm:$0xff]  }
 0x67d   :  { %13948 = vmatpush1.bf16.msra.mxu1 %v17983_v51  ;;  %13261 = vmatprep.subr.bf16.mxu0 %v17988_v24  ;;  %v18070_v51 = vld [vmem:[#allocation5 + $0x1b00] ss:$16 sps:$4 sm:$0xff]   ;;  %v18073_v24 = vld [vmem:[#allocation5 + $0x1b08] ss:$16 sps:$4 sm:$0xff]  }
 0x67e   :  { %13949 = vmatprep.subr.bf16.mxu1 %v17991_v54  ;;  %v18078_v54 = vld [vmem:[#allocation5 + $0x1b24] ss:$16 sps:$4 sm:$0xff]  }
 0x680   :  { %13262 = vmatpush1.bf16.msra.mxu0 %v17986_v14  ;;  %v18081_v14 = vld [vmem:[#allocation5 + $0x1b2c] ss:$16 sps:$4 sm:$0xff]  }
 0x681   :  { %13950 = vmatpush1.bf16.msra.mxu1 %v17989_v56  ;;  %13263 = vmatprep.subr.bf16.mxu0 %v17994_v52  ;;  %v18076_v56 = vld [vmem:[#allocation5 + $0x1b20] ss:$16 sps:$4 sm:$0xff]   ;;  %v18079_v52 = vld [vmem:[#allocation5 + $0x1b28] ss:$16 sps:$4 sm:$0xff]  }
 0x682   :  { %13951 = vmatprep.subr.bf16.mxu1 %v17997_v58  ;;  %v18084_v58 = vld [vmem:[#allocation5 + $0x1b44] ss:$16 sps:$4 sm:$0xff]  }
 0x684   :  { %13264 = vmatpush1.bf16.msra.mxu0 %v17992_v37  ;;  %v18087_v37 = vld [vmem:[#allocation5 + $0x1b4c] ss:$16 sps:$4 sm:$0xff]  }
 0x685   :  { %13952 = vmatpush1.bf16.msra.mxu1 %v17995_v46  ;;  %13265 = vmatprep.subr.bf16.mxu0 %v18000_v59  ;;  %v18082_v46 = vld [vmem:[#allocation5 + $0x1b40] ss:$16 sps:$4 sm:$0xff]   ;;  %v18085_v59 = vld [vmem:[#allocation5 + $0x1b48] ss:$16 sps:$4 sm:$0xff]  }
 0x686   :  { %13953 = vmatprep.subr.bf16.mxu1 %v18003_v62  ;;  %v18090_v62 = vld [vmem:[#allocation5 + $0x1b64] ss:$16 sps:$4 sm:$0xff]  }
 0x688   :  { %13266 = vmatpush1.bf16.msra.mxu0 %v17998_v21  ;;  %v18093_v21 = vld [vmem:[#allocation5 + $0x1b6c] ss:$16 sps:$4 sm:$0xff]  }
 0x689   :  { %13954 = vmatpush1.bf16.msra.mxu1 %v18001_v5  ;;  %13267 = vmatprep.subr.bf16.mxu0 %v18006_v30  ;;  %v18088_v5 = vld [vmem:[#allocation5 + $0x1b60] ss:$16 sps:$4 sm:$0xff]   ;;  %v18091_v30 = vld [vmem:[#allocation5 + $0x1b68] ss:$16 sps:$4 sm:$0xff]  }
 0x68a   :  { %13955 = vmatprep.subr.bf16.mxu1 %v18009_v20  ;;  %v18096_v20 = vld [vmem:[#allocation5 + $0x1b84] ss:$16 sps:$4 sm:$0xff]  }
 0x68c   :  { %13268 = vmatpush1.bf16.msra.mxu0 %v18004_v53  ;;  %v18099_v53 = vld [vmem:[#allocation5 + $0x1b8c] ss:$16 sps:$4 sm:$0xff]  }
 0x68d   :  { %13956 = vmatpush1.bf16.msra.mxu1 %v18007_v40  ;;  %13269 = vmatprep.subr.bf16.mxu0 %v18012_v38  ;;  %v18094_v40 = vld [vmem:[#allocation5 + $0x1b80] ss:$16 sps:$4 sm:$0xff]   ;;  %v18097_v38 = vld [vmem:[#allocation5 + $0x1b88] ss:$16 sps:$4 sm:$0xff]  }
 0x68e   :  { %13957 = vmatprep.subr.bf16.mxu1 %v18015_v22  ;;  %v18102_v22 = vld [vmem:[#allocation5 + $0x1ba4] ss:$16 sps:$4 sm:$0xff]  }
 0x690   :  { %13270 = vmatpush1.bf16.msra.mxu0 %v18010_v43  ;;  %v18105_v43 = vld [vmem:[#allocation5 + $0x1bac] ss:$16 sps:$4 sm:$0xff]  }
 0x691   :  { %13958 = vmatpush1.bf16.msra.mxu1 %v18013_v18  ;;  %13271 = vmatprep.subr.bf16.mxu0 %v18018_v2  ;;  %v18100_v18 = vld [vmem:[#allocation5 + $0x1ba0] ss:$16 sps:$4 sm:$0xff]   ;;  %v18103_v2 = vld [vmem:[#allocation5 + $0x1ba8] ss:$16 sps:$4 sm:$0xff]  }
 0x692   :  { %13959 = vmatprep.subr.bf16.mxu1 %v18021_v19  ;;  %v18108_v19 = vld [vmem:[#allocation5 + $0x1bc4] ss:$16 sps:$4 sm:$0xff]  }
 0x694   :  { %13272 = vmatpush1.bf16.msra.mxu0 %v18016_v25  ;;  %v18111_v25 = vld [vmem:[#allocation5 + $0x1bcc] ss:$16 sps:$4 sm:$0xff]  }
 0x695   :  { %13960 = vmatpush1.bf16.msra.mxu1 %v18019_v45  ;;  %13284 = vmatprep.subr.bf16.mxu0 %v18024_v39  ;;  %v18106_v45 = vld [vmem:[#allocation5 + $0x1bc0] ss:$16 sps:$4 sm:$0xff]   ;;  %v18109_v39 = vld [vmem:[#allocation5 + $0x1bc8] ss:$16 sps:$4 sm:$0xff]  }
 0x696   :  { %13972 = vmatprep.subr.bf16.mxu1 %v18027_v15  ;;  %v18114_v15 = vld [vmem:[#allocation5 + $0x1be4] ss:$16 sps:$4 sm:$0xff]  }
 0x697   :  { %13274 = vmatmul.mubr.bf16.vlgmr.msra.gmra.mrb[120].mxu0 %v21506_v49 }
 0x698   :  { %13962 = vmatmul.mubr.bf16.vlgmr.msra.gmra.mrb[136].mxu1 %v21506_v49  ;;  %13285 = vmatpush1.bf16.msra.mxu0 %v18022_v11  ;;  %v18045_v49 = vld [vmem:[#allocation5 + $0x1a6c] ss:$16 sps:$4 sm:$0xff]  }
 0x699   :  { %13316 = vmatprep.mubr.bf16.mxu0 %v21521_v7  ;;  %13973 = vmatpush1.bf16.msra.mxu1 %v18025_v23  ;;  %v18117_v11 = vld [vmem:[#allocation5 + $0x1bec] ss:$16 sps:$4 sm:$0xff]   ;;  %v18112_v23 = vld [vmem:[#allocation5 + $0x1be0] ss:$16 sps:$4 sm:$0xff]  }
 0x69a   :  { %14004 = vmatprep.mubr.bf16.mxu1 %v21521_v7  ;;  %13286 = vmatprep.subr.bf16.mxu0 %v18030_v13  ;;  %v18046_v7 = vld [vmem:[#allocation5 + $0x1a80] ss:$16 sps:$4 sm:$0xff]   ;;  %v18115_v13 = vld [vmem:[#allocation5 + $0x1be8] ss:$16 sps:$4 sm:$0xff]  }
 0x69b   :  { %13974 = vmatprep.subr.bf16.mxu1 %v18033_v44  ;;  %v18120_v44 = vld [vmem:[#allocation5 + $0x1c04] ss:$16 sps:$4 sm:$0xff]  }
 0x69c   :  { %13287 = vmatpush1.bf16.msra.mxu0 %v18028_v32  ;;  %v18123_v32 = vld [vmem:[#allocation5 + $0x1c0c] ss:$16 sps:$4 sm:$0xff]  }
 0x69d   :  { %13975 = vmatpush1.bf16.msra.mxu1 %v18031_v41  ;;  %13288 = vmatprep.subr.bf16.mxu0 %v18036_v55  ;;  %v18118_v41 = vld [vmem:[#allocation5 + $0x1c00] ss:$16 sps:$4 sm:$0xff]   ;;  %v18121_v55 = vld [vmem:[#allocation5 + $0x1c08] ss:$16 sps:$4 sm:$0xff]  }
 0x69e   :  { %13976 = vmatprep.subr.bf16.mxu1 %v18039_v60  ;;  %v18126_v60 = vld [vmem:[#allocation5 + $0x1c24] ss:$16 sps:$4 sm:$0xff]  }
 0x6a0   :  { %13289 = vmatpush1.bf16.msra.mxu0 %v18034_v10  ;;  %v18129_v10 = vld [vmem:[#allocation5 + $0x1c2c] ss:$16 sps:$4 sm:$0xff]  }
 0x6a1   :  { %13977 = vmatpush1.bf16.msra.mxu1 %v18037_v48  ;;  %13290 = vmatprep.subr.bf16.mxu0 %v18042_v6  ;;  %v18124_v48 = vld [vmem:[#allocation5 + $0x1c20] ss:$16 sps:$4 sm:$0xff]   ;;  %v18127_v6 = vld [vmem:[#allocation5 + $0x1c28] ss:$16 sps:$4 sm:$0xff]  }
 0x6a2   :  { %13978 = vmatprep.subr.bf16.mxu1 %v18045_v49  ;;  %v18132_v49 = vld [vmem:[#allocation5 + $0x1c44] ss:$16 sps:$4 sm:$0xff]  }
 0x6a4   :  { %13291 = vmatpush1.bf16.msra.mxu0 %v18040_v1  ;;  %v18135_v1 = vld [vmem:[#allocation5 + $0x1c4c] ss:$16 sps:$4 sm:$0xff]  }
 0x6a5   :  { %13979 = vmatpush1.bf16.msra.mxu1 %v18043_v29  ;;  %13292 = vmatprep.subr.bf16.mxu0 %v18048_v57  ;;  %v18130_v29 = vld [vmem:[#allocation5 + $0x1c40] ss:$16 sps:$4 sm:$0xff]   ;;  %v18133_v57 = vld [vmem:[#allocation5 + $0x1c48] ss:$16 sps:$4 sm:$0xff]  }
 0x6a6   :  { %13980 = vmatprep.subr.bf16.mxu1 %v18051_v8  ;;  %v18138_v8 = vld [vmem:[#allocation5 + $0x1c64] ss:$16 sps:$4 sm:$0xff]  }
 0x6a8   :  { %13293 = vmatpush1.bf16.msra.mxu0 %v18046_v7  ;;  %v18136_v7 = vld [vmem:[#allocation5 + $0x1c60] ss:$16 sps:$4 sm:$0xff]  }
 0x6a9   :  { %13981 = vmatpush1.bf16.msra.mxu1 %v18049_v35  ;;  %13294 = vmatprep.subr.bf16.mxu0 %v18054_v26  ;;  %v18139_v35 = vld [vmem:[#allocation5 + $0x1c68] ss:$16 sps:$4 sm:$0xff]   ;;  %v18144_v26 = vld [vmem:[#allocation5 + $0x1c84] ss:$16 sps:$4 sm:$0xff]  }
 0x6aa   :  { %13982 = vmatprep.subr.bf16.mxu1 %v18057_v36  ;;  %v18147_v36 = vld [vmem:[#allocation5 + $0x1c8c] ss:$16 sps:$4 sm:$0xff]  }
 0x6ac   :  { %13295 = vmatpush1.bf16.msra.mxu0 %v18052_v28  ;;  %v18145_v28 = vld [vmem:[#allocation5 + $0x1c88] ss:$16 sps:$4 sm:$0xff]  }
 0x6ad   :  { %13983 = vmatpush1.bf16.msra.mxu1 %v18055_v63  ;;  %13296 = vmatprep.subr.bf16.mxu0 %v18060_v33  ;;  %v18150_v63 = vld [vmem:[#allocation5 + $0x1ca4] ss:$16 sps:$4 sm:$0xff]   ;;  %v18153_v33 = vld [vmem:[#allocation5 + $0x1cac] ss:$16 sps:$4 sm:$0xff]  }
 0x6ae   :  { %13984 = vmatprep.subr.bf16.mxu1 %v18063_v17  ;;  %v18148_v17 = vld [vmem:[#allocation5 + $0x1ca0] ss:$16 sps:$4 sm:$0xff]  }
 0x6b0   :  { %13297 = vmatpush1.bf16.msra.mxu0 %v18058_v4  ;;  %v18151_v4 = vld [vmem:[#allocation5 + $0x1ca8] ss:$16 sps:$4 sm:$0xff]  }
 0x6b1   :  { %13985 = vmatpush1.bf16.msra.mxu1 %v18061_v50  ;;  %13298 = vmatprep.subr.bf16.mxu0 %v18066_v47  ;;  %v18156_v50 = vld [vmem:[#allocation5 + $0x1cc4] ss:$16 sps:$4 sm:$0xff]   ;;  %v18159_v47 = vld [vmem:[#allocation5 + $0x1ccc] ss:$16 sps:$4 sm:$0xff]  }
 0x6b2   :  { %13986 = vmatprep.subr.bf16.mxu1 %v18069_v9  ;;  %v18154_v9 = vld [vmem:[#allocation5 + $0x1cc0] ss:$16 sps:$4 sm:$0xff]  }
 0x6b4   :  { %13299 = vmatpush1.bf16.msra.mxu0 %v18064_v27  ;;  %v18157_v27 = vld [vmem:[#allocation5 + $0x1cc8] ss:$16 sps:$4 sm:$0xff]  }
 0x6b5   :  { %13987 = vmatpush1.bf16.msra.mxu1 %v18067_v34  ;;  %13300 = vmatprep.subr.bf16.mxu0 %v18072_v42  ;;  %v18162_v34 = vld [vmem:[#allocation5 + $0x1ce4] ss:$16 sps:$4 sm:$0xff]   ;;  %v18165_v42 = vld [vmem:[#allocation5 + $0x1cec] ss:$16 sps:$4 sm:$0xff]  }
 0x6b6   :  { %13988 = vmatprep.subr.bf16.mxu1 %v18075_v0  ;;  %v18160_v0 = vld [vmem:[#allocation5 + $0x1ce0] ss:$16 sps:$4 sm:$0xff]  }
 0x6b8   :  { %13301 = vmatpush1.bf16.msra.mxu0 %v18070_v51  ;;  %v18163_v51 = vld [vmem:[#allocation5 + $0x1ce8] ss:$16 sps:$4 sm:$0xff]  }
 0x6b9   :  { %13989 = vmatpush1.bf16.msra.mxu1 %v18073_v24  ;;  %13302 = vmatprep.subr.bf16.mxu0 %v18078_v54  ;;  %v18168_v24 = vld [vmem:[#allocation5 + $0x1d04] ss:$16 sps:$4 sm:$0xff]   ;;  %v18171_v54 = vld [vmem:[#allocation5 + $0x1d0c] ss:$16 sps:$4 sm:$0xff]  }
 0x6ba   :  { %13990 = vmatprep.subr.bf16.mxu1 %v18081_v14  ;;  %v18166_v14 = vld [vmem:[#allocation5 + $0x1d00] ss:$16 sps:$4 sm:$0xff]  }
 0x6bc   :  { %13303 = vmatpush1.bf16.msra.mxu0 %v18076_v56  ;;  %v18169_v56 = vld [vmem:[#allocation5 + $0x1d08] ss:$16 sps:$4 sm:$0xff]  }
 0x6bd   :  { %13991 = vmatpush1.bf16.msra.mxu1 %v18079_v52  ;;  %13304 = vmatprep.subr.bf16.mxu0 %v18084_v58  ;;  %v18174_v52 = vld [vmem:[#allocation5 + $0x1d24] ss:$16 sps:$4 sm:$0xff]   ;;  %v18177_v58 = vld [vmem:[#allocation5 + $0x1d2c] ss:$16 sps:$4 sm:$0xff]  }
 0x6be   :  { %13992 = vmatprep.subr.bf16.mxu1 %v18087_v37  ;;  %v18172_v37 = vld [vmem:[#allocation5 + $0x1d20] ss:$16 sps:$4 sm:$0xff]  }
 0x6c0   :  { %13305 = vmatpush1.bf16.msra.mxu0 %v18082_v46  ;;  %v18175_v46 = vld [vmem:[#allocation5 + $0x1d28] ss:$16 sps:$4 sm:$0xff]  }
 0x6c1   :  { %13993 = vmatpush1.bf16.msra.mxu1 %v18085_v59  ;;  %13306 = vmatprep.subr.bf16.mxu0 %v18090_v62  ;;  %v18180_v59 = vld [vmem:[#allocation5 + $0x1d44] ss:$16 sps:$4 sm:$0xff]   ;;  %v18183_v62 = vld [vmem:[#allocation5 + $0x1d4c] ss:$16 sps:$4 sm:$0xff]  }
 0x6c2   :  { %13994 = vmatprep.subr.bf16.mxu1 %v18093_v21  ;;  %v18178_v21 = vld [vmem:[#allocation5 + $0x1d40] ss:$16 sps:$4 sm:$0xff]  }
 0x6c4   :  { %13307 = vmatpush1.bf16.msra.mxu0 %v18088_v5  ;;  %v18181_v5 = vld [vmem:[#allocation5 + $0x1d48] ss:$16 sps:$4 sm:$0xff]  }
 0x6c5   :  { %13995 = vmatpush1.bf16.msra.mxu1 %v18091_v30  ;;  %13308 = vmatprep.subr.bf16.mxu0 %v18096_v20  ;;  %v18186_v30 = vld [vmem:[#allocation5 + $0x1d64] ss:$16 sps:$4 sm:$0xff]   ;;  %v18189_v20 = vld [vmem:[#allocation5 + $0x1d6c] ss:$16 sps:$4 sm:$0xff]  }
 0x6c6   :  { %13996 = vmatprep.subr.bf16.mxu1 %v18099_v53  ;;  %v18184_v53 = vld [vmem:[#allocation5 + $0x1d60] ss:$16 sps:$4 sm:$0xff]  }
 0x6c8   :  { %13309 = vmatpush1.bf16.msra.mxu0 %v18094_v40  ;;  %v18187_v40 = vld [vmem:[#allocation5 + $0x1d68] ss:$16 sps:$4 sm:$0xff]  }
 0x6c9   :  { %13997 = vmatpush1.bf16.msra.mxu1 %v18097_v38  ;;  %13310 = vmatprep.subr.bf16.mxu0 %v18102_v22  ;;  %v18192_v38 = vld [vmem:[#allocation5 + $0x1d84] ss:$16 sps:$4 sm:$0xff]   ;;  %v18195_v22 = vld [vmem:[#allocation5 + $0x1d8c] ss:$16 sps:$4 sm:$0xff]  }
 0x6ca   :  { %13998 = vmatprep.subr.bf16.mxu1 %v18105_v43  ;;  %v18190_v43 = vld [vmem:[#allocation5 + $0x1d80] ss:$16 sps:$4 sm:$0xff]  }
 0x6cc   :  { %13311 = vmatpush1.bf16.msra.mxu0 %v18100_v18  ;;  %v18193_v18 = vld [vmem:[#allocation5 + $0x1d88] ss:$16 sps:$4 sm:$0xff]  }
 0x6cd   :  { %13999 = vmatpush1.bf16.msra.mxu1 %v18103_v2  ;;  %13312 = vmatprep.subr.bf16.mxu0 %v18108_v19  ;;  %v18198_v2 = vld [vmem:[#allocation5 + $0x1da4] ss:$16 sps:$4 sm:$0xff]   ;;  %v18201_v19 = vld [vmem:[#allocation5 + $0x1dac] ss:$16 sps:$4 sm:$0xff]  }
 0x6ce   :  { %14000 = vmatprep.subr.bf16.mxu1 %v18111_v25  ;;  %v18196_v25 = vld [vmem:[#allocation5 + $0x1da0] ss:$16 sps:$4 sm:$0xff]  }
 0x6d0   :  { %13313 = vmatpush1.bf16.msra.mxu0 %v18106_v45  ;;  %v18199_v45 = vld [vmem:[#allocation5 + $0x1da8] ss:$16 sps:$4 sm:$0xff]  }
 0x6d1   :  { %14001 = vmatpush1.bf16.msra.mxu1 %v18109_v39  ;;  %13314 = vmatprep.subr.bf16.mxu0 %v18114_v15  ;;  %v18204_v39 = vld [vmem:[#allocation5 + $0x1dc4] ss:$16 sps:$4 sm:$0xff]   ;;  %v18207_v15 = vld [vmem:[#allocation5 + $0x1dcc] ss:$16 sps:$4 sm:$0xff]  }
 0x6d2   :  { %14002 = vmatprep.subr.bf16.mxu1 %v18117_v11  ;;  %v18202_v11 = vld [vmem:[#allocation5 + $0x1dc0] ss:$16 sps:$4 sm:$0xff]  }
 0x6d4   :  { %13315 = vmatpush1.bf16.msra.mxu0 %v18112_v23  ;;  %v18205_v23 = vld [vmem:[#allocation5 + $0x1dc8] ss:$16 sps:$4 sm:$0xff]  }
 0x6d5   :  { %14003 = vmatpush1.bf16.msra.mxu1 %v18115_v13  ;;  %13327 = vmatprep.subr.bf16.mxu0 %v18120_v44  ;;  %v18210_v13 = vld [vmem:[#allocation5 + $0x1de4] ss:$16 sps:$4 sm:$0xff]   ;;  %v18213_v44 = vld [vmem:[#allocation5 + $0x1dec] ss:$16 sps:$4 sm:$0xff]  }
 0x6d6   :  { %14015 = vmatprep.subr.bf16.mxu1 %v18123_v32  ;;  %v18208_v32 = vld [vmem:[#allocation5 + $0x1de0] ss:$16 sps:$4 sm:$0xff]  }
 0x6d7   :  { %13317 = vmatmul.mubr.bf16.vlgmr.msra.gmra.mrb[120].mxu0 %v21523_v3 }
 0x6d8   :  { %14005 = vmatmul.mubr.bf16.vlgmr.msra.gmra.mrb[136].mxu1 %v21523_v3  ;;  %13328 = vmatpush1.bf16.msra.mxu0 %v18118_v41  ;;  %v18141_v3 = vld [vmem:[#allocation5 + $0x1c6c] ss:$16 sps:$4 sm:$0xff]   ;;  %v18211_v41 = vld [vmem:[#allocation5 + $0x1de8] ss:$16 sps:$4 sm:$0xff]  }
 0x6d9   :  { %13359 = vmatprep.mubr.bf16.mxu0 %v21542_v61  ;;  %14016 = vmatpush1.bf16.msra.mxu1 %v18121_v55  ;;  %v18216_v55 = vld [vmem:[#allocation5 + $0x1e04] ss:$16 sps:$4 sm:$0xff]  }
 0x6da   :  { %14047 = vmatprep.mubr.bf16.mxu1 %v21542_v61  ;;  %13329 = vmatprep.subr.bf16.mxu0 %v18126_v60  ;;  %v18142_v61 = vld [vmem:[#allocation5 + $0x1c80] ss:$16 sps:$4 sm:$0xff]   ;;  %v18219_v60 = vld [vmem:[#allocation5 + $0x1e0c] ss:$16 sps:$4 sm:$0xff]  }
 0x6db   :  { %14017 = vmatprep.subr.bf16.mxu1 %v18129_v10  ;;  %v18214_v10 = vld [vmem:[#allocation5 + $0x1e00] ss:$16 sps:$4 sm:$0xff]  }
 0x6dc   :  { %13330 = vmatpush1.bf16.msra.mxu0 %v18124_v48  ;;  %v18217_v48 = vld [vmem:[#allocation5 + $0x1e08] ss:$16 sps:$4 sm:$0xff]  }
 0x6dd   :  { %14018 = vmatpush1.bf16.msra.mxu1 %v18127_v6  ;;  %13331 = vmatprep.subr.bf16.mxu0 %v18132_v49  ;;  %v18222_v6 = vld [vmem:[#allocation5 + $0x1e24] ss:$16 sps:$4 sm:$0xff]   ;;  %v18225_v49 = vld [vmem:[#allocation5 + $0x1e2c] ss:$16 sps:$4 sm:$0xff]  }
 0x6de   :  { %14019 = vmatprep.subr.bf16.mxu1 %v18135_v1  ;;  %v18220_v1 = vld [vmem:[#allocation5 + $0x1e20] ss:$16 sps:$4 sm:$0xff]  }
 0x6e0   :  { %13332 = vmatpush1.bf16.msra.mxu0 %v18130_v29  ;;  %v18223_v29 = vld [vmem:[#allocation5 + $0x1e28] ss:$16 sps:$4 sm:$0xff]  }
 0x6e1   :  { %14020 = vmatpush1.bf16.msra.mxu1 %v18133_v57  ;;  %13333 = vmatprep.subr.bf16.mxu0 %v18138_v8  ;;  %v18228_v57 = vld [vmem:[#allocation5 + $0x1e44] ss:$16 sps:$4 sm:$0xff]   ;;  %v18231_v8 = vld [vmem:[#allocation5 + $0x1e4c] ss:$16 sps:$4 sm:$0xff]  }
 0x6e2   :  { %14021 = vmatprep.subr.bf16.mxu1 %v18141_v3  ;;  %v18226_v3 = vld [vmem:[#allocation5 + $0x1e40] ss:$16 sps:$4 sm:$0xff]  }
 0x6e4   :  { %13334 = vmatpush1.bf16.msra.mxu0 %v18136_v7  ;;  %v18229_v7 = vld [vmem:[#allocation5 + $0x1e48] ss:$16 sps:$4 sm:$0xff]  }
 0x6e5   :  { %14022 = vmatpush1.bf16.msra.mxu1 %v18139_v35  ;;  %13335 = vmatprep.subr.bf16.mxu0 %v18144_v26  ;;  %v18234_v35 = vld [vmem:[#allocation5 + $0x1e64] ss:$16 sps:$4 sm:$0xff]   ;;  %v18232_v26 = vld [vmem:[#allocation5 + $0x1e60] ss:$16 sps:$4 sm:$0xff]  }
 0x6e6   :  { %14023 = vmatprep.subr.bf16.mxu1 %v18147_v36  ;;  %v18235_v36 = vld [vmem:[#allocation5 + $0x1e68] ss:$16 sps:$4 sm:$0xff]  }
 0x6e8   :  { %13336 = vmatpush1.bf16.msra.mxu0 %v18142_v61  ;;  %v18240_v61 = vld [vmem:[#allocation5 + $0x1e84] ss:$16 sps:$4 sm:$0xff]  }
 0x6e9   :  { %14024 = vmatpush1.bf16.msra.mxu1 %v18145_v28  ;;  %13337 = vmatprep.subr.bf16.mxu0 %v18150_v63  ;;  %v18243_v28 = vld [vmem:[#allocation5 + $0x1e8c] ss:$16 sps:$4 sm:$0xff]   ;;  %v18241_v63 = vld [vmem:[#allocation5 + $0x1e88] ss:$16 sps:$4 sm:$0xff]  }
 0x6ea   :  { %14025 = vmatprep.subr.bf16.mxu1 %v18153_v33  ;;  %v18246_v33 = vld [vmem:[#allocation5 + $0x1ea4] ss:$16 sps:$4 sm:$0xff]  }
 0x6ec   :  { %13338 = vmatpush1.bf16.msra.mxu0 %v18148_v17  ;;  %v18249_v17 = vld [vmem:[#allocation5 + $0x1eac] ss:$16 sps:$4 sm:$0xff]  }
 0x6ed   :  { %14026 = vmatpush1.bf16.msra.mxu1 %v18151_v4  ;;  %13339 = vmatprep.subr.bf16.mxu0 %v18156_v50  ;;  %v18244_v4 = vld [vmem:[#allocation5 + $0x1ea0] ss:$16 sps:$4 sm:$0xff]   ;;  %v18247_v50 = vld [vmem:[#allocation5 + $0x1ea8] ss:$16 sps:$4 sm:$0xff]  }
 0x6ee   :  { %14027 = vmatprep.subr.bf16.mxu1 %v18159_v47  ;;  %v18252_v47 = vld [vmem:[#allocation5 + $0x1ec4] ss:$16 sps:$4 sm:$0xff]  }
 0x6f0   :  { %13340 = vmatpush1.bf16.msra.mxu0 %v18154_v9  ;;  %v18255_v9 = vld [vmem:[#allocation5 + $0x1ecc] ss:$16 sps:$4 sm:$0xff]  }
 0x6f1   :  { %14028 = vmatpush1.bf16.msra.mxu1 %v18157_v27  ;;  %13341 = vmatprep.subr.bf16.mxu0 %v18162_v34  ;;  %v18250_v27 = vld [vmem:[#allocation5 + $0x1ec0] ss:$16 sps:$4 sm:$0xff]   ;;  %v18253_v34 = vld [vmem:[#allocation5 + $0x1ec8] ss:$16 sps:$4 sm:$0xff]  }
 0x6f2   :  { %14029 = vmatprep.subr.bf16.mxu1 %v18165_v42  ;;  %v18258_v42 = vld [vmem:[#allocation5 + $0x1ee4] ss:$16 sps:$4 sm:$0xff]  }
 0x6f4   :  { %13342 = vmatpush1.bf16.msra.mxu0 %v18160_v0  ;;  %v18261_v0 = vld [vmem:[#allocation5 + $0x1eec] ss:$16 sps:$4 sm:$0xff]  }
 0x6f5   :  { %14030 = vmatpush1.bf16.msra.mxu1 %v18163_v51  ;;  %13343 = vmatprep.subr.bf16.mxu0 %v18168_v24  ;;  %v18256_v51 = vld [vmem:[#allocation5 + $0x1ee0] ss:$16 sps:$4 sm:$0xff]   ;;  %v18259_v24 = vld [vmem:[#allocation5 + $0x1ee8] ss:$16 sps:$4 sm:$0xff]  }
 0x6f6   :  { %14031 = vmatprep.subr.bf16.mxu1 %v18171_v54  ;;  %v18264_v54 = vld [vmem:[#allocation5 + $0x1f04] ss:$16 sps:$4 sm:$0xff]  }
 0x6f8   :  { %13344 = vmatpush1.bf16.msra.mxu0 %v18166_v14  ;;  %v18267_v14 = vld [vmem:[#allocation5 + $0x1f0c] ss:$16 sps:$4 sm:$0xff]  }
 0x6f9   :  { %14032 = vmatpush1.bf16.msra.mxu1 %v18169_v56  ;;  %13345 = vmatprep.subr.bf16.mxu0 %v18174_v52  ;;  %v18262_v56 = vld [vmem:[#allocation5 + $0x1f00] ss:$16 sps:$4 sm:$0xff]   ;;  %v18265_v52 = vld [vmem:[#allocation5 + $0x1f08] ss:$16 sps:$4 sm:$0xff]  }
 0x6fa   :  { %14033 = vmatprep.subr.bf16.mxu1 %v18177_v58  ;;  %v18270_v58 = vld [vmem:[#allocation5 + $0x1f24] ss:$16 sps:$4 sm:$0xff]  }
 0x6fc   :  { %13346 = vmatpush1.bf16.msra.mxu0 %v18172_v37  ;;  %v18273_v37 = vld [vmem:[#allocation5 + $0x1f2c] ss:$16 sps:$4 sm:$0xff]  }
 0x6fd   :  { %14034 = vmatpush1.bf16.msra.mxu1 %v18175_v46  ;;  %13347 = vmatprep.subr.bf16.mxu0 %v18180_v59  ;;  %v18268_v46 = vld [vmem:[#allocation5 + $0x1f20] ss:$16 sps:$4 sm:$0xff]   ;;  %v18271_v59 = vld [vmem:[#allocation5 + $0x1f28] ss:$16 sps:$4 sm:$0xff]  }
 0x6fe   :  { %14035 = vmatprep.subr.bf16.mxu1 %v18183_v62  ;;  %v18276_v62 = vld [vmem:[#allocation5 + $0x1f44] ss:$16 sps:$4 sm:$0xff]  }
 0x700   :  { %13348 = vmatpush1.bf16.msra.mxu0 %v18178_v21  ;;  %v18279_v21 = vld [vmem:[#allocation5 + $0x1f4c] ss:$16 sps:$4 sm:$0xff]  }
 0x701   :  { %14036 = vmatpush1.bf16.msra.mxu1 %v18181_v5  ;;  %13349 = vmatprep.subr.bf16.mxu0 %v18186_v30  ;;  %v18274_v5 = vld [vmem:[#allocation5 + $0x1f40] ss:$16 sps:$4 sm:$0xff]   ;;  %v18277_v30 = vld [vmem:[#allocation5 + $0x1f48] ss:$16 sps:$4 sm:$0xff]  }
 0x702   :  { %14037 = vmatprep.subr.bf16.mxu1 %v18189_v20  ;;  %v18282_v20 = vld [vmem:[#allocation5 + $0x1f64] ss:$16 sps:$4 sm:$0xff]  }
 0x704   :  { %13350 = vmatpush1.bf16.msra.mxu0 %v18184_v53  ;;  %v18285_v53 = vld [vmem:[#allocation5 + $0x1f6c] ss:$16 sps:$4 sm:$0xff]  }
 0x705   :  { %14038 = vmatpush1.bf16.msra.mxu1 %v18187_v40  ;;  %13351 = vmatprep.subr.bf16.mxu0 %v18192_v38  ;;  %v18280_v40 = vld [vmem:[#allocation5 + $0x1f60] ss:$16 sps:$4 sm:$0xff]   ;;  %v18283_v38 = vld [vmem:[#allocation5 + $0x1f68] ss:$16 sps:$4 sm:$0xff]  }
 0x706   :  { %14039 = vmatprep.subr.bf16.mxu1 %v18195_v22  ;;  %v18288_v22 = vld [vmem:[#allocation5 + $0x1f84] ss:$16 sps:$4 sm:$0xff]  }
 0x708   :  { %13352 = vmatpush1.bf16.msra.mxu0 %v18190_v43  ;;  %v18291_v43 = vld [vmem:[#allocation5 + $0x1f8c] ss:$16 sps:$4 sm:$0xff]  }
 0x709   :  { %14040 = vmatpush1.bf16.msra.mxu1 %v18193_v18  ;;  %13353 = vmatprep.subr.bf16.mxu0 %v18198_v2  ;;  %v18286_v18 = vld [vmem:[#allocation5 + $0x1f80] ss:$16 sps:$4 sm:$0xff]   ;;  %v18289_v2 = vld [vmem:[#allocation5 + $0x1f88] ss:$16 sps:$4 sm:$0xff]  }
 0x70a   :  { %14041 = vmatprep.subr.bf16.mxu1 %v18201_v19  ;;  %v18294_v19 = vld [vmem:[#allocation5 + $0x1fa4] ss:$16 sps:$4 sm:$0xff]  }
 0x70c   :  { %13354 = vmatpush1.bf16.msra.mxu0 %v18196_v25  ;;  %v18297_v25 = vld [vmem:[#allocation5 + $0x1fac] ss:$16 sps:$4 sm:$0xff]  }
 0x70d   :  { %14042 = vmatpush1.bf16.msra.mxu1 %v18199_v45  ;;  %13355 = vmatprep.subr.bf16.mxu0 %v18204_v39  ;;  %v18292_v45 = vld [vmem:[#allocation5 + $0x1fa0] ss:$16 sps:$4 sm:$0xff]   ;;  %v18295_v39 = vld [vmem:[#allocation5 + $0x1fa8] ss:$16 sps:$4 sm:$0xff]  }
 0x70e   :  { %14043 = vmatprep.subr.bf16.mxu1 %v18207_v15  ;;  %v18300_v15 = vld [vmem:[#allocation5 + $0x1fc4] ss:$16 sps:$4 sm:$0xff]  }
 0x710   :  { %13356 = vmatpush1.bf16.msra.mxu0 %v18202_v11  ;;  %v18303_v11 = vld [vmem:[#allocation5 + $0x1fcc] ss:$16 sps:$4 sm:$0xff]  }
 0x711   :  { %14044 = vmatpush1.bf16.msra.mxu1 %v18205_v23  ;;  %13357 = vmatprep.subr.bf16.mxu0 %v18210_v13  ;;  %v18298_v23 = vld [vmem:[#allocation5 + $0x1fc0] ss:$16 sps:$4 sm:$0xff]   ;;  %v18301_v13 = vld [vmem:[#allocation5 + $0x1fc8] ss:$16 sps:$4 sm:$0xff]  }
 0x712   :  { %14045 = vmatprep.subr.bf16.mxu1 %v18213_v44  ;;  %v18306_v44 = vld [vmem:[#allocation5 + $0x1fe4] ss:$16 sps:$4 sm:$0xff]  }
 0x714   :  { %13358 = vmatpush1.bf16.msra.mxu0 %v18208_v32  ;;  %v18309_v32 = vld [vmem:[#allocation5 + $0x1fec] ss:$16 sps:$4 sm:$0xff]  }
 0x715   :  { %14046 = vmatpush1.bf16.msra.mxu1 %v18211_v41  ;;  %13370 = vmatprep.subr.bf16.mxu0 %v18216_v55  ;;  %v18304_v41 = vld [vmem:[#allocation5 + $0x1fe0] ss:$16 sps:$4 sm:$0xff]   ;;  %v18307_v55 = vld [vmem:[#allocation5 + $0x1fe8] ss:$16 sps:$4 sm:$0xff]  }
 0x716   :  { %14058 = vmatprep.subr.bf16.mxu1 %v18219_v60  ;;  %v18310_v60 = vld [vmem:[#allocation8 + $0x40] sm:$0xff]  }
 0x717   :  { %13360 = vmatmul.mubr.bf16.vlgmr.msra.gmra.mrb[120].mxu0 %v21544_v12 }
 0x718   :  { %14048 = vmatmul.mubr.bf16.vlgmr.msra.gmra.mrb[136].mxu1 %v21544_v12  ;;  %13371 = vmatpush1.bf16.msra.mxu0 %v18214_v10  ;;  %v18237_v12 = vld [vmem:[#allocation5 + $0x1e6c] ss:$16 sps:$4 sm:$0xff]   ;;  %v18311_v10 = vld [vmem:[#allocation8 + $0xc0] sm:$0xff]  }
 0x719   :  { %13402 = vmatprep.mubr.bf16.mxu0 %v21546_v31  ;;  %14059 = vmatpush1.bf16.msra.mxu1 %v18217_v48  ;;  %v18312_v48 = vld [vmem:[#allocation8] sm:$0xff]  }
 0x71a   :  { %14090 = vmatprep.mubr.bf16.mxu1 %v21546_v31  ;;  %13372 = vmatprep.subr.bf16.mxu0 %v18222_v6  ;;  %v18238_v31 = vld [vmem:[#allocation5 + $0x1e80] ss:$16 sps:$4 sm:$0xff]   ;;  %v18313_v6 = vld [vmem:[#allocation8 + $0x80] sm:$0xff]  }
 0x71b   :  { %14060 = vmatprep.subr.bf16.mxu1 %v18225_v49  ;;  %v18314_v49 = vld [vmem:[#allocation8 + $0x48] sm:$0xff]  }
 0x71c   :  { %13373 = vmatpush1.bf16.msra.mxu0 %v18220_v1  ;;  %v18315_v1 = vld [vmem:[#allocation8 + $0xc8] sm:$0xff]  }
 0x71d   :  { %14061 = vmatpush1.bf16.msra.mxu1 %v18223_v29  ;;  %13374 = vmatprep.subr.bf16.mxu0 %v18228_v57  ;;  %v18316_v29 = vld [vmem:[#allocation8 + $0x8] sm:$0xff]  }
 0x71e   :  { %14062 = vmatprep.subr.bf16.mxu1 %v18231_v8  ;;  %v18317_v57 = vld [vmem:[#allocation8 + $0x88] sm:$0xff]   ;;  %v18318_v8 = vld [vmem:[#allocation8 + $0x50] sm:$0xff]  }
 0x720   :  { %13375 = vmatpush1.bf16.msra.mxu0 %v18226_v3  ;;  %v18319_v3 = vld [vmem:[#allocation8 + $0xd0] sm:$0xff]  }
 0x721   :  { %14063 = vmatpush1.bf16.msra.mxu1 %v18229_v7  ;;  %13376 = vmatprep.subr.bf16.mxu0 %v18234_v35  ;;  %v18320_v7 = vld [vmem:[#allocation8 + $0x10] sm:$0xff]  }
 0x722   :  { %14064 = vmatprep.subr.bf16.mxu1 %v18237_v12  ;;  %v18321_v35 = vld [vmem:[#allocation8 + $0x90] sm:$0xff]   ;;  %v18322_v12 = vld [vmem:[#allocation8 + $0x58] sm:$0xff]  }
 0x724   :  { %13377 = vmatpush1.bf16.msra.mxu0 %v18232_v26  ;;  %v18323_v26 = vld [vmem:[#allocation8 + $0xd8] sm:$0xff]  }
 0x725   :  { %14065 = vmatpush1.bf16.msra.mxu1 %v18235_v36  ;;  %13378 = vmatprep.subr.bf16.mxu0 %v18240_v61  ;;  %v18324_v36 = vld [vmem:[#allocation8 + $0x18] sm:$0xff]   ;;  %v18326_v61 = vld [vmem:[#allocation8 + $0x60] sm:$0xff]  }
 0x726   :  { %14066 = vmatprep.subr.bf16.mxu1 %v18243_v28  ;;  %v18327_v28 = vld [vmem:[#allocation8 + $0xe0] sm:$0xff]  }
 0x728   :  { %13379 = vmatpush1.bf16.msra.mxu0 %v18238_v31  ;;  %v18328_v31 = vld [vmem:[#allocation8 + $0x20] sm:$0xff]  }
 0x729   :  { %14067 = vmatpush1.bf16.msra.mxu1 %v18241_v63  ;;  %13380 = vmatprep.subr.bf16.mxu0 %v18246_v33  ;;  %v18329_v63 = vld [vmem:[#allocation8 + $0xa0] sm:$0xff]   ;;  %v18330_v33 = vld [vmem:[#allocation8 + $0x68] sm:$0xff]  }
 0x72a   :  { %14068 = vmatprep.subr.bf16.mxu1 %v18249_v17  ;;  %v18331_v17 = vld [vmem:[#allocation8 + $0xe8] sm:$0xff]  }
 0x72c   :  { %13381 = vmatpush1.bf16.msra.mxu0 %v18244_v4  ;;  %v18332_v4 = vld [vmem:[#allocation8 + $0x28] sm:$0xff]  }
 0x72d   :  { %14069 = vmatpush1.bf16.msra.mxu1 %v18247_v50  ;;  %13382 = vmatprep.subr.bf16.mxu0 %v18252_v47  ;;  %v18333_v50 = vld [vmem:[#allocation8 + $0xa8] sm:$0xff]   ;;  %v18334_v47 = vld [vmem:[#allocation8 + $0x70] sm:$0xff]  }
 0x72e   :  { %14070 = vmatprep.subr.bf16.mxu1 %v18255_v9  ;;  %v18335_v9 = vld [vmem:[#allocation8 + $0xf0] sm:$0xff]  }
 0x730   :  { %13383 = vmatpush1.bf16.msra.mxu0 %v18250_v27  ;;  %v18336_v27 = vld [vmem:[#allocation8 + $0x30] sm:$0xff]  }
 0x731   :  { %14071 = vmatpush1.bf16.msra.mxu1 %v18253_v34  ;;  %13384 = vmatprep.subr.bf16.mxu0 %v18258_v42  ;;  %v18337_v34 = vld [vmem:[#allocation8 + $0xb0] sm:$0xff]   ;;  %v18338_v42 = vld [vmem:[#allocation8 + $0x78] sm:$0xff]  }
 0x732   :  { %14072 = vmatprep.subr.bf16.mxu1 %v18261_v0  ;;  %v18339_v0 = vld [vmem:[#allocation8 + $0xf8] sm:$0xff]  }
 0x734   :  { %13385 = vmatpush1.bf16.msra.mxu0 %v18256_v51  ;;  %v14488_v51 = vld [vmem:[#allocation11] sm:$0xff] }
 0x735   :  { %14073 = vmatpush1.bf16.msra.mxu1 %v18259_v24  ;;  %13386 = vmatprep.subr.bf16.mxu0 %v18264_v54  ;;  %v14489_v24 = vld [vmem:[#allocation11 + $0x8] sm:$0xf]  ;;  %v18340_v54 = vld [vmem:[#allocation8 + $0x38] sm:$0xff]  }
 0x736   :  { %14074 = vmatprep.subr.bf16.mxu1 %v18267_v14  ;;  %v18341_v14 = vld [vmem:[#allocation8 + $0xb8] sm:$0xff]  }
 0x738   :  { %13387 = vmatpush1.bf16.msra.mxu0 %v18262_v56  ;;  %v16567_v56 = vpack.c.bf16 %v14489_v24, %v14488_v51  ;;  %v14477_v51 = vld [vmem:[%s21712_s12 + $0x38] sm:$0xff] }
 0x739   :  { %14075 = vmatpush1.bf16.msra.mxu1 %v18265_v52  ;;  %13388 = vmatprep.subr.bf16.mxu0 %v18270_v58  ;;  %v22052_v58 = vld [vmem:[#allocation36_spill] sm:$0xff]  ;;  %v14480_v52 = vld [vmem:[%s21712_s12 + $0x50] sm:$0xff] }
 0x73a   :  { %14076 = vmatprep.subr.bf16.mxu1 %v18273_v37  ;;  %v7587_v37 = vsub.s32 0, %v22052_v58 }
 0x73c   :  { %13389 = vmatpush1.bf16.msra.mxu0 %v18268_v46  ;;  %v7583_v46 = vld [vmem:[#allocation7] sm:$0xf] }
 0x73d   :  { %14077 = vmatpush1.bf16.msra.mxu1 %v18271_v59  ;;  %13390 = vmatprep.subr.bf16.mxu0 %v18276_v62  ;;  %v7595_v59 = vsub.s32 2, %v22052_v58  ;;  %v7591_v62 = vsub.s32 1, %v22052_v58 }
 0x73e   :  { %14078 = vmatprep.subr.bf16.mxu1 %v18279_v21  ;;  %v7599_v21 = vsub.s32 3, %v22052_v58  ;;  %v14481_v58 = vld [vmem:[%s21712_s12 + $0x58] sm:$0xff] }
 0x740   :  { %13391 = vmatpush1.bf16.msra.mxu0 %v18274_v5  ;;  %v7588_v5 = vrot.slane %v7583_v46, %v7587_v37  ;;  %v16593_v37 = vpack.c.bf16 %v14481_v58, %v14480_v52 }
 0x741   :  { %14079 = vmatpush1.bf16.msra.mxu1 %v18277_v30  ;;  %13392 = vmatprep.subr.bf16.mxu0 %v18282_v20  ;;  %v7596_v30 = vrot.slane %v7583_v46, %v7595_v59  ;;  %v7592_v20 = vrot.slane %v7583_v46, %v7591_v62  ;;  %v14483_v59 = vld [vmem:[%s21712_s12 + $0x68] sm:$0xff]  ;;  %v14484_v62 = vld [vmem:[%s21712_s12 + $0x70] sm:$0xff] }
 0x742   :  { %14080 = vmatprep.subr.bf16.mxu1 %v18285_v53  ;;  %v7600_v53 = vrot.slane %v7583_v46, %v7599_v21  ;;  %v14482_v46 = vld [vmem:[%s21712_s12 + $0x60] sm:$0xff] }
 0x743   :  { %v16597_v21 = vpack.c.bf16 %v14483_v59, %v14482_v46 }
 0x744   :  { %13393 = vmatpush1.bf16.msra.mxu0 %v18280_v40 }
 0x745   :  { %14081 = vmatpush1.bf16.msra.mxu1 %v18283_v38  ;;  %13394 = vmatprep.subr.bf16.mxu0 %v18288_v22 }
 0x746   :  { %14082 = vmatprep.subr.bf16.mxu1 %v18291_v43 }
 0x748   :  { %13395 = vmatpush1.bf16.msra.mxu0 %v18286_v18 }
 0x749   :  { %14083 = vmatpush1.bf16.msra.mxu1 %v18289_v2  ;;  %13396 = vmatprep.subr.bf16.mxu0 %v18294_v19 }
 0x74a   :  { %14084 = vmatprep.subr.bf16.mxu1 %v18297_v25 }
 0x74c   :  { %13397 = vmatpush1.bf16.msra.mxu0 %v18292_v45 }
 0x74d   :  { %14085 = vmatpush1.bf16.msra.mxu1 %v18295_v39  ;;  %13398 = vmatprep.subr.bf16.mxu0 %v18300_v15 }
 0x74e   :  { %14086 = vmatprep.subr.bf16.mxu1 %v18303_v11 }
 0x750   :  { %13399 = vmatpush1.bf16.msra.mxu0 %v18298_v23 }
 0x751   :  { %14087 = vmatpush1.bf16.msra.mxu1 %v18301_v13  ;;  %13400 = vmatprep.subr.bf16.mxu0 %v18306_v44 }
 0x752   :  { %14088 = vmatprep.subr.bf16.mxu1 %v18309_v32 }
 0x754   :  { %13401 = vmatpush1.bf16.msra.mxu0 %v18304_v41 }
 0x755   :  { %14089 = vmatpush1.bf16.msra.mxu1 %v18307_v55  ;;  %16430 = vmatprep.subr.bf16.mxu0 %v18310_v60 }
 0x756   :  { %16452 = vmatprep.subr.bf16.mxu1 %v18311_v10 }
 0x757   :  { %13403 = vmatmul.mubr.bf16.vlgmr.msra.gmra.mrb[120].mxu0 %v21548_v16 }
 0x758   :  { %14091 = vmatmul.mubr.bf16.vlgmr.msra.gmra.mrb[136].mxu1 %v21548_v16  ;;  %16431 = vmatpush3.bf16.msra.mxu0 %v18312_v48  ;;  %v18325_v16 = vld [vmem:[#allocation8 + $0x98] sm:$0xff]  }
 0x759   :  { %16453 = vmatpush3.bf16.msra.mxu1 %v18313_v6  ;;  %16432 = vmatprep.subr.bf16.mxu0 %v18314_v49 }
 0x75a   :  { %16454 = vmatprep.subr.bf16.mxu1 %v18315_v1 }
 0x75c   :  { %16433 = vmatpush3.bf16.msra.mxu0 %v18316_v29 }
 0x75d   :  { %16455 = vmatpush3.bf16.msra.mxu1 %v18317_v57  ;;  %16434 = vmatprep.subr.bf16.mxu0 %v18318_v8 }
 0x75e   :  { %16456 = vmatprep.subr.bf16.mxu1 %v18319_v3 }
 0x760   :  { %16435 = vmatpush3.bf16.msra.mxu0 %v18320_v7 }
 0x761   :  { %16457 = vmatpush3.bf16.msra.mxu1 %v18321_v35  ;;  %16436 = vmatprep.subr.bf16.mxu0 %v18322_v12  ;;  %v14470_v12 = vld [vmem:[%s21712_s12] sm:$0xff] }
 0x762   :  { %16458 = vmatprep.subr.bf16.mxu1 %v18323_v26  ;;  %v14471_v26 = vld [vmem:[%s21712_s12 + $0x8] sm:$0xff] }
 0x764   :  { %16437 = vmatpush3.bf16.msra.mxu0 %v18324_v36 }
 0x765   :  { %16459 = vmatpush3.bf16.msra.mxu1 %v18325_v16  ;;  %16438 = vmatprep.subr.bf16.mxu0 %v18326_v61 }
 0x766   :  { %16460 = vmatprep.subr.bf16.mxu1 %v18327_v28 }
 0x768   :  { %16439 = vmatpush3.bf16.msra.mxu0 %v18328_v31 }
 0x769   :  { %16461 = vmatpush3.bf16.msra.mxu1 %v18329_v63  ;;  %16440 = vmatprep.subr.bf16.mxu0 %v18330_v33  ;;  %v16573_v33 = vpack.c.bf16 %v14471_v26, %v14470_v12  ;;  %v16394_v26 = vld [vmem:[#allocation13] ss:$0 sm:$0xff] }
 0x76a   :  { %16462 = vmatprep.subr.bf16.mxu1 %v18331_v17  ;;  %v14486_v17 = vld [vmem:[%s21703_s3] sm:$0xff] }
 0x76c   :  { %16441 = vmatpush3.bf16.msra.mxu0 %v18332_v4  ;;  %v14472_v4 = vld [vmem:[%s21712_s12 + $0x10] sm:$0xff] }
 0x76d   :  { %16463 = vmatpush3.bf16.msra.mxu1 %v18333_v50  ;;  %16442 = vmatprep.subr.bf16.mxu0 %v18334_v47  ;;  %v14473_v50 = vld [vmem:[%s21712_s12 + $0x18] sm:$0xff]  ;;  %v14487_v47 = vld [vmem:[%s21703_s3 + $0x8] sm:$0xff] }
 0x76e   :  { %16464 = vmatprep.subr.bf16.mxu1 %v18335_v9  ;;  %v16577_v9 = vpack.c.bf16 %v14473_v50, %v14472_v4 }
 0x770   :  { %16443 = vmatpush3.bf16.msra.mxu0 %v18336_v27  ;;  %v14474_v27 = vld [vmem:[%s21712_s12 + $0x20] sm:$0xff] }
 0x771   :  { %16465 = vmatpush3.bf16.msra.mxu1 %v18337_v34  ;;  %16444 = vmatprep.subr.bf16.mxu0 %v18338_v42  ;;  %v14475_v34 = vld [vmem:[%s21712_s12 + $0x28] sm:$0xff] }
 0x772   :  { %16466 = vmatprep.subr.bf16.mxu1 %v18339_v0  ;;  %v16581_v42 = vpack.c.bf16 %v14475_v34, %v14474_v27  ;;  %v14476_v0 = vld [vmem:[%s21712_s12 + $0x30] sm:$0xff] }
 0x773   :  { %v16585_v24 = vpack.c.bf16 %v14477_v51, %v14476_v0 }
 0x774   :  { %16445 = vmatpush3.bf16.msra.mxu0 %v18340_v54  ;;  %v14478_v54 = vld [vmem:[%s21712_s12 + $0x40] sm:$0xff] }
 0x775   :  { %16467 = vmatpush3.bf16.msra.mxu1 %v18341_v14  ;;  %16569 = vmatprep.subr.msk.bf16.mxu0 %vm21604_vm5, %v16567_v56  ;;  %v14479_v14 = vld [vmem:[%s21712_s12 + $0x48] sm:$0xff] }
 0x82a   :  { %v13404_v40 = vpop.f32.mrb[120].mxu0 }
 0x82b   :  { %v16621_v38 = vadd.f32 %v13404_v40, %v7588_v5  ;;  %v14092_v22 = vpop.f32.mrb[136].mxu1  ;;  %v13406_v43 = vpop.f32.mrb[121].mxu0  ;;  %v14664_v40 = vld [vmem:[%s21715_s15 + $0x10] sm:$0xff] }
 0x82c   :  { %v16625_v18 = vadd.f32 %v14092_v22, %v7596_v30  ;;  %v16622_v2 = vadd.f32 %v13406_v43, %v7592_v20  ;;  %v14094_v19 = vpop.f32.mrb[137].mxu1  ;;  %v13408_v25 = vpop.f32.mrb[122].mxu0  ;;  %v14665_v22 = vld [vmem:[%s21715_s15 + $0x18] sm:$0xff] }
 0x82d   :  { %v14101_v45 = vmul.f32 0.01, %v16621_v38  ;;  %v16626_v39 = vadd.f32 %v14094_v19, %v7600_v53  ;;  %v16623_v15 = vadd.f32 %v13408_v25, %v7588_v5  ;;  %v14096_v11 = vpop.f32.mrb[138].mxu1  ;;  %v13410_v23 = vpop.f32.mrb[123].mxu0  ;;  %v14485_v5 = vld [vmem:[%s21712_s12 + $0x78] sm:$0xff]  ;;  %v16609_v43 = vpack.c.bf16 %v14665_v22, %v14664_v40 }
 0x82e   :  { %v14103_v13 = vmul.f32 0.01, %v16625_v18  ;;  %v14102_v44 = vmul.f32 0.01, %v16622_v2  ;;  %v16627_v32 = vadd.f32 %v14096_v11, %v7596_v30  ;;  %v16624_v41 = vadd.f32 %v13410_v23, %v7592_v20  ;;  %v14098_v55 = vpop.f32.mrb[139].mxu1  ;;  %v14662_v20 = vld [vmem:[%s21715_s15] sm:$0xff] }
 0x82f   :  { %v14104_v60 = vmul.f32 0.01, %v16626_v39  ;;  %v14105_v10 = vmul.f32 0.01, %v16623_v15  ;;  %v16628_v48 = vadd.f32 %v14098_v55, %v7600_v53  ;;  %v14109_v1 = vmax.f32 %v16621_v38, %v14101_v45  ;;  %v14663_v53 = vld [vmem:[%s21715_s15 + $0x8] sm:$0xff] }
 0x830   :  { %v14107_v6 = vmul.f32 0.01, %v16627_v32  ;;  %v14106_v49 = vmul.f32 0.01, %v16624_v41  ;;  %v14111_v8 = vmax.f32 %v16625_v18, %v14103_v13  ;;  %v14110_v3 = vmax.f32 %v16622_v2, %v14102_v44  ;;  %v14666_v18 = vld [vmem:[%s21715_s15 + $0x20] sm:$0xff]  ;;  %v14667_v2 = vld [vmem:[%s21715_s15 + $0x28] sm:$0xff] }
 0x831   :  { %v14113_v29 = vmax.f32 %v16623_v15, %v14105_v10  ;;  %v14108_v57 = vmul.f32 0.01, %v16628_v48  ;;  %v14112_v36 = vmax.f32 %v16626_v39, %v14104_v60  ;;  %v16601_v30 = vpack.c.bf16 %v14485_v5, %v14484_v62  ;;  %v16358_v39 = vld [vmem:[#allocation10] ss:$0 sm:$0xff] }
 0x832   :  { %v14115_v7 = vmax.f32 %v16627_v32, %v14107_v6  ;;  %v14114_v35 = vmax.f32 %v16624_v41, %v14106_v49  ;;  %v16605_v38 = vpack.c.bf16 %v14663_v53, %v14662_v20  ;;  %v16613_v19 = vpack.c.bf16 %v14667_v2, %v14666_v18 }
 0x833   :  { %v14117_v16 = vpack.c.bf16 %v14113_v29, %v14109_v1  ;;  %v14116_v61 = vmax.f32 %v16628_v48, %v14108_v57 }
 0x834   :  { %v14119_v28 = vpack.c.bf16 %v14115_v7, %v14111_v8  ;;  %v14118_v31 = vpack.c.bf16 %v14114_v35, %v14110_v3  ;;  %16606 = vmatprep.subr.bf16.mxu1 %v16605_v38  ;;  %v14668_v7 = vld [vmem:[%s21715_s15 + $0x30] sm:$0xff]  ;;  %v14669_v35 = vld [vmem:[%s21715_s15 + $0x38] sm:$0xff] }
 0x835   :  { %v14120_v63 = vpack.c.bf16 %v14116_v61, %v14112_v36  ;;  %v16617_v12 = vpack.c.bf16 %v14669_v35, %v14668_v7 }
 0x836   :  { %14416 = vmatprep.mubr.bf16.mxu0 %v14118_v31 }
 0x837   :  { %14457 = vmatprep.mubr.bf16.mxu1 %v14120_v63  ;;  %14417 = vmatmul.mubr.bf16.vlgmr.msra.gmra.mrb[124].mxu0 %v14117_v16 }
 0x838   :  { %14458 = vmatmul.mubr.bf16.vlgmr.msra.gmra.mrb[140].mxu1 %v14119_v28  ;;  %16572 = vmatpush3.bf16.msk.msra.mxu0 %vm21604_vm5, %v16567_v56  ;;  %v16589_v56 = vpack.c.bf16 %v14479_v14, %v14478_v54 }
 0x839   :  { %16510 = vmatprep.mubr.msk.f32.mxu0 %vm14490_vm6, %v14486_v17  ;;  %16574 = vmatprep.subr.bf16.mxu0 %v16573_v33 }
 0x83a   :  { %16608 = vmatpush3.bf16.msra.mxu1 %v16605_v38 }
 0x83b   :  { %16610 = vmatprep.subr.bf16.mxu1 %v16609_v43 }
 0x83e   :  { %16612 = vmatpush3.bf16.msra.mxu1 %v16609_v43 }
 0x83f   :  { %16511 = vmatmul.mubr.msk.f32.vlgmr.msra.gmra.mrb[128].mxu0 %vm14490_vm6, %v14487_v47  ;;  %16614 = vmatprep.subr.bf16.mxu1 %v16613_v19 }
 0x840   :  { %16576 = vmatpush3.bf16.msra.mxu0 %v16573_v33  ;;  %v16395_v33 = vld [vmem:[#allocation2] ss:$0 sm:$0xff] }
 0x841   :  { %16578 = vmatprep.subr.bf16.mxu0 %v16577_v9 }
 0x842   :  { %16616 = vmatpush3.bf16.msra.mxu1 %v16613_v19 }
 0x843   :  { %16618 = vmatprep.subr.bf16.mxu1 %v16617_v12 }
 0x844   :  { %16580 = vmatpush3.bf16.msra.mxu0 %v16577_v9 }
 0x845   :  { %16582 = vmatprep.subr.bf16.mxu0 %v16581_v42 }
 0x846   :  { %16620 = vmatpush3.bf16.msra.mxu1 %v16617_v12 }
 0x848   :  { %16584 = vmatpush3.bf16.msra.mxu0 %v16581_v42 }
 0x849   :  { %16586 = vmatprep.subr.bf16.mxu0 %v16585_v24 }
 0x84c   :  { %16588 = vmatpush3.bf16.msra.mxu0 %v16585_v24 }
 0x84d   :  { %16590 = vmatprep.subr.bf16.mxu0 %v16589_v56 }
 0x850   :  { %16592 = vmatpush3.bf16.msra.mxu0 %v16589_v56 }
 0x851   :  { %16594 = vmatprep.subr.bf16.mxu0 %v16593_v37 }
 0x854   :  { %16596 = vmatpush3.bf16.msra.mxu0 %v16593_v37 }
 0x855   :  { %16598 = vmatprep.subr.bf16.mxu0 %v16597_v21 }
 0x858   :  { %16600 = vmatpush3.bf16.msra.mxu0 %v16597_v21 }
 0x859   :  { %16602 = vmatprep.subr.bf16.mxu0 %v16601_v30 }
 0x85c   :  { %16604 = vmatpush3.bf16.msra.mxu0 %v16601_v30 }
 0x90a   :  { %v16446_v25 = vpop.f32.mrb[124].mxu0 }
 0x90b   :  { %v16468_v45 = vpop.f32.mrb[140].mxu1  ;;  %v16447_v15 = vpop.f32.mrb[125].mxu0 }
 0x90c   :  { %v16448_v11 = vadd.f32 %v16447_v15, %v16446_v25  ;;  %v16469_v23 = vpop.f32.mrb[141].mxu1  ;;  %v16449_v13 = vpop.f32.mrb[126].mxu0 }
 0x90d   :  { %v16470_v44 = vadd.f32 %v16469_v23, %v16468_v45  ;;  %v16471_v32 = vpop.f32.mrb[142].mxu1  ;;  %v16450_v41 = vpop.f32.mrb[127].mxu0 }
 0x90e   :  { %v14419_v55 = vadd.f32 %v16448_v11, %v16358_v39  ;;  %v16451_v60 = vadd.f32 %v16450_v41, %v16449_v13  ;;  %v16472_v10 = vpop.f32.mrb[143].mxu1 }
 0x90f   :  { %v16473_v48 = vadd.f32 %v16472_v10, %v16471_v32 }
 0x910   :  { %v14460_v6 = vadd.f32 %v16470_v44, %v14419_v55  ;;  %v14422_v49 = vadd.f32 %v16451_v60, %v16358_v39 }
 0x912   :  { %v14466_v1 = vmul.f32 0.01, %v14460_v6  ;;  %v14463_v29 = vadd.f32 %v16473_v48, %v14422_v49 }
 0x914   :  { %v14467_v57 = vmul.f32 0.01, %v14463_v29  ;;  %v14468_v8 = vmax.f32 %v14460_v6, %v14466_v1 }
 0x916   :  { %v14469_v3 = vmax.f32 %v14463_v29, %v14467_v57  ;;  %16545 = vmatprep.mubr.f32.mxu0 %v14468_v8 }
 0x918   :  { %16546 = vmatmul.mubr.f32.vlgmr.msra.gmra.mrb[128].mxu0 %v14469_v3 }
 0x9eb   :  { %v16547_v36 = vpop.f32.mrb[128].mxu0 }
 0x9ec   :  { %v14659_v16 = vadd.f32 %v16547_v36, %v16394_v26  ;;  %v14642_v61 = vpop.f32.mrb[129].mxu0 }
 0x9ed   :  { %v14658_v28 = vadd.f32 %v16394_v26, %v14642_v61 }
 0x9ee   :  { %v14661_v63 = vmax.f32 %v14659_v16, 0.0 }
 0x9ef   :  { %v14660_v31 = vmax.f32 %v14658_v28, 0.0 }
 0x9f1   :  { %16564 = vmatprep.mubr.msk.f32.mxu1 %vm14677_vm7, %v14660_v31 }
 0x9f2   :  { %16565 = vmatmul.mubr.msk.f32.vlgmr.msra.gmra.mrb[144].mxu1 %vm14677_vm7, %v14661_v63 }
 0xac5   :  { %v16566_v17 = vpop.f32.mrb[144].mxu1 }
 0xac6   :  { %v14756_v4 = vadd.f32 %v16566_v17, %v16395_v33  ;;  %v14750_v50 = vpop.f32.mrb[145].mxu1 }
 0xac7   :  { %v14751_v47 = vadd.f32 %v16395_v33, %v14750_v50 }
 0xac8   :  { %14761 = vst.msk [vmem:[%s21717_s17 + $0x8] sm:$0xff] %vm14759_vm8, %v14756_v4 }
 0xac9   :  { %14760 = vst.msk [vmem:[%s21717_s17] sm:$0xff] %vm14759_vm8, %v14751_v47 }
 0xaca   :  { %14766 = vsyncpa [#allocation4], 1 }
 0xacb   :  { %14767 = vsyncpa [#allocation6], 1 }
 0xacc   :  { %14768 = vsyncpa [#allocation9], 1 }
 0xacd   :  { %14769 = vsyncpa [#allocation12], 1 }

</bundles_post_ra>
